<compile_context>
chip_gen: v6e
topology: v6e:2x2x1
jax: 0.10.0
libtpu: 0.0.40
codegen_flags: <defaults>
</compile_context>

<pallas_src>
import jax
import jax.numpy as jnp
from jax.experimental import pallas as pl
from jax.experimental.pallas import tpu as pltpu

NEG_SLOPE = 0.01   # torch.nn.LeakyReLU default
LN_EPS = 1e-5      # torch.nn.LayerNorm default


def _leaky(x):
    return jnp.where(x >= 0, x, NEG_SLOPE * x)


def _lane_tile(x, reps):
    """reps copies of x concatenated along the last (lane) dim, log-depth concat."""
    result = None
    chunk = x
    r = int(reps)
    while r > 0:
        if r & 1:
            result = chunk if result is None else jnp.concatenate([result, chunk], axis=-1)
        r >>= 1
        if r:
            chunk = jnp.concatenate([chunk, chunk], axis=-1)
    return result


def _round_up(a, m):
    return ((a + m - 1) // m) * m


# ---------------------------------------------------------------------------
# Fused kernel: all DeepGCN layers + dense head + global_mean_pool + output layer
# ---------------------------------------------------------------------------
def gnn_fused_kernel(src_ref, dst_ref, batch_ref,
                     x_ref, ea_ref, invdeg_ref, invcnt_ref,
                     ln_w_ref, ln_b_ref, w1_ref, b1_ref, w2_ref, b2_ref,
                     root_ref, bias_ref,
                     dw_ref, db_ref, ow_ref, ob_ref,
                     out_ref,
                     x_state, h_scr, agg_scr, r_scr):
    l = pl.program_id(0)
    et = pl.program_id(1)
    n_layers = pl.num_programs(0)
    n_et = pl.num_programs(1)
    e_tile, d = ea_ref.shape
    n_pad = x_ref.shape[0]
    b_pad = invcnt_ref.shape[0]

    # ---- one-time: fold matrix  r[k, j] = 1  iff  k // d == j   (msg = prod @ r)
    @pl.when(jnp.logical_and(l == 0, et == 0))
    def _build_fold():
        kk = jax.lax.broadcasted_iota(jnp.int32, (d * d, d), 0)
        jj = jax.lax.broadcasted_iota(jnp.int32, (d * d, d), 1)
        r_scr[...] = jnp.logical_and(kk >= jj * d, kk < (jj + 1) * d).astype(r_scr.dtype)

    # ---- per-layer prologue: h = LeakyReLU(LayerNorm(x)); reset scatter accumulator
    @pl.when(et == 0)
    def _prologue():
        @pl.when(l == 0)
        def _init():
            x_state[...] = x_ref[...]
        x = x_state[...]
        mu = jnp.mean(x, axis=-1, keepdims=True)
        var = jnp.mean((x - mu) * (x - mu), axis=-1, keepdims=True)
        h = (x - mu) * jax.lax.rsqrt(var + LN_EPS)
        h = h * ln_w_ref[0] + ln_b_ref[0]
        h_scr[...] = _leaky(h)                       # dropout = identity (eval mode)
        agg_scr[...] = jnp.zeros_like(agg_scr)

    # ---- edge tile: MapE2NxN edge net (bf16 MXU, f32 accumulate)
    ea = ea_ref[...]                                                                # (Et, d) bf16
    e1 = _leaky(jnp.dot(ea, w1_ref[0], preferred_element_type=jnp.float32) + b1_ref[0])
    w_e = (jnp.dot(e1.astype(jnp.bfloat16), w2_ref[0],
                   preferred_element_type=jnp.float32)
           + b2_ref[0]).astype(jnp.bfloat16)          # (Et, d*d), column layout j*d + i

    # ---- gather xs[e] = h[src[e]] as a one-hot MXU matmul (no serial loop)
    h_bf = h_scr[...].astype(jnp.bfloat16)
    src_col = src_ref[...]                                                          # (Et, 1) int32
    onehot_src = (src_col ==
                  jax.lax.broadcasted_iota(jnp.int32, (e_tile, n_pad), 1)
                  ).astype(jnp.bfloat16)                                            # (Et, n_pad)
    xs = jnp.dot(onehot_src, h_bf,
                 preferred_element_type=jnp.float32).astype(jnp.bfloat16)           # (Et, d)

    # ---- per-edge matvec: msg[e, j] = sum_i xs[e, i] * W_e[i, j]
    # xs_tiled[e, j*d + i] = xs[e, i]  (lane-tile), then elementwise * w_e, then fold.
    xs_tiled = _lane_tile(xs, d)                                                    # (Et, d*d) bf16
    msg = jnp.dot(xs_tiled * w_e, r_scr[...],
                  preferred_element_type=jnp.float32)                               # (Et, d) f32

    # ---- scatter-add agg[dst[e]] += msg[e] as a one-hot MXU matmul (f32 accumulate)
    dst_row = dst_ref[...]                                                          # (1, Et) int32
    onehot_dst = (jax.lax.broadcasted_iota(jnp.int32, (n_pad, e_tile), 0) == dst_row
                  ).astype(jnp.float32)                                             # (n_pad, Et)
    agg_scr[...] += jnp.dot(onehot_dst, msg, preferred_element_type=jnp.float32)

    # ---- per-layer epilogue: mean aggregation + NNConv root/bias + 'res+' residual
    @pl.when(et == n_et - 1)
    def _epilogue():
        h_bf2 = h_scr[...].astype(jnp.bfloat16)
        agg = agg_scr[...] * invdeg_ref[...]
        conv = (agg
                + jnp.dot(h_bf2, root_ref[0], preferred_element_type=jnp.float32)
                + bias_ref[0])
        x_state[...] = x_state[...] + conv

        # ---- encoder head (last layer): dense -> global_mean_pool -> LeakyReLU -> out
        @pl.when(l == n_layers - 1)
        def _head():
            dense_x = (jnp.dot(x_state[...], dw_ref[...],
                               preferred_element_type=jnp.float32) + db_ref[...])   # (n_pad, d)
            batch_row = batch_ref[...]                                              # (1, n_pad)
            onehot_b = (jax.lax.broadcasted_iota(jnp.int32, (b_pad, n_pad), 0) == batch_row
                        ).astype(jnp.float32)                                       # (b_pad, n_pad)
            pooled = jnp.dot(onehot_b, dense_x, preferred_element_type=jnp.float32)
            pooled = _leaky(pooled * invcnt_ref[...])          # dropout = identity
            out_ref[...] = (jnp.dot(pooled, ow_ref[...],
                                    preferred_element_type=jnp.float32)
                            + ob_ref[...]).astype(out_ref.dtype)


# ---------------------------------------------------------------------------
# Wrapper: block specs / grid + pallas_call
# ---------------------------------------------------------------------------
def _per_layer_spec(shape):
    nd = len(shape)
    return pl.BlockSpec((1,) + tuple(shape[1:]),
                        lambda l, et: (l,) + (0,) * (nd - 1))


def _full_spec(shape):
    nd = len(shape)
    return pl.BlockSpec(tuple(shape), lambda l, et: (0,) * nd)


def _pick_vmem_limit():
    try:
        kind = jax.devices()[0].device_kind.lower()
    except Exception:
        kind = ""
    if "v7" in kind or "7x" in kind:
        return 48 * 1024 * 1024          # v7x: 64 MiB physical per TC
    if any(g in kind for g in ("v4", "v5", "v6")):
        return 100 * 1024 * 1024         # 128 MiB physical
    return 48 * 1024 * 1024              # unknown: stay safe everywhere


def run_gnn_encoder(x_p, ea_p, src2, dst2, batch2, inv_deg, inv_cnt,
                    lp, hp, *, e_tile, b_pad, out_dim):
    n_pad, d = x_p.shape
    e_pad = ea_p.shape[0]
    n_layers = lp['w1'].shape[0]
    assert e_tile % 128 == 0 and e_pad % e_tile == 0
    n_et = e_pad // e_tile

    in_specs = [
        pl.BlockSpec((e_tile, 1), lambda l, et: (et, 0)),       # src   (E_pad, 1) int32
        pl.BlockSpec((1, e_tile), lambda l, et: (0, et)),       # dst   (1, E_pad) int32
        _full_spec(batch2.shape),                               # batch (1, N_pad) int32
        _full_spec(x_p.shape),                                  # x (layer-invariant)
        pl.BlockSpec((e_tile, d), lambda l, et: (et, 0)),       # edge_attr, edge-tiled (bf16)
        _full_spec(inv_deg.shape),
        _full_spec(inv_cnt.shape),
        _per_layer_spec(lp['ln_w'].shape),
        _per_layer_spec(lp['ln_b'].shape),
        _per_layer_spec(lp['w1'].shape),
        _per_layer_spec(lp['b1'].shape),
        _per_layer_spec(lp['w2'].shape),
        _per_layer_spec(lp['b2'].shape),
        _per_layer_spec(lp['root'].shape),
        _per_layer_spec(lp['bias'].shape),
        _full_spec(hp['dense_w'].shape),
        _full_spec(hp['dense_b'].shape),
        _full_spec(hp['out_w'].shape),
        _full_spec(hp['out_b'].shape),
    ]
    out_spec = pl.BlockSpec((b_pad, out_dim), lambda l, et: (0, 0))

    grid_spec = pltpu.PrefetchScalarGridSpec(
        num_scalar_prefetch=0,
        grid=(n_layers, n_et),
        in_specs=in_specs,
        out_specs=out_spec,
        scratch_shapes=[
            pltpu.VMEM((n_pad, d), jnp.float32),      # x_state, carried across layers
            pltpu.VMEM((n_pad, d), jnp.float32),      # h = act(norm(x))
            pltpu.VMEM((n_pad, d), jnp.float32),      # scatter-sum accumulator
            pltpu.VMEM((d * d, d), jnp.bfloat16),     # fold matrix (built in-kernel)
        ],
    )

    return pl.pallas_call(
        gnn_fused_kernel,
        out_shape=jax.ShapeDtypeStruct((b_pad, out_dim), jnp.float32),
        grid_spec=grid_spec,
        compiler_params=pltpu.CompilerParams(
            dimension_semantics=("arbitrary", "arbitrary"),   # both axes carry state
            vmem_limit_bytes=_pick_vmem_limit(),
        ),
    )(src2, dst2, batch2,
      x_p, ea_p, inv_deg, inv_cnt,
      lp['ln_w'], lp['ln_b'], lp['w1'], lp['b1'], lp['w2'], lp['b2'],
      lp['root'], lp['bias'],
      hp['dense_w'], hp['dense_b'], hp['out_w'], hp['out_b'])


def _prepare_params(lp, hp, d):
    """Permute MapE2NxN linear2 columns from (i*d+j) to (j*d+i) layout and cast the
    big MXU weights to bf16 (halves HBM->VMEM traffic & residency)."""
    L, hidden, _ = lp['w2'].shape
    w2p = lp['w2'].reshape(L, hidden, d, d).transpose(0, 1, 3, 2).reshape(L, hidden, d * d)
    b2p = lp['b2'].reshape(L, 1, d, d).transpose(0, 1, 3, 2).reshape(L, 1, d * d)
    lp2 = dict(lp)
    lp2['w1'] = lp['w1'].astype(jnp.bfloat16)
    lp2['w2'] = w2p.astype(jnp.bfloat16)
    lp2['b2'] = b2p
    lp2['root'] = lp['root'].astype(jnp.bfloat16)
    return lp2, dict(hp)


def gnn_encoder_forward(x, edge_attr, src, dst, batch, num_graphs,
                        layer_params, head_params, *, e_tile=256):
    N, d = x.shape
    E = edge_attr.shape[0]
    B = int(num_graphs)
    out_dim = head_params['out_w'].shape[1]

    # Pad nodes/edges/graphs to TPU-friendly sizes.  Padded edges/nodes carry index -1,
    # whose one-hot row is all zeros, so they contribute nothing anywhere.
    n_pad = max(8, _round_up(N, 8))
    e_pad = max(e_tile, _round_up(E, e_tile))
    b_pad = max(8, _round_up(B, 8))

    x_p = jnp.zeros((n_pad, d), jnp.float32).at[:N].set(x)
    ea_p = jnp.zeros((e_pad, d), jnp.bfloat16).at[:E].set(edge_attr.astype(jnp.bfloat16))
    src2 = jnp.full((e_pad, 1), -1, jnp.int32).at[:E, 0].set(src.astype(jnp.int32))
    dst2 = jnp.full((1, e_pad), -1, jnp.int32).at[0, :E].set(dst.astype(jnp.int32))
    batch2 = jnp.full((1, n_pad), -1, jnp.int32).at[0, :N].set(batch.astype(jnp.int32))

    # scatter-mean / global-mean-pool normalizers (PyG clamps the degree at 1)
    deg = jnp.zeros((n_pad,), jnp.float32).at[dst].add(1.0)
    inv_deg = (1.0 / jnp.maximum(deg, 1.0)).reshape(n_pad, 1)
    cnt = jnp.zeros((b_pad,), jnp.float32).at[batch].add(1.0)
    inv_cnt = (1.0 / jnp.maximum(cnt, 1.0)).reshape(b_pad, 1)

    lp, hp = _prepare_params(layer_params, head_params, d)

    y_pad = run_gnn_encoder(x_p, ea_p, src2, dst2, batch2, inv_deg, inv_cnt,
                            lp, hp, e_tile=e_tile, b_pad=b_pad, out_dim=out_dim)
    return y_pad[:B]


# ---------------------------------------------------------------------------
# Deterministic synthetic parameters (shapes from GNNEncoder.__init__), stacked per layer
# ---------------------------------------------------------------------------
def init_params(key, num_layers, d, hidden, out_dim):
    ks = jax.random.split(key, 5)

    def nrm(k, shape, fan_in):
        return jax.random.normal(k, shape, jnp.float32) / jnp.sqrt(float(fan_in))

    L = num_layers
    layers = dict(
        ln_w=jnp.ones((L, 1, d), jnp.float32),
        ln_b=jnp.zeros((L, 1, d), jnp.float32),
        w1=nrm(ks[0], (L, d, hidden), d),            # MapE2NxN.linear1
        b1=jnp.zeros((L, 1, hidden), jnp.float32),
        w2=nrm(ks[1], (L, hidden, d * d), hidden),   # MapE2NxN.linear2 (i*d+j layout)
        b2=jnp.zeros((L, 1, d * d), jnp.float32),
        root=nrm(ks[2], (L, d, d), d),               # NNConv root weight
        bias=jnp.zeros((L, 1, d), jnp.float32),      # NNConv bias
    )
    head = dict(
        dense_w=nrm(ks[3], (d, d), d),
        dense_b=jnp.zeros((1, d), jnp.float32),
        out_w=nrm(ks[4], (d, out_dim), d),
        out_b=jnp.zeros((1, out_dim), jnp.float32),
    )
    return layers, head


if __name__ == "__main__":
    key = jax.random.PRNGKey(0)
    k = jax.random.split(key, 6)

    # Small synthetic graph batch: 2 graphs, 10 nodes, 24 directed edges.
    N, E, B = 10, 24, 2
    d_model, ffn_hidden, out_dim, num_layers = 32, 32, 4, 3

    x = jax.random.normal(k[0], (N, d_model), jnp.float32)            # data.x
    edge_attr = jax.random.normal(k[1], (E, d_model), jnp.float32)    # data.edge_attr
    src = jax.random.randint(k[2], (E,), 0, N, dtype=jnp.int32)       # data.edge_index[0]
    dst = jax.random.randint(k[3], (E,), 0, N, dtype=jnp.int32)       # data.edge_index[1]
    batch = jnp.concatenate([jnp.zeros(5, jnp.int32),
                             jnp.ones(5, jnp.int32)])                 # data.batch

    layer_params, head_params = init_params(k[4], num_layers, d_model, ffn_hidden, out_dim)

    y = gnn_encoder_forward(x, edge_attr, src, dst, batch, B,
                            layer_params, head_params)
    jax.block_until_ready(y)
    assert y.shape == (B, out_dim) and y.dtype == jnp.float32
    print("KERNEL_OK")
</pallas_src>

<mosaic_0001>
module attributes {stable_mosaic.version = 11 : i64} {
  func.func @gnn_fused_kernel(%arg0: i32, %arg1: i32, %arg2: memref<256x1xi32, #tpu.memory_space<vmem>>, %arg3: memref<1x256xi32, #tpu.memory_space<vmem>>, %arg4: memref<1x16xi32, #tpu.memory_space<vmem>>, %arg5: memref<16x32xf32, #tpu.memory_space<vmem>>, %arg6: memref<256x32xbf16, #tpu.memory_space<vmem>>, %arg7: memref<16x1xf32, #tpu.memory_space<vmem>>, %arg8: memref<8x1xf32, #tpu.memory_space<vmem>>, %arg9: memref<1x1x32xf32, #tpu.memory_space<vmem>>, %arg10: memref<1x1x32xf32, #tpu.memory_space<vmem>>, %arg11: memref<1x32x32xbf16, #tpu.memory_space<vmem>>, %arg12: memref<1x1x32xf32, #tpu.memory_space<vmem>>, %arg13: memref<1x32x1024xbf16, #tpu.memory_space<vmem>>, %arg14: memref<1x1x1024xf32, #tpu.memory_space<vmem>>, %arg15: memref<1x32x32xbf16, #tpu.memory_space<vmem>>, %arg16: memref<1x1x32xf32, #tpu.memory_space<vmem>>, %arg17: memref<32x32xf32, #tpu.memory_space<vmem>>, %arg18: memref<1x32xf32, #tpu.memory_space<vmem>>, %arg19: memref<32x4xf32, #tpu.memory_space<vmem>>, %arg20: memref<1x4xf32, #tpu.memory_space<vmem>>, %arg21: memref<8x4xf32, #tpu.memory_space<vmem>>, %arg22: memref<16x32xf32, #tpu.memory_space<vmem>>, %arg23: memref<16x32xf32, #tpu.memory_space<vmem>>, %arg24: memref<16x32xf32, #tpu.memory_space<vmem>>, %arg25: memref<1024x32xbf16, #tpu.memory_space<vmem>>) attributes {dimension_semantics = [#tpu.dimension_semantics<arbitrary>, #tpu.dimension_semantics<arbitrary>], iteration_bounds = array<i64: 3, 1>, scalar_prefetch = 0 : i64, scratch_operands = 4 : i64, tpu.core_type = #tpu.core_type<tc>, window_params = [{transform_indices = @transform_0, window_bounds = array<i64: 256, 1>}, {transform_indices = @transform_1, window_bounds = array<i64: 1, 256>}, {pipeline_mode = #tpu.pipeline_mode<synchronous>, transform_indices = @transform_2, window_bounds = array<i64: 1, 16>}, {pipeline_mode = #tpu.pipeline_mode<synchronous>, transform_indices = @transform_3, window_bounds = array<i64: 16, 32>}, {transform_indices = @transform_4, window_bounds = array<i64: 256, 32>}, {pipeline_mode = #tpu.pipeline_mode<synchronous>, transform_indices = @transform_5, window_bounds = array<i64: 16, 1>}, {pipeline_mode = #tpu.pipeline_mode<synchronous>, transform_indices = @transform_6, window_bounds = array<i64: 8, 1>}, {transform_indices = @transform_7, window_bounds = array<i64: 1, 1, 32>}, {transform_indices = @transform_8, window_bounds = array<i64: 1, 1, 32>}, {transform_indices = @transform_9, window_bounds = array<i64: 1, 32, 32>}, {transform_indices = @transform_10, window_bounds = array<i64: 1, 1, 32>}, {transform_indices = @transform_11, window_bounds = array<i64: 1, 32, 1024>}, {transform_indices = @transform_12, window_bounds = array<i64: 1, 1, 1024>}, {transform_indices = @transform_13, window_bounds = array<i64: 1, 32, 32>}, {transform_indices = @transform_14, window_bounds = array<i64: 1, 1, 32>}, {pipeline_mode = #tpu.pipeline_mode<synchronous>, transform_indices = @transform_15, window_bounds = array<i64: 32, 32>}, {pipeline_mode = #tpu.pipeline_mode<synchronous>, transform_indices = @transform_16, window_bounds = array<i64: 1, 32>}, {pipeline_mode = #tpu.pipeline_mode<synchronous>, transform_indices = @transform_17, window_bounds = array<i64: 32, 4>}, {pipeline_mode = #tpu.pipeline_mode<synchronous>, transform_indices = @transform_18, window_bounds = array<i64: 1, 4>}, {pipeline_mode = #tpu.pipeline_mode<synchronous>, transform_indices = @transform_19, window_bounds = array<i64: 8, 4>}]} {
    %c0_i32 = arith.constant 0 : i32
    %0 = arith.cmpi eq, %arg0, %c0_i32 : i32
    %c0_i32_0 = arith.constant 0 : i32
    %1 = arith.cmpi eq, %arg1, %c0_i32_0 : i32
    %2 = arith.andi %0, %1 : i1
    %3 = arith.extui %2 : i1 to i32
    %c0_i32_1 = arith.constant 0 : i32
    %4 = arith.cmpi ne, %3, %c0_i32_1 : i32
    scf.if %4 {
      %62 = tpu.iota {dimensions = array<i32: 0>} : vector<1024x32xi32>
      %63 = tpu.iota {dimensions = array<i32: 1>} : vector<1024x32xi32>
      %c32_i32 = arith.constant 32 : i32
      %64 = vector.broadcast %c32_i32 : i32 to vector<1024x32xi32>
      %65 = arith.muli %63, %64 : vector<1024x32xi32>
      %66 = arith.cmpi sge, %62, %65 : vector<1024x32xi32>
      %c1_i32 = arith.constant 1 : i32
      %67 = vector.broadcast %c1_i32 : i32 to vector<1024x32xi32>
      %68 = arith.addi %63, %67 : vector<1024x32xi32>
      %c32_i32_37 = arith.constant 32 : i32
      %69 = vector.broadcast %c32_i32_37 : i32 to vector<1024x32xi32>
      %70 = arith.muli %68, %69 : vector<1024x32xi32>
      %71 = arith.cmpi slt, %62, %70 : vector<1024x32xi32>
      %72 = arith.andi %66, %71 : vector<1024x32xi1>
      %73 = arith.extui %72 : vector<1024x32xi1> to vector<1024x32xi32>
      %74 = arith.sitofp %73 : vector<1024x32xi32> to vector<1024x32xf32>
      %75 = arith.truncf %74 : vector<1024x32xf32> to vector<1024x32xbf16>
      %c0_38 = arith.constant 0 : index
      %c0_39 = arith.constant 0 : index
      %76 = vector.load %arg25[%c0_38, %c0_39] : memref<1024x32xbf16, #tpu.memory_space<vmem>>, vector<1024x32xbf16>
      tpu.vector_store %arg25[%c0_38, %c0_39], %75 {strides = array<i32>} : memref<1024x32xbf16, #tpu.memory_space<vmem>>, vector<1024x32xbf16>,
    } else {
    }
    %c0_i32_2 = arith.constant 0 : i32
    %5 = arith.cmpi eq, %arg1, %c0_i32_2 : i32
    %6 = arith.extui %5 : i1 to i32
    %c0_i32_3 = arith.constant 0 : i32
    %7 = arith.cmpi ne, %6, %c0_i32_3 : i32
    scf.if %7 {
      %c0_i32_37 = arith.constant 0 : i32
      %62 = arith.cmpi eq, %arg0, %c0_i32_37 : i32
      %63 = arith.extui %62 : i1 to i32
      %c0_i32_38 = arith.constant 0 : i32
      %64 = arith.cmpi ne, %63, %c0_i32_38 : i32
      scf.if %64 {
        %c0_59 = arith.constant 0 : index
        %c0_60 = arith.constant 0 : index
        %102 = vector.load %arg5[%c0_59, %c0_60] : memref<16x32xf32, #tpu.memory_space<vmem>>, vector<16x32xf32>
        %c0_61 = arith.constant 0 : index
        %c0_62 = arith.constant 0 : index
        %103 = vector.load %arg22[%c0_61, %c0_62] : memref<16x32xf32, #tpu.memory_space<vmem>>, vector<16x32xf32>
        tpu.vector_store %arg22[%c0_61, %c0_62], %102 {strides = array<i32>} : memref<16x32xf32, #tpu.memory_space<vmem>>, vector<16x32xf32>,
      } else {
      }
      %c0_39 = arith.constant 0 : index
      %c0_40 = arith.constant 0 : index
      %65 = vector.load %arg22[%c0_39, %c0_40] : memref<16x32xf32, #tpu.memory_space<vmem>>, vector<16x32xf32>
      %cst_41 = arith.constant dense<0.000000e+00> : vector<16xf32>
      %66 = vector.multi_reduction <add>, %65, %cst_41 [1] : vector<16x32xf32> to vector<16xf32>
      %67 = vector.shape_cast %66 : vector<16xf32> to vector<16x1xf32>
      %cst_42 = arith.constant 3.200000e+01 : f32
      %68 = vector.broadcast %cst_42 : f32 to vector<16x1xf32>
      %69 = arith.divf %67, %68 : vector<16x1xf32>
      %70 = vector.broadcast %69 : vector<16x1xf32> to vector<16x32xf32>
      %71 = arith.subf %65, %70 : vector<16x32xf32>
      %72 = vector.broadcast %69 : vector<16x1xf32> to vector<16x32xf32>
      %73 = arith.subf %65, %72 : vector<16x32xf32>
      %74 = arith.mulf %71, %73 : vector<16x32xf32>
      %cst_43 = arith.constant dense<0.000000e+00> : vector<16xf32>
      %75 = vector.multi_reduction <add>, %74, %cst_43 [1] : vector<16x32xf32> to vector<16xf32>
      %76 = vector.shape_cast %75 : vector<16xf32> to vector<16x1xf32>
      %cst_44 = arith.constant 3.200000e+01 : f32
      %77 = vector.broadcast %cst_44 : f32 to vector<16x1xf32>
      %78 = arith.divf %76, %77 : vector<16x1xf32>
      %79 = vector.broadcast %69 : vector<16x1xf32> to vector<16x32xf32>
      %80 = arith.subf %65, %79 : vector<16x32xf32>
      %cst_45 = arith.constant 9.99999974E-6 : f32
      %81 = vector.broadcast %cst_45 : f32 to vector<16x1xf32>
      %82 = arith.addf %78, %81 : vector<16x1xf32>
      %83 = math.rsqrt %82 : vector<16x1xf32>
      %84 = vector.broadcast %83 : vector<16x1xf32> to vector<16x32xf32>
      %85 = arith.mulf %80, %84 : vector<16x32xf32>
      %c0_46 = arith.constant 0 : index
      %c0_47 = arith.constant 0 : index
      %c0_48 = arith.constant 0 : index
      %86 = vector.load %arg9[%c0_46, %c0_47, %c0_48] : memref<1x1x32xf32, #tpu.memory_space<vmem>>, vector<1x1x32xf32>
      %87 = vector.shape_cast %86 : vector<1x1x32xf32> to vector<1x32xf32>
      %88 = vector.broadcast %87 : vector<1x32xf32> to vector<16x32xf32>
      %89 = arith.mulf %85, %88 : vector<16x32xf32>
      %c0_49 = arith.constant 0 : index
      %c0_50 = arith.constant 0 : index
      %c0_51 = arith.constant 0 : index
      %90 = vector.load %arg10[%c0_49, %c0_50, %c0_51] : memref<1x1x32xf32, #tpu.memory_space<vmem>>, vector<1x1x32xf32>
      %91 = vector.shape_cast %90 : vector<1x1x32xf32> to vector<1x32xf32>
      %92 = vector.broadcast %91 : vector<1x32xf32> to vector<16x32xf32>
      %93 = arith.addf %89, %92 : vector<16x32xf32>
      %cst_52 = arith.constant 0.000000e+00 : f32
      %94 = vector.broadcast %cst_52 : f32 to vector<16x32xf32>
      %95 = arith.cmpf oge, %93, %94 : vector<16x32xf32>
      %cst_53 = arith.constant 0.00999999977 : f32
      %96 = vector.broadcast %cst_53 : f32 to vector<16x32xf32>
      %97 = arith.mulf %96, %93 : vector<16x32xf32>
      %98 = arith.select %95, %93, %97 : vector<16x32xi1>, vector<16x32xf32>
      %c0_54 = arith.constant 0 : index
      %c0_55 = arith.constant 0 : index
      %99 = vector.load %arg23[%c0_54, %c0_55] : memref<16x32xf32, #tpu.memory_space<vmem>>, vector<16x32xf32>
      tpu.vector_store %arg23[%c0_54, %c0_55], %98 {strides = array<i32>} : memref<16x32xf32, #tpu.memory_space<vmem>>, vector<16x32xf32>,
      %cst_56 = arith.constant 0.000000e+00 : f32
      %100 = vector.broadcast %cst_56 : f32 to vector<16x32xf32>
      %c0_57 = arith.constant 0 : index
      %c0_58 = arith.constant 0 : index
      %101 = vector.load %arg24[%c0_57, %c0_58] : memref<16x32xf32, #tpu.memory_space<vmem>>, vector<16x32xf32>
      tpu.vector_store %arg24[%c0_57, %c0_58], %100 {strides = array<i32>} : memref<16x32xf32, #tpu.memory_space<vmem>>, vector<16x32xf32>,
    } else {
    }
    %c0 = arith.constant 0 : index
    %c0_4 = arith.constant 0 : index
    %8 = vector.load %arg6[%c0, %c0_4] : memref<256x32xbf16, #tpu.memory_space<vmem>>, vector<256x32xbf16>
    %c0_5 = arith.constant 0 : index
    %c0_6 = arith.constant 0 : index
    %c0_7 = arith.constant 0 : index
    %9 = vector.load %arg11[%c0_5, %c0_6, %c0_7] : memref<1x32x32xbf16, #tpu.memory_space<vmem>>, vector<1x32x32xbf16>
    %10 = vector.shape_cast %9 : vector<1x32x32xbf16> to vector<32x32xbf16>
    %cst = arith.constant dense<0.000000e+00> : vector<256x32xf32>
    %11 = tpu.matmul %8, %10, %cst {dimension_numbers = #tpu.dot_dimension_numbers<[1], [0], [0], [1], [0, 0, 1, 1], [], []>} : vector<256x32xbf16>, vector<32x32xbf16>, vector<256x32xf32> -> vector<256x32xf32>
    %c0_8 = arith.constant 0 : index
    %c0_9 = arith.constant 0 : index
    %c0_10 = arith.constant 0 : index
    %12 = vector.load %arg12[%c0_8, %c0_9, %c0_10] : memref<1x1x32xf32, #tpu.memory_space<vmem>>, vector<1x1x32xf32>
    %13 = vector.shape_cast %12 : vector<1x1x32xf32> to vector<1x32xf32>
    %14 = vector.broadcast %13 : vector<1x32xf32> to vector<256x32xf32>
    %15 = arith.addf %11, %14 : vector<256x32xf32>
    %cst_11 = arith.constant 0.000000e+00 : f32
    %16 = vector.broadcast %cst_11 : f32 to vector<256x32xf32>
    %17 = arith.cmpf oge, %15, %16 : vector<256x32xf32>
    %cst_12 = arith.constant 0.00999999977 : f32
    %18 = vector.broadcast %cst_12 : f32 to vector<256x32xf32>
    %19 = arith.mulf %18, %15 : vector<256x32xf32>
    %20 = arith.select %17, %15, %19 : vector<256x32xi1>, vector<256x32xf32>
    %21 = arith.truncf %20 : vector<256x32xf32> to vector<256x32xbf16>
    %c0_13 = arith.constant 0 : index
    %c0_14 = arith.constant 0 : index
    %c0_15 = arith.constant 0 : index
    %22 = vector.load %arg13[%c0_13, %c0_14, %c0_15] : memref<1x32x1024xbf16, #tpu.memory_space<vmem>>, vector<1x32x1024xbf16>
    %23 = vector.shape_cast %22 : vector<1x32x1024xbf16> to vector<32x1024xbf16>
    %cst_16 = arith.constant dense<0.000000e+00> : vector<256x1024xf32>
    %24 = tpu.matmul %21, %23, %cst_16 {dimension_numbers = #tpu.dot_dimension_numbers<[1], [0], [0], [1], [0, 0, 1, 1], [], []>} : vector<256x32xbf16>, vector<32x1024xbf16>, vector<256x1024xf32> -> vector<256x1024xf32>
    %c0_17 = arith.constant 0 : index
    %c0_18 = arith.constant 0 : index
    %c0_19 = arith.constant 0 : index
    %25 = vector.load %arg14[%c0_17, %c0_18, %c0_19] : memref<1x1x1024xf32, #tpu.memory_space<vmem>>, vector<1x1x1024xf32>
    %26 = vector.shape_cast %25 : vector<1x1x1024xf32> to vector<1x1024xf32>
    %27 = vector.broadcast %26 : vector<1x1024xf32> to vector<256x1024xf32>
    %28 = arith.addf %24, %27 : vector<256x1024xf32>
    %29 = arith.truncf %28 : vector<256x1024xf32> to vector<256x1024xbf16>
    %c0_20 = arith.constant 0 : index
    %c0_21 = arith.constant 0 : index
    %30 = vector.load %arg23[%c0_20, %c0_21] : memref<16x32xf32, #tpu.memory_space<vmem>>, vector<16x32xf32>
    %31 = arith.truncf %30 : vector<16x32xf32> to vector<16x32xbf16>
    %c0_22 = arith.constant 0 : index
    %c0_23 = arith.constant 0 : index
    %32 = vector.load %arg2[%c0_22, %c0_23] : memref<256x1xi32, #tpu.memory_space<vmem>>, vector<256x1xi32>
    %33 = tpu.iota {dimensions = array<i32: 1>} : vector<256x16xi32>
    %34 = vector.broadcast %32 : vector<256x1xi32> to vector<256x16xi32>
    %35 = arith.cmpi eq, %34, %33 : vector<256x16xi32>
    %36 = arith.extui %35 : vector<256x16xi1> to vector<256x16xi32>
    %37 = arith.sitofp %36 : vector<256x16xi32> to vector<256x16xf32>
    %38 = arith.truncf %37 : vector<256x16xf32> to vector<256x16xbf16>
    %cst_24 = arith.constant dense<0.000000e+00> : vector<256x32xf32>
    %39 = tpu.matmul %38, %31, %cst_24 {dimension_numbers = #tpu.dot_dimension_numbers<[1], [0], [0], [1], [0, 0, 1, 1], [], []>} : vector<256x16xbf16>, vector<16x32xbf16>, vector<256x32xf32> -> vector<256x32xf32>
    %40 = arith.truncf %39 : vector<256x32xf32> to vector<256x32xbf16>
    %41 = tpu.concatenate %40, %40 in 1 : vector<256x32xbf16>, vector<256x32xbf16> -> vector<256x64xbf16>
    %42 = tpu.concatenate %41, %41 in 1 : vector<256x64xbf16>, vector<256x64xbf16> -> vector<256x128xbf16>
    %43 = tpu.concatenate %42, %42 in 1 : vector<256x128xbf16>, vector<256x128xbf16> -> vector<256x256xbf16>
    %44 = tpu.concatenate %43, %43 in 1 : vector<256x256xbf16>, vector<256x256xbf16> -> vector<256x512xbf16>
    %45 = tpu.concatenate %44, %44 in 1 : vector<256x512xbf16>, vector<256x512xbf16> -> vector<256x1024xbf16>
    %46 = arith.mulf %45, %29 : vector<256x1024xbf16>
    %c0_25 = arith.constant 0 : index
    %c0_26 = arith.constant 0 : index
    %47 = vector.load %arg25[%c0_25, %c0_26] : memref<1024x32xbf16, #tpu.memory_space<vmem>>, vector<1024x32xbf16>
    %cst_27 = arith.constant dense<0.000000e+00> : vector<256x32xf32>
    %48 = tpu.matmul %46, %47, %cst_27 {dimension_numbers = #tpu.dot_dimension_numbers<[1], [0], [0], [1], [0, 0, 1, 1], [], []>} : vector<256x1024xbf16>, vector<1024x32xbf16>, vector<256x32xf32> -> vector<256x32xf32>
    %c0_28 = arith.constant 0 : index
    %c0_29 = arith.constant 0 : index
    %49 = vector.load %arg3[%c0_28, %c0_29] : memref<1x256xi32, #tpu.memory_space<vmem>>, vector<1x256xi32>
    %50 = tpu.iota {dimensions = array<i32: 0>} : vector<16x256xi32>
    %51 = vector.broadcast %49 : vector<1x256xi32> to vector<16x256xi32>
    %52 = arith.cmpi eq, %50, %51 : vector<16x256xi32>
    %53 = arith.extui %52 : vector<16x256xi1> to vector<16x256xi32>
    %54 = arith.sitofp %53 : vector<16x256xi32> to vector<16x256xf32>
    %c0_30 = arith.constant 0 : index
    %c0_31 = arith.constant 0 : index
    %55 = vector.load %arg24[%c0_30, %c0_31] : memref<16x32xf32, #tpu.memory_space<vmem>>, vector<16x32xf32>
    %cst_32 = arith.constant dense<0.000000e+00> : vector<16x32xf32>
    %56 = tpu.matmul %54, %48, %cst_32 {dimension_numbers = #tpu.dot_dimension_numbers<[1], [0], [0], [1], [0, 0, 1, 1], [], []>} : vector<16x256xf32>, vector<256x32xf32>, vector<16x32xf32> -> vector<16x32xf32>
    %57 = arith.addf %55, %56 : vector<16x32xf32>
    %c0_33 = arith.constant 0 : index
    %c0_34 = arith.constant 0 : index
    %58 = vector.load %arg24[%c0_33, %c0_34] : memref<16x32xf32, #tpu.memory_space<vmem>>, vector<16x32xf32>
    tpu.vector_store %arg24[%c0_33, %c0_34], %57 {strides = array<i32>} : memref<16x32xf32, #tpu.memory_space<vmem>>, vector<16x32xf32>,
    %c0_i32_35 = arith.constant 0 : i32
    %59 = arith.cmpi eq, %arg1, %c0_i32_35 : i32
    %60 = arith.extui %59 : i1 to i32
    %c0_i32_36 = arith.constant 0 : i32
    %61 = arith.cmpi ne, %60, %c0_i32_36 : i32
    scf.if %61 {
      %c0_37 = arith.constant 0 : index
      %c0_38 = arith.constant 0 : index
      %62 = vector.load %arg23[%c0_37, %c0_38] : memref<16x32xf32, #tpu.memory_space<vmem>>, vector<16x32xf32>
      %63 = arith.truncf %62 : vector<16x32xf32> to vector<16x32xbf16>
      %c0_39 = arith.constant 0 : index
      %c0_40 = arith.constant 0 : index
      %64 = vector.load %arg24[%c0_39, %c0_40] : memref<16x32xf32, #tpu.memory_space<vmem>>, vector<16x32xf32>
      %c0_41 = arith.constant 0 : index
      %c0_42 = arith.constant 0 : index
      %65 = vector.load %arg7[%c0_41, %c0_42] : memref<16x1xf32, #tpu.memory_space<vmem>>, vector<16x1xf32>
      %66 = vector.broadcast %65 : vector<16x1xf32> to vector<16x32xf32>
      %67 = arith.mulf %64, %66 : vector<16x32xf32>
      %c0_43 = arith.constant 0 : index
      %c0_44 = arith.constant 0 : index
      %c0_45 = arith.constant 0 : index
      %68 = vector.load %arg15[%c0_43, %c0_44, %c0_45] : memref<1x32x32xbf16, #tpu.memory_space<vmem>>, vector<1x32x32xbf16>
      %69 = vector.shape_cast %68 : vector<1x32x32xbf16> to vector<32x32xbf16>
      %cst_46 = arith.constant dense<0.000000e+00> : vector<16x32xf32>
      %70 = tpu.matmul %63, %69, %cst_46 {dimension_numbers = #tpu.dot_dimension_numbers<[1], [0], [0], [1], [0, 0, 1, 1], [], []>} : vector<16x32xbf16>, vector<32x32xbf16>, vector<16x32xf32> -> vector<16x32xf32>
      %71 = arith.addf %67, %70 : vector<16x32xf32>
      %c0_47 = arith.constant 0 : index
      %c0_48 = arith.constant 0 : index
      %c0_49 = arith.constant 0 : index
      %72 = vector.load %arg16[%c0_47, %c0_48, %c0_49] : memref<1x1x32xf32, #tpu.memory_space<vmem>>, vector<1x1x32xf32>
      %73 = vector.shape_cast %72 : vector<1x1x32xf32> to vector<1x32xf32>
      %74 = vector.broadcast %73 : vector<1x32xf32> to vector<16x32xf32>
      %75 = arith.addf %71, %74 : vector<16x32xf32>
      %c0_50 = arith.constant 0 : index
      %c0_51 = arith.constant 0 : index
      %76 = vector.load %arg22[%c0_50, %c0_51] : memref<16x32xf32, #tpu.memory_space<vmem>>, vector<16x32xf32>
      %77 = arith.addf %76, %75 : vector<16x32xf32>
      %c0_52 = arith.constant 0 : index
      %c0_53 = arith.constant 0 : index
      %78 = vector.load %arg22[%c0_52, %c0_53] : memref<16x32xf32, #tpu.memory_space<vmem>>, vector<16x32xf32>
      tpu.vector_store %arg22[%c0_52, %c0_53], %77 {strides = array<i32>} : memref<16x32xf32, #tpu.memory_space<vmem>>, vector<16x32xf32>,
      %c2_i32 = arith.constant 2 : i32
      %79 = arith.cmpi eq, %arg0, %c2_i32 : i32
      %80 = arith.extui %79 : i1 to i32
      %c0_i32_54 = arith.constant 0 : i32
      %81 = arith.cmpi ne, %80, %c0_i32_54 : i32
      scf.if %81 {
        %c0_55 = arith.constant 0 : index
        %c0_56 = arith.constant 0 : index
        %82 = vector.load %arg22[%c0_55, %c0_56] : memref<16x32xf32, #tpu.memory_space<vmem>>, vector<16x32xf32>
        %c0_57 = arith.constant 0 : index
        %c0_58 = arith.constant 0 : index
        %83 = vector.load %arg17[%c0_57, %c0_58] : memref<32x32xf32, #tpu.memory_space<vmem>>, vector<32x32xf32>
        %cst_59 = arith.constant dense<0.000000e+00> : vector<16x32xf32>
        %84 = tpu.matmul %82, %83, %cst_59 {dimension_numbers = #tpu.dot_dimension_numbers<[1], [0], [0], [1], [0, 0, 1, 1], [], []>} : vector<16x32xf32>, vector<32x32xf32>, vector<16x32xf32> -> vector<16x32xf32>
        %c0_60 = arith.constant 0 : index
        %c0_61 = arith.constant 0 : index
        %85 = vector.load %arg18[%c0_60, %c0_61] : memref<1x32xf32, #tpu.memory_space<vmem>>, vector<1x32xf32>
        %86 = vector.broadcast %85 : vector<1x32xf32> to vector<16x32xf32>
        %87 = arith.addf %84, %86 : vector<16x32xf32>
        %c0_62 = arith.constant 0 : index
        %c0_63 = arith.constant 0 : index
        %88 = vector.load %arg4[%c0_62, %c0_63] : memref<1x16xi32, #tpu.memory_space<vmem>>, vector<1x16xi32>
        %89 = tpu.iota {dimensions = array<i32: 0>} : vector<8x16xi32>
        %90 = vector.broadcast %88 : vector<1x16xi32> to vector<8x16xi32>
        %91 = arith.cmpi eq, %89, %90 : vector<8x16xi32>
        %92 = arith.extui %91 : vector<8x16xi1> to vector<8x16xi32>
        %93 = arith.sitofp %92 : vector<8x16xi32> to vector<8x16xf32>
        %cst_64 = arith.constant dense<0.000000e+00> : vector<8x32xf32>
        %94 = tpu.matmul %93, %87, %cst_64 {dimension_numbers = #tpu.dot_dimension_numbers<[1], [0], [0], [1], [0, 0, 1, 1], [], []>} : vector<8x16xf32>, vector<16x32xf32>, vector<8x32xf32> -> vector<8x32xf32>
        %c0_65 = arith.constant 0 : index
        %c0_66 = arith.constant 0 : index
        %95 = vector.load %arg8[%c0_65, %c0_66] : memref<8x1xf32, #tpu.memory_space<vmem>>, vector<8x1xf32>
        %96 = vector.broadcast %95 : vector<8x1xf32> to vector<8x32xf32>
        %97 = arith.mulf %94, %96 : vector<8x32xf32>
        %cst_67 = arith.constant 0.000000e+00 : f32
        %98 = vector.broadcast %cst_67 : f32 to vector<8x32xf32>
        %99 = arith.cmpf oge, %97, %98 : vector<8x32xf32>
        %cst_68 = arith.constant 0.00999999977 : f32
        %100 = vector.broadcast %cst_68 : f32 to vector<8x32xf32>
        %101 = arith.mulf %100, %97 : vector<8x32xf32>
        %102 = arith.select %99, %97, %101 : vector<8x32xi1>, vector<8x32xf32>
        %c0_69 = arith.constant 0 : index
        %c0_70 = arith.constant 0 : index
        %103 = vector.load %arg19[%c0_69, %c0_70] : memref<32x4xf32, #tpu.memory_space<vmem>>, vector<32x4xf32>
        %cst_71 = arith.constant dense<0.000000e+00> : vector<8x4xf32>
        %104 = tpu.matmul %102, %103, %cst_71 {dimension_numbers = #tpu.dot_dimension_numbers<[1], [0], [0], [1], [0, 0, 1, 1], [], []>} : vector<8x32xf32>, vector<32x4xf32>, vector<8x4xf32> -> vector<8x4xf32>
        %c0_72 = arith.constant 0 : index
        %c0_73 = arith.constant 0 : index
        %105 = vector.load %arg20[%c0_72, %c0_73] : memref<1x4xf32, #tpu.memory_space<vmem>>, vector<1x4xf32>
        %106 = vector.broadcast %105 : vector<1x4xf32> to vector<8x4xf32>
        %107 = arith.addf %104, %106 : vector<8x4xf32>
        %c0_74 = arith.constant 0 : index
        %c0_75 = arith.constant 0 : index
        %108 = vector.load %arg21[%c0_74, %c0_75] : memref<8x4xf32, #tpu.memory_space<vmem>>, vector<8x4xf32>
        tpu.vector_store %arg21[%c0_74, %c0_75], %107 {strides = array<i32>} : memref<8x4xf32, #tpu.memory_space<vmem>>, vector<8x4xf32>,
      } else {
      }
    } else {
    }
    return
  }
  func.func @transform_0(%arg0: i32, %arg1: i32) -> (i32, i32) {
    %c0_i32 = arith.constant 0 : i32
    %c0_i32_0 = arith.constant 0 : i32
    return %arg1, %c0_i32 : i32, i32
  }
  func.func @transform_1(%arg0: i32, %arg1: i32) -> (i32, i32) {
    %c0_i32 = arith.constant 0 : i32
    %c0_i32_0 = arith.constant 0 : i32
    return %c0_i32, %arg1 : i32, i32
  }
  func.func @transform_2(%arg0: i32, %arg1: i32) -> (i32, i32) {
    %c0_i32 = arith.constant 0 : i32
    %c0_i32_0 = arith.constant 0 : i32
    %c0_i32_1 = arith.constant 0 : i32
    return %c0_i32, %c0_i32_0 : i32, i32
  }
  func.func @transform_3(%arg0: i32, %arg1: i32) -> (i32, i32) {
    %c0_i32 = arith.constant 0 : i32
    %c0_i32_0 = arith.constant 0 : i32
    %c0_i32_1 = arith.constant 0 : i32
    return %c0_i32, %c0_i32_0 : i32, i32
  }
  func.func @transform_4(%arg0: i32, %arg1: i32) -> (i32, i32) {
    %c0_i32 = arith.constant 0 : i32
    %c0_i32_0 = arith.constant 0 : i32
    return %arg1, %c0_i32 : i32, i32
  }
  func.func @transform_5(%arg0: i32, %arg1: i32) -> (i32, i32) {
    %c0_i32 = arith.constant 0 : i32
    %c0_i32_0 = arith.constant 0 : i32
    %c0_i32_1 = arith.constant 0 : i32
    return %c0_i32, %c0_i32_0 : i32, i32
  }
  func.func @transform_6(%arg0: i32, %arg1: i32) -> (i32, i32) {
    %c0_i32 = arith.constant 0 : i32
    %c0_i32_0 = arith.constant 0 : i32
    %c0_i32_1 = arith.constant 0 : i32
    return %c0_i32, %c0_i32_0 : i32, i32
  }
  func.func @transform_7(%arg0: i32, %arg1: i32) -> (i32, i32, i32) {
    %c0_i32 = arith.constant 0 : i32
    %c0_i32_0 = arith.constant 0 : i32
    %c0_i32_1 = arith.constant 0 : i32
    return %arg0, %c0_i32, %c0_i32_0 : i32, i32, i32
  }
  func.func @transform_8(%arg0: i32, %arg1: i32) -> (i32, i32, i32) {
    %c0_i32 = arith.constant 0 : i32
    %c0_i32_0 = arith.constant 0 : i32
    %c0_i32_1 = arith.constant 0 : i32
    return %arg0, %c0_i32, %c0_i32_0 : i32, i32, i32
  }
  func.func @transform_9(%arg0: i32, %arg1: i32) -> (i32, i32, i32) {
    %c0_i32 = arith.constant 0 : i32
    %c0_i32_0 = arith.constant 0 : i32
    %c0_i32_1 = arith.constant 0 : i32
    return %arg0, %c0_i32, %c0_i32_0 : i32, i32, i32
  }
  func.func @transform_10(%arg0: i32, %arg1: i32) -> (i32, i32, i32) {
    %c0_i32 = arith.constant 0 : i32
    %c0_i32_0 = arith.constant 0 : i32
    %c0_i32_1 = arith.constant 0 : i32
    return %arg0, %c0_i32, %c0_i32_0 : i32, i32, i32
  }
  func.func @transform_11(%arg0: i32, %arg1: i32) -> (i32, i32, i32) {
    %c0_i32 = arith.constant 0 : i32
    %c0_i32_0 = arith.constant 0 : i32
    %c0_i32_1 = arith.constant 0 : i32
    return %arg0, %c0_i32, %c0_i32_0 : i32, i32, i32
  }
  func.func @transform_12(%arg0: i32, %arg1: i32) -> (i32, i32, i32) {
    %c0_i32 = arith.constant 0 : i32
    %c0_i32_0 = arith.constant 0 : i32
    %c0_i32_1 = arith.constant 0 : i32
    return %arg0, %c0_i32, %c0_i32_0 : i32, i32, i32
  }
  func.func @transform_13(%arg0: i32, %arg1: i32) -> (i32, i32, i32) {
    %c0_i32 = arith.constant 0 : i32
    %c0_i32_0 = arith.constant 0 : i32
    %c0_i32_1 = arith.constant 0 : i32
    return %arg0, %c0_i32, %c0_i32_0 : i32, i32, i32
  }
  func.func @transform_14(%arg0: i32, %arg1: i32) -> (i32, i32, i32) {
    %c0_i32 = arith.constant 0 : i32
    %c0_i32_0 = arith.constant 0 : i32
    %c0_i32_1 = arith.constant 0 : i32
    return %arg0, %c0_i32, %c0_i32_0 : i32, i32, i32
  }
  func.func @transform_15(%arg0: i32, %arg1: i32) -> (i32, i32) {
    %c0_i32 = arith.constant 0 : i32
    %c0_i32_0 = arith.constant 0 : i32
    %c0_i32_1 = arith.constant 0 : i32
    return %c0_i32, %c0_i32_0 : i32, i32
  }
  func.func @transform_16(%arg0: i32, %arg1: i32) -> (i32, i32) {
    %c0_i32 = arith.constant 0 : i32
    %c0_i32_0 = arith.constant 0 : i32
    %c0_i32_1 = arith.constant 0 : i32
    return %c0_i32, %c0_i32_0 : i32, i32
  }
  func.func @transform_17(%arg0: i32, %arg1: i32) -> (i32, i32) {
    %c0_i32 = arith.constant 0 : i32
    %c0_i32_0 = arith.constant 0 : i32
    %c0_i32_1 = arith.constant 0 : i32
    return %c0_i32, %c0_i32_0 : i32, i32
  }
  func.func @transform_18(%arg0: i32, %arg1: i32) -> (i32, i32) {
    %c0_i32 = arith.constant 0 : i32
    %c0_i32_0 = arith.constant 0 : i32
    %c0_i32_1 = arith.constant 0 : i32
    return %c0_i32, %c0_i32_0 : i32, i32
  }
  func.func @transform_19(%arg0: i32, %arg1: i32) -> (i32, i32) {
    %c0_i32 = arith.constant 0 : i32
    %c0_i32_0 = arith.constant 0 : i32
    %c0_i32_1 = arith.constant 0 : i32
    return %c0_i32, %c0_i32_0 : i32, i32
  }
}

</mosaic_0001>

<bundles_post_ra>
// kernel: tpu_custom_call.1
= control target key start
LH: loop header
LB: loop body
LE: loop exit
PB: predicated region body
PF: predicated region fallthrough
CT: control target
= control target key end

     0   :  { %s11998_s0 = inlined_call_operand.vmem [shape: s32[256,1], index: 0, kind: input, shape index: {}]   ;;  %s11999_s1 = inlined_call_operand.hbm [shape: s32[1,256], index: 1, kind: input, shape index: {}]   ;;  %s12000_s2 = inlined_call_operand.vmem [shape: s32[1,16], index: 2, kind: input, shape index: {}]   ;;  %s12001_s3 = inlined_call_operand.vmem [shape: f32[16,32], index: 3, kind: input, shape index: {}]   ;;  %s12002_s4 = inlined_call_operand.vmem [shape: bf16[256,32], index: 4, kind: input, shape index: {}]   ;;  %s12003_s5 = inlined_call_operand.vmem [shape: f32[16,1], index: 5, kind: input, shape index: {}]   ;;  %s12004_s6 = inlined_call_operand.vmem [shape: f32[8,1], index: 6, kind: input, shape index: {}]   ;;  %s12005_s7 = inlined_call_operand.hbm [shape: f32[3,1,32], index: 7, kind: input, shape index: {}]   ;;  %s12006_s8 = inlined_call_operand.hbm [shape: f32[3,1,32], index: 8, kind: input, shape index: {}]   ;;  %s12007_s9 = inlined_call_operand.vmem [shape: bf16[3,32,32], index: 9, kind: input, shape index: {}]   ;;  %s12008_s10 = inlined_call_operand.hbm [shape: f32[3,1,32], index: 10, kind: input, shape index: {}]   ;;  %s12009_s11 = inlined_call_operand.vmem [shape: bf16[3,32,1024], index: 11, kind: input, shape index: {}]   ;;  %s12010_s12 = inlined_call_operand.hbm [shape: f32[3,1,1024], index: 12, kind: input, shape index: {}]   ;;  %s12011_s13 = inlined_call_operand.vmem [shape: bf16[3,32,32], index: 13, kind: input, shape index: {}]   ;;  %s12012_s14 = inlined_call_operand.hbm [shape: f32[3,1,32], index: 14, kind: input, shape index: {}]   ;;  %s12013_s15 = inlined_call_operand.hbm [shape: f32[32,32], index: 15, kind: input, shape index: {}]   ;;  %s12014_s16 = inlined_call_operand.vmem [shape: f32[1,32], index: 16, kind: input, shape index: {}]   ;;  %s12015_s17 = inlined_call_operand.vmem [shape: f32[32,4], index: 17, kind: input, shape index: {}]   ;;  %s12016_s18 = inlined_call_operand.vmem [shape: f32[1,4], index: 18, kind: input, shape index: {}]   ;;  %s12017_s19 = inlined_call_operand.vmem [shape: f32[8,4], index: 19, kind: output, shape index: {}]  }
   0x1   :  { %12132 = sst [smem:[#allocation203_spill]] %s11998_s0 }
   0x2   :  { %12133 = sst [smem:[#allocation204_spill]] %s11999_s1 }
   0x3   :  { %12134 = sst [smem:[#allocation205_spill]] %s12000_s2 }
   0x4   :  { %12135 = sst [smem:[#allocation206_spill]] %s12001_s3 }
   0x5   :  { %12136 = sst [smem:[#allocation207_spill]] %s12002_s4 }
   0x6   :  { %12137 = sst [smem:[#allocation208_spill]] %s12003_s5 }
   0x7   :  { %12138 = sst [smem:[#allocation209_spill]] %s12004_s6 }
   0x8   :  { %12139 = sst [smem:[#allocation210_spill]] %s12005_s7 }
   0x9   :  { %12140 = sst [smem:[#allocation211_spill]] %s12009_s11 }
   0xa   :  { %12141 = sst [smem:[#allocation212_spill]] %s12011_s13 }
   0xb   :  { %12142 = sst [smem:[#allocation213_spill]] %s12013_s15 }
   0xc   :  { %12143 = sst [smem:[#allocation214_spill]] %s12014_s16 }
   0xd   :  { %12144 = sst [smem:[#allocation215_spill]] %s12015_s17 }
   0xe   :  { %12145 = sst [smem:[#allocation216_spill]] %s12016_s18 }
   0xf   :  { %12146 = sst [smem:[#allocation217_spill]] %s12017_s19 }
  0x10   :  { %24 = vsyncpa [#allocation7], 0 }
  0x11   :  { %25 = vsyncpa [#allocation9], 0 }
  0x12   :  { %27 = vsyncpa [#allocation9 + $0x1], 0 }
  0x13   :  { %28 = vsyncpa [#allocation12], 0 }
  0x14   :  { %30 = vsyncpa [#allocation12 + $0x1], 0 }
  0x15   :  { %31 = vsyncpa [#allocation15], 0 }
  0x16   :  { %33 = vsyncpa [#allocation15 + $0x1], 0  ;;  %s8451_s0 = smov 0   ;;  %s8453_s30 = smov 0  }
  0x17   :  { %s8455_s20 = smov 0   ;;  %s8457_s21 = smov 0  }
  0x18   :  { %s8459_s1 = smov 0   ;;  %s8461_s22 = smov 0  }
  0x19 LB: > { %12147 = sst [smem:[#allocation22_spill]] %s8318_s20  ;;  %s12020_s2 = sadd.s32 4294967295, %s8330_s22   ;;  %s8330_s22 = sphi %s8461_s22, %s39_s22   ;;  %s8326_s1 = sphi %s8459_s1, %s12715_s1   ;;  %s8322_s21 = sphi %s8457_s21, %s12714_s21   ;;  %s8318_s20 = sphi %s8455_s20, %s12710_s20   ;;  %s8314_s30 = sphi %s8453_s30, %s12713_s30   ;;  %s8310_s0 = sphi %s8451_s0, %s12712_s0  }
  0x1a   : > { %p233_p0 = scmp.ne.s32.totalorder %s8314_s30, %s8310_s0  ;;  %p8483_p1 = scmp.eq.s32.totalorder %s12020_s2, 0 }
  0x1b   : > { %p6561_p2 = scmp.ge.s32.totalorder %s8330_s22, 1  ;;  %p531_p3 = scmp.lt.s32.totalorder %s8330_s22, 4 }
  0x1c   : > { %p8491_p4 = por %p8483_p1, %p233_p0  ;;  %s8332_s3 = smov [#allocation16]  }
  0x1d   : > { %p8495_p5 = pnand %p6561_p2, %p531_p3  ;;  %s587_s26 = sshll.u32 %s8332_s3, 4  ;;  %s588_s26 = int_to_ptr.vmem [resolvable:$true] %s587_s26 }
  0x1e   : > { %s51_s28 = sadd.s32 1, %s8326_s1  ;;  %s8083_s29 = scalar_lea.vmem %s588_s26, 512 }
  0x1f   : > { %p7890_p6 = pneg %p8495_p5  ;;  %p8084_p9 = scmp.ne.s32.totalorder %s588_s26, %s8083_s29 }
  0x20   : > { %p8091_p12 = scmp.lt.s32.totalorder %s588_s26, %s588_s26  ;;  %p8092_p13 = scmp.lt.s32.totalorder %s8083_s29, %s8083_s29 }
  0x21   : > { %p8503_p7 = pnand %p7890_p6, %p8483_p1 }
  0x22   : > { %p8093_p0 = por %p8092_p13, %p8091_p12 }
  0x23   : > { %p8074_p8 = pneg %p8503_p7 }
  0x25   : > { %p8086_p10 = pnand %p8084_p9, %p8074_p8 }
  0x27   : > { %p8087_p11 = pneg %p8086_p10 }
  0x29   : > { %p8094_p2 = pnand %p8093_p0, %p8087_p11 }
  0x2b   : > { %8097 = shalt.err (!%p8094_p2)
}
  0x2c   : > { %s8333_s0 = smov 128   ;;  %s8334_s3 = smov 8  }
  0x2d   : > { %s12152_s15 = sld [smem:[#allocation213_spill]]  ;;  %p53_p3 = scmp.ge.s32.totalorder %s51_s28, 3 }
  0x2e   : > { %s220_s29 = sadd.s32 1, %s8318_s20  ;;  %p227_p6 = scmp.ne.s32.totalorder %s8318_s20, %s8314_s30 }
  0x2f   : > { %p228_p9 = scmp.eq.s32.totalorder %s8330_s22, 0  ;;  %s12717_s28 = smov (%p53_p3, %s51_s28), 0 }
  0x30   : > { %12153 = sst [smem:[#allocation23_spill]] %s12717_s28  ;;  %p7915_p11 = scmp.lt.s32.totalorder %s8330_s22, 3 }
  0x31   : > { %p229_p10 = por %p228_p9, %p227_p6  ;;  %s217_s18 = ssub.s32 %s8326_s1, %s12717_s28 }
  0x32   : > { %s8528_s17 = sand.u32 1, %s8330_s22   ;;  %p218_p12 = scmp.eq.s32.totalorder %s217_s18, 0 }
  0x33   : > { %7896 = dma.hbm_to_vmem [thread:$0]  (!%p8503_p7), %s12152_s15, 512, %s588_s26, [#allocation15], %s8333_s0, %s8333_s0, %s8334_s3  }
  0x34   : > { %s8531_s16 = sand.u32 1, %s8318_s20   ;;  %s8534_s6 = sshll.u32 %s8326_s1, 4 }
  0x35   : > { %s8537_s19 = scalar_select %p218_p12, %s8318_s20, %s220_s29  }
  0x36   : > { %s12155_s7 = sld [smem:[#allocation210_spill]]  ;;  %s613_s3 = scalar_lea.vmem [#allocation8], %s8531_s16 }
  0x37   : > { %12154 = sst [smem:[#allocation24_spill]] %s8537_s19  ;;  %s620_s15 = sshll.u32 %s613_s3, 4  ;;  %s621_s15 = int_to_ptr.vmem [resolvable:$true] %s620_s15 }
  0x38   : > { %p8544_p13 = pnand %p7915_p11, %p229_p10  ;;  %s611_s18 = scalar_lea.sflag [#allocation9], %s8528_s17 }
  0x39   : > { %s8111_s29 = scalar_lea.vmem %s621_s15, 16  ;;  %s8335_s2 = smov [#allocation8]  }
  0x3a   : > { %p8551_p0 = pneg %p8544_p13  ;;  %p8112_p2 = scmp.ne.s32.totalorder %s621_s15, %s8111_s29 }
  0x3b   : > { %s8116_s26 = sshll.u32 %s8335_s2, 4  ;;  %s8117_s26 = int_to_ptr.vmem [resolvable:$false] %s8116_s26 }
  0x3c   : > { %s618_s0 = scalar_lea.hbm %s12155_s7, %s8534_s6  ;;  %p8114_p3 = pnand %p8112_p2, %p8551_p0 }
  0x3d   : > { %s8118_s3 = scalar_lea.vmem %s8117_s26, 32  ;;  %p8119_p9 = scmp.lt.s32.totalorder %s621_s15, %s8117_s26 }
  0x3e   : > { %p8115_p6 = pneg %p8114_p3  ;;  %p8120_p10 = scmp.lt.s32.totalorder %s8118_s3, %s8111_s29 }
  0x40   : > { %p8121_p11 = por %p8120_p10, %p8119_p9 }
  0x42   : > { %p8122_p12 = pnand %p8121_p11, %p8115_p6 }
  0x44   : > { %8125 = shalt.err (!%p8122_p12)
}
  0x45   : > { %7900 = dma.hbm_to_vmem [thread:$0]  (!%p8544_p13), %s618_s0, 16, %s621_s15, %s611_s18  }
  0x46   : > { %s660_s2 = scalar_lea.hbm %s12008_s10, %s8534_s6  ;;  %s655_s20 = scalar_lea.vmem [#allocation11], %s8531_s16 }
  0x47   : > { %s662_s4 = sshll.u32 %s655_s20, 4  ;;  %s12026_s29 = scalar_lea.sflag [#allocation12], %s8528_s17  ;;  %s663_s4 = int_to_ptr.vmem [resolvable:$true] %s662_s4 }
  0x48   : > { %s8139_s26 = scalar_lea.vmem %s663_s4, 16  ;;  %s8336_s3 = smov [#allocation11]  }
  0x49   : > { %p8140_p2 = scmp.ne.s32.totalorder %s663_s4, %s8139_s26  ;;  %s8144_s13 = sshll.u32 %s8336_s3, 4  ;;  %s8145_s13 = int_to_ptr.vmem [resolvable:$false] %s8144_s13 }
  0x4a   : > { %s8146_s11 = scalar_lea.vmem %s8145_s13, 32  ;;  %p8147_p9 = scmp.lt.s32.totalorder %s663_s4, %s8145_s13 }
  0x4b   : > { %p8142_p3 = pnand %p8140_p2, %p8551_p0  ;;  %p8148_p10 = scmp.lt.s32.totalorder %s8146_s11, %s8139_s26 }
  0x4d   : > { %p8143_p6 = pneg %p8142_p3  ;;  %p8149_p11 = por %p8148_p10, %p8147_p9 }
  0x4f   : > { %p8150_p12 = pnand %p8149_p11, %p8143_p6 }
  0x51   : > { %8153 = shalt.err (!%p8150_p12)
}
  0x52   : > { %7906 = dma.hbm_to_vmem [thread:$0]  (!%p8544_p13), %s660_s2, 16, %s663_s4, %s12026_s29  }
  0x53   : > { %s8337_s7 = smov [#allocation6]   ;;  %s635_s0 = scalar_lea.hbm %s12006_s8, %s8534_s6 }
  0x54   : > { %s556_s15 = sshll.u32 %s8337_s7, 4  ;;  %s557_s15 = int_to_ptr.vmem [resolvable:$true] %s556_s15 }
  0x55   : > { %s8165_s3 = scalar_lea.vmem %s557_s15, 32  ;;  %p8173_p9 = scmp.lt.s32.totalorder %s557_s15, %s557_s15 }
  0x56   : > { %p8166_p2 = scmp.ne.s32.totalorder %s557_s15, %s8165_s3  ;;  %p8174_p10 = scmp.lt.s32.totalorder %s8165_s3, %s8165_s3 }
  0x58   : > { %p8168_p3 = pnand %p8166_p2, %p8074_p8  ;;  %p8175_p11 = por %p8174_p10, %p8173_p9 }
  0x5a   : > { %p8169_p6 = pneg %p8168_p3 }
  0x5c   : > { %p8176_p12 = pnand %p8175_p11, %p8169_p6 }
  0x5e   : > { %8179 = shalt.err (!%p8176_p12)
}
  0x5f   : > { %s12158_s13 = sld [smem:[#allocation204_spill]]  ;;  %s630_s2 = scalar_lea.vmem [#allocation10], %s8531_s16 }
  0x60   : > { %s637_s26 = sshll.u32 %s630_s2, 4  ;;  %s6570_s7 = sshll.u32 %s8531_s16, 3  ;;  %s638_s26 = int_to_ptr.vmem [resolvable:$true] %s637_s26 }
  0x61   : > { %s8193_s20 = scalar_lea.vmem %s638_s26, 16  ;;  %s8338_s19 = smov [#allocation10]  }
  0x62   : > { %p8194_p8 = scmp.ne.s32.totalorder %s638_s26, %s8193_s20  ;;  %s8198_s3 = sshll.u32 %s8338_s19, 4  ;;  %s8199_s3 = int_to_ptr.vmem [resolvable:$false] %s8198_s3 }
  0x63   : > { %s8200_s27 = scalar_lea.vmem %s8199_s3, 32  ;;  %p8201_p6 = scmp.lt.s32.totalorder %s638_s26, %s8199_s3 }
  0x64   : > { %p8196_p2 = pnand %p8194_p8, %p8551_p0  ;;  %p8202_p9 = scmp.lt.s32.totalorder %s8200_s27, %s8193_s20 }
  0x65   : > { %7893 = dma.hbm_to_vmem [thread:$0]  (!%p8503_p7), %s12158_s13, 32, %s557_s15, [#allocation7]  }
  0x66   : > { %p8197_p3 = pneg %p8196_p2  ;;  %p8203_p10 = por %p8202_p9, %p8201_p6 }
  0x68   : > { %p8204_p11 = pnand %p8203_p10, %p8197_p3 }
  0x6a   : > { %8207 = shalt.err (!%p8204_p11)
}
  0x6b   : > { %7903 = dma.hbm_to_vmem [thread:$0]  (!%p8544_p13), %s635_s0, 16, %s638_s26, %s611_s18  }
  0x6c   : > { %s7094_s11 = sshll.u32 %s8326_s1, 7  ;;  %s681_s13 = scalar_lea.vmem [#allocation13], %s6570_s7 }
  0x6d   : > { %s689_s2 = sshll.u32 %s681_s13, 4  ;;  %s687_s3 = scalar_lea.hbm %s12010_s12, %s7094_s11  ;;  %s690_s2 = int_to_ptr.vmem [resolvable:$true] %s689_s2 }
  0x6e   : > { %s8221_s27 = scalar_lea.vmem %s690_s2, 128  ;;  %s8339_s29 = smov [#allocation13]  }
  0x6f   : > { %p8222_p7 = scmp.ne.s32.totalorder %s690_s2, %s8221_s27  ;;  %s8226_s15 = sshll.u32 %s8339_s29, 4  ;;  %s8227_s15 = int_to_ptr.vmem [resolvable:$false] %s8226_s15 }
  0x70   : > { %s8228_s4 = scalar_lea.vmem %s8227_s15, 256  ;;  %p8229_p2 = scmp.lt.s32.totalorder %s690_s2, %s8227_s15 }
  0x71   : > { %p8224_p12 = pnand %p8222_p7, %p8551_p0  ;;  %p8230_p3 = scmp.lt.s32.totalorder %s8228_s4, %s8221_s27 }
  0x73   : > { %p8225_p8 = pneg %p8224_p12  ;;  %p8231_p6 = por %p8230_p3, %p8229_p2 }
  0x75   : > { %p8232_p9 = pnand %p8231_p6, %p8225_p8 }
  0x77   : > { %8235 = shalt.err (!%p8232_p9)
}
  0x78   : > { %s12159_s18 = scalar_lea.sflag [#allocation12], %s8528_s17  ;;  %s712_s29 = scalar_lea.hbm %s12012_s14, %s8534_s6 }
  0x79   : > { %7909 = dma.hbm_to_vmem [thread:$0]  (!%p8544_p13), %s687_s3, 128, %s690_s2, %s12159_s18  }
  0x7a   : > { %s707_s7 = scalar_lea.vmem [#allocation14], %s8531_s16  ;;  %s705_s13 = scalar_lea.sflag [#allocation15], %s8528_s17 }
  0x7b   : > { %s714_s11 = sshll.u32 %s707_s7, 4  ;;  %s8340_s20 = smov [#allocation14]   ;;  %s715_s11 = int_to_ptr.vmem [resolvable:$true] %s714_s11 }
  0x7c   : > { %s8249_s19 = scalar_lea.vmem %s715_s11, 16  ;;  %s8254_s27 = sshll.u32 %s8340_s20, 4  ;;  %s8255_s27 = int_to_ptr.vmem [resolvable:$false] %s8254_s27 }
  0x7d   : > { %p8250_p10 = scmp.ne.s32.totalorder %s715_s11, %s8249_s19  ;;  %s8256_s15 = scalar_lea.vmem %s8255_s27, 32 }
  0x7e   : > { %p8257_p12 = scmp.lt.s32.totalorder %s715_s11, %s8255_s27  ;;  %p8258_p8 = scmp.lt.s32.totalorder %s8256_s15, %s8249_s19 }
  0x7f   : > { %p8252_p11 = pnand %p8250_p10, %p8551_p0 }
  0x80   : > { %p8259_p2 = por %p8258_p8, %p8257_p12 }
  0x81   : > { %p8253_p7 = pneg %p8252_p11 }
  0x83   : > { %p8260_p3 = pnand %p8259_p2, %p8253_p7 }
  0x85   : > { %8263 = shalt.err (!%p8260_p3)
}
  0x86   : > { %7912 = dma.hbm_to_vmem [thread:$0]  (!%p8544_p13), %s712_s29, 16, %s715_s11, %s705_s13  }
  0x87   : > { %723 = sbr.rel (%p8495_p5) target bundleno = 2558 (0x9fe), region = 96 }
  0x8c   : > { %8289 = dma.done.wait (%p8483_p1), [#allocation7], 32  }
  0x8d   : > { %8291 = vsyncadd (%p8483_p1), [#allocation7], 4294967264  ;;  %s12160_s5 = sadd.s32 4294967295, %s8330_s22   ;;  %s8627_s16 = sand.u32 1, %s8314_s30  }
  0x8e   : > { %s729_s6 = sand.u32 1, %s12160_s5   ;;  %s732_s28 = scalar_lea.vmem [#allocation8], %s8627_s16 }
  0x8f   : > { %s730_s17 = scalar_lea.sflag [#allocation9], %s729_s6 }
  0x90   : > { %8293 = dma.done.wait (%p8491_p4), %s730_s17, 32  }
  0x91   : > { %8295 = vsyncadd (%p8491_p4), %s730_s17, 4294967264  ;;  %s740_s25 = scalar_lea.vmem [#allocation10], %s8627_s16  ;;  %s746_s2 = scalar_lea.sflag [#allocation12], %s729_s6 }
  0x92   : > { %s748_s3 = scalar_lea.vmem [#allocation11], %s8627_s16 }
  0x93   : > { %8297 = dma.done.wait (%p8491_p4), %s746_s2, 144  }
  0x94   : > { %8299 = vsyncadd (%p8491_p4), %s746_s2, 4294967152  ;;  %s6576_s4 = sshll.u32 %s8627_s16, 3  ;;  %s763_s0 = scalar_lea.sflag [#allocation15], %s729_s6 }
  0x95   : > { %s8641_s18 = scalar_lea.vmem [#allocation13], %s6576_s4  ;;  %s765_s26 = scalar_lea.vmem [#allocation14], %s8627_s16 }
  0x96   : > { %8301 = dma.done.wait (%p8491_p4), %s763_s0, 16  }
  0x97   : > { %8303 = vsyncadd (%p8491_p4), %s763_s0, 4294967280 }
  0x98   : > { %8305 = dma.done.wait (%p8483_p1), [#allocation15], 512  }
  0x99   : > { %8307 = vsyncadd (%p8483_p1), [#allocation15], 4294966784  ;;  %p873_p5 = scmp.lt.s32.totalorder %s8322_s21, 2  ;;  %p889_p13 = scmp.eq.s32.totalorder %s8322_s21, 0 }
  0x9a   : > { %s12161_s15 = sld [smem:[#allocation211_spill]]  ;;  %v895_v0 = vlaneseq (%p889_p13)  ;;  %vm2181_vm0 = vcmask (%p889_p13), 257024   ;;  %v8341_v13 = vmov (%p889_p13), 0.0  }
  0x9b   : > { %s874_s29 = scalar_select %p873_p5, %s8322_s21, 2 }
  0x9c   : > { %s12162_s17 = sld [smem:[#allocation212_spill]]  ;;  %v8670_v1 = vshrl.u32 (%p889_p13), %v895_v0, 7  ;;  %v1025_v2 = vand.u32 (%p889_p13), 127, %v895_v0 }
  0x9d   : > { %s7095_s7 = sshll.u32 %s874_s29, 4  ;;  %s7096_s11 = sshll.u32 %s874_s29, 7 }
  0x9e   : > { %s8658_s20 = scalar_lea.vmem %s12007_s9, %s7095_s7  ;;  %894 = sbr.rel (!%p889_p13) target bundleno = 323 (0x143), region = 128  ;;  %v8672_v3 = vmul.u32 (%p889_p13), 32, %v1025_v2  ;;  %v1155_v4 = vadd.s32 (%p889_p13), 1, %v1025_v2  ;;  %v897_v5 = vadd.s32 (%p889_p13), 8, %v8670_v1  ;;  %v898_v6 = vadd.s32 (%p889_p13), 16, %v8670_v1 }
  0x9f   : > { %v899_v7 = vadd.s32 (%p889_p13), 24, %v8670_v1  ;;  %v900_v8 = vadd.s32 (%p889_p13), 32, %v8670_v1  ;;  %v901_v9 = vadd.s32 (%p889_p13), 40, %v8670_v1  ;;  %v902_v10 = vadd.s32 (%p889_p13), 48, %v8670_v1 }
  0xa0   : > { %s8663_s5 = scalar_lea.vmem %s12161_s15, %s7096_s11  ;;  %vm1027_vm1 = vcmp.ge.s32.totalorder (%p889_p13), %v8670_v1, %v8672_v3  ;;  %v8682_v11 = vmul.u32 (%p889_p13), 32, %v1155_v4  ;;  %vm1028_vm2 = vcmp.ge.s32.totalorder (%p889_p13), %v897_v5, %v8672_v3  ;;  %vm1029_vm3 = vcmp.ge.s32.totalorder (%p889_p13), %v898_v6, %v8672_v3 }
  0xa1   : > { %vm1030_vm4 = vcmp.ge.s32.totalorder (%p889_p13), %v899_v7, %v8672_v3  ;;  %vm1031_vm5 = vcmp.ge.s32.totalorder (%p889_p13), %v900_v8, %v8672_v3  ;;  %vm1032_vm6 = vcmp.ge.s32.totalorder (%p889_p13), %v901_v9, %v8672_v3  ;;  %v903_v12 = vadd.s32 (%p889_p13), 56, %v8670_v1 }
  0xa2   : > { %s8668_s2 = scalar_lea.vmem %s12162_s17, %s7095_s7  ;;  %vm1157_vm8 = vcmp.lt.s32.totalorder (%p889_p13), %v8670_v1, %v8682_v11  ;;  %vm1158_vm9 = vcmp.lt.s32.totalorder (%p889_p13), %v897_v5, %v8682_v11  ;;  %vm1159_vm10 = vcmp.lt.s32.totalorder (%p889_p13), %v898_v6, %v8682_v11  ;;  %vm1160_vm11 = vcmp.lt.s32.totalorder (%p889_p13), %v899_v7, %v8682_v11 }
  0xa3   : > { %vm1285_vm12 = vmand %vm1027_vm1, %vm1157_vm8  ;;  %vm1161_vm13 = vcmp.lt.s32.totalorder %v900_v8, %v8682_v11  ;;  %vm1162_vm14 = vcmp.lt.s32.totalorder %v901_v9, %v8682_v11  ;;  %vm1163_vm15 = vcmp.lt.s32.totalorder %v902_v10, %v8682_v11  ;;  %v904_v15 = vadd.s32 64, %v8670_v1 }
  0xa4   : > { %v6585_v14 = vsel %vm1285_vm12, 1.0, %v8341_v13  ;;  %vm1286_vm7 = vmand %vm1028_vm2, %vm1158_vm9  ;;  %v905_v16 = vadd.s32 72, %v8670_v1  ;;  %v906_v17 = vadd.s32 80, %v8670_v1  ;;  %vm1034_vm8 = vcmp.ge.s32.totalorder %v903_v12, %v8672_v3 }
  0xa5   : > { %v7099_v18 = vpack.c.bf16 %v6585_v14, %v6585_v14  ;;  %v6586_v19 = vsel %vm1286_vm7, 1.0, %v8341_v13  ;;  %vm1287_vm1 = vmand %vm1029_vm3, %vm1159_vm10  ;;  %vm1164_vm12 = vcmp.lt.s32.totalorder %v903_v12, %v8682_v11  ;;  %vm1035_vm9 = vcmp.ge.s32.totalorder %v904_v15, %v8672_v3 }
  0xa6   : > { %v7100_v20 = vpack.c.bf16 %v6586_v19, %v6586_v19  ;;  %v6587_v21 = vsel %vm1287_vm1, 1.0, %v8341_v13  ;;  %vm1288_vm2 = vmand %vm1030_vm4, %vm1160_vm11  ;;  %vm1165_vm7 = vcmp.lt.s32.totalorder %v904_v15, %v8682_v11  ;;  %vm1036_vm10 = vcmp.ge.s32.totalorder %v905_v16, %v8672_v3 }
  0xa7   : > { %2182 = vst.msk [vmem:[#allocation5] sm:$0xf] %vm2181_vm0, %v7099_v18  ;;  %v7101_v22 = vpack.c.bf16 %v6587_v21, %v6587_v21  ;;  %v6588_v23 = vsel %vm1288_vm2, 1.0, %v8341_v13  ;;  %vm1289_vm3 = vmand %vm1031_vm5, %vm1161_vm13  ;;  %vm1166_vm1 = vcmp.lt.s32.totalorder %v905_v16, %v8682_v11  ;;  %vm1037_vm11 = vcmp.ge.s32.totalorder %v906_v17, %v8672_v3 }
  0xa8   : > { %2183 = vst.msk [vmem:[#allocation5 + $0x4] sm:$0xf] %vm2181_vm0, %v7100_v20  ;;  %v7102_v24 = vpack.c.bf16 %v6588_v23, %v6588_v23  ;;  %v6589_v25 = vsel %vm1289_vm3, 1.0, %v8341_v13  ;;  %vm1290_vm4 = vmand %vm1032_vm6, %vm1162_vm14  ;;  %vm1167_vm2 = vcmp.lt.s32.totalorder %v906_v17, %v8682_v11  ;;  %vm12163_vm5 = vcmp.ge.s32.totalorder %v902_v10, %v8672_v3 }
  0xa9   : > { %2184 = vst.msk [vmem:[#allocation5 + $0x8] sm:$0xf] %vm2181_vm0, %v7101_v22  ;;  %v7103_v26 = vpack.c.bf16 %v6589_v25, %v6589_v25  ;;  %v6590_v27 = vsel %vm1290_vm4, 1.0, %v8341_v13  ;;  %vm1291_vm13 = vmand %vm12163_vm5, %vm1163_vm15  ;;  %v907_v28 = vadd.s32 88, %v8670_v1  ;;  %v908_v29 = vadd.s32 96, %v8670_v1 }
  0xaa   : > { %2185 = vst.msk [vmem:[#allocation5 + $0xc] sm:$0xf] %vm2181_vm0, %v7102_v24  ;;  %v7104_v30 = vpack.c.bf16 %v6590_v27, %v6590_v27  ;;  %v6591_v31 = vsel %vm1291_vm13, 1.0, %v8341_v13  ;;  %vm1292_vm6 = vmand %vm1034_vm8, %vm1164_vm12  ;;  %v909_v32 = vadd.s32 104, %v8670_v1  ;;  %v910_v33 = vadd.s32 112, %v8670_v1 }
  0xab   : > { %2186 = vst.msk [vmem:[#allocation5 + $0x10] sm:$0xf] %vm2181_vm0, %v7103_v26  ;;  %v7105_v34 = vpack.c.bf16 %v6591_v31, %v6591_v31  ;;  %v6592_v35 = vsel %vm1292_vm6, 1.0, %v8341_v13  ;;  %vm1293_vm14 = vmand %vm1035_vm9, %vm1165_vm7  ;;  %vm1038_vm15 = vcmp.ge.s32.totalorder %v907_v28, %v8672_v3  ;;  %vm1168_vm3 = vcmp.lt.s32.totalorder %v907_v28, %v8682_v11 }
  0xac   : > { %2187 = vst.msk [vmem:[#allocation5 + $0x14] sm:$0xf] %vm2181_vm0, %v7104_v30  ;;  %v7106_v36 = vpack.c.bf16 %v6592_v35, %v6592_v35  ;;  %v6593_v37 = vsel %vm1293_vm14, 1.0, %v8341_v13  ;;  %vm1294_vm8 = vmand %vm1036_vm10, %vm1166_vm1  ;;  %vm1039_vm12 = vcmp.ge.s32.totalorder %v908_v29, %v8672_v3  ;;  %vm1169_vm4 = vcmp.lt.s32.totalorder %v908_v29, %v8682_v11 }
  0xad   : > { %2188 = vst.msk [vmem:[#allocation5 + $0x18] sm:$0xf] %vm2181_vm0, %v7105_v34  ;;  %v7107_v38 = vpack.c.bf16 %v6593_v37, %v6593_v37  ;;  %v6594_v39 = vsel %vm1294_vm8, 1.0, %v8341_v13  ;;  %vm1295_vm9 = vmand %vm1037_vm11, %vm1167_vm2  ;;  %vm1040_vm7 = vcmp.ge.s32.totalorder %v909_v32, %v8672_v3  ;;  %vm1170_vm5 = vcmp.lt.s32.totalorder %v909_v32, %v8682_v11 }
  0xae   : > { %2189 = vst.msk [vmem:[#allocation5 + $0x1c] sm:$0xf] %vm2181_vm0, %v7106_v36  ;;  %v7108_v40 = vpack.c.bf16 %v6594_v39, %v6594_v39  ;;  %v6595_v41 = vsel %vm1295_vm9, 1.0, %v8341_v13  ;;  %vm1296_vm10 = vmand %vm1038_vm15, %vm1168_vm3  ;;  %vm1041_vm1 = vcmp.ge.s32.totalorder %v910_v33, %v8672_v3  ;;  %vm1171_vm13 = vcmp.lt.s32.totalorder %v910_v33, %v8682_v11 }
  0xaf   : > { %2190 = vst.msk [vmem:[#allocation5 + $0x20] sm:$0xf] %vm2181_vm0, %v7107_v38  ;;  %v7109_v42 = vpack.c.bf16 %v6595_v41, %v6595_v41  ;;  %v6596_v43 = vsel %vm1296_vm10, 1.0, %v8341_v13  ;;  %vm1297_vm11 = vmand %vm1039_vm12, %vm1169_vm4  ;;  %v911_v44 = vadd.s32 120, %v8670_v1  ;;  %v912_v45 = vadd.s32 128, %v8670_v1 }
  0xb0   : > { %2191 = vst.msk [vmem:[#allocation5 + $0x24] sm:$0xf] %vm2181_vm0, %v7108_v40  ;;  %v7110_v46 = vpack.c.bf16 %v6596_v43, %v6596_v43  ;;  %v6597_v47 = vsel %vm1297_vm11, 1.0, %v8341_v13  ;;  %vm1298_vm2 = vmand %vm1040_vm7, %vm1170_vm5  ;;  %v913_v48 = vadd.s32 136, %v8670_v1  ;;  %v914_v49 = vadd.s32 144, %v8670_v1 }
  0xb1   : > { %2192 = vst.msk [vmem:[#allocation5 + $0x28] sm:$0xf] %vm2181_vm0, %v7109_v42  ;;  %v7111_v50 = vpack.c.bf16 %v6597_v47, %v6597_v47  ;;  %v6598_v51 = vsel %vm1298_vm2, 1.0, %v8341_v13  ;;  %vm1299_vm6 = vmand %vm1041_vm1, %vm1171_vm13  ;;  %vm1042_vm14 = vcmp.ge.s32.totalorder %v911_v44, %v8672_v3  ;;  %vm1172_vm15 = vcmp.lt.s32.totalorder %v911_v44, %v8682_v11 }
  0xb2   : > { %2193 = vst.msk [vmem:[#allocation5 + $0x2c] sm:$0xf] %vm2181_vm0, %v7110_v46  ;;  %v7112_v52 = vpack.c.bf16 %v6598_v51, %v6598_v51  ;;  %v6599_v53 = vsel %vm1299_vm6, 1.0, %v8341_v13  ;;  %vm1300_vm3 = vmand %vm1042_vm14, %vm1172_vm15  ;;  %vm1043_vm8 = vcmp.ge.s32.totalorder %v912_v45, %v8672_v3  ;;  %vm1173_vm12 = vcmp.lt.s32.totalorder %v912_v45, %v8682_v11 }
  0xb3   : > { %2194 = vst.msk [vmem:[#allocation5 + $0x30] sm:$0xf] %vm2181_vm0, %v7111_v50  ;;  %v7113_v54 = vpack.c.bf16 %v6599_v53, %v6599_v53  ;;  %v6600_v55 = vsel %vm1300_vm3, 1.0, %v8341_v13  ;;  %vm1301_vm4 = vmand %vm1043_vm8, %vm1173_vm12  ;;  %vm1044_vm9 = vcmp.ge.s32.totalorder %v913_v48, %v8672_v3  ;;  %vm1174_vm7 = vcmp.lt.s32.totalorder %v913_v48, %v8682_v11 }
  0xb4   : > { %2195 = vst.msk [vmem:[#allocation5 + $0x34] sm:$0xf] %vm2181_vm0, %v7112_v52  ;;  %v7114_v56 = vpack.c.bf16 %v6600_v55, %v6600_v55  ;;  %v6601_v57 = vsel %vm1301_vm4, 1.0, %v8341_v13  ;;  %vm1302_vm5 = vmand %vm1044_vm9, %vm1174_vm7  ;;  %vm1045_vm10 = vcmp.ge.s32.totalorder %v914_v49, %v8672_v3  ;;  %vm1175_vm1 = vcmp.lt.s32.totalorder %v914_v49, %v8682_v11 }
  0xb5   : > { %2196 = vst.msk [vmem:[#allocation5 + $0x38] sm:$0xf] %vm2181_vm0, %v7113_v54  ;;  %v7115_v58 = vpack.c.bf16 %v6601_v57, %v6601_v57  ;;  %v6602_v59 = vsel %vm1302_vm5, 1.0, %v8341_v13  ;;  %vm1303_vm13 = vmand %vm1045_vm10, %vm1175_vm1  ;;  %v915_v60 = vadd.s32 152, %v8670_v1  ;;  %v916_v61 = vadd.s32 160, %v8670_v1 }
  0xb6   : > { %2197 = vst.msk [vmem:[#allocation5 + $0x3c] sm:$0xf] %vm2181_vm0, %v7114_v56  ;;  %v7116_v62 = vpack.c.bf16 %v6602_v59, %v6602_v59  ;;  %v6603_v63 = vsel %vm1303_vm13, 1.0, %v8341_v13  ;;  %v917_v0 = vadd.s32 168, %v8670_v1  ;;  %v918_v2 = vadd.s32 176, %v8670_v1 }
  0xb7   : > { %2198 = vst.msk [vmem:[#allocation5 + $0x40] sm:$0xf] %vm2181_vm0, %v7115_v58  ;;  %v7117_v4 = vpack.c.bf16 %v6603_v63, %v6603_v63  ;;  %vm1046_vm11 = vcmp.ge.s32.totalorder %v915_v60, %v8672_v3  ;;  %vm1176_vm2 = vcmp.lt.s32.totalorder %v915_v60, %v8682_v11  ;;  %vm1047_vm6 = vcmp.ge.s32.totalorder %v916_v61, %v8672_v3 }
  0xb8   : > { %2199 = vst.msk [vmem:[#allocation5 + $0x44] sm:$0xf] %vm2181_vm0, %v7116_v62  ;;  %vm1304_vm14 = vmand %vm1046_vm11, %vm1176_vm2  ;;  %vm1177_vm15 = vcmp.lt.s32.totalorder %v916_v61, %v8682_v11  ;;  %vm1048_vm3 = vcmp.ge.s32.totalorder %v917_v0, %v8672_v3  ;;  %vm1178_vm8 = vcmp.lt.s32.totalorder %v917_v0, %v8682_v11  ;;  %vm1049_vm12 = vcmp.ge.s32.totalorder %v918_v2, %v8672_v3 }
  0xb9   : > { %2200 = vst.msk [vmem:[#allocation5 + $0x48] sm:$0xf] %vm2181_vm0, %v7117_v4  ;;  %v6604_v5 = vsel %vm1304_vm14, 1.0, %v8341_v13  ;;  %vm1305_vm4 = vmand %vm1047_vm6, %vm1177_vm15  ;;  %vm1179_vm9 = vcmp.lt.s32.totalorder %v918_v2, %v8682_v11  ;;  %v919_v6 = vadd.s32 184, %v8670_v1  ;;  %v920_v7 = vadd.s32 192, %v8670_v1 }
  0xba   : > { %v7118_v8 = vpack.c.bf16 %v6604_v5, %v6604_v5  ;;  %v6605_v9 = vsel %vm1305_vm4, 1.0, %v8341_v13  ;;  %vm1306_vm7 = vmand %vm1048_vm3, %vm1178_vm8  ;;  %v921_v10 = vadd.s32 200, %v8670_v1  ;;  %v922_v12 = vadd.s32 208, %v8670_v1 }
  0xbb   : > { %v7119_v14 = vpack.c.bf16 %v6605_v9, %v6605_v9  ;;  %v6606_v15 = vsel %vm1306_vm7, 1.0, %v8341_v13  ;;  %vm1307_vm5 = vmand %vm1049_vm12, %vm1179_vm9  ;;  %vm1050_vm10 = vcmp.ge.s32.totalorder %v919_v6, %v8672_v3  ;;  %vm1180_vm1 = vcmp.lt.s32.totalorder %v919_v6, %v8682_v11 }
  0xbc   : > { %2201 = vst.msk [vmem:[#allocation5 + $0x4c] sm:$0xf] %vm2181_vm0, %v7118_v8  ;;  %v7120_v16 = vpack.c.bf16 %v6606_v15, %v6606_v15  ;;  %v6607_v17 = vsel %vm1307_vm5, 1.0, %v8341_v13  ;;  %vm1308_vm13 = vmand %vm1050_vm10, %vm1180_vm1  ;;  %vm1051_vm11 = vcmp.ge.s32.totalorder %v920_v7, %v8672_v3  ;;  %vm1181_vm2 = vcmp.lt.s32.totalorder %v920_v7, %v8682_v11 }
  0xbd   : > { %2202 = vst.msk [vmem:[#allocation5 + $0x50] sm:$0xf] %vm2181_vm0, %v7119_v14  ;;  %v7121_v18 = vpack.c.bf16 %v6607_v17, %v6607_v17  ;;  %v6608_v19 = vsel %vm1308_vm13, 1.0, %v8341_v13  ;;  %vm1309_vm6 = vmand %vm1051_vm11, %vm1181_vm2  ;;  %vm1052_vm14 = vcmp.ge.s32.totalorder %v921_v10, %v8672_v3  ;;  %vm1182_vm15 = vcmp.lt.s32.totalorder %v921_v10, %v8682_v11 }
  0xbe   : > { %2203 = vst.msk [vmem:[#allocation5 + $0x54] sm:$0xf] %vm2181_vm0, %v7120_v16  ;;  %v7122_v20 = vpack.c.bf16 %v6608_v19, %v6608_v19  ;;  %v6609_v21 = vsel %vm1309_vm6, 1.0, %v8341_v13  ;;  %vm1310_vm3 = vmand %vm1052_vm14, %vm1182_vm15  ;;  %vm1053_vm8 = vcmp.ge.s32.totalorder %v922_v12, %v8672_v3  ;;  %vm1183_vm12 = vcmp.lt.s32.totalorder %v922_v12, %v8682_v11 }
  0xbf   : > { %2204 = vst.msk [vmem:[#allocation5 + $0x58] sm:$0xf] %vm2181_vm0, %v7121_v18  ;;  %v7123_v22 = vpack.c.bf16 %v6609_v21, %v6609_v21  ;;  %v6610_v23 = vsel %vm1310_vm3, 1.0, %v8341_v13  ;;  %vm1311_vm4 = vmand %vm1053_vm8, %vm1183_vm12  ;;  %v923_v24 = vadd.s32 216, %v8670_v1  ;;  %v924_v25 = vadd.s32 224, %v8670_v1 }
  0xc0   : > { %2205 = vst.msk [vmem:[#allocation5 + $0x5c] sm:$0xf] %vm2181_vm0, %v7122_v20  ;;  %v7124_v26 = vpack.c.bf16 %v6610_v23, %v6610_v23  ;;  %v6611_v27 = vsel %vm1311_vm4, 1.0, %v8341_v13  ;;  %v925_v28 = vadd.s32 232, %v8670_v1  ;;  %v926_v29 = vadd.s32 240, %v8670_v1 }
  0xc1   : > { %2206 = vst.msk [vmem:[#allocation5 + $0x60] sm:$0xf] %vm2181_vm0, %v7123_v22  ;;  %v7125_v30 = vpack.c.bf16 %v6611_v27, %v6611_v27  ;;  %vm1054_vm9 = vcmp.ge.s32.totalorder %v923_v24, %v8672_v3  ;;  %vm1184_vm7 = vcmp.lt.s32.totalorder %v923_v24, %v8682_v11  ;;  %vm1055_vm5 = vcmp.ge.s32.totalorder %v924_v25, %v8672_v3 }
  0xc2   : > { %2207 = vst.msk [vmem:[#allocation5 + $0x64] sm:$0xf] %vm2181_vm0, %v7124_v26  ;;  %vm1312_vm10 = vmand %vm1054_vm9, %vm1184_vm7  ;;  %vm1185_vm1 = vcmp.lt.s32.totalorder %v924_v25, %v8682_v11  ;;  %vm1056_vm13 = vcmp.ge.s32.totalorder %v925_v28, %v8672_v3  ;;  %vm1186_vm11 = vcmp.lt.s32.totalorder %v925_v28, %v8682_v11  ;;  %vm1057_vm2 = vcmp.ge.s32.totalorder %v926_v29, %v8672_v3 }
  0xc3   : > { %2208 = vst.msk [vmem:[#allocation5 + $0x68] sm:$0xf] %vm2181_vm0, %v7125_v30  ;;  %v6612_v31 = vsel %vm1312_vm10, 1.0, %v8341_v13  ;;  %vm1313_vm6 = vmand %vm1055_vm5, %vm1185_vm1  ;;  %vm1187_vm14 = vcmp.lt.s32.totalorder %v926_v29, %v8682_v11  ;;  %v927_v32 = vadd.s32 248, %v8670_v1  ;;  %v928_v33 = vadd.s32 256, %v8670_v1 }
  0xc4   : > { %v7126_v34 = vpack.c.bf16 %v6612_v31, %v6612_v31  ;;  %v6613_v35 = vsel %vm1313_vm6, 1.0, %v8341_v13  ;;  %vm1314_vm15 = vmand %vm1056_vm13, %vm1186_vm11  ;;  %v929_v36 = vadd.s32 264, %v8670_v1  ;;  %v930_v37 = vadd.s32 272, %v8670_v1 }
  0xc5   : > { %v7127_v38 = vpack.c.bf16 %v6613_v35, %v6613_v35  ;;  %v6614_v39 = vsel %vm1314_vm15, 1.0, %v8341_v13  ;;  %vm1315_vm3 = vmand %vm1057_vm2, %vm1187_vm14  ;;  %vm1058_vm8 = vcmp.ge.s32.totalorder %v927_v32, %v8672_v3  ;;  %vm1188_vm12 = vcmp.lt.s32.totalorder %v927_v32, %v8682_v11 }
  0xc6   : > { %2209 = vst.msk [vmem:[#allocation5 + $0x6c] sm:$0xf] %vm2181_vm0, %v7126_v34  ;;  %v7128_v40 = vpack.c.bf16 %v6614_v39, %v6614_v39  ;;  %v6615_v41 = vsel %vm1315_vm3, 1.0, %v8341_v13  ;;  %vm1316_vm4 = vmand %vm1058_vm8, %vm1188_vm12  ;;  %vm1059_vm9 = vcmp.ge.s32.totalorder %v928_v33, %v8672_v3  ;;  %vm1189_vm7 = vcmp.lt.s32.totalorder %v928_v33, %v8682_v11 }
  0xc7   : > { %2210 = vst.msk [vmem:[#allocation5 + $0x70] sm:$0xf] %vm2181_vm0, %v7127_v38  ;;  %v7129_v42 = vpack.c.bf16 %v6615_v41, %v6615_v41  ;;  %v6616_v43 = vsel %vm1316_vm4, 1.0, %v8341_v13  ;;  %vm1317_vm5 = vmand %vm1059_vm9, %vm1189_vm7  ;;  %vm1060_vm10 = vcmp.ge.s32.totalorder %v929_v36, %v8672_v3  ;;  %vm1190_vm1 = vcmp.lt.s32.totalorder %v929_v36, %v8682_v11 }
  0xc8   : > { %2211 = vst.msk [vmem:[#allocation5 + $0x74] sm:$0xf] %vm2181_vm0, %v7128_v40  ;;  %v7130_v44 = vpack.c.bf16 %v6616_v43, %v6616_v43  ;;  %v6617_v45 = vsel %vm1317_vm5, 1.0, %v8341_v13  ;;  %vm1318_vm13 = vmand %vm1060_vm10, %vm1190_vm1  ;;  %vm1061_vm11 = vcmp.ge.s32.totalorder %v930_v37, %v8672_v3  ;;  %vm1191_vm2 = vcmp.lt.s32.totalorder %v930_v37, %v8682_v11 }
  0xc9   : > { %2212 = vst.msk [vmem:[#allocation5 + $0x78] sm:$0xf] %vm2181_vm0, %v7129_v42  ;;  %v7131_v46 = vpack.c.bf16 %v6617_v45, %v6617_v45  ;;  %v6618_v47 = vsel %vm1318_vm13, 1.0, %v8341_v13  ;;  %vm1319_vm6 = vmand %vm1061_vm11, %vm1191_vm2  ;;  %v931_v48 = vadd.s32 280, %v8670_v1  ;;  %v932_v49 = vadd.s32 288, %v8670_v1 }
  0xca   : > { %2213 = vst.msk [vmem:[#allocation5 + $0x7c] sm:$0xf] %vm2181_vm0, %v7130_v44  ;;  %v7132_v50 = vpack.c.bf16 %v6618_v47, %v6618_v47  ;;  %v6619_v51 = vsel %vm1319_vm6, 1.0, %v8341_v13  ;;  %v933_v52 = vadd.s32 296, %v8670_v1  ;;  %v934_v53 = vadd.s32 304, %v8670_v1 }
  0xcb   : > { %2214 = vst.msk [vmem:[#allocation5 + $0x80] sm:$0xf] %vm2181_vm0, %v7131_v46  ;;  %v7133_v54 = vpack.c.bf16 %v6619_v51, %v6619_v51  ;;  %vm1062_vm14 = vcmp.ge.s32.totalorder %v931_v48, %v8672_v3  ;;  %vm1192_vm15 = vcmp.lt.s32.totalorder %v931_v48, %v8682_v11  ;;  %vm1063_vm3 = vcmp.ge.s32.totalorder %v932_v49, %v8672_v3 }
  0xcc   : > { %2215 = vst.msk [vmem:[#allocation5 + $0x84] sm:$0xf] %vm2181_vm0, %v7132_v50  ;;  %vm1320_vm8 = vmand %vm1062_vm14, %vm1192_vm15  ;;  %vm1193_vm12 = vcmp.lt.s32.totalorder %v932_v49, %v8682_v11  ;;  %vm1064_vm4 = vcmp.ge.s32.totalorder %v933_v52, %v8672_v3  ;;  %vm1194_vm9 = vcmp.lt.s32.totalorder %v933_v52, %v8682_v11  ;;  %vm1065_vm7 = vcmp.ge.s32.totalorder %v934_v53, %v8672_v3 }
  0xcd   : > { %2216 = vst.msk [vmem:[#allocation5 + $0x88] sm:$0xf] %vm2181_vm0, %v7133_v54  ;;  %v6620_v55 = vsel %vm1320_vm8, 1.0, %v8341_v13  ;;  %vm1321_vm5 = vmand %vm1063_vm3, %vm1193_vm12  ;;  %vm1195_vm10 = vcmp.lt.s32.totalorder %v934_v53, %v8682_v11  ;;  %v935_v56 = vadd.s32 312, %v8670_v1  ;;  %v936_v57 = vadd.s32 320, %v8670_v1 }
  0xce   : > { %v7134_v58 = vpack.c.bf16 %v6620_v55, %v6620_v55  ;;  %v6621_v59 = vsel %vm1321_vm5, 1.0, %v8341_v13  ;;  %vm1322_vm1 = vmand %vm1064_vm4, %vm1194_vm9  ;;  %v937_v60 = vadd.s32 328, %v8670_v1  ;;  %v938_v61 = vadd.s32 336, %v8670_v1 }
  0xcf   : > { %v7135_v62 = vpack.c.bf16 %v6621_v59, %v6621_v59  ;;  %v6622_v63 = vsel %vm1322_vm1, 1.0, %v8341_v13  ;;  %vm1323_vm13 = vmand %vm1065_vm7, %vm1195_vm10  ;;  %vm1066_vm11 = vcmp.ge.s32.totalorder %v935_v56, %v8672_v3  ;;  %vm1196_vm2 = vcmp.lt.s32.totalorder %v935_v56, %v8682_v11 }
  0xd0   : > { %2217 = vst.msk [vmem:[#allocation5 + $0x8c] sm:$0xf] %vm2181_vm0, %v7134_v58  ;;  %v7136_v0 = vpack.c.bf16 %v6622_v63, %v6622_v63  ;;  %v6623_v2 = vsel %vm1323_vm13, 1.0, %v8341_v13  ;;  %vm1324_vm6 = vmand %vm1066_vm11, %vm1196_vm2  ;;  %vm1067_vm14 = vcmp.ge.s32.totalorder %v936_v57, %v8672_v3  ;;  %vm1197_vm15 = vcmp.lt.s32.totalorder %v936_v57, %v8682_v11 }
  0xd1   : > { %2218 = vst.msk [vmem:[#allocation5 + $0x90] sm:$0xf] %vm2181_vm0, %v7135_v62  ;;  %v7137_v4 = vpack.c.bf16 %v6623_v2, %v6623_v2  ;;  %v6624_v5 = vsel %vm1324_vm6, 1.0, %v8341_v13  ;;  %vm1325_vm3 = vmand %vm1067_vm14, %vm1197_vm15  ;;  %vm1068_vm8 = vcmp.ge.s32.totalorder %v937_v60, %v8672_v3  ;;  %vm1198_vm12 = vcmp.lt.s32.totalorder %v937_v60, %v8682_v11 }
  0xd2   : > { %2219 = vst.msk [vmem:[#allocation5 + $0x94] sm:$0xf] %vm2181_vm0, %v7136_v0  ;;  %v7138_v6 = vpack.c.bf16 %v6624_v5, %v6624_v5  ;;  %v6625_v7 = vsel %vm1325_vm3, 1.0, %v8341_v13  ;;  %vm1326_vm4 = vmand %vm1068_vm8, %vm1198_vm12  ;;  %vm1069_vm9 = vcmp.ge.s32.totalorder %v938_v61, %v8672_v3  ;;  %vm1199_vm7 = vcmp.lt.s32.totalorder %v938_v61, %v8682_v11 }
  0xd3   : > { %2220 = vst.msk [vmem:[#allocation5 + $0x98] sm:$0xf] %vm2181_vm0, %v7137_v4  ;;  %v7139_v8 = vpack.c.bf16 %v6625_v7, %v6625_v7  ;;  %v6626_v9 = vsel %vm1326_vm4, 1.0, %v8341_v13  ;;  %vm1327_vm5 = vmand %vm1069_vm9, %vm1199_vm7  ;;  %v939_v10 = vadd.s32 344, %v8670_v1  ;;  %v940_v12 = vadd.s32 352, %v8670_v1 }
  0xd4   : > { %2221 = vst.msk [vmem:[#allocation5 + $0x9c] sm:$0xf] %vm2181_vm0, %v7138_v6  ;;  %v7140_v14 = vpack.c.bf16 %v6626_v9, %v6626_v9  ;;  %v6627_v15 = vsel %vm1327_vm5, 1.0, %v8341_v13  ;;  %v941_v16 = vadd.s32 360, %v8670_v1  ;;  %v942_v17 = vadd.s32 368, %v8670_v1 }
  0xd5   : > { %2222 = vst.msk [vmem:[#allocation5 + $0xa0] sm:$0xf] %vm2181_vm0, %v7139_v8  ;;  %v7141_v18 = vpack.c.bf16 %v6627_v15, %v6627_v15  ;;  %vm1070_vm10 = vcmp.ge.s32.totalorder %v939_v10, %v8672_v3  ;;  %vm1200_vm1 = vcmp.lt.s32.totalorder %v939_v10, %v8682_v11  ;;  %vm1071_vm13 = vcmp.ge.s32.totalorder %v940_v12, %v8672_v3 }
  0xd6   : > { %2223 = vst.msk [vmem:[#allocation5 + $0xa4] sm:$0xf] %vm2181_vm0, %v7140_v14  ;;  %vm1328_vm11 = vmand %vm1070_vm10, %vm1200_vm1  ;;  %vm1201_vm2 = vcmp.lt.s32.totalorder %v940_v12, %v8682_v11  ;;  %vm1072_vm6 = vcmp.ge.s32.totalorder %v941_v16, %v8672_v3  ;;  %vm1202_vm14 = vcmp.lt.s32.totalorder %v941_v16, %v8682_v11  ;;  %vm1073_vm15 = vcmp.ge.s32.totalorder %v942_v17, %v8672_v3 }
  0xd7   : > { %2224 = vst.msk [vmem:[#allocation5 + $0xa8] sm:$0xf] %vm2181_vm0, %v7141_v18  ;;  %v6628_v19 = vsel %vm1328_vm11, 1.0, %v8341_v13  ;;  %vm1329_vm3 = vmand %vm1071_vm13, %vm1201_vm2  ;;  %vm1203_vm8 = vcmp.lt.s32.totalorder %v942_v17, %v8682_v11  ;;  %v943_v20 = vadd.s32 376, %v8670_v1  ;;  %v944_v21 = vadd.s32 384, %v8670_v1 }
  0xd8   : > { %v7142_v22 = vpack.c.bf16 %v6628_v19, %v6628_v19  ;;  %v6629_v23 = vsel %vm1329_vm3, 1.0, %v8341_v13  ;;  %vm1330_vm12 = vmand %vm1072_vm6, %vm1202_vm14  ;;  %v945_v24 = vadd.s32 392, %v8670_v1  ;;  %v946_v25 = vadd.s32 400, %v8670_v1 }
  0xd9   : > { %v7143_v26 = vpack.c.bf16 %v6629_v23, %v6629_v23  ;;  %v6630_v27 = vsel %vm1330_vm12, 1.0, %v8341_v13  ;;  %vm1331_vm4 = vmand %vm1073_vm15, %vm1203_vm8  ;;  %vm1074_vm9 = vcmp.ge.s32.totalorder %v943_v20, %v8672_v3  ;;  %vm1204_vm7 = vcmp.lt.s32.totalorder %v943_v20, %v8682_v11 }
  0xda   : > { %2225 = vst.msk [vmem:[#allocation5 + $0xac] sm:$0xf] %vm2181_vm0, %v7142_v22  ;;  %v7144_v28 = vpack.c.bf16 %v6630_v27, %v6630_v27  ;;  %v6631_v29 = vsel %vm1331_vm4, 1.0, %v8341_v13  ;;  %vm1332_vm5 = vmand %vm1074_vm9, %vm1204_vm7  ;;  %vm1075_vm10 = vcmp.ge.s32.totalorder %v944_v21, %v8672_v3  ;;  %vm1205_vm1 = vcmp.lt.s32.totalorder %v944_v21, %v8682_v11 }
  0xdb   : > { %2226 = vst.msk [vmem:[#allocation5 + $0xb0] sm:$0xf] %vm2181_vm0, %v7143_v26  ;;  %v7145_v30 = vpack.c.bf16 %v6631_v29, %v6631_v29  ;;  %v6632_v31 = vsel %vm1332_vm5, 1.0, %v8341_v13  ;;  %vm1333_vm13 = vmand %vm1075_vm10, %vm1205_vm1  ;;  %vm1076_vm11 = vcmp.ge.s32.totalorder %v945_v24, %v8672_v3  ;;  %vm1206_vm2 = vcmp.lt.s32.totalorder %v945_v24, %v8682_v11 }
  0xdc   : > { %2227 = vst.msk [vmem:[#allocation5 + $0xb4] sm:$0xf] %vm2181_vm0, %v7144_v28  ;;  %v7146_v32 = vpack.c.bf16 %v6632_v31, %v6632_v31  ;;  %v6633_v33 = vsel %vm1333_vm13, 1.0, %v8341_v13  ;;  %vm1334_vm6 = vmand %vm1076_vm11, %vm1206_vm2  ;;  %vm1077_vm14 = vcmp.ge.s32.totalorder %v946_v25, %v8672_v3  ;;  %vm1207_vm15 = vcmp.lt.s32.totalorder %v946_v25, %v8682_v11 }
  0xdd   : > { %2228 = vst.msk [vmem:[#allocation5 + $0xb8] sm:$0xf] %vm2181_vm0, %v7145_v30  ;;  %v7147_v34 = vpack.c.bf16 %v6633_v33, %v6633_v33  ;;  %v6634_v35 = vsel %vm1334_vm6, 1.0, %v8341_v13  ;;  %vm1335_vm3 = vmand %vm1077_vm14, %vm1207_vm15  ;;  %v947_v36 = vadd.s32 408, %v8670_v1  ;;  %v948_v37 = vadd.s32 416, %v8670_v1 }
  0xde   : > { %2229 = vst.msk [vmem:[#allocation5 + $0xbc] sm:$0xf] %vm2181_vm0, %v7146_v32  ;;  %v7148_v38 = vpack.c.bf16 %v6634_v35, %v6634_v35  ;;  %v6635_v39 = vsel %vm1335_vm3, 1.0, %v8341_v13  ;;  %v949_v40 = vadd.s32 424, %v8670_v1  ;;  %v950_v41 = vadd.s32 432, %v8670_v1 }
  0xdf   : > { %2230 = vst.msk [vmem:[#allocation5 + $0xc0] sm:$0xf] %vm2181_vm0, %v7147_v34  ;;  %v7149_v42 = vpack.c.bf16 %v6635_v39, %v6635_v39  ;;  %vm1078_vm8 = vcmp.ge.s32.totalorder %v947_v36, %v8672_v3  ;;  %vm1208_vm12 = vcmp.lt.s32.totalorder %v947_v36, %v8682_v11  ;;  %vm1079_vm4 = vcmp.ge.s32.totalorder %v948_v37, %v8672_v3 }
  0xe0   : > { %2231 = vst.msk [vmem:[#allocation5 + $0xc4] sm:$0xf] %vm2181_vm0, %v7148_v38  ;;  %vm1336_vm9 = vmand %vm1078_vm8, %vm1208_vm12  ;;  %vm1209_vm7 = vcmp.lt.s32.totalorder %v948_v37, %v8682_v11  ;;  %vm1080_vm5 = vcmp.ge.s32.totalorder %v949_v40, %v8672_v3  ;;  %vm1210_vm10 = vcmp.lt.s32.totalorder %v949_v40, %v8682_v11  ;;  %vm1081_vm1 = vcmp.ge.s32.totalorder %v950_v41, %v8672_v3 }
  0xe1   : > { %2232 = vst.msk [vmem:[#allocation5 + $0xc8] sm:$0xf] %vm2181_vm0, %v7149_v42  ;;  %v6636_v43 = vsel %vm1336_vm9, 1.0, %v8341_v13  ;;  %vm1337_vm13 = vmand %vm1079_vm4, %vm1209_vm7  ;;  %vm1211_vm11 = vcmp.lt.s32.totalorder %v950_v41, %v8682_v11  ;;  %v951_v44 = vadd.s32 440, %v8670_v1  ;;  %v952_v45 = vadd.s32 448, %v8670_v1 }
  0xe2   : > { %v7150_v46 = vpack.c.bf16 %v6636_v43, %v6636_v43  ;;  %v6637_v47 = vsel %vm1337_vm13, 1.0, %v8341_v13  ;;  %vm1338_vm2 = vmand %vm1080_vm5, %vm1210_vm10  ;;  %v953_v48 = vadd.s32 456, %v8670_v1  ;;  %v954_v49 = vadd.s32 464, %v8670_v1 }
  0xe3   : > { %v7151_v50 = vpack.c.bf16 %v6637_v47, %v6637_v47  ;;  %v6638_v51 = vsel %vm1338_vm2, 1.0, %v8341_v13  ;;  %vm1339_vm6 = vmand %vm1081_vm1, %vm1211_vm11  ;;  %vm1082_vm14 = vcmp.ge.s32.totalorder %v951_v44, %v8672_v3  ;;  %vm1212_vm15 = vcmp.lt.s32.totalorder %v951_v44, %v8682_v11 }
  0xe4   : > { %2233 = vst.msk [vmem:[#allocation5 + $0xcc] sm:$0xf] %vm2181_vm0, %v7150_v46  ;;  %v7152_v52 = vpack.c.bf16 %v6638_v51, %v6638_v51  ;;  %v6639_v53 = vsel %vm1339_vm6, 1.0, %v8341_v13  ;;  %vm1340_vm3 = vmand %vm1082_vm14, %vm1212_vm15  ;;  %vm1083_vm8 = vcmp.ge.s32.totalorder %v952_v45, %v8672_v3  ;;  %vm1213_vm12 = vcmp.lt.s32.totalorder %v952_v45, %v8682_v11 }
  0xe5   : > { %2234 = vst.msk [vmem:[#allocation5 + $0xd0] sm:$0xf] %vm2181_vm0, %v7151_v50  ;;  %v7153_v54 = vpack.c.bf16 %v6639_v53, %v6639_v53  ;;  %v6640_v55 = vsel %vm1340_vm3, 1.0, %v8341_v13  ;;  %vm1341_vm4 = vmand %vm1083_vm8, %vm1213_vm12  ;;  %vm1084_vm9 = vcmp.ge.s32.totalorder %v953_v48, %v8672_v3  ;;  %vm1214_vm7 = vcmp.lt.s32.totalorder %v953_v48, %v8682_v11 }
  0xe6   : > { %2235 = vst.msk [vmem:[#allocation5 + $0xd4] sm:$0xf] %vm2181_vm0, %v7152_v52  ;;  %v7154_v56 = vpack.c.bf16 %v6640_v55, %v6640_v55  ;;  %v6641_v57 = vsel %vm1341_vm4, 1.0, %v8341_v13  ;;  %vm1342_vm5 = vmand %vm1084_vm9, %vm1214_vm7  ;;  %vm1085_vm10 = vcmp.ge.s32.totalorder %v954_v49, %v8672_v3  ;;  %vm1215_vm1 = vcmp.lt.s32.totalorder %v954_v49, %v8682_v11 }
  0xe7   : > { %2236 = vst.msk [vmem:[#allocation5 + $0xd8] sm:$0xf] %vm2181_vm0, %v7153_v54  ;;  %v7155_v58 = vpack.c.bf16 %v6641_v57, %v6641_v57  ;;  %v6642_v59 = vsel %vm1342_vm5, 1.0, %v8341_v13  ;;  %vm1343_vm13 = vmand %vm1085_vm10, %vm1215_vm1  ;;  %v955_v60 = vadd.s32 472, %v8670_v1  ;;  %v956_v61 = vadd.s32 480, %v8670_v1 }
  0xe8   : > { %2237 = vst.msk [vmem:[#allocation5 + $0xdc] sm:$0xf] %vm2181_vm0, %v7154_v56  ;;  %v7156_v62 = vpack.c.bf16 %v6642_v59, %v6642_v59  ;;  %v6643_v63 = vsel %vm1343_vm13, 1.0, %v8341_v13  ;;  %v957_v0 = vadd.s32 488, %v8670_v1  ;;  %v958_v2 = vadd.s32 496, %v8670_v1 }
  0xe9   : > { %2238 = vst.msk [vmem:[#allocation5 + $0xe0] sm:$0xf] %vm2181_vm0, %v7155_v58  ;;  %v7157_v4 = vpack.c.bf16 %v6643_v63, %v6643_v63  ;;  %vm1086_vm11 = vcmp.ge.s32.totalorder %v955_v60, %v8672_v3  ;;  %vm1216_vm2 = vcmp.lt.s32.totalorder %v955_v60, %v8682_v11  ;;  %vm1087_vm6 = vcmp.ge.s32.totalorder %v956_v61, %v8672_v3 }
  0xea   : > { %2239 = vst.msk [vmem:[#allocation5 + $0xe4] sm:$0xf] %vm2181_vm0, %v7156_v62  ;;  %vm1344_vm14 = vmand %vm1086_vm11, %vm1216_vm2  ;;  %vm1217_vm15 = vcmp.lt.s32.totalorder %v956_v61, %v8682_v11  ;;  %vm1088_vm3 = vcmp.ge.s32.totalorder %v957_v0, %v8672_v3  ;;  %vm1218_vm8 = vcmp.lt.s32.totalorder %v957_v0, %v8682_v11  ;;  %vm1089_vm12 = vcmp.ge.s32.totalorder %v958_v2, %v8672_v3 }
  0xeb   : > { %2240 = vst.msk [vmem:[#allocation5 + $0xe8] sm:$0xf] %vm2181_vm0, %v7157_v4  ;;  %v6644_v5 = vsel %vm1344_vm14, 1.0, %v8341_v13  ;;  %vm1345_vm4 = vmand %vm1087_vm6, %vm1217_vm15  ;;  %vm1219_vm9 = vcmp.lt.s32.totalorder %v958_v2, %v8682_v11  ;;  %v959_v6 = vadd.s32 504, %v8670_v1  ;;  %v960_v7 = vadd.s32 512, %v8670_v1 }
  0xec   : > { %v7158_v8 = vpack.c.bf16 %v6644_v5, %v6644_v5  ;;  %v6645_v9 = vsel %vm1345_vm4, 1.0, %v8341_v13  ;;  %vm1346_vm7 = vmand %vm1088_vm3, %vm1218_vm8  ;;  %v961_v10 = vadd.s32 520, %v8670_v1  ;;  %v962_v12 = vadd.s32 528, %v8670_v1 }
  0xed   : > { %v7159_v14 = vpack.c.bf16 %v6645_v9, %v6645_v9  ;;  %v6646_v15 = vsel %vm1346_vm7, 1.0, %v8341_v13  ;;  %vm1347_vm5 = vmand %vm1089_vm12, %vm1219_vm9  ;;  %vm1090_vm10 = vcmp.ge.s32.totalorder %v959_v6, %v8672_v3  ;;  %vm1220_vm1 = vcmp.lt.s32.totalorder %v959_v6, %v8682_v11 }
  0xee   : > { %2241 = vst.msk [vmem:[#allocation5 + $0xec] sm:$0xf] %vm2181_vm0, %v7158_v8  ;;  %v7160_v16 = vpack.c.bf16 %v6646_v15, %v6646_v15  ;;  %v6647_v17 = vsel %vm1347_vm5, 1.0, %v8341_v13  ;;  %vm1348_vm13 = vmand %vm1090_vm10, %vm1220_vm1  ;;  %vm1091_vm11 = vcmp.ge.s32.totalorder %v960_v7, %v8672_v3  ;;  %vm1221_vm2 = vcmp.lt.s32.totalorder %v960_v7, %v8682_v11 }
  0xef   : > { %2242 = vst.msk [vmem:[#allocation5 + $0xf0] sm:$0xf] %vm2181_vm0, %v7159_v14  ;;  %v7161_v18 = vpack.c.bf16 %v6647_v17, %v6647_v17  ;;  %v6648_v19 = vsel %vm1348_vm13, 1.0, %v8341_v13  ;;  %vm1349_vm6 = vmand %vm1091_vm11, %vm1221_vm2  ;;  %vm1092_vm14 = vcmp.ge.s32.totalorder %v961_v10, %v8672_v3  ;;  %vm1222_vm15 = vcmp.lt.s32.totalorder %v961_v10, %v8682_v11 }
  0xf0   : > { %2243 = vst.msk [vmem:[#allocation5 + $0xf4] sm:$0xf] %vm2181_vm0, %v7160_v16  ;;  %v7162_v20 = vpack.c.bf16 %v6648_v19, %v6648_v19  ;;  %v6649_v21 = vsel %vm1349_vm6, 1.0, %v8341_v13  ;;  %vm1350_vm3 = vmand %vm1092_vm14, %vm1222_vm15  ;;  %vm1093_vm8 = vcmp.ge.s32.totalorder %v962_v12, %v8672_v3  ;;  %vm1223_vm12 = vcmp.lt.s32.totalorder %v962_v12, %v8682_v11 }
  0xf1   : > { %2244 = vst.msk [vmem:[#allocation5 + $0xf8] sm:$0xf] %vm2181_vm0, %v7161_v18  ;;  %v7163_v22 = vpack.c.bf16 %v6649_v21, %v6649_v21  ;;  %v6650_v23 = vsel %vm1350_vm3, 1.0, %v8341_v13  ;;  %vm1351_vm4 = vmand %vm1093_vm8, %vm1223_vm12  ;;  %v963_v24 = vadd.s32 536, %v8670_v1  ;;  %v964_v25 = vadd.s32 544, %v8670_v1 }
  0xf2   : > { %2245 = vst.msk [vmem:[#allocation5 + $0xfc] sm:$0xf] %vm2181_vm0, %v7162_v20  ;;  %v7164_v26 = vpack.c.bf16 %v6650_v23, %v6650_v23  ;;  %v6651_v27 = vsel %vm1351_vm4, 1.0, %v8341_v13  ;;  %v965_v28 = vadd.s32 552, %v8670_v1  ;;  %v966_v29 = vadd.s32 560, %v8670_v1 }
  0xf3   : > { %2246 = vst.msk [vmem:[#allocation5 + $0x100] sm:$0xf] %vm2181_vm0, %v7163_v22  ;;  %v7165_v30 = vpack.c.bf16 %v6651_v27, %v6651_v27  ;;  %vm1094_vm9 = vcmp.ge.s32.totalorder %v963_v24, %v8672_v3  ;;  %vm1224_vm7 = vcmp.lt.s32.totalorder %v963_v24, %v8682_v11  ;;  %vm1095_vm5 = vcmp.ge.s32.totalorder %v964_v25, %v8672_v3 }
  0xf4   : > { %2247 = vst.msk [vmem:[#allocation5 + $0x104] sm:$0xf] %vm2181_vm0, %v7164_v26  ;;  %vm1352_vm10 = vmand %vm1094_vm9, %vm1224_vm7  ;;  %vm1225_vm1 = vcmp.lt.s32.totalorder %v964_v25, %v8682_v11  ;;  %vm1096_vm13 = vcmp.ge.s32.totalorder %v965_v28, %v8672_v3  ;;  %vm1226_vm11 = vcmp.lt.s32.totalorder %v965_v28, %v8682_v11  ;;  %vm1097_vm2 = vcmp.ge.s32.totalorder %v966_v29, %v8672_v3 }
  0xf5   : > { %2248 = vst.msk [vmem:[#allocation5 + $0x108] sm:$0xf] %vm2181_vm0, %v7165_v30  ;;  %v6652_v31 = vsel %vm1352_vm10, 1.0, %v8341_v13  ;;  %vm1353_vm6 = vmand %vm1095_vm5, %vm1225_vm1  ;;  %vm1227_vm14 = vcmp.lt.s32.totalorder %v966_v29, %v8682_v11  ;;  %v967_v32 = vadd.s32 568, %v8670_v1  ;;  %v968_v33 = vadd.s32 576, %v8670_v1 }
  0xf6   : > { %v7166_v34 = vpack.c.bf16 %v6652_v31, %v6652_v31  ;;  %v6653_v35 = vsel %vm1353_vm6, 1.0, %v8341_v13  ;;  %vm1354_vm15 = vmand %vm1096_vm13, %vm1226_vm11  ;;  %v969_v36 = vadd.s32 584, %v8670_v1  ;;  %v970_v37 = vadd.s32 592, %v8670_v1 }
  0xf7   : > { %v7167_v38 = vpack.c.bf16 %v6653_v35, %v6653_v35  ;;  %v6654_v39 = vsel %vm1354_vm15, 1.0, %v8341_v13  ;;  %vm1355_vm3 = vmand %vm1097_vm2, %vm1227_vm14  ;;  %vm1098_vm8 = vcmp.ge.s32.totalorder %v967_v32, %v8672_v3  ;;  %vm1228_vm12 = vcmp.lt.s32.totalorder %v967_v32, %v8682_v11 }
  0xf8   : > { %2249 = vst.msk [vmem:[#allocation5 + $0x10c] sm:$0xf] %vm2181_vm0, %v7166_v34  ;;  %v7168_v40 = vpack.c.bf16 %v6654_v39, %v6654_v39  ;;  %v6655_v41 = vsel %vm1355_vm3, 1.0, %v8341_v13  ;;  %vm1356_vm4 = vmand %vm1098_vm8, %vm1228_vm12  ;;  %vm1099_vm9 = vcmp.ge.s32.totalorder %v968_v33, %v8672_v3  ;;  %vm1229_vm7 = vcmp.lt.s32.totalorder %v968_v33, %v8682_v11 }
  0xf9   : > { %2250 = vst.msk [vmem:[#allocation5 + $0x110] sm:$0xf] %vm2181_vm0, %v7167_v38  ;;  %v7169_v42 = vpack.c.bf16 %v6655_v41, %v6655_v41  ;;  %v6656_v43 = vsel %vm1356_vm4, 1.0, %v8341_v13  ;;  %vm1357_vm5 = vmand %vm1099_vm9, %vm1229_vm7  ;;  %vm1100_vm10 = vcmp.ge.s32.totalorder %v969_v36, %v8672_v3  ;;  %vm1230_vm1 = vcmp.lt.s32.totalorder %v969_v36, %v8682_v11 }
  0xfa   : > { %2251 = vst.msk [vmem:[#allocation5 + $0x114] sm:$0xf] %vm2181_vm0, %v7168_v40  ;;  %v7170_v44 = vpack.c.bf16 %v6656_v43, %v6656_v43  ;;  %v6657_v45 = vsel %vm1357_vm5, 1.0, %v8341_v13  ;;  %vm1358_vm13 = vmand %vm1100_vm10, %vm1230_vm1  ;;  %vm1101_vm11 = vcmp.ge.s32.totalorder %v970_v37, %v8672_v3  ;;  %vm1231_vm2 = vcmp.lt.s32.totalorder %v970_v37, %v8682_v11 }
  0xfb   : > { %2252 = vst.msk [vmem:[#allocation5 + $0x118] sm:$0xf] %vm2181_vm0, %v7169_v42  ;;  %v7171_v46 = vpack.c.bf16 %v6657_v45, %v6657_v45  ;;  %v6658_v47 = vsel %vm1358_vm13, 1.0, %v8341_v13  ;;  %vm1359_vm6 = vmand %vm1101_vm11, %vm1231_vm2  ;;  %v971_v48 = vadd.s32 600, %v8670_v1  ;;  %v972_v49 = vadd.s32 608, %v8670_v1 }
  0xfc   : > { %2253 = vst.msk [vmem:[#allocation5 + $0x11c] sm:$0xf] %vm2181_vm0, %v7170_v44  ;;  %v7172_v50 = vpack.c.bf16 %v6658_v47, %v6658_v47  ;;  %v6659_v51 = vsel %vm1359_vm6, 1.0, %v8341_v13  ;;  %v973_v52 = vadd.s32 616, %v8670_v1  ;;  %v974_v53 = vadd.s32 624, %v8670_v1 }
  0xfd   : > { %2254 = vst.msk [vmem:[#allocation5 + $0x120] sm:$0xf] %vm2181_vm0, %v7171_v46  ;;  %v7173_v54 = vpack.c.bf16 %v6659_v51, %v6659_v51  ;;  %vm1102_vm14 = vcmp.ge.s32.totalorder %v971_v48, %v8672_v3  ;;  %vm1232_vm15 = vcmp.lt.s32.totalorder %v971_v48, %v8682_v11  ;;  %vm1103_vm3 = vcmp.ge.s32.totalorder %v972_v49, %v8672_v3 }
  0xfe   : > { %2255 = vst.msk [vmem:[#allocation5 + $0x124] sm:$0xf] %vm2181_vm0, %v7172_v50  ;;  %vm1360_vm8 = vmand %vm1102_vm14, %vm1232_vm15  ;;  %vm1233_vm12 = vcmp.lt.s32.totalorder %v972_v49, %v8682_v11  ;;  %vm1104_vm4 = vcmp.ge.s32.totalorder %v973_v52, %v8672_v3  ;;  %vm1234_vm9 = vcmp.lt.s32.totalorder %v973_v52, %v8682_v11  ;;  %vm1105_vm7 = vcmp.ge.s32.totalorder %v974_v53, %v8672_v3 }
  0xff   : > { %2256 = vst.msk [vmem:[#allocation5 + $0x128] sm:$0xf] %vm2181_vm0, %v7173_v54  ;;  %v6660_v55 = vsel %vm1360_vm8, 1.0, %v8341_v13  ;;  %vm1361_vm5 = vmand %vm1103_vm3, %vm1233_vm12  ;;  %vm1235_vm10 = vcmp.lt.s32.totalorder %v974_v53, %v8682_v11  ;;  %v975_v56 = vadd.s32 632, %v8670_v1  ;;  %v976_v57 = vadd.s32 640, %v8670_v1 }
 0x100   : > { %v7174_v58 = vpack.c.bf16 %v6660_v55, %v6660_v55  ;;  %v6661_v59 = vsel %vm1361_vm5, 1.0, %v8341_v13  ;;  %vm1362_vm1 = vmand %vm1104_vm4, %vm1234_vm9  ;;  %v977_v60 = vadd.s32 648, %v8670_v1  ;;  %v978_v61 = vadd.s32 656, %v8670_v1 }
 0x101   : > { %v7175_v62 = vpack.c.bf16 %v6661_v59, %v6661_v59  ;;  %v6662_v63 = vsel %vm1362_vm1, 1.0, %v8341_v13  ;;  %vm1363_vm13 = vmand %vm1105_vm7, %vm1235_vm10  ;;  %vm1106_vm11 = vcmp.ge.s32.totalorder %v975_v56, %v8672_v3  ;;  %vm1236_vm2 = vcmp.lt.s32.totalorder %v975_v56, %v8682_v11 }
 0x102   : > { %2257 = vst.msk [vmem:[#allocation5 + $0x12c] sm:$0xf] %vm2181_vm0, %v7174_v58  ;;  %v7176_v0 = vpack.c.bf16 %v6662_v63, %v6662_v63  ;;  %v6663_v2 = vsel %vm1363_vm13, 1.0, %v8341_v13  ;;  %vm1364_vm6 = vmand %vm1106_vm11, %vm1236_vm2  ;;  %vm1107_vm14 = vcmp.ge.s32.totalorder %v976_v57, %v8672_v3  ;;  %vm1237_vm15 = vcmp.lt.s32.totalorder %v976_v57, %v8682_v11 }
 0x103   : > { %2258 = vst.msk [vmem:[#allocation5 + $0x130] sm:$0xf] %vm2181_vm0, %v7175_v62  ;;  %v7177_v4 = vpack.c.bf16 %v6663_v2, %v6663_v2  ;;  %v6664_v5 = vsel %vm1364_vm6, 1.0, %v8341_v13  ;;  %vm1365_vm3 = vmand %vm1107_vm14, %vm1237_vm15  ;;  %vm1108_vm8 = vcmp.ge.s32.totalorder %v977_v60, %v8672_v3  ;;  %vm1238_vm12 = vcmp.lt.s32.totalorder %v977_v60, %v8682_v11 }
 0x104   : > { %2259 = vst.msk [vmem:[#allocation5 + $0x134] sm:$0xf] %vm2181_vm0, %v7176_v0  ;;  %v7178_v6 = vpack.c.bf16 %v6664_v5, %v6664_v5  ;;  %v6665_v7 = vsel %vm1365_vm3, 1.0, %v8341_v13  ;;  %vm1366_vm4 = vmand %vm1108_vm8, %vm1238_vm12  ;;  %vm1109_vm9 = vcmp.ge.s32.totalorder %v978_v61, %v8672_v3  ;;  %vm1239_vm7 = vcmp.lt.s32.totalorder %v978_v61, %v8682_v11 }
 0x105   : > { %2260 = vst.msk [vmem:[#allocation5 + $0x138] sm:$0xf] %vm2181_vm0, %v7177_v4  ;;  %v7179_v8 = vpack.c.bf16 %v6665_v7, %v6665_v7  ;;  %v6666_v9 = vsel %vm1366_vm4, 1.0, %v8341_v13  ;;  %vm1367_vm5 = vmand %vm1109_vm9, %vm1239_vm7  ;;  %v979_v10 = vadd.s32 664, %v8670_v1  ;;  %v980_v12 = vadd.s32 672, %v8670_v1 }
 0x106   : > { %2261 = vst.msk [vmem:[#allocation5 + $0x13c] sm:$0xf] %vm2181_vm0, %v7178_v6  ;;  %v7180_v14 = vpack.c.bf16 %v6666_v9, %v6666_v9  ;;  %v6667_v15 = vsel %vm1367_vm5, 1.0, %v8341_v13  ;;  %v981_v16 = vadd.s32 680, %v8670_v1  ;;  %v982_v17 = vadd.s32 688, %v8670_v1 }
 0x107   : > { %2262 = vst.msk [vmem:[#allocation5 + $0x140] sm:$0xf] %vm2181_vm0, %v7179_v8  ;;  %v7181_v18 = vpack.c.bf16 %v6667_v15, %v6667_v15  ;;  %vm1110_vm10 = vcmp.ge.s32.totalorder %v979_v10, %v8672_v3  ;;  %vm1240_vm1 = vcmp.lt.s32.totalorder %v979_v10, %v8682_v11  ;;  %vm1111_vm13 = vcmp.ge.s32.totalorder %v980_v12, %v8672_v3 }
 0x108   : > { %2263 = vst.msk [vmem:[#allocation5 + $0x144] sm:$0xf] %vm2181_vm0, %v7180_v14  ;;  %vm1368_vm11 = vmand %vm1110_vm10, %vm1240_vm1  ;;  %vm1241_vm2 = vcmp.lt.s32.totalorder %v980_v12, %v8682_v11  ;;  %vm1112_vm6 = vcmp.ge.s32.totalorder %v981_v16, %v8672_v3  ;;  %vm1242_vm14 = vcmp.lt.s32.totalorder %v981_v16, %v8682_v11  ;;  %vm1113_vm15 = vcmp.ge.s32.totalorder %v982_v17, %v8672_v3 }
 0x109   : > { %2264 = vst.msk [vmem:[#allocation5 + $0x148] sm:$0xf] %vm2181_vm0, %v7181_v18  ;;  %v6668_v19 = vsel %vm1368_vm11, 1.0, %v8341_v13  ;;  %vm1369_vm3 = vmand %vm1111_vm13, %vm1241_vm2  ;;  %vm1243_vm8 = vcmp.lt.s32.totalorder %v982_v17, %v8682_v11  ;;  %v983_v20 = vadd.s32 696, %v8670_v1  ;;  %v984_v21 = vadd.s32 704, %v8670_v1 }
 0x10a   : > { %v7182_v22 = vpack.c.bf16 %v6668_v19, %v6668_v19  ;;  %v6669_v23 = vsel %vm1369_vm3, 1.0, %v8341_v13  ;;  %vm1370_vm12 = vmand %vm1112_vm6, %vm1242_vm14  ;;  %v985_v24 = vadd.s32 712, %v8670_v1  ;;  %v986_v25 = vadd.s32 720, %v8670_v1 }
 0x10b   : > { %v7183_v26 = vpack.c.bf16 %v6669_v23, %v6669_v23  ;;  %v6670_v27 = vsel %vm1370_vm12, 1.0, %v8341_v13  ;;  %vm1371_vm4 = vmand %vm1113_vm15, %vm1243_vm8  ;;  %vm1114_vm9 = vcmp.ge.s32.totalorder %v983_v20, %v8672_v3  ;;  %vm1244_vm7 = vcmp.lt.s32.totalorder %v983_v20, %v8682_v11 }
 0x10c   : > { %2265 = vst.msk [vmem:[#allocation5 + $0x14c] sm:$0xf] %vm2181_vm0, %v7182_v22  ;;  %v7184_v28 = vpack.c.bf16 %v6670_v27, %v6670_v27  ;;  %v6671_v29 = vsel %vm1371_vm4, 1.0, %v8341_v13  ;;  %vm1372_vm5 = vmand %vm1114_vm9, %vm1244_vm7  ;;  %vm1115_vm10 = vcmp.ge.s32.totalorder %v984_v21, %v8672_v3  ;;  %vm1245_vm1 = vcmp.lt.s32.totalorder %v984_v21, %v8682_v11 }
 0x10d   : > { %2266 = vst.msk [vmem:[#allocation5 + $0x150] sm:$0xf] %vm2181_vm0, %v7183_v26  ;;  %v7185_v30 = vpack.c.bf16 %v6671_v29, %v6671_v29  ;;  %v6672_v31 = vsel %vm1372_vm5, 1.0, %v8341_v13  ;;  %vm1373_vm13 = vmand %vm1115_vm10, %vm1245_vm1  ;;  %vm1116_vm11 = vcmp.ge.s32.totalorder %v985_v24, %v8672_v3  ;;  %vm1246_vm2 = vcmp.lt.s32.totalorder %v985_v24, %v8682_v11 }
 0x10e   : > { %2267 = vst.msk [vmem:[#allocation5 + $0x154] sm:$0xf] %vm2181_vm0, %v7184_v28  ;;  %v7186_v32 = vpack.c.bf16 %v6672_v31, %v6672_v31  ;;  %v6673_v33 = vsel %vm1373_vm13, 1.0, %v8341_v13  ;;  %vm1374_vm6 = vmand %vm1116_vm11, %vm1246_vm2  ;;  %vm1117_vm14 = vcmp.ge.s32.totalorder %v986_v25, %v8672_v3  ;;  %vm1247_vm15 = vcmp.lt.s32.totalorder %v986_v25, %v8682_v11 }
 0x10f   : > { %2268 = vst.msk [vmem:[#allocation5 + $0x158] sm:$0xf] %vm2181_vm0, %v7185_v30  ;;  %v7187_v34 = vpack.c.bf16 %v6673_v33, %v6673_v33  ;;  %v6674_v35 = vsel %vm1374_vm6, 1.0, %v8341_v13  ;;  %vm1375_vm3 = vmand %vm1117_vm14, %vm1247_vm15  ;;  %v987_v36 = vadd.s32 728, %v8670_v1  ;;  %v988_v37 = vadd.s32 736, %v8670_v1 }
 0x110   : > { %2269 = vst.msk [vmem:[#allocation5 + $0x15c] sm:$0xf] %vm2181_vm0, %v7186_v32  ;;  %v7188_v38 = vpack.c.bf16 %v6674_v35, %v6674_v35  ;;  %v6675_v39 = vsel %vm1375_vm3, 1.0, %v8341_v13  ;;  %v989_v40 = vadd.s32 744, %v8670_v1  ;;  %v990_v41 = vadd.s32 752, %v8670_v1 }
 0x111   : > { %2270 = vst.msk [vmem:[#allocation5 + $0x160] sm:$0xf] %vm2181_vm0, %v7187_v34  ;;  %v7189_v42 = vpack.c.bf16 %v6675_v39, %v6675_v39  ;;  %vm1118_vm8 = vcmp.ge.s32.totalorder %v987_v36, %v8672_v3  ;;  %vm1248_vm12 = vcmp.lt.s32.totalorder %v987_v36, %v8682_v11  ;;  %vm1119_vm4 = vcmp.ge.s32.totalorder %v988_v37, %v8672_v3 }
 0x112   : > { %2271 = vst.msk [vmem:[#allocation5 + $0x164] sm:$0xf] %vm2181_vm0, %v7188_v38  ;;  %vm1376_vm9 = vmand %vm1118_vm8, %vm1248_vm12  ;;  %vm1249_vm7 = vcmp.lt.s32.totalorder %v988_v37, %v8682_v11  ;;  %vm1120_vm5 = vcmp.ge.s32.totalorder %v989_v40, %v8672_v3  ;;  %vm1250_vm10 = vcmp.lt.s32.totalorder %v989_v40, %v8682_v11  ;;  %vm1121_vm1 = vcmp.ge.s32.totalorder %v990_v41, %v8672_v3 }
 0x113   : > { %2272 = vst.msk [vmem:[#allocation5 + $0x168] sm:$0xf] %vm2181_vm0, %v7189_v42  ;;  %v6676_v43 = vsel %vm1376_vm9, 1.0, %v8341_v13  ;;  %vm1377_vm13 = vmand %vm1119_vm4, %vm1249_vm7  ;;  %vm1251_vm11 = vcmp.lt.s32.totalorder %v990_v41, %v8682_v11  ;;  %v991_v44 = vadd.s32 760, %v8670_v1  ;;  %v992_v45 = vadd.s32 768, %v8670_v1 }
 0x114   : > { %v7190_v46 = vpack.c.bf16 %v6676_v43, %v6676_v43  ;;  %v6677_v47 = vsel %vm1377_vm13, 1.0, %v8341_v13  ;;  %vm1378_vm2 = vmand %vm1120_vm5, %vm1250_vm10  ;;  %v993_v48 = vadd.s32 776, %v8670_v1  ;;  %v994_v49 = vadd.s32 784, %v8670_v1 }
 0x115   : > { %v7191_v50 = vpack.c.bf16 %v6677_v47, %v6677_v47  ;;  %v6678_v51 = vsel %vm1378_vm2, 1.0, %v8341_v13  ;;  %vm1379_vm6 = vmand %vm1121_vm1, %vm1251_vm11  ;;  %vm1122_vm14 = vcmp.ge.s32.totalorder %v991_v44, %v8672_v3  ;;  %vm1252_vm15 = vcmp.lt.s32.totalorder %v991_v44, %v8682_v11 }
 0x116   : > { %2273 = vst.msk [vmem:[#allocation5 + $0x16c] sm:$0xf] %vm2181_vm0, %v7190_v46  ;;  %v7192_v52 = vpack.c.bf16 %v6678_v51, %v6678_v51  ;;  %v6679_v53 = vsel %vm1379_vm6, 1.0, %v8341_v13  ;;  %vm1380_vm3 = vmand %vm1122_vm14, %vm1252_vm15  ;;  %vm1123_vm8 = vcmp.ge.s32.totalorder %v992_v45, %v8672_v3  ;;  %vm1253_vm12 = vcmp.lt.s32.totalorder %v992_v45, %v8682_v11 }
 0x117   : > { %2274 = vst.msk [vmem:[#allocation5 + $0x170] sm:$0xf] %vm2181_vm0, %v7191_v50  ;;  %v7193_v54 = vpack.c.bf16 %v6679_v53, %v6679_v53  ;;  %v6680_v55 = vsel %vm1380_vm3, 1.0, %v8341_v13  ;;  %vm1381_vm4 = vmand %vm1123_vm8, %vm1253_vm12  ;;  %vm1124_vm9 = vcmp.ge.s32.totalorder %v993_v48, %v8672_v3  ;;  %vm1254_vm7 = vcmp.lt.s32.totalorder %v993_v48, %v8682_v11 }
 0x118   : > { %2275 = vst.msk [vmem:[#allocation5 + $0x174] sm:$0xf] %vm2181_vm0, %v7192_v52  ;;  %v7194_v56 = vpack.c.bf16 %v6680_v55, %v6680_v55  ;;  %v6681_v57 = vsel %vm1381_vm4, 1.0, %v8341_v13  ;;  %vm1382_vm5 = vmand %vm1124_vm9, %vm1254_vm7  ;;  %vm1125_vm10 = vcmp.ge.s32.totalorder %v994_v49, %v8672_v3  ;;  %vm1255_vm1 = vcmp.lt.s32.totalorder %v994_v49, %v8682_v11 }
 0x119   : > { %2276 = vst.msk [vmem:[#allocation5 + $0x178] sm:$0xf] %vm2181_vm0, %v7193_v54  ;;  %v7195_v58 = vpack.c.bf16 %v6681_v57, %v6681_v57  ;;  %v6682_v59 = vsel %vm1382_vm5, 1.0, %v8341_v13  ;;  %vm1383_vm13 = vmand %vm1125_vm10, %vm1255_vm1  ;;  %v995_v60 = vadd.s32 792, %v8670_v1  ;;  %v996_v61 = vadd.s32 800, %v8670_v1 }
 0x11a   : > { %2277 = vst.msk [vmem:[#allocation5 + $0x17c] sm:$0xf] %vm2181_vm0, %v7194_v56  ;;  %v7196_v62 = vpack.c.bf16 %v6682_v59, %v6682_v59  ;;  %v6683_v63 = vsel %vm1383_vm13, 1.0, %v8341_v13  ;;  %v997_v0 = vadd.s32 808, %v8670_v1  ;;  %v998_v2 = vadd.s32 816, %v8670_v1 }
 0x11b   : > { %2278 = vst.msk [vmem:[#allocation5 + $0x180] sm:$0xf] %vm2181_vm0, %v7195_v58  ;;  %v7197_v4 = vpack.c.bf16 %v6683_v63, %v6683_v63  ;;  %vm1126_vm11 = vcmp.ge.s32.totalorder %v995_v60, %v8672_v3  ;;  %vm1256_vm2 = vcmp.lt.s32.totalorder %v995_v60, %v8682_v11  ;;  %vm1127_vm6 = vcmp.ge.s32.totalorder %v996_v61, %v8672_v3 }
 0x11c   : > { %2279 = vst.msk [vmem:[#allocation5 + $0x184] sm:$0xf] %vm2181_vm0, %v7196_v62  ;;  %vm1384_vm14 = vmand %vm1126_vm11, %vm1256_vm2  ;;  %vm1257_vm15 = vcmp.lt.s32.totalorder %v996_v61, %v8682_v11  ;;  %vm1128_vm3 = vcmp.ge.s32.totalorder %v997_v0, %v8672_v3  ;;  %vm1258_vm8 = vcmp.lt.s32.totalorder %v997_v0, %v8682_v11  ;;  %vm1129_vm12 = vcmp.ge.s32.totalorder %v998_v2, %v8672_v3 }
 0x11d   : > { %2280 = vst.msk [vmem:[#allocation5 + $0x188] sm:$0xf] %vm2181_vm0, %v7197_v4  ;;  %v6684_v5 = vsel %vm1384_vm14, 1.0, %v8341_v13  ;;  %vm1385_vm4 = vmand %vm1127_vm6, %vm1257_vm15  ;;  %vm1259_vm9 = vcmp.lt.s32.totalorder %v998_v2, %v8682_v11  ;;  %v999_v6 = vadd.s32 824, %v8670_v1  ;;  %v1000_v7 = vadd.s32 832, %v8670_v1 }
 0x11e   : > { %v7198_v8 = vpack.c.bf16 %v6684_v5, %v6684_v5  ;;  %v6685_v9 = vsel %vm1385_vm4, 1.0, %v8341_v13  ;;  %vm1386_vm7 = vmand %vm1128_vm3, %vm1258_vm8  ;;  %v1001_v10 = vadd.s32 840, %v8670_v1  ;;  %v1002_v12 = vadd.s32 848, %v8670_v1 }
 0x11f   : > { %v7199_v14 = vpack.c.bf16 %v6685_v9, %v6685_v9  ;;  %v6686_v15 = vsel %vm1386_vm7, 1.0, %v8341_v13  ;;  %vm1387_vm5 = vmand %vm1129_vm12, %vm1259_vm9  ;;  %vm1130_vm10 = vcmp.ge.s32.totalorder %v999_v6, %v8672_v3  ;;  %vm1260_vm1 = vcmp.lt.s32.totalorder %v999_v6, %v8682_v11 }
 0x120   : > { %2281 = vst.msk [vmem:[#allocation5 + $0x18c] sm:$0xf] %vm2181_vm0, %v7198_v8  ;;  %v7200_v16 = vpack.c.bf16 %v6686_v15, %v6686_v15  ;;  %v6687_v17 = vsel %vm1387_vm5, 1.0, %v8341_v13  ;;  %vm1388_vm13 = vmand %vm1130_vm10, %vm1260_vm1  ;;  %vm1131_vm11 = vcmp.ge.s32.totalorder %v1000_v7, %v8672_v3  ;;  %vm1261_vm2 = vcmp.lt.s32.totalorder %v1000_v7, %v8682_v11 }
 0x121   : > { %2282 = vst.msk [vmem:[#allocation5 + $0x190] sm:$0xf] %vm2181_vm0, %v7199_v14  ;;  %v7201_v18 = vpack.c.bf16 %v6687_v17, %v6687_v17  ;;  %v6688_v19 = vsel %vm1388_vm13, 1.0, %v8341_v13  ;;  %vm1389_vm6 = vmand %vm1131_vm11, %vm1261_vm2  ;;  %vm1132_vm14 = vcmp.ge.s32.totalorder %v1001_v10, %v8672_v3  ;;  %vm1262_vm15 = vcmp.lt.s32.totalorder %v1001_v10, %v8682_v11 }
 0x122   : > { %2283 = vst.msk [vmem:[#allocation5 + $0x194] sm:$0xf] %vm2181_vm0, %v7200_v16  ;;  %v7202_v20 = vpack.c.bf16 %v6688_v19, %v6688_v19  ;;  %v6689_v21 = vsel %vm1389_vm6, 1.0, %v8341_v13  ;;  %vm1390_vm3 = vmand %vm1132_vm14, %vm1262_vm15  ;;  %vm1133_vm8 = vcmp.ge.s32.totalorder %v1002_v12, %v8672_v3  ;;  %vm1263_vm12 = vcmp.lt.s32.totalorder %v1002_v12, %v8682_v11 }
 0x123   : > { %2284 = vst.msk [vmem:[#allocation5 + $0x198] sm:$0xf] %vm2181_vm0, %v7201_v18  ;;  %v7203_v22 = vpack.c.bf16 %v6689_v21, %v6689_v21  ;;  %v6690_v23 = vsel %vm1390_vm3, 1.0, %v8341_v13  ;;  %vm1391_vm4 = vmand %vm1133_vm8, %vm1263_vm12  ;;  %v1003_v24 = vadd.s32 856, %v8670_v1  ;;  %v1004_v25 = vadd.s32 864, %v8670_v1 }
 0x124   : > { %2285 = vst.msk [vmem:[#allocation5 + $0x19c] sm:$0xf] %vm2181_vm0, %v7202_v20  ;;  %v7204_v26 = vpack.c.bf16 %v6690_v23, %v6690_v23  ;;  %v6691_v27 = vsel %vm1391_vm4, 1.0, %v8341_v13  ;;  %v1005_v28 = vadd.s32 872, %v8670_v1  ;;  %v1006_v29 = vadd.s32 880, %v8670_v1 }
 0x125   : > { %2286 = vst.msk [vmem:[#allocation5 + $0x1a0] sm:$0xf] %vm2181_vm0, %v7203_v22  ;;  %v7205_v30 = vpack.c.bf16 %v6691_v27, %v6691_v27  ;;  %vm1134_vm9 = vcmp.ge.s32.totalorder %v1003_v24, %v8672_v3  ;;  %vm1264_vm7 = vcmp.lt.s32.totalorder %v1003_v24, %v8682_v11  ;;  %vm1135_vm5 = vcmp.ge.s32.totalorder %v1004_v25, %v8672_v3 }
 0x126   : > { %2287 = vst.msk [vmem:[#allocation5 + $0x1a4] sm:$0xf] %vm2181_vm0, %v7204_v26  ;;  %vm1392_vm10 = vmand %vm1134_vm9, %vm1264_vm7  ;;  %vm1265_vm1 = vcmp.lt.s32.totalorder %v1004_v25, %v8682_v11  ;;  %vm1136_vm13 = vcmp.ge.s32.totalorder %v1005_v28, %v8672_v3  ;;  %vm1266_vm11 = vcmp.lt.s32.totalorder %v1005_v28, %v8682_v11  ;;  %vm1137_vm2 = vcmp.ge.s32.totalorder %v1006_v29, %v8672_v3 }
 0x127   : > { %2288 = vst.msk [vmem:[#allocation5 + $0x1a8] sm:$0xf] %vm2181_vm0, %v7205_v30  ;;  %v6692_v31 = vsel %vm1392_vm10, 1.0, %v8341_v13  ;;  %vm1393_vm6 = vmand %vm1135_vm5, %vm1265_vm1  ;;  %vm1267_vm14 = vcmp.lt.s32.totalorder %v1006_v29, %v8682_v11  ;;  %v1007_v32 = vadd.s32 888, %v8670_v1  ;;  %v1008_v33 = vadd.s32 896, %v8670_v1 }
 0x128   : > { %v7206_v34 = vpack.c.bf16 %v6692_v31, %v6692_v31  ;;  %v6693_v35 = vsel %vm1393_vm6, 1.0, %v8341_v13  ;;  %vm1394_vm15 = vmand %vm1136_vm13, %vm1266_vm11  ;;  %v1009_v36 = vadd.s32 904, %v8670_v1  ;;  %v1010_v37 = vadd.s32 912, %v8670_v1 }
 0x129   : > { %v7207_v38 = vpack.c.bf16 %v6693_v35, %v6693_v35  ;;  %v6694_v39 = vsel %vm1394_vm15, 1.0, %v8341_v13  ;;  %vm1395_vm3 = vmand %vm1137_vm2, %vm1267_vm14  ;;  %vm1138_vm8 = vcmp.ge.s32.totalorder %v1007_v32, %v8672_v3  ;;  %vm1268_vm12 = vcmp.lt.s32.totalorder %v1007_v32, %v8682_v11 }
 0x12a   : > { %2289 = vst.msk [vmem:[#allocation5 + $0x1ac] sm:$0xf] %vm2181_vm0, %v7206_v34  ;;  %v7208_v40 = vpack.c.bf16 %v6694_v39, %v6694_v39  ;;  %v6695_v41 = vsel %vm1395_vm3, 1.0, %v8341_v13  ;;  %vm1396_vm4 = vmand %vm1138_vm8, %vm1268_vm12  ;;  %vm1139_vm9 = vcmp.ge.s32.totalorder %v1008_v33, %v8672_v3  ;;  %vm1269_vm7 = vcmp.lt.s32.totalorder %v1008_v33, %v8682_v11 }
 0x12b   : > { %2290 = vst.msk [vmem:[#allocation5 + $0x1b0] sm:$0xf] %vm2181_vm0, %v7207_v38  ;;  %v7209_v42 = vpack.c.bf16 %v6695_v41, %v6695_v41  ;;  %v6696_v43 = vsel %vm1396_vm4, 1.0, %v8341_v13  ;;  %vm1397_vm5 = vmand %vm1139_vm9, %vm1269_vm7  ;;  %vm1140_vm10 = vcmp.ge.s32.totalorder %v1009_v36, %v8672_v3  ;;  %vm1270_vm1 = vcmp.lt.s32.totalorder %v1009_v36, %v8682_v11 }
 0x12c   : > { %2291 = vst.msk [vmem:[#allocation5 + $0x1b4] sm:$0xf] %vm2181_vm0, %v7208_v40  ;;  %v7210_v44 = vpack.c.bf16 %v6696_v43, %v6696_v43  ;;  %v6697_v45 = vsel %vm1397_vm5, 1.0, %v8341_v13  ;;  %vm1398_vm13 = vmand %vm1140_vm10, %vm1270_vm1  ;;  %vm1141_vm11 = vcmp.ge.s32.totalorder %v1010_v37, %v8672_v3  ;;  %vm1271_vm2 = vcmp.lt.s32.totalorder %v1010_v37, %v8682_v11 }
 0x12d   : > { %2292 = vst.msk [vmem:[#allocation5 + $0x1b8] sm:$0xf] %vm2181_vm0, %v7209_v42  ;;  %v7211_v46 = vpack.c.bf16 %v6697_v45, %v6697_v45  ;;  %v6698_v47 = vsel %vm1398_vm13, 1.0, %v8341_v13  ;;  %vm1399_vm6 = vmand %vm1141_vm11, %vm1271_vm2  ;;  %v1011_v48 = vadd.s32 920, %v8670_v1  ;;  %v1012_v49 = vadd.s32 928, %v8670_v1 }
 0x12e   : > { %2293 = vst.msk [vmem:[#allocation5 + $0x1bc] sm:$0xf] %vm2181_vm0, %v7210_v44  ;;  %v7212_v50 = vpack.c.bf16 %v6698_v47, %v6698_v47  ;;  %v6699_v51 = vsel %vm1399_vm6, 1.0, %v8341_v13  ;;  %v1013_v52 = vadd.s32 936, %v8670_v1  ;;  %v1014_v53 = vadd.s32 944, %v8670_v1 }
 0x12f   : > { %2294 = vst.msk [vmem:[#allocation5 + $0x1c0] sm:$0xf] %vm2181_vm0, %v7211_v46  ;;  %v7213_v54 = vpack.c.bf16 %v6699_v51, %v6699_v51  ;;  %vm1142_vm14 = vcmp.ge.s32.totalorder %v1011_v48, %v8672_v3  ;;  %vm1272_vm15 = vcmp.lt.s32.totalorder %v1011_v48, %v8682_v11  ;;  %vm1143_vm3 = vcmp.ge.s32.totalorder %v1012_v49, %v8672_v3 }
 0x130   : > { %2295 = vst.msk [vmem:[#allocation5 + $0x1c4] sm:$0xf] %vm2181_vm0, %v7212_v50  ;;  %vm1400_vm8 = vmand %vm1142_vm14, %vm1272_vm15  ;;  %vm1273_vm12 = vcmp.lt.s32.totalorder %v1012_v49, %v8682_v11  ;;  %vm1144_vm4 = vcmp.ge.s32.totalorder %v1013_v52, %v8672_v3  ;;  %vm1274_vm9 = vcmp.lt.s32.totalorder %v1013_v52, %v8682_v11  ;;  %vm1145_vm7 = vcmp.ge.s32.totalorder %v1014_v53, %v8672_v3 }
 0x131   : > { %2296 = vst.msk [vmem:[#allocation5 + $0x1c8] sm:$0xf] %vm2181_vm0, %v7213_v54  ;;  %v6700_v55 = vsel %vm1400_vm8, 1.0, %v8341_v13  ;;  %vm1401_vm5 = vmand %vm1143_vm3, %vm1273_vm12  ;;  %vm1275_vm10 = vcmp.lt.s32.totalorder %v1014_v53, %v8682_v11  ;;  %v1015_v56 = vadd.s32 952, %v8670_v1  ;;  %v1016_v57 = vadd.s32 960, %v8670_v1 }
 0x132   : > { %v7214_v58 = vpack.c.bf16 %v6700_v55, %v6700_v55  ;;  %v6701_v59 = vsel %vm1401_vm5, 1.0, %v8341_v13  ;;  %vm1402_vm1 = vmand %vm1144_vm4, %vm1274_vm9  ;;  %v1017_v60 = vadd.s32 968, %v8670_v1  ;;  %v1018_v61 = vadd.s32 976, %v8670_v1 }
 0x133   : > { %v7215_v62 = vpack.c.bf16 %v6701_v59, %v6701_v59  ;;  %v6702_v63 = vsel %vm1402_vm1, 1.0, %v8341_v13  ;;  %vm1403_vm13 = vmand %vm1145_vm7, %vm1275_vm10  ;;  %vm1146_vm11 = vcmp.ge.s32.totalorder %v1015_v56, %v8672_v3  ;;  %vm1276_vm2 = vcmp.lt.s32.totalorder %v1015_v56, %v8682_v11 }
 0x134   : > { %2297 = vst.msk [vmem:[#allocation5 + $0x1cc] sm:$0xf] %vm2181_vm0, %v7214_v58  ;;  %v7216_v0 = vpack.c.bf16 %v6702_v63, %v6702_v63  ;;  %v6703_v2 = vsel %vm1403_vm13, 1.0, %v8341_v13  ;;  %vm1404_vm6 = vmand %vm1146_vm11, %vm1276_vm2  ;;  %vm1147_vm14 = vcmp.ge.s32.totalorder %v1016_v57, %v8672_v3  ;;  %vm1277_vm15 = vcmp.lt.s32.totalorder %v1016_v57, %v8682_v11 }
 0x135   : > { %2298 = vst.msk [vmem:[#allocation5 + $0x1d0] sm:$0xf] %vm2181_vm0, %v7215_v62  ;;  %v7217_v4 = vpack.c.bf16 %v6703_v2, %v6703_v2  ;;  %v6704_v5 = vsel %vm1404_vm6, 1.0, %v8341_v13  ;;  %vm1405_vm3 = vmand %vm1147_vm14, %vm1277_vm15  ;;  %vm1148_vm8 = vcmp.ge.s32.totalorder %v1017_v60, %v8672_v3  ;;  %vm1278_vm12 = vcmp.lt.s32.totalorder %v1017_v60, %v8682_v11 }
 0x136   : > { %2299 = vst.msk [vmem:[#allocation5 + $0x1d4] sm:$0xf] %vm2181_vm0, %v7216_v0  ;;  %v7218_v6 = vpack.c.bf16 %v6704_v5, %v6704_v5  ;;  %v6705_v7 = vsel %vm1405_vm3, 1.0, %v8341_v13  ;;  %vm1406_vm4 = vmand %vm1148_vm8, %vm1278_vm12  ;;  %vm1149_vm9 = vcmp.ge.s32.totalorder %v1018_v61, %v8672_v3  ;;  %vm1279_vm7 = vcmp.lt.s32.totalorder %v1018_v61, %v8682_v11 }
 0x137   : > { %2300 = vst.msk [vmem:[#allocation5 + $0x1d8] sm:$0xf] %vm2181_vm0, %v7217_v4  ;;  %v7219_v8 = vpack.c.bf16 %v6705_v7, %v6705_v7  ;;  %v6706_v9 = vsel %vm1406_vm4, 1.0, %v8341_v13  ;;  %vm1407_vm5 = vmand %vm1149_vm9, %vm1279_vm7  ;;  %v1019_v10 = vadd.s32 984, %v8670_v1  ;;  %v1020_v12 = vadd.s32 992, %v8670_v1 }
 0x138   : > { %2301 = vst.msk [vmem:[#allocation5 + $0x1dc] sm:$0xf] %vm2181_vm0, %v7218_v6  ;;  %v7220_v14 = vpack.c.bf16 %v6706_v9, %v6706_v9  ;;  %v6707_v15 = vsel %vm1407_vm5, 1.0, %v8341_v13  ;;  %v1021_v16 = vadd.s32 1000, %v8670_v1  ;;  %v1022_v17 = vadd.s32 1008, %v8670_v1 }
 0x139   : > { %2302 = vst.msk [vmem:[#allocation5 + $0x1e0] sm:$0xf] %vm2181_vm0, %v7219_v8  ;;  %v7221_v18 = vpack.c.bf16 %v6707_v15, %v6707_v15  ;;  %vm1150_vm10 = vcmp.ge.s32.totalorder %v1019_v10, %v8672_v3  ;;  %vm1280_vm1 = vcmp.lt.s32.totalorder %v1019_v10, %v8682_v11  ;;  %vm1151_vm13 = vcmp.ge.s32.totalorder %v1020_v12, %v8672_v3 }
 0x13a   : > { %2303 = vst.msk [vmem:[#allocation5 + $0x1e4] sm:$0xf] %vm2181_vm0, %v7220_v14  ;;  %vm1408_vm11 = vmand %vm1150_vm10, %vm1280_vm1  ;;  %vm1281_vm2 = vcmp.lt.s32.totalorder %v1020_v12, %v8682_v11  ;;  %vm1152_vm6 = vcmp.ge.s32.totalorder %v1021_v16, %v8672_v3  ;;  %vm1282_vm14 = vcmp.lt.s32.totalorder %v1021_v16, %v8682_v11  ;;  %vm1153_vm15 = vcmp.ge.s32.totalorder %v1022_v17, %v8672_v3 }
 0x13b   : > { %2304 = vst.msk [vmem:[#allocation5 + $0x1e8] sm:$0xf] %vm2181_vm0, %v7221_v18  ;;  %v6708_v19 = vsel %vm1408_vm11, 1.0, %v8341_v13  ;;  %vm1409_vm3 = vmand %vm1151_vm13, %vm1281_vm2  ;;  %vm1283_vm8 = vcmp.lt.s32.totalorder %v1022_v17, %v8682_v11  ;;  %v1023_v20 = vadd.s32 1016, %v8670_v1 }
 0x13c   : > { %v7222_v21 = vpack.c.bf16 %v6708_v19, %v6708_v19  ;;  %v6709_v22 = vsel %vm1409_vm3, 1.0, %v8341_v13  ;;  %vm1410_vm12 = vmand %vm1152_vm6, %vm1282_vm14 }
 0x13d   : > { %v7223_v23 = vpack.c.bf16 %v6709_v22, %v6709_v22  ;;  %v6710_v24 = vsel %vm1410_vm12, 1.0, %v8341_v13  ;;  %vm1411_vm4 = vmand %vm1153_vm15, %vm1283_vm8  ;;  %vm1154_vm9 = vcmp.ge.s32.totalorder %v1023_v20, %v8672_v3  ;;  %vm1284_vm7 = vcmp.lt.s32.totalorder %v1023_v20, %v8682_v11 }
 0x13e   : > { %2305 = vst.msk [vmem:[#allocation5 + $0x1ec] sm:$0xf] %vm2181_vm0, %v7222_v21  ;;  %v7224_v25 = vpack.c.bf16 %v6710_v24, %v6710_v24  ;;  %v6711_v26 = vsel %vm1411_vm4, 1.0, %v8341_v13  ;;  %vm1412_vm5 = vmand %vm1154_vm9, %vm1284_vm7 }
 0x13f   : > { %2306 = vst.msk [vmem:[#allocation5 + $0x1f0] sm:$0xf] %vm2181_vm0, %v7223_v23  ;;  %v7225_v1 = vpack.c.bf16 %v6711_v26, %v6711_v26  ;;  %v6712_v27 = vsel %vm1412_vm5, 1.0, %v8341_v13 }
 0x140   : > { %2307 = vst.msk [vmem:[#allocation5 + $0x1f4] sm:$0xf] %vm2181_vm0, %v7224_v25  ;;  %v7226_v28 = vpack.c.bf16 %v6712_v27, %v6712_v27 }
 0x141   : > { %2308 = vst.msk [vmem:[#allocation5 + $0x1f8] sm:$0xf] %vm2181_vm0, %v7225_v1 }
 0x142   : > { %2309 = vst.msk [vmem:[#allocation5 + $0x1fc] sm:$0xf] %vm2181_vm0, %v7226_v28 }
 0x143 PF: > { %p6841_p1 = scmp.ne.s32.totalorder %s8322_s21, 0 }
 0x144   : > { %s12164_s29 = sld [smem:[#allocation206_spill]] (!%p6841_p1) }
 0x145   : > { %2315 = sbr.rel (%p6841_p1) target bundleno = 332 (0x14c), region = 136 }
 0x14a   : > { %v2316_v3 = vld [vmem:[%s12164_s29] sm:$0xff]  ;;  %vm2318_vm10 = vcmask 261120   ;;  %v2317_v11 = vld [vmem:[%s12164_s29 + $0x8] sm:$0xff] }
 0x14b   : > { %2319 = vst.msk [vmem:[#allocation2] sm:$0xff] %vm2318_vm10, %v2316_v3  ;;  %2320 = vst.msk [vmem:[#allocation2 + $0x8] sm:$0xff] %vm2318_vm10, %v2317_v11 }
 0x14c PF: > { %vm2323_vm0 = vcmask 261120   ;;  %v7982_v30 = vld [vmem:[%s8658_s20 + $0x8] sm:$0xff]   ;;  %v7983_v32 = vld [vmem:[%s8658_s20] sm:$0xff]   ;;  %s12165_s24 = sld [smem:[#allocation207_spill]]  ;;  %v12031_v4 = vmov 0   ;;  %v9516_v3 = vld [vmem:[%s8663_s5 + $0x50] sm:$0xff] }
 0x14d   : > { %7765 = vmatprep.subr.bf16.mxu0 %v7982_v30  ;;  %v2844_v50 = vld [vmem:[%s8663_s5 + $0x40] sm:$0xff]  ;;  %v2845_v52 = vld [vmem:[%s8663_s5 + $0x48] sm:$0xff]  ;;  %3054 = vmatprep.mubr.bf16.mxu1 %v12031_v4  ;;  %s12166_s7 = sld [smem:[#allocation203_spill]]  ;;  %v9519_v11 = vld [vmem:[%s8663_s5 + $0x70] sm:$0xff]  ;;  %p7083_p4 = scmp.ne.s32.totalorder %s8322_s21, 2 }
 0x14e   : > { %7766 = vmatpush3.bf16.msra.mxu0 %v7982_v30  ;;  %v2848_v51 = vld [vmem:[%s8663_s5 + $0x60] sm:$0xff]  ;;  %v2849_v54 = vld [vmem:[%s8663_s5 + $0x68] sm:$0xff]  ;;  %7981 = vset.pattern.permute.xlu1 %v12031_v4  ;;  %v6892_v30 = vcombine.high %v9516_v3, %v9519_v11  ;;  %s12703_s17 = sld [smem:[#allocation205_spill]] (!%p7083_p4) }
 0x14f   : > { %7767 = vmatprep.subr.bf16.mxu0 %v7983_v32  ;;  %v6888_v53 = vcombine.high %v2844_v50, %v2848_v51  ;;  %v6889_v55 = vcombine.low %v2845_v52, %v2849_v54  ;;  %v6890_v56 = vcombine.high %v2845_v52, %v2849_v54  ;;  %v6887_v57 = vcombine.low %v2844_v50, %v2848_v51  ;;  %v2836_v58 = vld [vmem:[%s8663_s5] sm:$0xff]  ;;  %v2837_v60 = vld [vmem:[%s8663_s5 + $0x8] sm:$0xff]  ;;  %s12704_s11 = sld [smem:[#allocation214_spill]] (!%p7083_p4) }
 0x150   : > { %v2840_v59 = vld [vmem:[%s8663_s5 + $0x20] sm:$0xff]  ;;  %v2841_v62 = vld [vmem:[%s8663_s5 + $0x28] sm:$0xff]  ;;  %7980 = vset.pattern.permute.xlu0 %v12031_v4  ;;  %s12706_s19 = sld [smem:[#allocation215_spill]] (!%p7083_p4) }
 0x151   : > { %3034 = vmatprep.subr.bf16.mxu1 %v6888_v53  ;;  %v6880_v61 = vcombine.high %v2836_v58, %v2840_v59  ;;  %v6881_v63 = vcombine.low %v2837_v60, %v2841_v62  ;;  %v6882_v0 = vcombine.high %v2837_v60, %v2841_v62  ;;  %v6879_v2 = vcombine.low %v2836_v58, %v2840_v59  ;;  %v2842_v58 = vld [vmem:[%s8663_s5 + $0x30] sm:$0xff]  ;;  %v2839_v62 = vld [vmem:[%s8663_s5 + $0x18] sm:$0xff]  ;;  %s12707_s16 = sld [smem:[#allocation216_spill]] (!%p7083_p4) }
 0x152   : > { %v9378_v13 = vld [vmem:[#allocation2] sm:$0xff]  ;;  %v9383_v31 = vld [vmem:[#allocation2 + $0x8] sm:$0xff]  ;;  %7768 = vmatpush3.bf16.msra.mxu0 %v7983_v32  ;;  %v7986_v36 = vld [vmem:[%s12165_s24 + $0x10] sm:$0xff]   ;;  %3035 = vmatpush1.bf16.msra.mxu1 %v6887_v57 }
 0x153   : > { %v2324_v29 = vsel %vm2323_vm0, %v9378_v13, 0.0  ;;  %v2327_v33 = vsel %vm2323_vm0, %v9383_v31, 0.0  ;;  %v7984_v34 = vld [vmem:[%s12165_s24] sm:$0xff]   ;;  %v7985_v35 = vld [vmem:[%s12165_s24 + $0x8] sm:$0xff]   ;;  %v7987_v37 = vld [vmem:[%s12165_s24 + $0x18] sm:$0xff]   ;;  %3227 = vmatprep.subr.bf16.mxu0 %v6890_v56  ;;  %3036 = vmatprep.subr.bf16.mxu1 %v6880_v61 }
 0x154   : > { %2325 = vadd.xlane.f32.xlu0 %v2324_v29  ;;  %7769 = vmatprep.mubr.msk.bf16.mxu0 %vm2323_vm0, %v7984_v34  ;;  %v7988_v38 = vld [vmem:[%s12165_s24 + $0x20] sm:$0xff]   ;;  %v7989_v39 = vld [vmem:[%s12165_s24 + $0x28] sm:$0xff]   ;;  %v7990_v40 = vld [vmem:[%s12165_s24 + $0x30] sm:$0xff]  }
 0x155   : > { %7770 = vmatmul.mubr.msk.bf16.vlgmr.msra.gmra.mxu0 %vm2323_vm0, %v7985_v35  ;;  %v7991_v41 = vld [vmem:[%s12165_s24 + $0x38] sm:$0xff]   ;;  %v7992_v42 = vld [vmem:[%s12165_s24 + $0x40] sm:$0xff]   ;;  %v7993_v43 = vld [vmem:[%s12165_s24 + $0x48] sm:$0xff]  }
 0x156   : > { %7773 = vmatprep.mubr.msk.bf16.mxu0 %vm2323_vm0, %v7986_v36  ;;  %v7994_v44 = vld [vmem:[%s12165_s24 + $0x50] sm:$0xff]   ;;  %v7995_v45 = vld [vmem:[%s12165_s24 + $0x58] sm:$0xff]   ;;  %v7996_v46 = vld [vmem:[%s12165_s24 + $0x60] sm:$0xff]   ;;  %3228 = vmatpush1.bf16.msra.mxu0 %v6889_v55 }
 0x157   : > { %v7997_v47 = vld [vmem:[%s12165_s24 + $0x68] sm:$0xff]   ;;  %v7998_v48 = vld [vmem:[%s12165_s24 + $0x70] sm:$0xff]   ;;  %v7999_v49 = vld [vmem:[%s12165_s24 + $0x78] sm:$0xff]   ;;  %3229 = vmatprep.subr.bf16.mxu0 %v6882_v0  ;;  %3037 = vmatpush1.bf16.msra.mxu1 %v6879_v2 }
 0x158   : > { %2328 = vadd.xlane.f32.xlu0 %v2327_v33  ;;  %v3925_v17 = vld [vmem:[%s12166_s7] sm:$0xff]  ;;  %v3934_v18 = vld [vmem:[%s12166_s7 + $0x48] sm:$0xff]  ;;  %v3936_v20 = vld [vmem:[%s12166_s7 + $0x58] sm:$0xff]  ;;  %3420 = vmatprep.subr.bf16.mxu1 %v6892_v30 }
 0x159   : > { %v3926_v19 = vld [vmem:[%s12166_s7 + $0x8] sm:$0xff]  ;;  %v3927_v21 = vld [vmem:[%s12166_s7 + $0x10] sm:$0xff]  ;;  %v3928_v23 = vld [vmem:[%s12166_s7 + $0x18] sm:$0xff] }
 0x15a   : > { %3230 = vmatpush1.bf16.msra.mxu0 %v6881_v63  ;;  %v3938_v22 = vld [vmem:[%s12166_s7 + $0x68] sm:$0xff]  ;;  %v3940_v24 = vld [vmem:[%s12166_s7 + $0x78] sm:$0xff]  ;;  %v3929_v25 = vld [vmem:[%s12166_s7 + $0x20] sm:$0xff] }
 0x15b   : > { %v3942_v26 = vld [vmem:[%s12166_s7 + $0x88] sm:$0xff]  ;;  %v3944_v27 = vld [vmem:[%s12166_s7 + $0x98] sm:$0xff]  ;;  %v3931_v28 = vld [vmem:[%s12166_s7 + $0x30] sm:$0xff] }
 0x15c   : > { %v3930_v1 = vld [vmem:[%s12166_s7 + $0x28] sm:$0xff]  ;;  %v3932_v29 = vld [vmem:[%s12166_s7 + $0x38] sm:$0xff]  ;;  %v3933_v32 = vld [vmem:[%s12166_s7 + $0x40] sm:$0xff] }
 0x15d   : > { %7774 = vmatmul.mubr.msk.bf16.gmra.mxu0 %vm2323_vm0, %v7987_v37  ;;  %v3950_v33 = vld [vmem:[%s12166_s7 + $0xc8] sm:$0xff]  ;;  %v3935_v34 = vld [vmem:[%s12166_s7 + $0x50] sm:$0xff]  ;;  %v3952_v35 = vld [vmem:[%s12166_s7 + $0xd8] sm:$0xff] }
 0x15e   : > { %7777 = vmatprep.mubr.msk.bf16.mxu0 %vm2323_vm0, %v7988_v38  ;;  %v3937_v36 = vld [vmem:[%s12166_s7 + $0x60] sm:$0xff]  ;;  %v3954_v37 = vld [vmem:[%s12166_s7 + $0xe8] sm:$0xff]  ;;  %v3943_v56 = vld [vmem:[%s12166_s7 + $0x90] sm:$0xff] }
 0x15f   : > { %v2838_v57 = vld [vmem:[%s8663_s5 + $0x10] sm:$0xff]  ;;  %v2843_v63 = vld [vmem:[%s8663_s5 + $0x38] sm:$0xff] }
 0x165   : > { %7778 = vmatmul.mubr.msk.bf16.gmra.mxu0 %vm2323_vm0, %v7989_v39  ;;  %v9552_v39 = vld [vmem:[%s748_s3] ss:$0 sm:$0xff] }
 0x166   : > { %7781 = vmatprep.mubr.msk.bf16.mxu0 %vm2323_vm0, %v7990_v40 }
 0x16d   : > { %7782 = vmatmul.mubr.msk.bf16.gmra.mxu0 %vm2323_vm0, %v7991_v41  ;;  %v3939_v41 = vld [vmem:[%s12166_s7 + $0x70] sm:$0xff] }
 0x16e   : > { %7785 = vmatprep.mubr.msk.bf16.mxu0 %vm2323_vm0, %v7992_v42  ;;  %3960 = vperm.xlu0 %7980, %v3925_v17   ;;  %v6883_v17 = vcombine.low %v2838_v57, %v2842_v58 }
 0x172   : > { %3987 = vperm.xlu0 %7980, %v3934_v18   ;;  %v6885_v18 = vcombine.low %v2839_v62, %v2843_v63 }
 0x175   : > { %7786 = vmatmul.mubr.msk.bf16.gmra.mxu0 %vm2323_vm0, %v7993_v43  ;;  %v2847_v43 = vld [vmem:[%s8663_s5 + $0x58] sm:$0xff] }
 0x176   : > { %7789 = vmatprep.mubr.msk.bf16.mxu0 %vm2323_vm0, %v7994_v44  ;;  %3993 = vperm.xlu0 %7980, %v3936_v20   ;;  %v2851_v44 = vld [vmem:[%s8663_s5 + $0x78] sm:$0xff]  ;;  %s12330_s5 = sld [smem:[#allocation208_spill]] }
 0x17a   : > { %3999 = vperm.xlu0 %7980, %v3938_v22  }
 0x17d   : > { %7790 = vmatmul.mubr.msk.bf16.gmra.mxu0 %vm2323_vm0, %v7995_v45 }
 0x17e   : > { %7793 = vmatprep.mubr.msk.bf16.mxu0 %vm2323_vm0, %v7996_v46  ;;  %4005 = vperm.xlu0 %7980, %v3940_v24   ;;  %v6894_v46 = vcombine.high %v2847_v43, %v2851_v44 }
 0x180   : > { %3613 = vmatprep.subr.bf16.mxu0 %v6894_v46 }
 0x182   : > { %4011 = vperm.xlu0 %7980, %v3942_v26  }
 0x185   : > { %7794 = vmatmul.mubr.msk.bf16.gmra.mxu0 %vm2323_vm0, %v7997_v47  ;;  %v3956_v47 = vld [vmem:[%s12166_s7 + $0xf8] sm:$0xff] }
 0x186   : > { %7797 = vmatprep.mubr.msk.bf16.mxu0 %vm2323_vm0, %v7998_v48  ;;  %4017 = vperm.xlu0 %7980, %v3944_v27  }
 0x18d   : > { %7798 = vmatmul.mubr.msk.bf16.gmra.mxu0 %vm2323_vm0, %v7999_v49  ;;  %v3941_v49 = vld [vmem:[%s12166_s7 + $0x80] sm:$0xff] }
 0x18e   : > { %3247 = vmatprep.mubr.bf16.mxu0 %v12031_v4 }
 0x1dd   : > { %v2326_v5 = vpop.xlane.xlu0 %2325 }
 0x1de   : > { %v2331_v6 = vmul.f32 0.03125, %v2326_v5  ;;  %v6891_v5 = vcombine.low %v9516_v3, %v9519_v11 }
 0x1e0   : > { %v9465_v7 = vsub.f32 %v9378_v13, %v2331_v6  ;;  %v3946_v13 = vld [vmem:[%s12166_s7 + $0xa8] sm:$0xff]  ;;  %v6893_v6 = vcombine.low %v2847_v43, %v2851_v44  ;;  %v3955_v43 = vld [vmem:[%s12166_s7 + $0xf0] sm:$0xff] }
 0x1e1   : > { %v2329_v8 = vpop.xlane.xlu0 %2328  ;;  %4023 = vperm.xlu0 %7980, %v3946_v13  }
 0x1e2   : > { %v2332_v9 = vmul.f32 0.03125, %v2329_v8  ;;  %v2335_v10 = vmul.f32 %v9465_v7, %v9465_v7 }
 0x1e4   : > { %v9470_v12 = vsub.f32 %v9383_v31, %v2332_v9  ;;  %v2337_v14 = vsel %vm2323_vm0, %v2335_v10, 0.0  ;;  %v3948_v31 = vld [vmem:[%s12166_s7 + $0xb8] sm:$0xff]  ;;  %v6884_v9 = vcombine.high %v2838_v57, %v2842_v58 }
 0x1e5   : > { %2338 = vadd.xlane.f32.xlu1 %v2337_v14  ;;  %4029 = vperm.xlu0 %7980, %v3948_v31   ;;  %v3945_v14 = vld [vmem:[%s12166_s7 + $0xa0] sm:$0xff]  ;;  %v3951_v31 = vld [vmem:[%s12166_s7 + $0xd0] sm:$0xff] }
 0x1e6   : > { %v2336_v15 = vmul.f32 %v9470_v12, %v9470_v12 }
 0x1e8   : > { %v2340_v16 = vsel %vm2323_vm0, %v2336_v15, 0.0  ;;  %v6886_v15 = vcombine.high %v2839_v62, %v2843_v63 }
 0x1e9   : > { %2341 = vadd.xlane.f32.xlu1 %v2340_v16  ;;  %4035 = vperm.xlu0 %7980, %v3950_v33  }
 0x1ed   : > { %4041 = vperm.xlu0 %7980, %v3952_v35  }
 0x1f1   : > { %4047 = vperm.xlu0 %7980, %v3954_v37  }
 0x1f5   : > { %4053 = vperm.xlu0 %7980, %v3956_v47  }
 0x1fa   : > { %3963 = vperm.xlu1 %7981, %v3926_v19  }
 0x1fe   : > { %3966 = vperm.xlu1 %7981, %v3927_v21  }
 0x202   : > { %3969 = vperm.xlu1 %7981, %v3928_v23   ;;  %v3947_v23 = vld [vmem:[%s12166_s7 + $0xb0] sm:$0xff] }
 0x206   : > { %3972 = vperm.xlu1 %7981, %v3929_v25  }
 0x20a   : > { %3975 = vperm.xlu1 %7981, %v3930_v1  }
 0x20e   : > { %3978 = vperm.xlu1 %7981, %v3931_v28   ;;  %v3949_v28 = vld [vmem:[%s12166_s7 + $0xc0] sm:$0xff] }
 0x212   : > { %3981 = vperm.xlu1 %7981, %v3932_v29  }
 0x215   : > { %v7771_v38 = vpop.f32.mrf.mxu0 }
 0x216   : > { %3984 = vperm.xlu1 %7981, %v3933_v32   ;;  %v2606_v59 = vadd.f32 %v7771_v38, %v9552_v39 }
 0x217   : > { %v2597_v40 = vpop.f32.mrf.mxu0 }
 0x218   : > { %v2598_v42 = vadd.f32 %v9552_v39, %v2597_v40  ;;  %v2758_v16 = vmul.f32 0.01, %v2606_v59  ;;  %vm2726_vm2 = vcmp.ge.f32.partialorder %v2606_v59, 0.0 }
 0x219   : > { %v7772_v45 = vpop.f32.mrf.mxu0 }
 0x21a   : > { %3990 = vperm.xlu1 %7981, %v3935_v34   ;;  %v2756_v50 = vmul.f32 0.01, %v2598_v42  ;;  %vm2724_vm1 = vcmp.ge.f32.partialorder %v2598_v42, 0.0  ;;  %v2609_v53 = vadd.f32 %v7772_v45, %v9552_v39  ;;  %v2790_v24 = vsel %vm2726_vm2, %v2606_v59, %v2758_v16 }
 0x21b   : > { %v2600_v48 = vpop.f32.mrf.mxu0 }
 0x21c   : > { %v2601_v51 = vadd.f32 %v9552_v39, %v2600_v48  ;;  %v2788_v60 = vsel %vm2724_vm1, %v2598_v42, %v2756_v50  ;;  %v2759_v8 = vmul.f32 0.01, %v2609_v53  ;;  %vm2727_vm11 = vcmp.ge.f32.partialorder %v2609_v53, 0.0 }
 0x21d   : > { %v7775_v52 = vpop.f32.mrf.mxu0 }
 0x21e   : > { %3996 = vperm.xlu1 %7981, %v3937_v36   ;;  %vm2725_vm13 = vcmp.ge.f32.partialorder %v2601_v51, 0.0  ;;  %v2757_v54 = vmul.f32 0.01, %v2601_v51  ;;  %v2791_v19 = vsel %vm2727_vm11, %v2609_v53, %v2759_v8  ;;  %v2622_v3 = vadd.f32 %v7775_v52, %v9552_v39  ;;  %v3953_v36 = vld [vmem:[%s12166_s7 + $0xe0] sm:$0xff] }
 0x21f   : > { %v2613_v55 = vpop.f32.mrf.mxu0  ;;  %v9594_v25 = vpack.c.bf16 %v2791_v19, %v2790_v24 }
 0x220   : > { %v2789_v61 = vsel %vm2725_vm13, %v2601_v51, %v2757_v54  ;;  %v2614_v20 = vadd.f32 %v9552_v39, %v2613_v55  ;;  %v2762_v33 = vmul.f32 0.01, %v2622_v3  ;;  %vm2730_vm15 = vcmp.ge.f32.partialorder %v2622_v3, 0.0 }
 0x221   : > { %v9576_v0 = vpack.c.bf16 %v2789_v61, %v2788_v60  ;;  %v7776_v2 = vpop.f32.mrf.mxu0 }
 0x222   : > { %4002 = vperm.xlu1 %7981, %v3939_v41   ;;  %v2760_v26 = vmul.f32 0.01, %v2614_v20  ;;  %vm2728_vm6 = vcmp.ge.f32.partialorder %v2614_v20, 0.0  ;;  %v2625_v13 = vadd.f32 %v7776_v2, %v9552_v39  ;;  %v2794_v37 = vsel %vm2730_vm15, %v2622_v3, %v2762_v33 }
 0x223   : > { %v2616_v10 = vpop.f32.mrf.mxu0  ;;  %6895 = vmatmul.mubr.msk.bf16.vlgmr.msra.gmra.mxu1 %vm2323_vm0, %v9576_v0  ;;  %6911 = vmatmul.mubr.msk.bf16.vlgmr.msra.gmra.mxu0 %vm2323_vm0, %v9576_v0 }
 0x224   : > { %3064 = vmatprep.mubr.bf16.mxu1 %v12031_v4  ;;  %3257 = vmatprep.mubr.bf16.mxu0 %v12031_v4  ;;  %v2617_v21 = vadd.f32 %v9552_v39, %v2616_v10  ;;  %v2792_v11 = vsel %vm2728_vm6, %v2614_v20, %v2760_v26  ;;  %v2763_v34 = vmul.f32 0.01, %v2625_v13  ;;  %vm2731_vm3 = vcmp.ge.f32.partialorder %v2625_v13, 0.0 }
 0x225   : > { %3421 = vmatpush1.bf16.msra.mxu1 %v6891_v5  ;;  %3614 = vmatpush1.bf16.msra.mxu0 %v6893_v6  ;;  %v7779_v22 = vpop.f32.mrf.mxu0  ;;  %v12029_v6 = vmov 0.0  }
 0x226   : > { %4008 = vperm.xlu1 %7981, %v3941_v49   ;;  %3422 = vmatprep.subr.bf16.mxu1 %v6884_v9  ;;  %v2761_v1 = vmul.f32 0.01, %v2617_v21  ;;  %vm2729_vm14 = vcmp.ge.f32.partialorder %v2617_v21, 0.0  ;;  %v2795_v38 = vsel %vm2731_vm3, %v2625_v13, %v2763_v34  ;;  %v2638_v48 = vadd.f32 %v7779_v22, %v9552_v39  ;;  %2377 = vst.msk [vmem:[#allocation4] sm:$0xff] %vm2323_vm0, %v12029_v6 }
 0x227   : > { %3615 = vmatprep.subr.bf16.mxu0 %v6886_v15  ;;  %v2629_v27 = vpop.f32.mrf.mxu0  ;;  %v9626_v44 = vpack.c.bf16 %v2795_v38, %v2794_v37  ;;  %2378 = vst.msk [vmem:[#allocation4 + $0x8] sm:$0xff] %vm2323_vm0, %v12029_v6  ;;  %v12194_v6 = vmov 0.0  }
 0x228   : > { %v2793_v29 = vsel %vm2729_vm14, %v2617_v21, %v2761_v1  ;;  %v2630_v40 = vadd.f32 %v9552_v39, %v2629_v27  ;;  %v2766_v54 = vmul.f32 0.01, %v2638_v48  ;;  %vm2734_vm4 = vcmp.ge.f32.partialorder %v2638_v48, 0.0 }
 0x229   : > { %3423 = vmatpush1.bf16.msra.mxu1 %v6883_v17  ;;  %3616 = vmatpush1.bf16.msra.mxu0 %v6885_v18  ;;  %v7780_v30 = vpop.f32.mrf.mxu0  ;;  %v9610_v32 = vpack.c.bf16 %v2793_v29, %v2792_v11 }
 0x22a   : > { %4014 = vperm.xlu1 %7981, %v3943_v56   ;;  %v2764_v45 = vmul.f32 0.01, %v2630_v40  ;;  %vm2732_vm8 = vcmp.ge.f32.partialorder %v2630_v40, 0.0  ;;  %v2641_v50 = vadd.f32 %v7780_v30, %v9552_v39  ;;  %v2798_v57 = vsel %vm2734_vm4, %v2638_v48, %v2766_v54 }
 0x22b   : > { %6896 = vmatmul.mubr.msk.bf16.gmra.mxu1 %vm2323_vm0, %v9594_v25  ;;  %6912 = vmatmul.mubr.msk.bf16.gmra.mxu0 %vm2323_vm0, %v9594_v25  ;;  %v2632_v35 = vpop.f32.mrf.mxu0 }
 0x22c   : > { %3074 = vmatprep.mubr.bf16.mxu1 %v12031_v4  ;;  %3267 = vmatprep.mubr.bf16.mxu0 %v12031_v4  ;;  %v2633_v41 = vadd.f32 %v9552_v39, %v2632_v35  ;;  %v2796_v49 = vsel %vm2732_vm8, %v2630_v40, %v2764_v45  ;;  %v2767_v55 = vmul.f32 0.01, %v2641_v50  ;;  %vm2735_vm9 = vcmp.ge.f32.partialorder %v2641_v50, 0.0 }
 0x22d   : > { %v7783_v42 = vpop.f32.mrf.mxu0 }
 0x22e   : > { %4020 = vperm.xlu1 %7981, %v3945_v14   ;;  %v2765_v46 = vmul.f32 0.01, %v2633_v41  ;;  %vm2733_vm12 = vcmp.ge.f32.partialorder %v2633_v41, 0.0  ;;  %v2799_v58 = vsel %vm2735_vm9, %v2641_v50, %v2767_v55  ;;  %v2654_v8 = vadd.f32 %v7783_v42, %v9552_v39 }
 0x22f   : > { %v2645_v47 = vpop.f32.mrf.mxu0  ;;  %v9646_v62 = vpack.c.bf16 %v2799_v58, %v2798_v57 }
 0x230   : > { %v2797_v51 = vsel %vm2733_vm12, %v2633_v41, %v2765_v46  ;;  %v2646_v59 = vadd.f32 %v9552_v39, %v2645_v47  ;;  %v2770_v17 = vmul.f32 0.01, %v2654_v8  ;;  %vm2738_vm10 = vcmp.ge.f32.partialorder %v2654_v8, 0.0 }
 0x231   : > { %v7784_v52 = vpop.f32.mrf.mxu0  ;;  %v9636_v53 = vpack.c.bf16 %v2797_v51, %v2796_v49 }
 0x232   : > { %4026 = vperm.xlu1 %7981, %v3947_v23   ;;  %v2768_v63 = vmul.f32 0.01, %v2646_v59  ;;  %vm2736_vm7 = vcmp.ge.f32.partialorder %v2646_v59, 0.0  ;;  %v2657_v10 = vadd.f32 %v7784_v52, %v9552_v39  ;;  %v2802_v20 = vsel %vm2738_vm10, %v2654_v8, %v2770_v17 }
 0x233   : > { %6897 = vmatmul.mubr.msk.bf16.gmra.mxu1 %vm2323_vm0, %v9610_v32  ;;  %6913 = vmatmul.mubr.msk.bf16.gmra.mxu0 %vm2323_vm0, %v9610_v32  ;;  %v2648_v56 = vpop.f32.mrf.mxu0 }
 0x234   : > { %3084 = vmatprep.mubr.bf16.mxu1 %v12031_v4  ;;  %3277 = vmatprep.mubr.bf16.mxu0 %v12031_v4  ;;  %v2649_v60 = vadd.f32 %v9552_v39, %v2648_v56  ;;  %v2800_v9 = vsel %vm2736_vm7, %v2646_v59, %v2768_v63  ;;  %v2771_v18 = vmul.f32 0.01, %v2657_v10  ;;  %vm2739_vm1 = vcmp.ge.f32.partialorder %v2657_v10, 0.0 }
 0x235   : > { %v7787_v61 = vpop.f32.mrf.mxu0 }
 0x236   : > { %4032 = vperm.xlu1 %7981, %v3949_v28   ;;  %v2769_v2 = vmul.f32 0.01, %v2649_v60  ;;  %vm2737_vm5 = vcmp.ge.f32.partialorder %v2649_v60, 0.0  ;;  %v2803_v21 = vsel %vm2739_vm1, %v2657_v10, %v2771_v18  ;;  %v2670_v3 = vadd.f32 %v7787_v61, %v9552_v39 }
 0x237   : > { %v2661_v5 = vpop.f32.mrf.mxu0  ;;  %v9670_v26 = vpack.c.bf16 %v2803_v21, %v2802_v20 }
 0x238   : > { %v2801_v14 = vsel %vm2737_vm5, %v2649_v60, %v2769_v2  ;;  %v2662_v22 = vadd.f32 %v9552_v39, %v2661_v5  ;;  %v2774_v33 = vmul.f32 0.01, %v2670_v3  ;;  %vm2742_vm2 = vcmp.ge.f32.partialorder %v2670_v3, 0.0 }
 0x239   : > { %v7788_v15 = vpop.f32.mrf.mxu0  ;;  %v9660_v16 = vpack.c.bf16 %v2801_v14, %v2800_v9 }
 0x23a   : > { %4038 = vperm.xlu1 %7981, %v3951_v31   ;;  %v2772_v1 = vmul.f32 0.01, %v2662_v22  ;;  %vm2740_vm13 = vcmp.ge.f32.partialorder %v2662_v22, 0.0  ;;  %v2673_v13 = vadd.f32 %v7788_v15, %v9552_v39  ;;  %v6842_v15 = vld [vmem:[%s732_s28] ss:$0 sm:$0xff]  ;;  %s8344_s28 = smov 32  }
 0x23b   : > { %6898 = vmatmul.mubr.msk.bf16.gmra.mxu1 %vm2323_vm0, %v9626_v44  ;;  %6914 = vmatmul.mubr.msk.bf16.gmra.mxu0 %vm2323_vm0, %v9626_v44  ;;  %v2664_v19 = vpop.f32.mrf.mxu0 }
 0x23c   : > { %3094 = vmatprep.mubr.bf16.mxu1 %v12031_v4  ;;  %3287 = vmatprep.mubr.bf16.mxu0 %v12031_v4  ;;  %v2665_v23 = vadd.f32 %v9552_v39, %v2664_v19  ;;  %v2804_v11 = vsel %vm2740_vm13, %v2662_v22, %v2772_v1  ;;  %v2775_v34 = vmul.f32 0.01, %v2673_v13  ;;  %vm2743_vm6 = vcmp.ge.f32.partialorder %v2673_v13, 0.0  ;;  %v6843_v19 = vld [vmem:[%s740_s25] ss:$0 sm:$0xff]  ;;  %s8345_s25 = smov 64  }
 0x23d   : > { %v7791_v24 = vpop.f32.mrf.mxu0 }
 0x23e   : > { %4044 = vperm.xlu1 %7981, %v3953_v36   ;;  %v2773_v27 = vmul.f32 0.01, %v2665_v23  ;;  %vm2741_vm11 = vcmp.ge.f32.partialorder %v2665_v23, 0.0  ;;  %v2806_v36 = vsel %vm2742_vm2, %v2670_v3, %v2774_v33  ;;  %v2807_v37 = vsel %vm2743_vm6, %v2673_v13, %v2775_v34 }
 0x23f   : > { %v2677_v28 = vpop.f32.mrf.mxu0  ;;  %v9690_v45 = vpack.c.bf16 %v2807_v37, %v2806_v36  ;;  %v2686_v54 = vadd.f32 %v7791_v24, %v9552_v39 }
 0x240   : > { %v2805_v29 = vsel %vm2741_vm11, %v2665_v23, %v2773_v27  ;;  %v2678_v38 = vadd.f32 %v9552_v39, %v2677_v28 }
 0x241   : > { %v7792_v30 = vpop.f32.mrf.mxu0  ;;  %v9680_v31 = vpack.c.bf16 %v2805_v29, %v2804_v11  ;;  %v2778_v60 = vmul.f32 0.01, %v2686_v54  ;;  %vm2746_vm3 = vcmp.ge.f32.partialorder %v2686_v54, 0.0 }
 0x242   : > { %4050 = vperm.xlu1 %7981, %v3955_v43   ;;  %v2776_v47 = vmul.f32 0.01, %v2678_v38  ;;  %vm2744_vm14 = vcmp.ge.f32.partialorder %v2678_v38, 0.0  ;;  %v2689_v56 = vadd.f32 %v7792_v30, %v9552_v39 }
 0x243   : > { %6899 = vmatmul.mubr.msk.bf16.gmra.mxu1 %vm2323_vm0, %v9636_v53  ;;  %6915 = vmatmul.mubr.msk.bf16.gmra.mxu0 %vm2323_vm0, %v9636_v53  ;;  %v2680_v35 = vpop.f32.mrf.mxu0  ;;  %v2810_v2 = vsel %vm2746_vm3, %v2686_v54, %v2778_v60 }
 0x244   : > { %3104 = vmatprep.mubr.bf16.mxu1 %v12031_v4  ;;  %3297 = vmatprep.mubr.bf16.mxu0 %v12031_v4  ;;  %v2681_v40 = vadd.f32 %v9552_v39, %v2680_v35  ;;  %v2808_v55 = vsel %vm2744_vm14, %v2678_v38, %v2776_v47  ;;  %v2779_v61 = vmul.f32 0.01, %v2689_v56  ;;  %vm2747_vm8 = vcmp.ge.f32.partialorder %v2689_v56, 0.0 }
 0x245   : > { %v7795_v43 = vpop.f32.mrf.mxu0 }
 0x246   : > { %v2777_v48 = vmul.f32 0.01, %v2681_v40  ;;  %vm2745_vm15 = vcmp.ge.f32.partialorder %v2681_v40, 0.0  ;;  %v2811_v5 = vsel %vm2747_vm8, %v2689_v56, %v2779_v61  ;;  %v2702_v27 = vadd.f32 %v7795_v43, %v9552_v39 }
 0x247   : > { %v2693_v51 = vpop.f32.mrf.mxu0  ;;  %v9712_v17 = vpack.c.bf16 %v2811_v5, %v2810_v2 }
 0x248   : > { %v2809_v57 = vsel %vm2745_vm15, %v2681_v40, %v2777_v48  ;;  %v2694_v8 = vadd.f32 %v9552_v39, %v2693_v51  ;;  %v2782_v36 = vmul.f32 0.01, %v2702_v27  ;;  %vm2750_vm5 = vcmp.ge.f32.partialorder %v2702_v27, 0.0 }
 0x249   : > { %v7796_v58 = vpop.f32.mrf.mxu0  ;;  %v9700_v59 = vpack.c.bf16 %v2809_v57, %v2808_v55  ;;  %vm4167_vm15 = vcmask 130048  }
 0x24a   : > { %v2780_v20 = vmul.f32 0.01, %v2694_v8  ;;  %vm2748_vm12 = vcmp.ge.f32.partialorder %v2694_v8, 0.0  ;;  %v2705_v3 = vadd.f32 %v7796_v58, %v9552_v39 }
 0x24b   : > { %6900 = vmatmul.mubr.msk.bf16.gmra.mxu1 %vm2323_vm0, %v9646_v62  ;;  %6916 = vmatmul.mubr.msk.bf16.gmra.mxu0 %vm2323_vm0, %v9646_v62  ;;  %v2696_v63 = vpop.f32.mrf.mxu0 }
 0x24c   : > { %3114 = vmatprep.mubr.bf16.mxu1 %v12031_v4  ;;  %3307 = vmatprep.mubr.bf16.mxu0 %v12031_v4  ;;  %v2697_v9 = vadd.f32 %v9552_v39, %v2696_v63  ;;  %v2812_v28 = vsel %vm2748_vm12, %v2694_v8, %v2780_v20  ;;  %v2783_v37 = vmul.f32 0.01, %v2705_v3  ;;  %vm2751_vm10 = vcmp.ge.f32.partialorder %v2705_v3, 0.0 }
 0x24d   : > { %v7799_v10 = vpop.f32.mrf.mxu0 }
 0x24e   : > { %v2781_v21 = vmul.f32 0.01, %v2697_v9  ;;  %vm2749_vm4 = vcmp.ge.f32.partialorder %v2697_v9, 0.0 }
 0x24f   : > { %v2709_v23 = vpop.f32.mrf.mxu0 }
 0x250   : > { %v2813_v11 = vsel %vm2749_vm4, %v2697_v9, %v2781_v21  ;;  %v2710_v43 = vadd.f32 %v9552_v39, %v2709_v23 }
 0x251   : > { %v7800_v30 = vpop.f32.mrf.mxu0  ;;  %v9726_v35 = vpack.c.bf16 %v2813_v11, %v2812_v28 }
 0x252   : > { %v2784_v48 = vmul.f32 0.01, %v2710_v43  ;;  %vm2752_vm1 = vcmp.ge.f32.partialorder %v2710_v43, 0.0  ;;  %v2721_v55 = vadd.f32 %v7800_v30, %v9552_v39 }
 0x253   : > { %6901 = vmatmul.mubr.msk.bf16.gmra.mxu1 %vm2323_vm0, %v9660_v16  ;;  %6917 = vmatmul.mubr.msk.bf16.gmra.mxu0 %vm2323_vm0, %v9660_v16  ;;  %v2712_v38 = vpop.f32.mrf.mxu0 }
 0x254   : > { %3124 = vmatprep.mubr.bf16.mxu1 %v12031_v4  ;;  %3317 = vmatprep.mubr.bf16.mxu0 %v12031_v4  ;;  %v2816_v54 = vsel %vm2752_vm1, %v2710_v43, %v2784_v48  ;;  %v2787_v61 = vmul.f32 0.01, %v2721_v55  ;;  %vm2755_vm2 = vcmp.ge.f32.partialorder %v2721_v55, 0.0 }
 0x256   : > { %v2819_v63 = vsel %vm2755_vm2, %v2721_v55, %v2787_v61 }
 0x25b   : > { %6902 = vmatmul.mubr.msk.bf16.gmra.mxu1 %vm2323_vm0, %v9670_v26  ;;  %6918 = vmatmul.mubr.msk.bf16.gmra.mxu0 %vm2323_vm0, %v9670_v26 }
 0x25c   : > { %3134 = vmatprep.mubr.bf16.mxu1 %v12031_v4  ;;  %3327 = vmatprep.mubr.bf16.mxu0 %v12031_v4 }
 0x263   : > { %6903 = vmatmul.mubr.msk.bf16.gmra.mxu1 %vm2323_vm0, %v9680_v31  ;;  %6919 = vmatmul.mubr.msk.bf16.gmra.mxu0 %vm2323_vm0, %v9680_v31 }
 0x264   : > { %3144 = vmatprep.mubr.bf16.mxu1 %v12031_v4  ;;  %3337 = vmatprep.mubr.bf16.mxu0 %v12031_v4 }
 0x26b   : > { %6904 = vmatmul.mubr.msk.bf16.gmra.mxu1 %vm2323_vm0, %v9690_v45  ;;  %6920 = vmatmul.mubr.msk.bf16.gmra.mxu0 %vm2323_vm0, %v9690_v45 }
 0x26c   : > { %3154 = vmatprep.mubr.bf16.mxu1 %v12031_v4  ;;  %3347 = vmatprep.mubr.bf16.mxu0 %v12031_v4 }
 0x26e   : > { %v2339_v41 = vpop.xlane.xlu1 %2338 }
 0x26f   : > { %v2343_v42 = vmul.f32 0.03125, %v2339_v41  ;;  %v2814_v41 = vsel %vm2750_vm5, %v2702_v27, %v2782_v36 }
 0x271   : > { %v2345_v46 = vadd.f32 1e-05, %v2343_v42  ;;  %v2815_v42 = vsel %vm2751_vm10, %v2705_v3, %v2783_v37 }
 0x272   : > { %v2342_v49 = vpop.xlane.xlu1 %2341  ;;  %v9738_v47 = vpack.c.bf16 %v2815_v42, %v2814_v41 }
 0x273   : > { %8066 = vrsqrt.f32 %v2345_v46  ;;  %v2344_v50 = vmul.f32 0.03125, %v2342_v49  ;;  %6905 = vmatmul.mubr.msk.bf16.gmra.mxu1 %vm2323_vm0, %v9700_v59  ;;  %6921 = vmatmul.mubr.msk.bf16.gmra.mxu0 %vm2323_vm0, %v9700_v59  ;;  %v2713_v46 = vadd.f32 %v9552_v39, %v2712_v38 }
 0x274   : > { %3164 = vmatprep.mubr.bf16.mxu1 %v12031_v4  ;;  %3357 = vmatprep.mubr.bf16.mxu0 %v12031_v4 }
 0x275   : > { %v2346_v52 = vadd.f32 1e-05, %v2344_v50  ;;  %v2785_v49 = vmul.f32 0.01, %v2713_v46  ;;  %vm2753_vm13 = vcmp.ge.f32.partialorder %v2713_v46, 0.0  ;;  %v2718_v50 = vadd.f32 %v7799_v10, %v9552_v39 }
 0x277   : > { %8068 = vrsqrt.f32 %v2346_v52  ;;  %v2817_v56 = vsel %vm2753_vm13, %v2713_v46, %v2785_v49  ;;  %v2786_v60 = vmul.f32 0.01, %v2718_v50  ;;  %vm2754_vm11 = vcmp.ge.f32.partialorder %v2718_v50, 0.0 }
 0x278   : > { %v9748_v58 = vpack.c.bf16 %v2817_v56, %v2816_v54  ;;  %v3961_v54 = vpop.permute.xlu0 %3960 }
 0x279   : > { %v2818_v39 = vsel %vm2754_vm11, %v2718_v50, %v2786_v60 }
 0x27a   : > { %v9756_v2 = vpack.c.bf16 %v2819_v63, %v2818_v39 }
 0x27b   : > { %6906 = vmatmul.mubr.msk.bf16.gmra.mxu1 %vm2323_vm0, %v9712_v17  ;;  %6922 = vmatmul.mubr.msk.bf16.gmra.mxu0 %vm2323_vm0, %v9712_v17 }
 0x27c   : > { %3174 = vmatprep.mubr.bf16.mxu1 %v12031_v4  ;;  %3367 = vmatprep.mubr.bf16.mxu0 %v12031_v4 }
 0x280   : > { %v8067_v14 = vpop.eup %8066 }
 0x281   : > { %v2349_v18 = vmul.f32 %v8067_v14, %v9465_v7 }
 0x283   : > { %v2358_v22 = vmul.f32 %v6842_v15, %v2349_v18  ;;  %6907 = vmatmul.mubr.msk.bf16.gmra.mxu1 %vm2323_vm0, %v9726_v35  ;;  %6923 = vmatmul.mubr.msk.bf16.gmra.mxu0 %vm2323_vm0, %v9726_v35 }
 0x284   : > { %v8069_v24 = vpop.eup %8068  ;;  %3184 = vmatprep.mubr.bf16.mxu1 %v12031_v4  ;;  %3377 = vmatprep.mubr.bf16.mxu0 %v12031_v4 }
 0x285   : > { %v2367_v7 = vadd.f32 %v6843_v19, %v2358_v22  ;;  %v2350_v1 = vmul.f32 %v8069_v24, %v9470_v12 }
 0x287   : > { %vm2369_vm9 = vcmp.ge.f32.partialorder %v2367_v7, 0.0  ;;  %v2371_v13 = vmul.f32 0.01, %v2367_v7  ;;  %v2359_v29 = vmul.f32 %v6842_v15, %v2350_v1 }
 0x289   : > { %v2373_v33 = vsel %vm2369_vm9, %v2367_v7, %v2371_v13  ;;  %v2368_v34 = vadd.f32 %v6843_v19, %v2359_v29 }
 0x28a   : > { %2375 = vst.msk [vmem:[#allocation3] sm:$0xff] %vm2323_vm0, %v2373_v33 }
 0x28b   : > { %vm2370_vm7 = vcmp.ge.f32.partialorder %v2368_v34, 0.0  ;;  %v2372_v12 = vmul.f32 0.01, %v2368_v34  ;;  %6908 = vmatmul.mubr.msk.bf16.gmra.mxu1 %vm2323_vm0, %v9738_v47  ;;  %6924 = vmatmul.mubr.msk.bf16.gmra.mxu0 %vm2323_vm0, %v9738_v47 }
 0x28c   : > { %3194 = vmatprep.mubr.bf16.mxu1 %v12031_v4  ;;  %3387 = vmatprep.mubr.bf16.mxu0 %v12031_v4 }
 0x28d   : > { %v2374_v40 = vsel %vm2370_vm7, %v2368_v34, %v2372_v12 }
 0x28e   : > { %2376 = vst.msk [vmem:[#allocation3 + $0x8] sm:$0xff] %vm2323_vm0, %v2374_v40 }
 0x291   : > { %v3922_v51 = vld [vmem:[#allocation3] sm:$0xff] }
 0x293   : > { %6909 = vmatmul.mubr.msk.bf16.gmra.mxu1 %vm2323_vm0, %v9748_v58  ;;  %6925 = vmatmul.mubr.msk.bf16.gmra.mxu0 %vm2323_vm0, %v9748_v58 }
 0x294   : > { %3204 = vmatprep.mubr.bf16.mxu1 %v12031_v4  ;;  %3397 = vmatprep.mubr.bf16.mxu0 %v12031_v4 }
 0x295   : > { %v3923_v52 = vld [vmem:[#allocation3 + $0x8] sm:$0xff] }
 0x296   : > { %v3924_v57 = vpack.c.bf16 %v3923_v52, %v3922_v51 }
 0x298   : > { %7801 = vmatprep.subr.bf16.mxu1 %v3924_v57 }
 0x29b   : > { %6910 = vmatmul.mubr.msk.bf16.gmra.mxu1 %vm2323_vm0, %v9756_v2  ;;  %6926 = vmatmul.mubr.msk.bf16.gmra.mxu0 %vm2323_vm0, %v9756_v2 }
 0x29c   : > { %3440 = vmatprep.mubr.bf16.mxu1 %v12031_v4  ;;  %3633 = vmatprep.mubr.bf16.mxu0 %v12031_v4 }
 0x2a3   : > { %6927 = vmatmul.mubr.msk.bf16.vlgmr.msra.gmra.mxu1 %vm2323_vm0, %v9576_v0  ;;  %6943 = vmatmul.mubr.msk.bf16.vlgmr.msra.gmra.mxu0 %vm2323_vm0, %v9576_v0  ;;  %v2854_v0 = vlaneseq }
 0x2a4   : > { %7802 = vmatpush3.bf16.msra.mxu1 %v3924_v57  ;;  %3450 = vmatprep.mubr.bf16.mxu1 %v12031_v4 }
 0x2a5   : > { %3643 = vmatprep.mubr.bf16.mxu0 %v12031_v4 }
 0x2ab   : > { %6928 = vmatmul.mubr.msk.bf16.gmra.mxu1 %vm2323_vm0, %v9594_v25  ;;  %6944 = vmatmul.mubr.msk.bf16.gmra.mxu0 %vm2323_vm0, %v9594_v25  ;;  %v9813_v25 = vshrl.u32 %v2854_v0, 7 }
 0x2ac   : > { %3460 = vmatprep.mubr.bf16.mxu1 %v12031_v4  ;;  %3653 = vmatprep.mubr.bf16.mxu0 %v12031_v4 }
 0x2ad   : > { %12167 = vst [vmem:[#allocation25_spill] sm:$0xff] %v9813_v25 }
 0x2b3   : > { %6929 = vmatmul.mubr.msk.bf16.gmra.mxu1 %vm2323_vm0, %v9610_v32  ;;  %6945 = vmatmul.mubr.msk.bf16.gmra.mxu0 %vm2323_vm0, %v9610_v32  ;;  %v12027_v32 = vsub.s32 0, %v9813_v25 }
 0x2b4   : > { %3470 = vmatprep.mubr.bf16.mxu1 %v12031_v4  ;;  %3663 = vmatprep.mubr.bf16.mxu0 %v12031_v4 }
 0x2bb   : > { %6930 = vmatmul.mubr.msk.bf16.gmra.mxu1 %vm2323_vm0, %v9626_v44  ;;  %6946 = vmatmul.mubr.msk.bf16.gmra.mxu0 %vm2323_vm0, %v9626_v44  ;;  %v2864_v44 = vsub.s32 2, %v9813_v25 }
 0x2bc   : > { %3480 = vmatprep.mubr.bf16.mxu1 %v12031_v4  ;;  %3673 = vmatprep.mubr.bf16.mxu0 %v12031_v4 }
 0x2c3   : > { %6931 = vmatmul.mubr.msk.bf16.gmra.mxu1 %vm2323_vm0, %v9636_v53  ;;  %6947 = vmatmul.mubr.msk.bf16.gmra.mxu0 %vm2323_vm0, %v9636_v53  ;;  %v9818_v53 = vld [vmem:[%s8641_s18] sm:$0xff] }
 0x2c4   : > { %3490 = vmatprep.mubr.bf16.mxu1 %v12031_v4  ;;  %3683 = vmatprep.mubr.bf16.mxu0 %v12031_v4  ;;  %v9831_v9 = vrot.slane %v9818_v53, %v12027_v32  ;;  %v9834_v10 = vrot.slane %v9818_v53, %v2864_v44 }
 0x2c6   : > { %12168 = vst [vmem:[#allocation26_spill] sm:$0xff] %v9834_v10 }
 0x2cb   : > { %6932 = vmatmul.mubr.msk.bf16.gmra.mxu1 %vm2323_vm0, %v9646_v62  ;;  %6948 = vmatmul.mubr.msk.bf16.gmra.mxu0 %vm2323_vm0, %v9646_v62  ;;  %v12028_v62 = vsub.s32 1, %v9813_v25 }
 0x2cc   : > { %3500 = vmatprep.mubr.bf16.mxu1 %v12031_v4  ;;  %3693 = vmatprep.mubr.bf16.mxu0 %v12031_v4 }
 0x2cd   : > { %v9841_v14 = vrot.slane %v9818_v53, %v12028_v62 }
 0x2cf   : > { %12169 = vst [vmem:[#allocation27_spill] sm:$0xff] %v9841_v14 }
 0x2d3   : > { %6933 = vmatmul.mubr.msk.bf16.gmra.mxu1 %vm2323_vm0, %v9660_v16  ;;  %6949 = vmatmul.mubr.msk.bf16.gmra.mxu0 %vm2323_vm0, %v9660_v16  ;;  %v2868_v16 = vsub.s32 3, %v9813_v25 }
 0x2d4   : > { %3510 = vmatprep.mubr.bf16.mxu1 %v12031_v4  ;;  %3703 = vmatprep.mubr.bf16.mxu0 %v12031_v4 }
 0x2d5   : > { %v9844_v15 = vrot.slane %v9818_v53, %v2868_v16 }
 0x2d7   : > { %12170 = vst [vmem:[#allocation28_spill] sm:$0xff] %v9844_v15 }
 0x2db   : > { %6934 = vmatmul.mubr.msk.bf16.gmra.mxu1 %vm2323_vm0, %v9670_v26  ;;  %6950 = vmatmul.mubr.msk.bf16.gmra.mxu0 %vm2323_vm0, %v9670_v26  ;;  %v9826_v26 = vpop.permute.xlu1 %3963 }
 0x2dc   : > { %3520 = vmatprep.mubr.bf16.mxu1 %v12031_v4  ;;  %3713 = vmatprep.mubr.bf16.mxu0 %v12031_v4 }
 0x2df   : > { %v9864_v3 = vpop.permute.xlu1 %3966 }
 0x2e3   : > { %v3056_v5 = vpop.f32.mrf.mxu1  ;;  %v3249_v8 = vpop.f32.mrf.mxu0  ;;  %6935 = vmatmul.mubr.msk.bf16.gmra.mxu1 %vm2323_vm0, %v9680_v31  ;;  %6951 = vmatmul.mubr.msk.bf16.gmra.mxu0 %vm2323_vm0, %v9680_v31 }
 0x2e4   : > { %3530 = vmatprep.mubr.bf16.mxu1 %v12031_v4  ;;  %3723 = vmatprep.mubr.bf16.mxu0 %v12031_v4  ;;  %v9847_v21 = vadd.f32 %v3056_v5, %v9831_v9  ;;  %v9850_v22 = vadd.f32 %v3249_v8, %v9834_v10  ;;  %v9886_v42 = vpop.permute.xlu1 %3969 }
 0x2e5   : > { %v3058_v31 = vpop.f32.mrf.mxu1  ;;  %v3251_v18 = vpop.f32.mrf.mxu0 }
 0x2e6   : > { %v9859_v7 = vadd.f32 %v3058_v31, %v9841_v14  ;;  %v9862_v1 = vadd.f32 %v3251_v18, %v9844_v15 }
 0x2e7   : > { %v3060_v19 = vpop.f32.mrf.mxu1  ;;  %v3253_v20 = vpop.f32.mrf.mxu0 }
 0x2e8   : > { %v9853_v23 = vadd.f32 %v3060_v19, %v9831_v9  ;;  %v9856_v24 = vadd.f32 %v3253_v20, %v9834_v10  ;;  %v9926_v5 = vpop.permute.xlu1 %3972 }
 0x2e9   : > { %v3062_v27 = vpop.f32.mrf.mxu1  ;;  %v3255_v28 = vpop.f32.mrf.mxu0 }
 0x2ea   : > { %v9871_v29 = vadd.f32 %v3062_v27, %v9841_v14  ;;  %v9874_v30 = vadd.f32 %v3255_v28, %v9844_v15 }
 0x2eb   : > { %v3066_v33 = vpop.f32.mrf.mxu1  ;;  %v3259_v34 = vpop.f32.mrf.mxu0  ;;  %6936 = vmatmul.mubr.msk.bf16.gmra.mxu1 %vm2323_vm0, %v9690_v45  ;;  %6952 = vmatmul.mubr.msk.bf16.gmra.mxu0 %vm2323_vm0, %v9690_v45 }
 0x2ec   : > { %3540 = vmatprep.mubr.bf16.mxu1 %v12031_v4  ;;  %3733 = vmatprep.mubr.bf16.mxu0 %v12031_v4  ;;  %v9889_v43 = vadd.f32 %v3066_v33, %v9831_v9  ;;  %v9892_v45 = vadd.f32 %v3259_v34, %v9834_v10 }
 0x2ed   : > { %v3068_v12 = vpop.f32.mrf.mxu1  ;;  %v3261_v38 = vpop.f32.mrf.mxu0 }
 0x2ee   : > { %v9901_v49 = vadd.f32 %v3068_v12, %v9841_v14  ;;  %v9904_v50 = vadd.f32 %v3261_v38, %v9844_v15 }
 0x2ef   : > { %v3070_v40 = vpop.f32.mrf.mxu1  ;;  %v3263_v41 = vpop.f32.mrf.mxu0 }
 0x2f0   : > { %v9895_v46 = vadd.f32 %v3070_v40, %v9831_v9  ;;  %v9898_v48 = vadd.f32 %v3263_v41, %v9834_v10 }
 0x2f1   : > { %v3072_v51 = vpop.f32.mrf.mxu1  ;;  %v3265_v52 = vpop.f32.mrf.mxu0 }
 0x2f2   : > { %v9911_v56 = vadd.f32 %v3072_v51, %v9841_v14  ;;  %v9914_v57 = vadd.f32 %v3265_v52, %v9844_v15 }
 0x2f3   : > { %v3076_v60 = vpop.f32.mrf.mxu1  ;;  %v3269_v61 = vpop.f32.mrf.mxu0  ;;  %6937 = vmatmul.mubr.msk.bf16.gmra.mxu1 %vm2323_vm0, %v9700_v59  ;;  %6953 = vmatmul.mubr.msk.bf16.gmra.mxu0 %vm2323_vm0, %v9700_v59 }
 0x2f4   : > { %3550 = vmatprep.mubr.bf16.mxu1 %v12031_v4  ;;  %3743 = vmatprep.mubr.bf16.mxu0 %v12031_v4  ;;  %v9929_v18 = vadd.f32 %v3076_v60, %v9831_v9  ;;  %v9932_v59 = vadd.f32 %v3269_v61, %v9834_v10  ;;  %v9960_v60 = vpop.permute.xlu1 %3975 }
 0x2f5   : > { %v3078_v44 = vpop.f32.mrf.mxu1  ;;  %v3271_v16 = vpop.f32.mrf.mxu0 }
 0x2f6   : > { %12171 = vst [vmem:[#allocation29_spill] sm:$0xff] %v9929_v18  ;;  %12172 = vst [vmem:[#allocation30_spill] sm:$0xff] %v9932_v59  ;;  %v9941_v27 = vadd.f32 %v3078_v44, %v9841_v14  ;;  %v9944_v28 = vadd.f32 %v3271_v16, %v9844_v15 }
 0x2f7   : > { %v3080_v8 = vpop.f32.mrf.mxu1  ;;  %v3273_v31 = vpop.f32.mrf.mxu0 }
 0x2f8   : > { %v9935_v19 = vadd.f32 %v3080_v8, %v9831_v9  ;;  %v9938_v20 = vadd.f32 %v3273_v31, %v9834_v10  ;;  %12175 = vst [vmem:[#allocation33_spill] sm:$0xff] %v9944_v28  ;;  %v9986_v55 = vpop.permute.xlu1 %3978 }
 0x2f9   : > { %v3082_v33 = vpop.f32.mrf.mxu1  ;;  %v3275_v34 = vpop.f32.mrf.mxu0 }
 0x2fa   : > { %12173 = vst [vmem:[#allocation31_spill] sm:$0xff] %v9935_v19  ;;  %12174 = vst [vmem:[#allocation32_spill] sm:$0xff] %v9938_v20  ;;  %v9951_v40 = vadd.f32 %v3082_v33, %v9841_v14  ;;  %v9954_v41 = vadd.f32 %v3275_v34, %v9844_v15 }
 0x2fb   : > { %v3086_v51 = vpop.f32.mrf.mxu1  ;;  %v3279_v52 = vpop.f32.mrf.mxu0  ;;  %6938 = vmatmul.mubr.msk.bf16.gmra.mxu1 %vm2323_vm0, %v9712_v17  ;;  %6954 = vmatmul.mubr.msk.bf16.gmra.mxu0 %vm2323_vm0, %v9712_v17 }
 0x2fc   : > { %12176 = vst [vmem:[#allocation34_spill] sm:$0xff] %v9954_v41  ;;  %3560 = vmatprep.mubr.bf16.mxu1 %v12031_v4  ;;  %3753 = vmatprep.mubr.bf16.mxu0 %v12031_v4  ;;  %v9969_v34 = vadd.f32 %v3086_v51, %v9831_v9  ;;  %v9972_v17 = vadd.f32 %v3279_v52, %v9834_v10  ;;  %v10008_v52 = vpop.permute.xlu1 %3981  ;;  %v10037_v51 = vpop.permute.xlu0 %3987 }
 0x2fd   : > { %v3088_v16 = vpop.f32.mrf.mxu1  ;;  %v3281_v8 = vpop.f32.mrf.mxu0 }
 0x2fe   : > { %12177 = vst [vmem:[#allocation35_spill] sm:$0xff] %v9969_v34  ;;  %12178 = vst [vmem:[#allocation36_spill] sm:$0xff] %v9972_v17  ;;  %v9981_v38 = vadd.f32 %v3088_v16, %v9841_v14  ;;  %v9984_v12 = vadd.f32 %v3281_v8, %v9844_v15 }
 0x2ff   : > { %v3090_v31 = vpop.f32.mrf.mxu1  ;;  %v3283_v33 = vpop.f32.mrf.mxu0 }
 0x300   : > { %v9975_v32 = vadd.f32 %v3090_v31, %v9831_v9  ;;  %v9978_v62 = vadd.f32 %v3283_v33, %v9834_v10  ;;  %12181 = vst [vmem:[#allocation39_spill] sm:$0xff] %v9981_v38  ;;  %12182 = vst [vmem:[#allocation40_spill] sm:$0xff] %v9984_v12 }
 0x301   : > { %v3092_v44 = vpop.f32.mrf.mxu1  ;;  %v3285_v61 = vpop.f32.mrf.mxu0 }
 0x302   : > { %12179 = vst [vmem:[#allocation37_spill] sm:$0xff] %v9975_v32  ;;  %12180 = vst [vmem:[#allocation38_spill] sm:$0xff] %v9978_v62  ;;  %v9993_v31 = vadd.f32 %v3092_v44, %v9841_v14  ;;  %v9996_v33 = vadd.f32 %v3285_v61, %v9844_v15 }
 0x303   : > { %v3096_v16 = vpop.f32.mrf.mxu1  ;;  %6939 = vmatmul.mubr.msk.bf16.gmra.mxu1 %vm2323_vm0, %v9726_v35  ;;  %6955 = vmatmul.mubr.msk.bf16.gmra.mxu0 %vm2323_vm0, %v9726_v35 }
 0x304   : > { %12183 = vst [vmem:[#allocation41_spill] sm:$0xff] %v9993_v31  ;;  %12184 = vst [vmem:[#allocation42_spill] sm:$0xff] %v9996_v33  ;;  %3570 = vmatprep.mubr.bf16.mxu1 %v12031_v4  ;;  %3763 = vmatprep.mubr.bf16.mxu0 %v12031_v4  ;;  %v10011_v63 = vadd.f32 %v3096_v16, %v9831_v9 }
 0x305   : > { %v3098_v44 = vpop.f32.mrf.mxu1 }
 0x306   : > { %12185 = vst [vmem:[#allocation43_spill] sm:$0xff] %v10011_v63  ;;  %v10017_v8 = vadd.f32 %v3098_v44, %v9841_v14  ;;  %v10032_v44 = vand.u32 127, %v2854_v0 }
 0x307   : > { %v3100_v61 = vpop.f32.mrf.mxu1 }
 0x308   : > { %v10014_v35 = vadd.f32 %v3100_v61, %v9831_v9  ;;  %12187 = vst [vmem:[#allocation45_spill] sm:$0xff] %v10017_v8  ;;  %vm4055_vm6 = vcmp.eq.s32.totalorder %v3961_v54, %v10032_v44  ;;  %vm4056_vm14 = vcmp.eq.s32.totalorder %v9826_v26, %v10032_v44  ;;  %v10062_v54 = vpop.permute.xlu0 %3993  ;;  %vm4057_vm3 = vcmp.eq.s32.totalorder %v9864_v3, %v10032_v44 }
 0x309   : > { %v3102_v39 = vpop.f32.mrf.mxu1  ;;  %vm4058_vm8 = vcmp.eq.s32.totalorder %v9886_v42, %v10032_v44  ;;  %vm4059_vm12 = vcmp.eq.s32.totalorder %v9926_v5, %v10032_v44  ;;  %vm4060_vm4 = vcmp.eq.s32.totalorder %v9960_v60, %v10032_v44  ;;  %v6961_v42 = vsel %vm4057_vm3, 1.0, %v12194_v6 }
 0x30a   : > { %12186 = vst [vmem:[#allocation44_spill] sm:$0xff] %v10014_v35  ;;  %v10022_v13 = vadd.f32 %v3102_v39, %v9841_v14  ;;  %v10035_v39 = vpop.permute.xlu1 %3984  ;;  %vm4061_vm9 = vcmp.eq.s32.totalorder %v9986_v55, %v10032_v44  ;;  %vm4062_vm7 = vcmp.eq.s32.totalorder %v10008_v52, %v10032_v44  ;;  %vm4064_vm10 = vcmp.eq.s32.totalorder %v10037_v51, %v10032_v44 }
 0x30b   : > { %v3106_v11 = vpop.f32.mrf.mxu1  ;;  %6940 = vmatmul.mubr.msk.bf16.gmra.mxu1 %vm2323_vm0, %v9738_v47  ;;  %6956 = vmatmul.mubr.msk.bf16.gmra.mxu0 %vm2323_vm0, %v9738_v47  ;;  %vm4063_vm5 = vcmp.eq.s32.totalorder %v10035_v39, %v10032_v44  ;;  %v6965_v55 = vsel %vm4061_vm9, 1.0, %v12194_v6  ;;  %vm4066_vm13 = vcmp.eq.s32.totalorder %v10062_v54, %v10032_v44 }
 0x30c   : > { %12188 = vst [vmem:[#allocation46_spill] sm:$0xff] %v10022_v13  ;;  %3580 = vmatprep.mubr.bf16.mxu1 %v12031_v4  ;;  %3773 = vmatprep.mubr.bf16.mxu0 %v12031_v4  ;;  %v10040_v36 = vadd.f32 %v3106_v11, %v9831_v9  ;;  %v6970_v54 = vsel %vm4066_vm13, 1.0, %v12194_v6 }
 0x30d   : > { %v3108_v61 = vpop.f32.mrf.mxu1 }
 0x30e   : > { %12189 = vst [vmem:[#allocation47_spill] sm:$0xff] %v10040_v36  ;;  %v10049_v0 = vadd.f32 %v3108_v61, %v9841_v14  ;;  %v12193_v61 = vmov 0   ;;  %v6960_v36 = vsel %vm4056_vm14, 1.0, %v12194_v6 }
 0x30f   : > { %v3110_v37 = vpop.f32.mrf.mxu1 }
 0x310   : > { %v10043_v47 = vadd.f32 %v3110_v37, %v9831_v9  ;;  %12191 = vst [vmem:[#allocation49_spill] sm:$0xff] %v10049_v0  ;;  %v10060_v37 = vpop.permute.xlu1 %3990  ;;  %v10078_v0 = vpop.permute.xlu0 %3999 }
 0x311   : > { %v3112_v16 = vpop.f32.mrf.mxu1  ;;  %vm4065_vm1 = vcmp.eq.s32.totalorder %v10060_v37, %v10032_v44  ;;  %vm4068_vm2 = vcmp.eq.s32.totalorder %v10078_v0, %v10032_v44 }
 0x312   : > { %12190 = vst [vmem:[#allocation48_spill] sm:$0xff] %v10043_v47  ;;  %v10054_v4 = vadd.f32 %v3112_v16, %v9841_v14  ;;  %v6959_v16 = vsel %vm4055_vm6, 1.0, %v12194_v6 }
 0x313   : > { %v3116_v11 = vpop.f32.mrf.mxu1  ;;  %6941 = vmatmul.mubr.msk.bf16.gmra.mxu1 %vm2323_vm0, %v9748_v58  ;;  %6957 = vmatmul.mubr.msk.bf16.gmra.mxu0 %vm2323_vm0, %v9748_v58  ;;  %v4151_v35 = vpack.c.bf16 %v6960_v36, %v6959_v16 }
 0x314   : > { %12192 = vst [vmem:[#allocation50_spill] sm:$0xff] %v10054_v4  ;;  %3590 = vmatprep.mubr.bf16.mxu1 %v12193_v61  ;;  %3783 = vmatprep.mubr.bf16.mxu0 %v12193_v61  ;;  %v10071_v58 = vadd.f32 %v3116_v11, %v9831_v9  ;;  %v10076_v26 = vpop.permute.xlu1 %3996  ;;  %v6963_v11 = vsel %vm4059_vm12, 1.0, %v12194_v6  ;;  %v10109_v5 = vpop.permute.xlu0 %4005 }
 0x315   : > { %v3118_v47 = vpop.f32.mrf.mxu1  ;;  %vm4067_vm11 = vcmp.eq.s32.totalorder %v10076_v26, %v10032_v44  ;;  %vm4070_vm14 = vcmp.eq.s32.totalorder %v10109_v5, %v10032_v44 }
 0x316   : > { %12195 = vst [vmem:[#allocation51_spill] sm:$0xff] %v10071_v58  ;;  %v10081_v4 = vadd.f32 %v3118_v47, %v9841_v14  ;;  %v6962_v47 = vsel %vm4058_vm8, 1.0, %v12194_v6 }
 0x317   : > { %v3120_v63 = vpop.f32.mrf.mxu1 }
 0x318   : > { %v10074_v8 = vadd.f32 %v3120_v63, %v9831_v9  ;;  %12197 = vst [vmem:[#allocation53_spill] sm:$0xff] %v10081_v4  ;;  %v10107_v61 = vpop.permute.xlu1 %4002 }
 0x319   : > { %v3122_v13 = vpop.f32.mrf.mxu1  ;;  %vm4069_vm6 = vcmp.eq.s32.totalorder %v10107_v61, %v10032_v44  ;;  %v6974_v61 = vsel %vm4070_vm14, 1.0, %v12194_v6 }
 0x31a   : > { %12196 = vst [vmem:[#allocation52_spill] sm:$0xff] %v10074_v8  ;;  %v10086_v36 = vadd.f32 %v3122_v13, %v9841_v14 }
 0x31b   : > { %v3126_v63 = vpop.f32.mrf.mxu1  ;;  %6942 = vmatmul.mubr.msk.bf16.gmra.mxu1 %vm2323_vm0, %v9756_v2  ;;  %6958 = vmatmul.mubr.msk.bf16.gmra.mxu0 %vm2323_vm0, %v9756_v2  ;;  %v6964_v2 = vsel %vm4060_vm4, 1.0, %v12194_v6 }
 0x31c   : > { %12198 = vst [vmem:[#allocation54_spill] sm:$0xff] %v10086_v36  ;;  %7803 = vmatprep.mubr.msk.bf16.mxu1 %vm4167_vm15, %v4151_v35  ;;  %v10112_v60 = vadd.f32 %v3126_v63, %v9831_v9  ;;  %v4152_v35 = vpack.c.bf16 %v6962_v47, %v6961_v42  ;;  %v4153_v8 = vpack.c.bf16 %v6964_v2, %v6963_v11  ;;  %v6966_v42 = vsel %vm4062_vm7, 1.0, %v12194_v6  ;;  %v4009_v52 = vpop.permute.xlu1 %4008  ;;  %v4012_v47 = vpop.permute.xlu0 %4011 }
 0x31d   : > { %v3128_v3 = vpop.f32.mrf.mxu1  ;;  %v6967_v11 = vsel %vm4063_vm5, 1.0, %v12194_v6  ;;  %v6968_v2 = vsel %vm4064_vm10, 1.0, %v12194_v6  ;;  %vm4071_vm3 = vcmp.eq.s32.totalorder %v4009_v52, %v10032_v44  ;;  %vm4072_vm8 = vcmp.eq.s32.totalorder %v4012_v47, %v10032_v44 }
 0x31e   : > { %12199 = vst [vmem:[#allocation55_spill] sm:$0xff] %v10112_v60  ;;  %v10118_v4 = vadd.f32 %v3128_v3, %v9841_v14  ;;  %v4155_v36 = vpack.c.bf16 %v6968_v2, %v6967_v11  ;;  %v6969_v11 = vsel %vm4065_vm1, 1.0, %v12194_v6  ;;  %v6971_v2 = vsel %vm4067_vm11, 1.0, %v12194_v6 }
 0x31f   : > { %v3130_v16 = vpop.f32.mrf.mxu1  ;;  %v6976_v5 = vsel %vm4072_vm8, 1.0, %v12194_v6 }
 0x320   : > { %v10115_v13 = vadd.f32 %v3130_v16, %v9831_v9  ;;  %12201 = vst [vmem:[#allocation57_spill] sm:$0xff] %v10118_v4 }
 0x321   : > { %v3132_v58 = vpop.f32.mrf.mxu1 }
 0x322   : > { %12200 = vst [vmem:[#allocation56_spill] sm:$0xff] %v10115_v13  ;;  %v10123_v10 = vadd.f32 %v3132_v58, %v9841_v14 }
 0x323   : > { %v3136_v63 = vpop.f32.mrf.mxu1  ;;  %7804 = vmatmul.mubr.msk.bf16.vlgmr.msra.gmra.mxu1 %vm4167_vm15, %v4152_v35  ;;  %v4154_v35 = vpack.c.bf16 %v6966_v42, %v6965_v55  ;;  %v4018_v55 = vpop.permute.xlu0 %4017 }
 0x324   : > { %12202 = vst [vmem:[#allocation58_spill] sm:$0xff] %v10123_v10  ;;  %7807 = vmatprep.mubr.msk.bf16.mxu1 %vm4167_vm15, %v4153_v8  ;;  %v10142_v16 = vadd.f32 %v3136_v63, %v9831_v9  ;;  %vm4074_vm4 = vcmp.eq.s32.totalorder %v4018_v55, %v10032_v44 }
 0x325   : > { %v3138_v58 = vpop.f32.mrf.mxu1 }
 0x326   : > { %12203 = vst [vmem:[#allocation59_spill] sm:$0xff] %v10142_v16  ;;  %v10148_v3 = vadd.f32 %v3138_v58, %v9841_v14  ;;  %v4015_v58 = vpop.permute.xlu1 %4014 }
 0x327   : > { %v3140_v39 = vpop.f32.mrf.mxu1  ;;  %v4024_v16 = vpop.permute.xlu0 %4023  ;;  %vm4073_vm12 = vcmp.eq.s32.totalorder %v4015_v58, %v10032_v44 }
 0x328   : > { %v10145_v51 = vadd.f32 %v3140_v39, %v9831_v9  ;;  %12205 = vst [vmem:[#allocation61_spill] sm:$0xff] %v10148_v3  ;;  %v6972_v39 = vsel %vm4068_vm2, 1.0, %v12194_v6  ;;  %vm4076_vm7 = vcmp.eq.s32.totalorder %v4024_v16, %v10032_v44 }
 0x329   : > { %v3142_v8 = vpop.f32.mrf.mxu1  ;;  %v4157_v42 = vpack.c.bf16 %v6972_v39, %v6971_v2 }
 0x32a   : > { %12204 = vst [vmem:[#allocation60_spill] sm:$0xff] %v10145_v51  ;;  %v10153_v13 = vadd.f32 %v3142_v8, %v9841_v14  ;;  %v4156_v8 = vpack.c.bf16 %v6970_v54, %v6969_v11  ;;  %v6973_v11 = vsel %vm4069_vm6, 1.0, %v12194_v6  ;;  %v6975_v54 = vsel %vm4071_vm3, 1.0, %v12194_v6 }
 0x32b   : > { %v3146_v63 = vpop.f32.mrf.mxu1  ;;  %7808 = vmatmul.mubr.msk.bf16.gmra.mxu1 %vm4167_vm15, %v4154_v35  ;;  %v4159_v3 = vpack.c.bf16 %v6976_v5, %v6975_v54  ;;  %v6978_v54 = vsel %vm4074_vm4, 1.0, %v12194_v6  ;;  %vm8346_vm4 = vmmov 0  }
 0x32c   : > { %12206 = vst [vmem:[#allocation62_spill] sm:$0xff] %v10153_v13  ;;  %7811 = vmatprep.mubr.msk.bf16.mxu1 %vm4167_vm15, %v4155_v36  ;;  %v10172_v35 = vadd.f32 %v3146_v63, %v9831_v9  ;;  %v4021_v36 = vpop.permute.xlu1 %4020 }
 0x32d   : > { %v3148_v37 = vpop.f32.mrf.mxu1  ;;  %vm4075_vm9 = vcmp.eq.s32.totalorder %v4021_v36, %v10032_v44 }
 0x32e   : > { %12207 = vst [vmem:[#allocation63_spill] sm:$0xff] %v10172_v35  ;;  %v10178_v51 = vadd.f32 %v3148_v37, %v9841_v14  ;;  %v6979_v55 = vsel %vm4075_vm9, 1.0, %v12194_v6 }
 0x32f   : > { %v3150_v26 = vpop.f32.mrf.mxu1 }
 0x330   : > { %v10175_v0 = vadd.f32 %v3150_v26, %v9831_v9  ;;  %12209 = vst [vmem:[#allocation65_spill] sm:$0xff] %v10178_v51  ;;  %v4027_v39 = vpop.permute.xlu1 %4026  ;;  %v4030_v26 = vpop.permute.xlu0 %4029 }
 0x331   : > { %v3152_v60 = vpop.f32.mrf.mxu1  ;;  %vm4077_vm5 = vcmp.eq.s32.totalorder %v4027_v39, %v10032_v44  ;;  %vm4078_vm10 = vcmp.eq.s32.totalorder %v4030_v26, %v10032_v44 }
 0x332   : > { %12208 = vst [vmem:[#allocation64_spill] sm:$0xff] %v10175_v0  ;;  %v10183_v13 = vadd.f32 %v3152_v60, %v9841_v14  ;;  %v6981_v39 = vsel %vm4077_vm5, 1.0, %v12194_v6  ;;  %v6982_v26 = vsel %vm4078_vm10, 1.0, %v12194_v6 }
 0x333   : > { %v3156_v63 = vpop.f32.mrf.mxu1  ;;  %7812 = vmatmul.mubr.msk.bf16.gmra.mxu1 %vm4167_vm15, %v4156_v8  ;;  %v4158_v8 = vpack.c.bf16 %v6974_v61, %v6973_v11  ;;  %v6977_v61 = vsel %vm4073_vm12, 1.0, %v12194_v6  ;;  %vm4537_vm12 = vcmask 523264  }
 0x334   : > { %12210 = vst [vmem:[#allocation66_spill] sm:$0xff] %v10183_v13  ;;  %7815 = vmatprep.mubr.msk.bf16.mxu1 %vm4167_vm15, %v4157_v42  ;;  %v10200_v52 = vadd.f32 %v3156_v63, %v9831_v9  ;;  %v4033_v58 = vpop.permute.xlu1 %4032  ;;  %v4036_v5 = vpop.permute.xlu0 %4035 }
 0x335   : > { %v3158_v60 = vpop.f32.mrf.mxu1  ;;  %vm4079_vm1 = vcmp.eq.s32.totalorder %v4033_v58, %v10032_v44  ;;  %vm4080_vm13 = vcmp.eq.s32.totalorder %v4036_v5, %v10032_v44 }
 0x336   : > { %12211 = vst [vmem:[#allocation67_spill] sm:$0xff] %v10200_v52  ;;  %v10206_v37 = vadd.f32 %v3158_v60, %v9841_v14 }
 0x337   : > { %v3160_v2 = vpop.f32.mrf.mxu1 }
 0x338   : > { %v10203_v47 = vadd.f32 %v3160_v2, %v9831_v9  ;;  %12213 = vst [vmem:[#allocation69_spill] sm:$0xff] %v10206_v37  ;;  %v6980_v2 = vsel %vm4076_vm7, 1.0, %v12194_v6 }
 0x339   : > { %v3162_v42 = vpop.f32.mrf.mxu1  ;;  %v4161_v4 = vpack.c.bf16 %v6980_v2, %v6979_v55  ;;  %v6983_v2 = vsel %vm4079_vm1, 1.0, %v12194_v6 }
 0x33a   : > { %12212 = vst [vmem:[#allocation68_spill] sm:$0xff] %v10203_v47  ;;  %v10211_v10 = vadd.f32 %v3162_v42, %v9841_v14  ;;  %v4160_v42 = vpack.c.bf16 %v6978_v54, %v6977_v61  ;;  %v4039_v61 = vpop.permute.xlu1 %4038 }
 0x33b   : > { %v3166_v63 = vpop.f32.mrf.mxu1  ;;  %7816 = vmatmul.mubr.msk.bf16.gmra.mxu1 %vm4167_vm15, %v4158_v8  ;;  %vm4081_vm11 = vcmp.eq.s32.totalorder %v4039_v61, %v10032_v44 }
 0x33c   : > { %12214 = vst [vmem:[#allocation70_spill] sm:$0xff] %v10211_v10  ;;  %7819 = vmatprep.mubr.msk.bf16.mxu1 %vm4167_vm15, %v4159_v3  ;;  %v10226_v36 = vadd.f32 %v3166_v63, %v9831_v9 }
 0x33d   : > { %v3168_v11 = vpop.f32.mrf.mxu1 }
 0x33e   : > { %12215 = vst [vmem:[#allocation71_spill] sm:$0xff] %v10226_v36  ;;  %v10232_v60 = vadd.f32 %v3168_v11, %v9841_v14  ;;  %v4042_v11 = vpop.permute.xlu0 %4041  ;;  %v4045_v54 = vpop.permute.xlu1 %4044 }
 0x33f   : > { %v3170_v8 = vpop.f32.mrf.mxu1  ;;  %vm4082_vm2 = vcmp.eq.s32.totalorder %v4042_v11, %v10032_v44  ;;  %vm4083_vm6 = vcmp.eq.s32.totalorder %v4045_v54, %v10032_v44 }
 0x340   : > { %v10229_v16 = vadd.f32 %v3170_v8, %v9831_v9  ;;  %12217 = vst [vmem:[#allocation73_spill] sm:$0xff] %v10232_v60  ;;  %v6984_v8 = vsel %vm4080_vm13, 1.0, %v12194_v6 }
 0x341   : > { %v3172_v3 = vpop.f32.mrf.mxu1 }
 0x342   : > { %12216 = vst [vmem:[#allocation72_spill] sm:$0xff] %v10229_v16  ;;  %v10237_v47 = vadd.f32 %v3172_v3, %v9841_v14  ;;  %v4162_v3 = vpack.c.bf16 %v6982_v26, %v6981_v39  ;;  %v4048_v36 = vpop.permute.xlu0 %4047  ;;  %v6985_v39 = vsel %vm4081_vm11, 1.0, %v12194_v6  ;;  %v6986_v26 = vsel %vm4082_vm2, 1.0, %v12194_v6 }
 0x343   : > { %v3176_v63 = vpop.f32.mrf.mxu1  ;;  %7820 = vmatmul.mubr.msk.bf16.gmra.mxu1 %vm4167_vm15, %v4160_v42  ;;  %vm4084_vm14 = vcmp.eq.s32.totalorder %v4048_v36, %v10032_v44  ;;  %v4164_v54 = vpack.c.bf16 %v6986_v26, %v6985_v39 }
 0x344   : > { %12218 = vst [vmem:[#allocation74_spill] sm:$0xff] %v10237_v47  ;;  %7823 = vmatprep.mubr.msk.bf16.mxu1 %vm4167_vm15, %v4161_v4  ;;  %v10254_v5 = vadd.f32 %v3176_v63, %v9831_v9  ;;  %v4163_v4 = vpack.c.bf16 %v6984_v8, %v6983_v2  ;;  %v6987_v2 = vsel %vm4083_vm6, 1.0, %v12194_v6  ;;  %v6988_v61 = vsel %vm4084_vm14, 1.0, %v12194_v6  ;;  %v4051_v8 = vpop.permute.xlu1 %4050 }
 0x345   : > { %v10247_v55 = vpop.f32.mrf.mxu1  ;;  %v4165_v16 = vpack.c.bf16 %v6988_v61, %v6987_v2  ;;  %vm4085_vm3 = vcmp.eq.s32.totalorder %v4051_v8, %v10032_v44 }
 0x346   : > { %12219 = vst [vmem:[#allocation75_spill] sm:$0xff] %v10247_v55  ;;  %12220 = vst [vmem:[#allocation76_spill] sm:$0xff] %v10254_v5 }
 0x347   : > { %v3180_v58 = vpop.f32.mrf.mxu1 }
 0x348   : > { %v10257_v42 = vadd.f32 %v3180_v58, %v9831_v9  ;;  %v4054_v58 = vpop.permute.xlu0 %4053 }
 0x349   : > { %v10259_v52 = vpop.f32.mrf.mxu1  ;;  %vm4086_vm8 = vcmp.eq.s32.totalorder %v4054_v58, %v10032_v44 }
 0x34a   : > { %12221 = vst [vmem:[#allocation77_spill] sm:$0xff] %v10257_v42  ;;  %12222 = vst [vmem:[#allocation78_spill] sm:$0xff] %v10259_v52  ;;  %v6990_v39 = vsel %vm4086_vm8, 1.0, %v12194_v6 }
 0x34b   : > { %v3186_v60 = vpop.f32.mrf.mxu1  ;;  %7824 = vmatmul.mubr.msk.bf16.gmra.mxu1 %vm4167_vm15, %v4162_v3 }
 0x34c   : > { %7827 = vmatprep.mubr.msk.bf16.mxu1 %vm4167_vm15, %v4163_v4  ;;  %v10276_v3 = vadd.f32 %v3186_v60, %v9831_v9 }
 0x34d   : > { %v10269_v63 = vpop.f32.mrf.mxu1 }
 0x34e   : > { %12223 = vst [vmem:[#allocation79_spill] sm:$0xff] %v10269_v63  ;;  %12224 = vst [vmem:[#allocation80_spill] sm:$0xff] %v10276_v3 }
 0x34f   : > { %v3190_v11 = vpop.f32.mrf.mxu1 }
 0x350   : > { %v10279_v36 = vadd.f32 %v3190_v11, %v9831_v9  ;;  %v6989_v11 = vsel %vm4085_vm3, 1.0, %v12194_v6 }
 0x351   : > { %v10281_v4 = vpop.f32.mrf.mxu1  ;;  %v4166_v8 = vpack.c.bf16 %v6990_v39, %v6989_v11 }
 0x352   : > { %12225 = vst [vmem:[#allocation81_spill] sm:$0xff] %v10279_v36  ;;  %12226 = vst [vmem:[#allocation82_spill] sm:$0xff] %v10281_v4 }
 0x353   : > { %v3196_v42 = vpop.f32.mrf.mxu1  ;;  %7828 = vmatmul.mubr.msk.bf16.gmra.mxu1 %vm4167_vm15, %v4164_v54 }
 0x354   : > { %7831 = vmatprep.mubr.msk.bf16.mxu1 %vm4167_vm15, %v4165_v16  ;;  %v10294_v2 = vadd.f32 %v3196_v42, %v9831_v9 }
 0x355   : > { %v10289_v60 = vpop.f32.mrf.mxu1 }
 0x356   : > { %12227 = vst [vmem:[#allocation83_spill] sm:$0xff] %v10289_v60  ;;  %12228 = vst [vmem:[#allocation84_spill] sm:$0xff] %v10294_v2 }
 0x357   : > { %v3200_v26 = vpop.f32.mrf.mxu1 }
 0x358   : > { %v10297_v61 = vadd.f32 %v3200_v26, %v9831_v9  ;;  %v2872_v26 = vsub.s32 4, %v9813_v25 }
 0x359   : > { %v10299_v44 = vpop.f32.mrf.mxu1 }
 0x35a   : > { %12229 = vst [vmem:[#allocation85_spill] sm:$0xff] %v10297_v61  ;;  %12230 = vst [vmem:[#allocation86_spill] sm:$0xff] %v10299_v44  ;;  %v10318_v2 = vrot.slane %v9818_v53, %v2872_v26 }
 0x35b   : > { %v3206_v16 = vpop.f32.mrf.mxu1  ;;  %7832 = vmatmul.mubr.msk.bf16.gmra.mxu1 %vm4167_vm15, %v4166_v8 }
 0x35c   : > { %v10307_v3 = vadd.f32 %v3206_v16, %v9831_v9 }
 0x35d   : > { %v10304_v54 = vpop.f32.mrf.mxu1 }
 0x35e   : > { %12231 = vst [vmem:[#allocation87_spill] sm:$0xff] %v10304_v54  ;;  %12232 = vst [vmem:[#allocation88_spill] sm:$0xff] %v10307_v3 }
 0x35f   : > { %v3210_v5 = vpop.f32.mrf.mxu1 }
 0x360   : > { %v10310_v42 = vadd.f32 %v3210_v5, %v9831_v9 }
 0x361   : > { %v10313_v11 = vpop.f32.mrf.mxu1 }
 0x362   : > { %12233 = vst [vmem:[#allocation89_spill] sm:$0xff] %v10310_v42  ;;  %12234 = vst [vmem:[#allocation90_spill] sm:$0xff] %v10313_v11 }
 0x363   : > { %v3442_v58 = vpop.f32.mrf.mxu1 }
 0x364   : > { %v10323_v16 = vadd.f32 %v3442_v58, %v10318_v2 }
 0x365   : > { %v10320_v8 = vpop.f32.mrf.mxu1 }
 0x367   : > { %v3446_v61 = vpop.f32.mrf.mxu1 }
 0x368   : > { %v10326_v9 = vadd.f32 %v3446_v61, %v10318_v2 }
 0x369   : > { %v10328_v5 = vpop.f32.mrf.mxu1 }
 0x36b   : > { %v3452_v11 = vpop.f32.mrf.mxu1 }
 0x36c   : > { %v10335_v53 = vadd.f32 %v3452_v11, %v10318_v2 }
 0x36d   : > { %v10332_v39 = vpop.f32.mrf.mxu1 }
 0x36f   : > { %v3456_v3 = vpop.f32.mrf.mxu1 }
 0x370   : > { %v10338_v26 = vadd.f32 %v3456_v3, %v10318_v2 }
 0x371   : > { %v10340_v58 = vpop.f32.mrf.mxu1 }
 0x373   : > { %v3462_v42 = vpop.f32.mrf.mxu1 }
 0x374   : > { %v10347_v54 = vadd.f32 %v3462_v42, %v10318_v2 }
 0x375   : > { %v10344_v36 = vpop.f32.mrf.mxu1 }
 0x377   : > { %v3466_v60 = vpop.f32.mrf.mxu1 }
 0x378   : > { %v10350_v44 = vadd.f32 %v3466_v60, %v10318_v2 }
 0x379   : > { %v10352_v11 = vpop.f32.mrf.mxu1 }
 0x37b   : > { %v3472_v63 = vpop.f32.mrf.mxu1 }
 0x37c   : > { %v10359_v61 = vadd.f32 %v3472_v63, %v10318_v2 }
 0x37d   : > { %v10356_v4 = vpop.f32.mrf.mxu1 }
 0x37e   : > { %12235 = vst [vmem:[#allocation91_spill] sm:$0xff] %v10359_v61  ;;  %v8002_v61 = vld [vmem:[#allocation5 + $0x38] sm:$0xff]  }
 0x37f   : > { %v3476_v47 = vpop.f32.mrf.mxu1 }
 0x380   : > { %v10362_v55 = vadd.f32 %v3476_v47, %v10318_v2 }
 0x381   : > { %v10364_v42 = vpop.f32.mrf.mxu1 }
 0x382   : > { %12236 = vst [vmem:[#allocation92_spill] sm:$0xff] %v10362_v55  ;;  %v8004_v55 = vld [vmem:[#allocation5 + $0x70] sm:$0xff]  }
 0x383   : > { %v3482_v52 = vpop.f32.mrf.mxu1 }
 0x384   : > { %v10371_v3 = vadd.f32 %v3482_v52, %v10318_v2 }
 0x385   : > { %v10368_v14 = vpop.f32.mrf.mxu1 }
 0x386   : > { %12237 = vst [vmem:[#allocation93_spill] sm:$0xff] %v10368_v14  ;;  %12238 = vst [vmem:[#allocation94_spill] sm:$0xff] %v10371_v3  ;;  %v8005_v14 = vld [vmem:[#allocation5 + $0xf0] sm:$0xff]  }
 0x387   : > { %v3486_v37 = vpop.f32.mrf.mxu1 }
 0x388   : > { %v10374_v10 = vadd.f32 %v3486_v37, %v10318_v2 }
 0x389   : > { %v10376_v63 = vpop.f32.mrf.mxu1 }
 0x38a   : > { %12239 = vst [vmem:[#allocation95_spill] sm:$0xff] %v10374_v10  ;;  %12240 = vst [vmem:[#allocation96_spill] sm:$0xff] %v10376_v63 }
 0x38b   : > { %v3492_v35 = vpop.f32.mrf.mxu1 }
 0x38c   : > { %v10383_v60 = vadd.f32 %v3492_v35, %v10318_v2 }
 0x38d   : > { %v10380_v0 = vpop.f32.mrf.mxu1 }
 0x38e   : > { %12241 = vst [vmem:[#allocation97_spill] sm:$0xff] %v10380_v0  ;;  %12242 = vst [vmem:[#allocation98_spill] sm:$0xff] %v10383_v60 }
 0x38f   : > { %v3496_v51 = vpop.f32.mrf.mxu1 }
 0x390   : > { %v10386_v13 = vadd.f32 %v3496_v51, %v10318_v2 }
 0x391   : > { %v10388_v52 = vpop.f32.mrf.mxu1 }
 0x392   : > { %12243 = vst [vmem:[#allocation99_spill] sm:$0xff] %v10386_v13  ;;  %12244 = vst [vmem:[#allocation100_spill] sm:$0xff] %v10388_v52  ;;  %v8001_v52 = vld [vmem:[#allocation5 + $0xf8] sm:$0xff]  }
 0x393   : > { %v3502_v6 = vpop.f32.mrf.mxu1  ;;  %7374 = vmatprep.subr.bf16.mxu1 %v8001_v52  ;;  %v8013_v52 = vld [vmem:[#allocation5 + $0xe0] sm:$0xff]  }
 0x394   : > { %v10395_v47 = vadd.f32 %v3502_v6, %v10318_v2 }
 0x395   : > { %v10392_v17 = vpop.f32.mrf.mxu1 }
 0x396   : > { %12245 = vst [vmem:[#allocation101_spill] sm:$0xff] %v10392_v17  ;;  %12246 = vst [vmem:[#allocation102_spill] sm:$0xff] %v10395_v47 }
 0x397   : > { %v3506_v62 = vpop.f32.mrf.mxu1 }
 0x398   : > { %v10398_v34 = vadd.f32 %v3506_v62, %v10318_v2 }
 0x399   : > { %v10400_v35 = vpop.f32.mrf.mxu1 }
 0x39a   : > { %12247 = vst [vmem:[#allocation103_spill] sm:$0xff] %v10398_v34  ;;  %12248 = vst [vmem:[#allocation104_spill] sm:$0xff] %v10400_v35 }
 0x39b   : > { %v3512_v32 = vpop.f32.mrf.mxu1 }
 0x39c   : > { %v10407_v37 = vadd.f32 %v3512_v32, %v10318_v2 }
 0x39d   : > { %v10404_v15 = vpop.f32.mrf.mxu1 }
 0x39e   : > { %12249 = vst [vmem:[#allocation105_spill] sm:$0xff] %v10404_v15  ;;  %12250 = vst [vmem:[#allocation106_spill] sm:$0xff] %v10407_v37 }
 0x39f   : > { %v3516_v12 = vpop.f32.mrf.mxu1 }
 0x3a0   : > { %v10410_v60 = vadd.f32 %v3516_v12, %v10318_v2 }
 0x3a1   : > { %v10412_v6 = vpop.f32.mrf.mxu1 }
 0x3a2   : > { %12251 = vst [vmem:[#allocation107_spill] sm:$0xff] %v10410_v60  ;;  %12252 = vst [vmem:[#allocation108_spill] sm:$0xff] %v10412_v6 }
 0x3a3   : > { %v3522_v13 = vpop.f32.mrf.mxu1 }
 0x3a4   : > { %v10419_v51 = vadd.f32 %v3522_v13, %v10318_v2 }
 0x3a5   : > { %v10416_v17 = vpop.f32.mrf.mxu1 }
 0x3a6   : > { %12253 = vst [vmem:[#allocation109_spill] sm:$0xff] %v10416_v17  ;;  %12254 = vst [vmem:[#allocation110_spill] sm:$0xff] %v10419_v51 }
 0x3a7   : > { %v3526_v35 = vpop.f32.mrf.mxu1 }
 0x3a8   : > { %v10422_v47 = vadd.f32 %v3526_v35, %v10318_v2 }
 0x3a9   : > { %v10424_v32 = vpop.f32.mrf.mxu1 }
 0x3aa   : > { %12255 = vst [vmem:[#allocation111_spill] sm:$0xff] %v10422_v47  ;;  %12256 = vst [vmem:[#allocation112_spill] sm:$0xff] %v10424_v32 }
 0x3ab   : > { %v3532_v34 = vpop.f32.mrf.mxu1 }
 0x3ac   : > { %v10431_v62 = vadd.f32 %v3532_v34, %v10318_v2 }
 0x3ad   : > { %v10428_v15 = vpop.f32.mrf.mxu1 }
 0x3ae   : > { %12257 = vst [vmem:[#allocation113_spill] sm:$0xff] %v10428_v15  ;;  %12258 = vst [vmem:[#allocation114_spill] sm:$0xff] %v10431_v62 }
 0x3af   : > { %v3536_v6 = vpop.f32.mrf.mxu1 }
 0x3b0   : > { %v10434_v37 = vadd.f32 %v3536_v6, %v10318_v2 }
 0x3b1   : > { %v10436_v13 = vpop.f32.mrf.mxu1 }
 0x3b2   : > { %12259 = vst [vmem:[#allocation115_spill] sm:$0xff] %v10434_v37  ;;  %12260 = vst [vmem:[#allocation116_spill] sm:$0xff] %v10436_v13 }
 0x3b3   : > { %v3542_v60 = vpop.f32.mrf.mxu1 }
 0x3b4   : > { %v10443_v12 = vadd.f32 %v3542_v60, %v10318_v2 }
 0x3b5   : > { %v10440_v17 = vpop.f32.mrf.mxu1 }
 0x3b6   : > { %12261 = vst [vmem:[#allocation117_spill] sm:$0xff] %v10440_v17  ;;  %12262 = vst [vmem:[#allocation118_spill] sm:$0xff] %v10443_v12 }
 0x3b7   : > { %v3546_v32 = vpop.f32.mrf.mxu1 }
 0x3b8   : > { %v10446_v51 = vadd.f32 %v3546_v32, %v10318_v2 }
 0x3b9   : > { %v10448_v34 = vpop.f32.mrf.mxu1 }
 0x3ba   : > { %12263 = vst [vmem:[#allocation119_spill] sm:$0xff] %v10446_v51  ;;  %12264 = vst [vmem:[#allocation120_spill] sm:$0xff] %v10448_v34 }
 0x3bb   : > { %v3552_v47 = vpop.f32.mrf.mxu1 }
 0x3bc   : > { %v10455_v35 = vadd.f32 %v3552_v47, %v10318_v2 }
 0x3bd   : > { %v10452_v15 = vpop.f32.mrf.mxu1 }
 0x3be   : > { %12265 = vst [vmem:[#allocation121_spill] sm:$0xff] %v10452_v15  ;;  %12266 = vst [vmem:[#allocation122_spill] sm:$0xff] %v10455_v35 }
 0x3bf   : > { %v3556_v13 = vpop.f32.mrf.mxu1 }
 0x3c0   : > { %v10458_v62 = vadd.f32 %v3556_v13, %v10318_v2 }
 0x3c1   : > { %v10460_v60 = vpop.f32.mrf.mxu1 }
 0x3c2   : > { %12267 = vst [vmem:[#allocation123_spill] sm:$0xff] %v10458_v62  ;;  %12268 = vst [vmem:[#allocation124_spill] sm:$0xff] %v10460_v60 }
 0x3c3   : > { %v3562_v37 = vpop.f32.mrf.mxu1 }
 0x3c4   : > { %v10467_v6 = vadd.f32 %v3562_v37, %v10318_v2 }
 0x3c5   : > { %v10464_v17 = vpop.f32.mrf.mxu1 }
 0x3c6   : > { %12269 = vst [vmem:[#allocation125_spill] sm:$0xff] %v10464_v17  ;;  %12270 = vst [vmem:[#allocation126_spill] sm:$0xff] %v10467_v6 }
 0x3c7   : > { %v3566_v34 = vpop.f32.mrf.mxu1 }
 0x3c8   : > { %v10470_v12 = vadd.f32 %v3566_v34, %v10318_v2 }
 0x3c9   : > { %v10472_v47 = vpop.f32.mrf.mxu1 }
 0x3ca   : > { %12271 = vst [vmem:[#allocation127_spill] sm:$0xff] %v10470_v12  ;;  %12272 = vst [vmem:[#allocation128_spill] sm:$0xff] %v10472_v47 }
 0x3cb   : > { %v3572_v51 = vpop.f32.mrf.mxu1 }
 0x3cc   : > { %v10479_v32 = vadd.f32 %v3572_v51, %v10318_v2  ;;  %v10496_v51 = vpop.f32.mrf.mxu0 }
 0x3cd   : > { %v10476_v15 = vpop.f32.mrf.mxu1  ;;  %12280 = vst [vmem:[#allocation136_spill] sm:$0xff] %v10496_v51 }
 0x3ce   : > { %12273 = vst [vmem:[#allocation129_spill] sm:$0xff] %v10476_v15  ;;  %12274 = vst [vmem:[#allocation130_spill] sm:$0xff] %v10479_v32 }
 0x3cf   : > { %v3576_v60 = vpop.f32.mrf.mxu1 }
 0x3d0   : > { %v10482_v35 = vadd.f32 %v3576_v60, %v10318_v2 }
 0x3d1   : > { %v10484_v37 = vpop.f32.mrf.mxu1 }
 0x3d2   : > { %12275 = vst [vmem:[#allocation131_spill] sm:$0xff] %v10482_v35  ;;  %12276 = vst [vmem:[#allocation132_spill] sm:$0xff] %v10484_v37  ;;  %v10502_v37 = vpop.f32.mrf.mxu0 }
 0x3d3   : > { %v3582_v62 = vpop.f32.mrf.mxu1  ;;  %12282 = vst [vmem:[#allocation138_spill] sm:$0xff] %v10502_v37 }
 0x3d4   : > { %v10491_v13 = vadd.f32 %v3582_v62, %v10318_v2 }
 0x3d5   : > { %v10488_v17 = vpop.f32.mrf.mxu1 }
 0x3d6   : > { %12277 = vst [vmem:[#allocation133_spill] sm:$0xff] %v10488_v17  ;;  %12278 = vst [vmem:[#allocation134_spill] sm:$0xff] %v10491_v13 }
 0x3d7   : > { %v3586_v47 = vpop.f32.mrf.mxu1 }
 0x3d8   : > { %v10494_v6 = vadd.f32 %v3586_v47, %v10318_v2  ;;  %v10512_v47 = vpop.f32.mrf.mxu0 }
 0x3d9   : > { %v10498_v12 = vpop.f32.mrf.mxu1  ;;  %12286 = vst [vmem:[#allocation142_spill] sm:$0xff] %v10512_v47 }
 0x3da   : > { %12279 = vst [vmem:[#allocation135_spill] sm:$0xff] %v10494_v6  ;;  %12281 = vst [vmem:[#allocation137_spill] sm:$0xff] %v10498_v12  ;;  %v10518_v13 = vpop.f32.mrf.mxu0 }
 0x3db   : > { %v3592_v15 = vpop.f32.mrf.mxu1  ;;  %12288 = vst [vmem:[#allocation144_spill] sm:$0xff] %v10518_v13 }
 0x3dc   : > { %v10507_v35 = vadd.f32 %v3592_v15, %v10318_v2  ;;  %v10522_v37 = vpop.f32.mrf.mxu0 }
 0x3dd   : > { %v10504_v34 = vpop.f32.mrf.mxu1  ;;  %12289 = vst [vmem:[#allocation145_spill] sm:$0xff] %v10522_v37 }
 0x3de   : > { %12283 = vst [vmem:[#allocation139_spill] sm:$0xff] %v10504_v34  ;;  %12284 = vst [vmem:[#allocation140_spill] sm:$0xff] %v10507_v35 }
 0x3df   : > { %v3596_v32 = vpop.f32.mrf.mxu1 }
 0x3e0   : > { %v10510_v62 = vadd.f32 %v3596_v32, %v10318_v2  ;;  %v10530_v32 = vpop.f32.mrf.mxu0 }
 0x3e1   : > { %v10514_v17 = vpop.f32.mrf.mxu1  ;;  %12290 = vst [vmem:[#allocation146_spill] sm:$0xff] %v10530_v32 }
 0x3e2   : > { %12285 = vst [vmem:[#allocation141_spill] sm:$0xff] %v10510_v62  ;;  %12287 = vst [vmem:[#allocation143_spill] sm:$0xff] %v10514_v17 }
 0x3e3   : > { %v7805_v60 = vpop.f32.mrf.mxu1 }
 0x3e5   : > { %v4250_v6 = vpop.f32.mrf.mxu1 }
 0x3e7   : > { %v7806_v51 = vpop.f32.mrf.mxu1 }
 0x3e8   : > { %v10520_v34 = vpack.c.bf16 %v7806_v51, %v7805_v60  ;;  %v10534_v51 = vpop.f32.mrf.mxu0 }
 0x3e9   : > { %v4253_v15 = vpop.f32.mrf.mxu1  ;;  %12291 = vst [vmem:[#allocation147_spill] sm:$0xff] %v10534_v51 }
 0x3ea   : > { %v10524_v33 = vpack.c.bf16 %v4253_v15, %v4250_v6  ;;  %4411 = vrot.lane.b32.xlu0 %v10520_v34, %s8344_s28  ;;  %v10542_v15 = vpop.f32.mrf.mxu0 }
 0x3eb   : > { %v7809_v2 = vpop.f32.mrf.mxu1  ;;  %12292 = vst [vmem:[#allocation148_spill] sm:$0xff] %v10542_v15 }
 0x3ec   : > { %4409 = vrot.lane.b32.xlu1 %v10524_v33, %s8344_s28 }
 0x3ed   : > { %v4266_v12 = vpop.f32.mrf.mxu1 }
 0x3ef   : > { %v7810_v35 = vpop.f32.mrf.mxu1 }
 0x3f0   : > { %v10532_v62 = vpack.c.bf16 %v7810_v35, %v7809_v2  ;;  %v10546_v35 = vpop.f32.mrf.mxu0 }
 0x3f1   : > { %v4269_v60 = vpop.f32.mrf.mxu1  ;;  %12293 = vst [vmem:[#allocation149_spill] sm:$0xff] %v10546_v35 }
 0x3f2   : > { %v10536_v17 = vpack.c.bf16 %v4269_v60, %v4266_v12  ;;  %4415 = vrot.lane.b32.xlu0 %v10532_v62, %s8344_s28  ;;  %v10554_v60 = vpop.f32.mrf.mxu0 }
 0x3f3   : > { %v7813_v6 = vpop.f32.mrf.mxu1  ;;  %12294 = vst [vmem:[#allocation150_spill] sm:$0xff] %v10554_v60 }
 0x3f4   : > { %4413 = vrot.lane.b32.xlu1 %v10536_v17, %s8344_s28 }
 0x3f5   : > { %v4282_v37 = vpop.f32.mrf.mxu1 }
 0x3f7   : > { %v7814_v32 = vpop.f32.mrf.mxu1 }
 0x3f8   : > { %v10544_v47 = vpack.c.bf16 %v7814_v32, %v7813_v6  ;;  %v10558_v32 = vpop.f32.mrf.mxu0 }
 0x3f9   : > { %v4285_v2 = vpop.f32.mrf.mxu1  ;;  %12295 = vst [vmem:[#allocation151_spill] sm:$0xff] %v10558_v32 }
 0x3fa   : > { %v10548_v51 = vpack.c.bf16 %v4285_v2, %v4282_v37  ;;  %4419 = vrot.lane.b32.xlu0 %v10544_v47, %s8344_s28  ;;  %v10566_v2 = vpop.f32.mrf.mxu0 }
 0x3fb   : > { %v7817_v12 = vpop.f32.mrf.mxu1  ;;  %12296 = vst [vmem:[#allocation152_spill] sm:$0xff] %v10566_v2 }
 0x3fc   : > { %4417 = vrot.lane.b32.xlu1 %v10548_v51, %s8344_s28  ;;  %v10568_v3 = vpop.f32.mrf.mxu0 }
 0x3fd   : > { %v4298_v13 = vpop.f32.mrf.mxu1  ;;  %12297 = vst [vmem:[#allocation153_spill] sm:$0xff] %v10568_v3 }
 0x3ff   : > { %v7818_v15 = vpop.f32.mrf.mxu1 }
 0x400   : > { %v10556_v38 = vpack.c.bf16 %v7818_v15, %v7817_v12 }
 0x401   : > { %v4301_v6 = vpop.f32.mrf.mxu1 }
 0x402   : > { %v10560_v35 = vpack.c.bf16 %v4301_v6, %v4298_v13  ;;  %4423 = vrot.lane.b32.xlu0 %v10556_v38, %s8344_s28  ;;  %v10574_v13 = vpop.f32.mrf.mxu0 }
 0x403   : > { %v7821_v37 = vpop.f32.mrf.mxu1  ;;  %12298 = vst [vmem:[#allocation154_spill] sm:$0xff] %v10574_v13 }
 0x404   : > { %4421 = vrot.lane.b32.xlu1 %v10560_v35, %s8344_s28  ;;  %v10580_v2 = vpop.f32.mrf.mxu0 }
 0x405   : > { %v4314_v31 = vpop.f32.mrf.mxu1  ;;  %12299 = vst [vmem:[#allocation155_spill] sm:$0xff] %v10580_v2 }
 0x407   : > { %v7822_v60 = vpop.f32.mrf.mxu1 }
 0x408   : > { %v10576_v10 = vpack.c.bf16 %v7822_v60, %v7821_v37 }
 0x409   : > { %v4317_v15 = vpop.f32.mrf.mxu1 }
 0x40a   : > { %v10570_v12 = vpack.c.bf16 %v4317_v15, %v4314_v31  ;;  %v10586_v15 = vpop.f32.mrf.mxu0 }
 0x40b   : > { %v7825_v32 = vpop.f32.mrf.mxu1  ;;  %12300 = vst [vmem:[#allocation156_spill] sm:$0xff] %v10586_v15 }
 0x40c   : > { %4425 = vrot.lane.b32.xlu0 %v10570_v12, %s8344_s28  ;;  %v10592_v37 = vpop.f32.mrf.mxu0 }
 0x40d   : > { %v4330_v6 = vpop.f32.mrf.mxu1  ;;  %12301 = vst [vmem:[#allocation157_spill] sm:$0xff] %v10592_v37 }
 0x40f   : > { %v7826_v59 = vpop.f32.mrf.mxu1 }
 0x410   : > { %4427 = vrot.lane.b32.xlu0 %v10576_v10, %s8344_s28  ;;  %v10588_v13 = vpack.c.bf16 %v7826_v59, %v7825_v32  ;;  %v8000_v32 = vld [vmem:[#allocation5 + $0x78] sm:$0xff]  }
 0x411   : > { %v4333_v20 = vpop.f32.mrf.mxu1  ;;  %7262 = vmatprep.subr.bf16.mxu0 %v8000_v32  ;;  %v8011_v32 = vld [vmem:[#allocation5 + $0xa8] sm:$0xff]  }
 0x412   : > { %v10582_v3 = vpack.c.bf16 %v4333_v20, %v4330_v6  ;;  %v10598_v6 = vpop.f32.mrf.mxu0  ;;  %7263 = vmatpush3.bf16.msra.mxu0 %v8002_v61  ;;  %v8012_v61 = vld [vmem:[#allocation5 + $0x60] sm:$0xff]  }
 0x413   : > { %v7829_v31 = vpop.f32.mrf.mxu1  ;;  %12302 = vst [vmem:[#allocation158_spill] sm:$0xff] %v10598_v6  ;;  %7264 = vmatprep.subr.bf16.mxu0 %v8004_v55  ;;  %v8008_v6 = vld [vmem:[#allocation5 + $0x68] sm:$0xff]   ;;  %v8014_v55 = vld [vmem:[#allocation5 + $0x20] sm:$0xff]  }
 0x414   : > { %4429 = vrot.lane.b32.xlu0 %v10582_v3, %s8344_s28  ;;  %v10604_v37 = vpop.f32.mrf.mxu0 }
 0x415   : > { %v4346_v18 = vpop.f32.mrf.mxu1  ;;  %12303 = vst [vmem:[#allocation159_spill] sm:$0xff] %v10604_v37  ;;  %v8009_v37 = vld [vmem:[#allocation5 + $0xe8] sm:$0xff]  }
 0x416   : > { %v10610_v28 = vpop.f32.mrf.mxu0 }
 0x417   : > { %v7830_v60 = vpop.f32.mrf.mxu1  ;;  %12304 = vst [vmem:[#allocation160_spill] sm:$0xff] %v10610_v28  ;;  %v8021_v28 = vld [vmem:[#allocation5 + $0xd0] sm:$0xff]  }
 0x418   : > { %4431 = vrot.lane.b32.xlu0 %v10588_v13, %s8344_s28  ;;  %v10600_v15 = vpack.c.bf16 %v7830_v60, %v7829_v31  ;;  %v8006_v31 = vld [vmem:[#allocation5 + $0x30] sm:$0xff]  }
 0x419   : > { %v4349_v19 = vpop.f32.mrf.mxu1  ;;  %v8007_v60 = vld [vmem:[#allocation5 + $0xb0] sm:$0xff]   ;;  %7265 = vmatpush3.bf16.msra.mxu0 %v8006_v31  ;;  %v8018_v31 = vld [vmem:[#allocation5 + $0x18] sm:$0xff]  }
 0x41a   : > { %v10594_v2 = vpack.c.bf16 %v4349_v19, %v4346_v18  ;;  %v8003_v19 = vld [vmem:[#allocation5 + $0xb8] sm:$0xff]   ;;  %7266 = vmatprep.subr.bf16.mxu0 %v8008_v6  ;;  %v8020_v6 = vld [vmem:[#allocation5 + $0x50] sm:$0xff]  }
 0x41b   : > { %v7833_v20 = vpop.f32.mrf.mxu1  ;;  %7375 = vmatpush3.bf16.msra.mxu1 %v8003_v19 }
 0x41c   : > { %4433 = vrot.lane.b32.xlu0 %v10594_v2, %s8344_s28  ;;  %7376 = vmatprep.subr.bf16.mxu1 %v8005_v14  ;;  %v8015_v14 = vld [vmem:[#allocation5 + $0xa0] sm:$0xff]  }
 0x41d   : > { %v4362_v0 = vpop.f32.mrf.mxu1 }
 0x41f   : > { %v7834_v59 = vpop.f32.mrf.mxu1  ;;  %7377 = vmatpush3.bf16.msra.mxu1 %v8007_v60  ;;  %v8019_v60 = vld [vmem:[#allocation5 + $0x98] sm:$0xff]  }
 0x420   : > { %4435 = vrot.lane.b32.xlu0 %v10600_v15, %s8344_s28  ;;  %v10612_v41 = vpack.c.bf16 %v7834_v59, %v7833_v20  ;;  %7378 = vmatprep.subr.bf16.mxu1 %v8009_v37  ;;  %v8016_v20 = vld [vmem:[#allocation5 + $0x58] sm:$0xff]   ;;  %v8022_v37 = vld [vmem:[#allocation5 + $0x10] sm:$0xff]  }
 0x421   : > { %v4365_v18 = vpop.f32.mrf.mxu1  ;;  %v8017_v59 = vld [vmem:[#allocation5 + $0xd8] sm:$0xff]  }
 0x422   : > { %v10606_v63 = vpack.c.bf16 %v4365_v18, %v4362_v0  ;;  %v8010_v0 = vld [vmem:[#allocation5 + $0x28] sm:$0xff]   ;;  %v10616_v18 = vpop.f32.mrf.mxu0 }
 0x423   : > { %12305 = vst [vmem:[#allocation161_spill] sm:$0xff] %v10616_v18  ;;  %7267 = vmatpush3.bf16.msra.mxu0 %v8010_v0  ;;  %7379 = vmatpush3.bf16.msra.mxu1 %v8011_v32  ;;  %v8023_v0 = vld [vmem:[#allocation5 + $0x90] sm:$0xff]   ;;  %v8024_v32 = vld [vmem:[#allocation5 + $0x48] sm:$0xff]  }
 0x424   : > { %4437 = vrot.lane.b32.xlu0 %v10606_v63, %s8344_s28  ;;  %7268 = vmatprep.subr.bf16.mxu0 %v8012_v61  ;;  %v10618_v19 = vpop.f32.mrf.mxu0  ;;  %v8025_v61 = vld [vmem:[#allocation5 + $0xc8] sm:$0xff]  }
 0x425   : > { %7380 = vmatprep.subr.bf16.mxu1 %v8013_v52 }
 0x426   : > { %v10620_v18 = vpop.f32.mrf.mxu0 }
 0x427   : > { %7269 = vmatpush3.bf16.msra.mxu0 %v8014_v55  ;;  %7381 = vmatpush3.bf16.msra.mxu1 %v8015_v14  ;;  %12306 = vst [vmem:[#allocation162_spill] sm:$0xff] %v10620_v18  ;;  %v8026_v55 = vld [vmem:[#allocation5 + $0x8] sm:$0xff]   ;;  %v8029_v18 = vld [vmem:[#allocation5 + $0xc0] sm:$0xff]  }
 0x428   : > { %4439 = vrot.lane.b32.xlu0 %v10612_v41, %s8344_s28  ;;  %7270 = vmatprep.subr.bf16.mxu0 %v8016_v20  ;;  %v10622_v52 = vpop.f32.mrf.mxu0  ;;  %v8027_v14 = vld [vmem:[#allocation5 + $0x88] sm:$0xff]  }
 0x429   : > { %7382 = vmatprep.subr.bf16.mxu1 %v8017_v59 }
 0x42a   : > { %v10624_v20 = vpop.f32.mrf.mxu0 }
 0x42b   : > { %7271 = vmatpush3.bf16.msra.mxu0 %v8018_v31  ;;  %7383 = vmatpush3.bf16.msra.mxu1 %v8019_v60  ;;  %12307 = vst [vmem:[#allocation163_spill] sm:$0xff] %v10624_v20 }
 0x42c   : > { %7272 = vmatprep.subr.bf16.mxu0 %v8020_v6  ;;  %7384 = vmatprep.subr.bf16.mxu1 %v8021_v28  ;;  %v10626_v59 = vpop.f32.mrf.mxu0 }
 0x42e   : > { %v10628_v31 = vpop.f32.mrf.mxu0 }
 0x42f   : > { %7273 = vmatpush3.bf16.msra.mxu0 %v8022_v37  ;;  %7385 = vmatpush3.bf16.msra.mxu1 %v8023_v0  ;;  %12308 = vst [vmem:[#allocation164_spill] sm:$0xff] %v10628_v31  ;;  %v8028_v0 = vld [vmem:[#allocation5 + $0x40] sm:$0xff]  }
 0x430   : > { %7274 = vmatprep.subr.bf16.mxu0 %v8024_v32  ;;  %7386 = vmatprep.subr.bf16.mxu1 %v8025_v61  ;;  %v10630_v60 = vpop.f32.mrf.mxu0  ;;  %v8030_v32 = vld [vmem:[#allocation5] sm:$0xff]  }
 0x431   : > { %v8031_v61 = vld [vmem:[#allocation5 + $0x80] sm:$0xff]  }
 0x432   : > { %v10632_v28 = vpop.f32.mrf.mxu0 }
 0x433   : > { %7275 = vmatpush3.bf16.msra.mxu0 %v8026_v55  ;;  %7387 = vmatpush3.bf16.msra.mxu1 %v8027_v14  ;;  %12309 = vst [vmem:[#allocation165_spill] sm:$0xff] %v10632_v28 }
 0x434   : > { %v10634_v6 = vpop.f32.mrf.mxu0  ;;  %7276 = vmatprep.subr.bf16.mxu0 %v8028_v0  ;;  %7388 = vmatprep.subr.bf16.mxu1 %v8029_v18 }
 0x435   : > { %12310 = vst [vmem:[#allocation166_spill] sm:$0xff] %v10634_v6 }
 0x436   : > { %v10636_v37 = vpop.f32.mrf.mxu0 }
 0x437   : > { %12311 = vst [vmem:[#allocation167_spill] sm:$0xff] %v10636_v37  ;;  %7277 = vmatpush3.bf16.msra.mxu0 %v8030_v32  ;;  %7389 = vmatpush3.bf16.msra.mxu1 %v8031_v61 }
 0x438   : > { %v10638_v55 = vpop.f32.mrf.mxu0 }
 0x439   : > { %12312 = vst [vmem:[#allocation168_spill] sm:$0xff] %v10638_v55 }
 0x43a   : > { %v10640_v14 = vpop.f32.mrf.mxu0 }
 0x43b   : > { %12313 = vst [vmem:[#allocation169_spill] sm:$0xff] %v10640_v14 }
 0x43c   : > { %v10642_v20 = vpop.f32.mrf.mxu0 }
 0x43d   : > { %12314 = vst [vmem:[#allocation170_spill] sm:$0xff] %v10642_v20 }
 0x43e   : > { %v10650_v0 = vpop.f32.mrf.mxu0 }
 0x43f   : > { %12315 = vst [vmem:[#allocation171_spill] sm:$0xff] %v10650_v0 }
 0x440   : > { %v10658_v32 = vpop.f32.mrf.mxu0 }
 0x441   : > { %12316 = vst [vmem:[#allocation172_spill] sm:$0xff] %v10658_v32  ;;  %v8032_v32 = vld [vmem:[#allocation5 + $0x178] sm:$0xff]  }
 0x442   : > { %v10666_v14 = vpop.f32.mrf.mxu0  ;;  %7486 = vmatprep.subr.bf16.mxu0 %v8032_v32 }
 0x443   : > { %12317 = vst [vmem:[#allocation173_spill] sm:$0xff] %v10666_v14 }
 0x45c   : > { %v4412_v37 = vpop.permute.xlu0 %4411 }
 0x45d   : > { %v10654_v18 = vsel %vm2323_vm0, %v10520_v34, %v4412_v37  ;;  %v10674_v37 = vpop.f32.mrf.mxu0 }
 0x45e   : > { %v4410_v31 = vpop.permute.xlu1 %4409  ;;  %12318 = vst [vmem:[#allocation174_spill] sm:$0xff] %v10674_v37 }
 0x45f   : > { %v10646_v28 = vsel %vm2323_vm0, %v10524_v33, %v4410_v31  ;;  %v10682_v20 = vpop.f32.mrf.mxu0 }
 0x460   : > { %4505 = vrot.lane.b32.xlu1 %v10646_v28, %s8345_s25  ;;  %12319 = vst [vmem:[#allocation175_spill] sm:$0xff] %v10682_v20 }
 0x464   : > { %4507 = vrot.lane.b32.xlu1 %v10654_v18, %s8345_s25  ;;  %v4416_v31 = vpop.permute.xlu0 %4415 }
 0x465   : > { %v10670_v34 = vsel %vm2323_vm0, %v10532_v62, %v4416_v31  ;;  %v10690_v31 = vpop.f32.mrf.mxu0 }
 0x466   : > { %v4414_v61 = vpop.permute.xlu1 %4413  ;;  %12320 = vst [vmem:[#allocation176_spill] sm:$0xff] %v10690_v31 }
 0x467   : > { %v10662_v33 = vsel %vm2323_vm0, %v10536_v17, %v4414_v61  ;;  %v10698_v37 = vpop.f32.mrf.mxu0 }
 0x468   : > { %4509 = vrot.lane.b32.xlu1 %v10662_v33, %s8345_s25  ;;  %12321 = vst [vmem:[#allocation177_spill] sm:$0xff] %v10698_v37 }
 0x46c   : > { %4511 = vrot.lane.b32.xlu1 %v10670_v34, %s8345_s25  ;;  %v4420_v61 = vpop.permute.xlu0 %4419 }
 0x46d   : > { %v10686_v62 = vsel %vm2323_vm0, %v10544_v47, %v4420_v61  ;;  %v10706_v61 = vpop.f32.mrf.mxu0 }
 0x46e   : > { %v4418_v0 = vpop.permute.xlu1 %4417  ;;  %12322 = vst [vmem:[#allocation178_spill] sm:$0xff] %v10706_v61 }
 0x46f   : > { %v10678_v17 = vsel %vm2323_vm0, %v10548_v51, %v4418_v0 }
 0x470   : > { %4513 = vrot.lane.b32.xlu1 %v10678_v17, %s8345_s25 }
 0x474   : > { %4515 = vrot.lane.b32.xlu1 %v10686_v62, %s8345_s25  ;;  %v4424_v0 = vpop.permute.xlu0 %4423 }
 0x475   : > { %v10702_v47 = vsel %vm2323_vm0, %v10556_v38, %v4424_v0 }
 0x476   : > { %v4422_v14 = vpop.permute.xlu1 %4421 }
 0x477   : > { %v10694_v51 = vsel %vm2323_vm0, %v10560_v35, %v4422_v14  ;;  %v10714_v14 = vpop.f32.mrf.mxu0 }
 0x478   : > { %4517 = vrot.lane.b32.xlu1 %v10694_v51, %s8345_s25  ;;  %12323 = vst [vmem:[#allocation179_spill] sm:$0xff] %v10714_v14 }
 0x479   : > { %v10722_v0 = vpop.f32.mrf.mxu0 }
 0x47a   : > { %12324 = vst [vmem:[#allocation180_spill] sm:$0xff] %v10722_v0 }
 0x47c   : > { %4519 = vrot.lane.b32.xlu1 %v10702_v47, %s8345_s25 }
 0x47e   : > { %v4426_v20 = vpop.permute.xlu0 %4425 }
 0x47f   : > { %v10710_v35 = vsel %vm2323_vm0, %v10570_v12, %v4426_v20  ;;  %v10730_v20 = vpop.f32.mrf.mxu0 }
 0x480   : > { %4521 = vrot.lane.b32.xlu1 %v10710_v35, %s8345_s25  ;;  %12325 = vst [vmem:[#allocation181_spill] sm:$0xff] %v10730_v20 }
 0x482   : > { %v4428_v37 = vpop.permute.xlu0 %4427 }
 0x483   : > { %v10718_v38 = vsel %vm2323_vm0, %v10576_v10, %v4428_v37  ;;  %v10738_v37 = vpop.f32.mrf.mxu0 }
 0x484   : > { %4523 = vrot.lane.b32.xlu0 %v10718_v38, %s8345_s25  ;;  %12326 = vst [vmem:[#allocation182_spill] sm:$0xff] %v10738_v37 }
 0x486   : > { %v4430_v61 = vpop.permute.xlu0 %4429 }
 0x487   : > { %v10726_v12 = vsel %vm2323_vm0, %v10582_v3, %v4430_v61  ;;  %v10746_v61 = vpop.f32.mrf.mxu0 }
 0x488   : > { %4525 = vrot.lane.b32.xlu1 %v10726_v12, %s8345_s25  ;;  %12327 = vst [vmem:[#allocation183_spill] sm:$0xff] %v10746_v61 }
 0x48a   : > { %v4432_v14 = vpop.permute.xlu0 %4431 }
 0x48b   : > { %v10734_v10 = vsel %vm2323_vm0, %v10588_v13, %v4432_v14  ;;  %v10754_v14 = vpop.f32.mrf.mxu0 }
 0x48c   : > { %4527 = vrot.lane.b32.xlu0 %v10734_v10, %s8345_s25  ;;  %12328 = vst [vmem:[#allocation184_spill] sm:$0xff] %v10754_v14 }
 0x48e   : > { %v4434_v0 = vpop.permute.xlu0 %4433 }
 0x48f   : > { %v10742_v3 = vsel %vm2323_vm0, %v10594_v2, %v4434_v0  ;;  %v10762_v0 = vpop.f32.mrf.mxu0 }
 0x490   : > { %4529 = vrot.lane.b32.xlu1 %v10742_v3, %s8345_s25  ;;  %12329 = vst [vmem:[#allocation185_spill] sm:$0xff] %v10762_v0 }
 0x492   : > { %v4436_v20 = vpop.permute.xlu0 %4435 }
 0x493   : > { %v10750_v13 = vsel %vm2323_vm0, %v10600_v15, %v4436_v20  ;;  %v5983_v15 = vld [vmem:[%s12330_s5] sm:$0xff] }
 0x494   : > { %4531 = vrot.lane.b32.xlu0 %v10750_v13, %s8345_s25 }
 0x496   : > { %v4438_v37 = vpop.permute.xlu0 %4437 }
 0x497   : > { %v10758_v2 = vsel %vm2323_vm0, %v10606_v63, %v4438_v37  ;;  %v10773_v63 = vpop.f32.mrf.mxu0  ;;  %v5984_v37 = vld [vmem:[%s12330_s5 + $0x8] sm:$0xff] }
 0x498   : > { %4533 = vrot.lane.b32.xlu1 %v10758_v2, %s8345_s25  ;;  %12331 = vst [vmem:[#allocation186_spill] sm:$0xff] %v10773_v63  ;;  %v8033_v63 = vld [vmem:[#allocation5 + $0x1f8] sm:$0xff]  }
 0x499   : > { %v10778_v0 = vpop.f32.mrf.mxu0  ;;  %7598 = vmatprep.subr.bf16.mxu1 %v8033_v63 }
 0x49a   : > { %v4440_v20 = vpop.permute.xlu0 %4439  ;;  %12332 = vst [vmem:[#allocation187_spill] sm:$0xff] %v10778_v0 }
 0x49b   : > { %v10769_v61 = vsel %vm2323_vm0, %v10612_v41, %v4440_v20  ;;  %v10780_v14 = vpop.f32.mrf.mxu0 }
 0x49c   : > { %5987 = vperm.xlu1 %7981, %v5983_v15   ;;  %4535 = vrot.lane.b32.xlu0 %v10769_v61, %s8345_s25  ;;  %12333 = vst [vmem:[#allocation188_spill] sm:$0xff] %v10780_v14 }
 0x49d   : > { %v10782_v31 = vpop.f32.mrf.mxu0 }
 0x49e   : > { %12334 = vst [vmem:[#allocation189_spill] sm:$0xff] %v10782_v31  ;;  %v2876_v31 = vsub.s32 5, %v9813_v25 }
 0x49f   : > { %v10784_v41 = vpop.f32.mrf.mxu0 }
 0x4a0   : > { %5992 = vperm.xlu0 %7980, %v5984_v37   ;;  %12335 = vst [vmem:[#allocation190_spill] sm:$0xff] %v10784_v41  ;;  %v10802_v41 = vld [vmem:[%s8641_s18] sm:$0xff]  ;;  %s12702_s18 = sld [smem:[#allocation209_spill]] (!%p7083_p4) }
 0x4a1   : > { %v10786_v15 = vpop.f32.mrf.mxu0 }
 0x4a2   : > { %12336 = vst [vmem:[#allocation191_spill] sm:$0xff] %v10786_v15  ;;  %v10805_v15 = vrot.slane %v10802_v41, %v2876_v31 }
 0x4a3   : > { %v10788_v20 = vpop.f32.mrf.mxu0 }
 0x4a4   : > { %12337 = vst [vmem:[#allocation192_spill] sm:$0xff] %v10788_v20  ;;  %v3449_v32 = vadd.f32 %v10328_v5, %v10805_v15  ;;  %v3445_v63 = vadd.f32 %v10320_v8, %v10805_v15 }
 0x4a5   : > { %v10790_v6 = vpop.f32.mrf.mxu0 }
 0x4a6   : > { %12338 = vst [vmem:[#allocation193_spill] sm:$0xff] %v10790_v6 }
 0x4a7   : > { %v10792_v37 = vpop.f32.mrf.mxu0 }
 0x4a8   : > { %12339 = vst [vmem:[#allocation194_spill] sm:$0xff] %v10792_v37  ;;  %v3799_v37 = vpack.c.bf16 %v3449_v32, %v3445_v63  ;;  %v12347_v32 = vpack.c.bf16 %v9853_v23, %v9847_v21  ;;  %v12349_v21 = vpack.c.bf16 %v10326_v9, %v10323_v16  ;;  %v12350_v16 = vpack.c.bf16 %v9911_v56, %v9901_v49 }
 0x4a9   : > { %v10794_v0 = vpop.f32.mrf.mxu0  ;;  %v12353_v56 = vpack.c.bf16 %v10338_v26, %v10335_v53  ;;  %v12354_v53 = vpack.c.bf16 %v9895_v46, %v9889_v43  ;;  %v12357_v43 = vpack.c.bf16 %v10350_v44, %v10347_v54  ;;  %v12363_v44 = vld [vmem:[#allocation96_spill] sm:$0xff] }
 0x4aa   : > { %12340 = vst [vmem:[#allocation195_spill] sm:$0xff] %v10794_v0  ;;  %v3489_v54 = vadd.f32 %v12363_v44, %v10805_v15 }
 0x4ab   : > { %v10796_v55 = vpop.f32.mrf.mxu0 }
 0x4ac   : > { %12341 = vst [vmem:[#allocation196_spill] sm:$0xff] %v10796_v55  ;;  %v12346_v55 = vpack.c.bf16 %v9874_v30, %v9862_v1  ;;  %v8036_v1 = vld [vmem:[#allocation5 + $0x170] sm:$0xff]  }
 0x4ad   : > { %v10799_v14 = vpop.f32.mrf.mxu0 }
 0x4ae   : > { %12342 = vst [vmem:[#allocation197_spill] sm:$0xff] %v10799_v14  ;;  %v3459_v14 = vadd.f32 %v10340_v58, %v10805_v15  ;;  %v12348_v58 = vpack.c.bf16 %v9856_v24, %v9850_v22 }
 0x4af   : > { %v10807_v20 = vpop.f32.mrf.mxu0 }
 0x4b0   : > { %12343 = vst [vmem:[#allocation198_spill] sm:$0xff] %v10807_v20  ;;  %v12345_v20 = vpack.c.bf16 %v9871_v29, %v9859_v7  ;;  %v3455_v7 = vadd.f32 %v10332_v39, %v10805_v15  ;;  %v3469_v39 = vadd.f32 %v10352_v11, %v10805_v15  ;;  %v3465_v11 = vadd.f32 %v10344_v36, %v10805_v15 }
 0x4b1   : > { %v10813_v6 = vpop.f32.mrf.mxu0 }
 0x4b2   : > { %12344 = vst [vmem:[#allocation199_spill] sm:$0xff] %v10813_v6  ;;  %v3807_v24 = vpack.c.bf16 %v3459_v14, %v3455_v7  ;;  %v3815_v36 = vpack.c.bf16 %v3469_v39, %v3465_v11  ;;  %v3475_v7 = vadd.f32 %v10356_v4, %v10805_v15  ;;  %v12361_v39 = vld [vmem:[#allocation33_spill] sm:$0xff]  ;;  %v12529_v6 = vld [vmem:[#allocation58_spill] sm:$0xff] }
 0x4b3   : > { %v10839_v29 = vpop.f32.mrf.mxu0 }
 0x4d2   : > { %v4506_v0 = vpop.permute.xlu1 %4505 }
 0x4d3   : > { %v10819_v31 = vsel %vm4537_vm12, %v10646_v28, %v4506_v0  ;;  %v8034_v0 = vld [vmem:[#allocation5 + $0x138] sm:$0xff]  }
 0x4d4   : > { %v4587_v5 = vmul.bf16 %v10819_v31, %v12345_v20  ;;  %v4589_v8 = vmul.bf16 %v10819_v31, %v12346_v55  ;;  %v4586_v63 = vmul.bf16 %v10819_v31, %v12347_v32  ;;  %v4588_v28 = vmul.bf16 %v10819_v31, %v12348_v58  ;;  %v8035_v20 = vld [vmem:[#allocation5 + $0x1b8] sm:$0xff]   ;;  %v8039_v32 = vld [vmem:[#allocation5 + $0x1b0] sm:$0xff]   ;;  %v8041_v58 = vld [vmem:[#allocation5 + $0x1e8] sm:$0xff]  }
 0x4d5   : > { %v10842_v30 = vmul.bf16 %v10819_v31, %v3799_v37  ;;  %v10848_v23 = vmul.bf16 %v10819_v31, %v12349_v21  ;;  %v8037_v37 = vld [vmem:[#allocation5 + $0x1f0] sm:$0xff]   ;;  %v8043_v21 = vld [vmem:[#allocation5 + $0x1a8] sm:$0xff]  }
 0x4d6   : > { %5258 = vmatprep.mubr.bf16.mxu0 %v4587_v5  ;;  %5419 = vmatprep.mubr.bf16.mxu1 %v4589_v8  ;;  %v4508_v22 = vpop.permute.xlu1 %4507  ;;  %v12351_v5 = vpack.c.bf16 %v9914_v57, %v9904_v50  ;;  %v8038_v8 = vld [vmem:[#allocation5 + $0x130] sm:$0xff]  }
 0x4d7   : > { %v10854_v55 = vsel %vm4537_vm12, %v10654_v18, %v4508_v22  ;;  %5259 = vmatmul.mubr.bf16.vlgmr.msra.gmra.mxu0 %v4586_v63  ;;  %5420 = vmatmul.mubr.bf16.vlgmr.msra.gmra.mxu1 %v4588_v28  ;;  %v10866_v18 = vpop.f32.mrf.mxu0  ;;  %v8040_v63 = vld [vmem:[#allocation5 + $0x168] sm:$0xff]   ;;  %v3479_v28 = vadd.f32 %v10364_v42, %v10805_v15 }
 0x4d8   : > { %v4595_v9 = vmul.bf16 %v10854_v55, %v12350_v16  ;;  %v4597_v14 = vmul.bf16 %v10854_v55, %v12351_v5  ;;  %7487 = vmatpush3.bf16.msra.mxu0 %v8034_v0  ;;  %12352 = vst [vmem:[#allocation200_spill] sm:$0xff] %v10866_v18  ;;  %7599 = vmatpush3.bf16.msra.mxu1 %v8035_v20  ;;  %v8045_v5 = vld [vmem:[#allocation5 + $0x1e0] sm:$0xff]  }
 0x4d9   : > { %7488 = vmatprep.subr.bf16.mxu0 %v8036_v1  ;;  %v10869_v49 = vmul.bf16 %v10854_v55, %v3807_v24  ;;  %v10875_v50 = vmul.bf16 %v10854_v55, %v12353_v56  ;;  %7600 = vmatprep.subr.bf16.mxu1 %v8037_v37  ;;  %v4594_v26 = vmul.bf16 %v10854_v55, %v12354_v53  ;;  %v10889_v20 = vpop.f32.mrf.mxu0 }
 0x4da   : > { %5266 = vmatprep.mubr.bf16.mxu0 %v4595_v9  ;;  %5427 = vmatprep.mubr.bf16.mxu1 %v4597_v14  ;;  %v4510_v57 = vpop.permute.xlu1 %4509  ;;  %12355 = vst [vmem:[#allocation201_spill] sm:$0xff] %v10889_v20  ;;  %v12356_v1 = vpack.c.bf16 %v9898_v48, %v9892_v45  ;;  %v12359_v24 = vpack.c.bf16 %v9951_v40, %v9941_v27  ;;  %v12360_v48 = vld [vmem:[#allocation34_spill] sm:$0xff]  ;;  %v12364_v27 = vld [vmem:[#allocation93_spill] sm:$0xff] }
 0x4db   : > { %v10881_v0 = vsel %vm4537_vm12, %v10662_v33, %v4510_v57  ;;  %v8042_v33 = vld [vmem:[#allocation5 + $0x128] sm:$0xff]   ;;  %v12362_v37 = vpack.c.bf16 %v12360_v48, %v12361_v39  ;;  %v8044_v9 = vld [vmem:[#allocation5 + $0x160] sm:$0xff]   ;;  %v3823_v14 = vpack.c.bf16 %v3479_v28, %v3475_v7  ;;  %v3485_v40 = vadd.f32 %v12364_v27, %v10805_v15  ;;  %v10920_v11 = vpop.f32.mrf.mxu0 }
 0x4dc   : > { %7489 = vmatpush3.bf16.msra.mxu0 %v8038_v8  ;;  %v4596_v42 = vmul.bf16 %v10854_v55, %v12356_v1  ;;  %7601 = vmatpush3.bf16.msra.mxu1 %v8039_v32  ;;  %v10896_v22 = vmul.bf16 %v10881_v0, %v3815_v36  ;;  %v10902_v46 = vmul.bf16 %v10881_v0, %v12357_v43  ;;  %v8046_v32 = vld [vmem:[#allocation5 + $0x120] sm:$0xff]   ;;  %v12367_v36 = vld [vmem:[#allocation92_spill] sm:$0xff]  ;;  %v12368_v28 = vld [vmem:[#allocation91_spill] sm:$0xff] }
 0x4dd   : > { %7490 = vmatprep.subr.bf16.mxu0 %v8040_v63  ;;  %v4603_v45 = vmul.bf16 %v10881_v0, %v12359_v24  ;;  %v4605_v16 = vmul.bf16 %v10881_v0, %v12362_v37  ;;  %7602 = vmatprep.subr.bf16.mxu1 %v8041_v58  ;;  %12365 = vst [vmem:[#allocation34_spill] sm:$0xff] %v10920_v11  ;;  %v8047_v63 = vld [vmem:[#allocation5 + $0x1a0] sm:$0xff]   ;;  %v8049_v58 = vld [vmem:[#allocation5 + $0x1d8] sm:$0xff]   ;;  %v10943_v39 = vpop.f32.mrf.mxu0 }
 0x4de   : > { %12358 = vst [vmem:[#allocation202_spill] sm:$0xff] %v10902_v46  ;;  %v4512_v4 = vpop.permute.xlu1 %4511  ;;  %v12369_v7 = vpack.c.bf16 %v12367_v36, %v12368_v28  ;;  %v12371_v1 = vld [vmem:[#allocation100_spill] sm:$0xff]  ;;  %v12375_v24 = vld [vmem:[#allocation29_spill] sm:$0xff]  ;;  %12377 = vst [vmem:[#allocation92_spill] sm:$0xff] %v10943_v39 }
 0x4df   : > { %v10916_v8 = vsel %vm4537_vm12, %v10670_v34, %v4512_v4  ;;  %5267 = vmatmul.mubr.bf16.gmra.mxu0 %v4594_v26  ;;  %5428 = vmatmul.mubr.bf16.gmra.mxu1 %v4596_v42  ;;  %v8048_v34 = vld [vmem:[#allocation5 + $0x158] sm:$0xff]   ;;  %v3831_v26 = vpack.c.bf16 %v3489_v54, %v3485_v40  ;;  %v3499_v42 = vadd.f32 %v12371_v1, %v10805_v15  ;;  %v12374_v4 = vld [vmem:[#allocation31_spill] sm:$0xff]  ;;  %v12383_v27 = vld [vmem:[#allocation94_spill] sm:$0xff] }
 0x4e0   : > { %5274 = vmatprep.mubr.bf16.mxu0 %v4603_v45  ;;  %5435 = vmatprep.mubr.bf16.mxu1 %v4605_v16  ;;  %v10923_v56 = vmul.bf16 %v10916_v8, %v3823_v14  ;;  %v10929_v53 = vmul.bf16 %v10916_v8, %v12369_v7  ;;  %v12376_v45 = vpack.c.bf16 %v12374_v4, %v12375_v24  ;;  %v12378_v37 = vld [vmem:[#allocation32_spill] sm:$0xff]  ;;  %v12379_v16 = vld [vmem:[#allocation30_spill] sm:$0xff]  ;;  %v12382_v54 = vld [vmem:[#allocation95_spill] sm:$0xff] }
 0x4e1   : > { %7491 = vmatpush3.bf16.msra.mxu0 %v8042_v33  ;;  %7603 = vmatpush3.bf16.msra.mxu1 %v8043_v21  ;;  %v12373_v21 = vld [vmem:[#allocation97_spill] sm:$0xff]  ;;  %v12384_v40 = vpack.c.bf16 %v12382_v54, %v12383_v27  ;;  %v12387_v7 = vld [vmem:[#allocation39_spill] sm:$0xff]  ;;  %v12389_v4 = vld [vmem:[#allocation42_spill] sm:$0xff] }
 0x4e2   : > { %12366 = vst [vmem:[#allocation33_spill] sm:$0xff] %v10923_v56  ;;  %v4514_v57 = vpop.permute.xlu1 %4513  ;;  %7492 = vmatprep.subr.bf16.mxu0 %v8044_v9  ;;  %7604 = vmatprep.subr.bf16.mxu1 %v8045_v5  ;;  %12370 = vst [vmem:[#allocation96_spill] sm:$0xff] %v10929_v53  ;;  %v3495_v43 = vadd.f32 %v12373_v21, %v10805_v15  ;;  %v4602_v48 = vmul.bf16 %v10881_v0, %v12376_v45  ;;  %v8050_v14 = vld [vmem:[#allocation5 + $0x118] sm:$0xff]   ;;  %v8053_v45 = vld [vmem:[#allocation5 + $0x1d0] sm:$0xff]  }
 0x4e3   : > { %v10935_v33 = vsel %vm4537_vm12, %v10678_v17, %v4514_v57  ;;  %v12380_v9 = vpack.c.bf16 %v12378_v37, %v12379_v16  ;;  %v8051_v17 = vld [vmem:[#allocation5 + $0x198] sm:$0xff]  }
 0x4e4   : > { %12372 = vst [vmem:[#allocation93_spill] sm:$0xff] %v10935_v33  ;;  %v10950_v44 = vmul.bf16 %v10935_v33, %v3831_v26  ;;  %v10956_v57 = vmul.bf16 %v10935_v33, %v12384_v40  ;;  %v12386_v28 = vld [vmem:[#allocation41_spill] sm:$0xff]  ;;  %v8052_v26 = vld [vmem:[#allocation5 + $0x150] sm:$0xff]   ;;  %v3839_v37 = vpack.c.bf16 %v3499_v42, %v3495_v43 }
 0x4e5   : > { %v4604_v5 = vmul.bf16 %v10881_v0, %v12380_v9  ;;  %7493 = vmatpush3.bf16.msra.mxu0 %v8046_v32  ;;  %7605 = vmatpush3.bf16.msra.mxu1 %v8047_v63  ;;  %v12388_v1 = vpack.c.bf16 %v12386_v28, %v12387_v7  ;;  %v12390_v32 = vld [vmem:[#allocation40_spill] sm:$0xff]  ;;  %v10974_v7 = vpop.f32.mrf.mxu0 }
 0x4e6   : > { %12381 = vst [vmem:[#allocation91_spill] sm:$0xff] %v10950_v44  ;;  %12385 = vst [vmem:[#allocation100_spill] sm:$0xff] %v10956_v57  ;;  %v4516_v36 = vpop.permute.xlu1 %4515  ;;  %v12391_v63 = vpack.c.bf16 %v12389_v4, %v12390_v32  ;;  %7494 = vmatprep.subr.bf16.mxu0 %v8048_v34  ;;  %7606 = vmatprep.subr.bf16.mxu1 %v8049_v58  ;;  %v12392_v16 = vld [vmem:[#allocation104_spill] sm:$0xff]  ;;  %v12397_v34 = vld [vmem:[#allocation101_spill] sm:$0xff] }
 0x4e7   : > { %v4611_v21 = vmul.bf16 %v10916_v8, %v12388_v1  ;;  %v3509_v9 = vadd.f32 %v12392_v16, %v10805_v15  ;;  %v10970_v54 = vsel %vm4537_vm12, %v10686_v62, %v4516_v36  ;;  %5275 = vmatmul.mubr.bf16.gmra.mxu0 %v4602_v48  ;;  %5436 = vmatmul.mubr.bf16.gmra.mxu1 %v4604_v5  ;;  %v12394_v27 = vld [vmem:[#allocation28_spill] sm:$0xff]  ;;  %v12399_v62 = vld [vmem:[#allocation138_spill] sm:$0xff]  ;;  %v12400_v4 = vld [vmem:[#allocation99_spill] sm:$0xff] }
 0x4e8   : > { %v4613_v24 = vmul.bf16 %v10916_v8, %v12391_v63  ;;  %12393 = vst [vmem:[#allocation97_spill] sm:$0xff] %v10970_v54  ;;  %v12395_v40 = vld [vmem:[#allocation144_spill] sm:$0xff]  ;;  %12396 = vst [vmem:[#allocation31_spill] sm:$0xff] %v10974_v7  ;;  %v3505_v58 = vadd.f32 %v12397_v34, %v10805_v15  ;;  %v10979_v1 = vmul.bf16 %v10970_v54, %v3839_v37  ;;  %v8056_v36 = vld [vmem:[#allocation5 + $0x148] sm:$0xff]  }
 0x4e9   : > { %v3296_v28 = vadd.f32 %v12395_v40, %v12394_v27  ;;  %5282 = vmatprep.mubr.bf16.mxu0 %v4611_v21  ;;  %7495 = vmatpush3.bf16.msra.mxu0 %v8050_v14  ;;  %v8054_v42 = vld [vmem:[#allocation5 + $0x110] sm:$0xff]   ;;  %v3292_v48 = vadd.f32 %v12399_v62, %v12394_v27  ;;  %v8057_v21 = vld [vmem:[#allocation5 + $0x1c8] sm:$0xff]   ;;  %v12407_v34 = vld [vmem:[#allocation37_spill] sm:$0xff] }
 0x4ea   : > { %5443 = vmatprep.mubr.bf16.mxu1 %v4613_v24  ;;  %7607 = vmatpush3.bf16.msra.mxu1 %v8051_v17  ;;  %v8055_v43 = vld [vmem:[#allocation5 + $0x190] sm:$0xff]   ;;  %12398 = vst [vmem:[#allocation29_spill] sm:$0xff] %v10979_v1  ;;  %v4518_v5 = vpop.permute.xlu1 %4517  ;;  %v12401_v32 = vld [vmem:[#allocation98_spill] sm:$0xff]  ;;  %v3847_v14 = vpack.c.bf16 %v3509_v9, %v3505_v58 }
 0x4eb   : > { %7496 = vmatprep.subr.bf16.mxu0 %v8052_v26  ;;  %7608 = vmatprep.subr.bf16.mxu1 %v8053_v45  ;;  %v12402_v63 = vpack.c.bf16 %v12400_v4, %v12401_v32  ;;  %v12404_v17 = vld [vmem:[#allocation108_spill] sm:$0xff]  ;;  %v10993_v37 = vsel %vm4537_vm12, %v10694_v51, %v4518_v5  ;;  %v3829_v40 = vpack.c.bf16 %v3296_v28, %v3292_v48  ;;  %v12406_v26 = vld [vmem:[#allocation105_spill] sm:$0xff]  ;;  %v12408_v62 = vld [vmem:[#allocation35_spill] sm:$0xff]  ;;  %v11001_v32 = vpop.f32.mrf.mxu0 }
 0x4ec   : > { %v3519_v16 = vadd.f32 %v12404_v17, %v10805_v15  ;;  %12405 = vst [vmem:[#allocation30_spill] sm:$0xff] %v10993_v37  ;;  %v3515_v45 = vadd.f32 %v12406_v26, %v10805_v15  ;;  %v12409_v7 = vpack.c.bf16 %v12407_v34, %v12408_v62  ;;  %12410 = vst [vmem:[#allocation95_spill] sm:$0xff] %v11001_v32  ;;  %v12412_v9 = vld [vmem:[#allocation36_spill] sm:$0xff]  ;;  %v8058_v51 = vld [vmem:[#allocation5 + $0x108] sm:$0xff]  }
 0x4ed   : > { %v10987_v24 = vmul.bf16 %v10970_v54, %v12402_v63  ;;  %v12411_v63 = vld [vmem:[#allocation38_spill] sm:$0xff]  ;;  %7497 = vmatpush3.bf16.msra.mxu0 %v8054_v42  ;;  %v11008_v28 = vmul.bf16 %v10993_v37, %v3847_v14  ;;  %v12415_v48 = vld [vmem:[#allocation103_spill] sm:$0xff] }
 0x4ee   : > { %v4610_v4 = vmul.bf16 %v10916_v8, %v12409_v7  ;;  %v12413_v58 = vpack.c.bf16 %v12411_v63, %v12412_v9  ;;  %7609 = vmatpush3.bf16.msra.mxu1 %v8055_v43  ;;  %v8059_v5 = vld [vmem:[#allocation5 + $0x188] sm:$0xff]   ;;  %v4520_v57 = vpop.permute.xlu1 %4519  ;;  %v12422_v9 = vld [vmem:[#allocation45_spill] sm:$0xff]  ;;  %v4621_v43 = vmul.bf16 %v10935_v33, %v3829_v40  ;;  %7498 = vmatprep.subr.bf16.mxu0 %v8056_v36  ;;  %v11033_v36 = vpop.f32.mrf.mxu0 }
 0x4ef   : > { %12403 = vst [vmem:[#allocation32_spill] sm:$0xff] %v10987_v24  ;;  %12414 = vst [vmem:[#allocation94_spill] sm:$0xff] %v11008_v28  ;;  %v12416_v26 = vld [vmem:[#allocation102_spill] sm:$0xff]  ;;  %7610 = vmatprep.subr.bf16.mxu1 %v8057_v21  ;;  %v3855_v32 = vpack.c.bf16 %v3519_v16, %v3515_v45  ;;  %v12428_v21 = vld [vmem:[#allocation109_spill] sm:$0xff] }
 0x4f0   : > { %v4612_v17 = vmul.bf16 %v10916_v8, %v12413_v58  ;;  %v12417_v24 = vpack.c.bf16 %v12415_v48, %v12416_v26  ;;  %v12419_v7 = vld [vmem:[#allocation26_spill] sm:$0xff]  ;;  %v12424_v48 = vld [vmem:[#allocation112_spill] sm:$0xff]  ;;  %v11027_v26 = vsel %vm4537_vm12, %v10702_v47, %v4520_v57  ;;  %5283 = vmatmul.mubr.bf16.gmra.mxu0 %v4610_v4  ;;  %12427 = vst [vmem:[#allocation39_spill] sm:$0xff] %v11033_v36 }
 0x4f1   : > { %v12420_v62 = vld [vmem:[#allocation142_spill] sm:$0xff]  ;;  %v3525_v16 = vadd.f32 %v12428_v21, %v10805_v15  ;;  %7499 = vmatpush3.bf16.msra.mxu0 %v8058_v51  ;;  %v11038_v57 = vmul.bf16 %v11027_v26, %v3855_v32  ;;  %v12435_v51 = vld [vmem:[#allocation145_spill] sm:$0xff]  ;;  %v12436_v32 = vld [vmem:[#allocation116_spill] sm:$0xff] }
 0x4f2   : > { %v11014_v34 = vmul.bf16 %v10993_v37, %v12417_v24  ;;  %v3294_v1 = vadd.f32 %v12420_v62, %v12419_v7  ;;  %v12421_v63 = vld [vmem:[#allocation46_spill] sm:$0xff]  ;;  %v3529_v24 = vadd.f32 %v12424_v48, %v10805_v15  ;;  %5444 = vmatmul.mubr.bf16.gmra.mxu1 %v4612_v17  ;;  %v12425_v62 = vld [vmem:[#allocation136_spill] sm:$0xff]  ;;  %v4522_v48 = vpop.permute.xlu1 %4521 }
 0x4f3   : > { %v12423_v58 = vpack.c.bf16 %v12421_v63, %v12422_v9  ;;  %v8060_v14 = vld [vmem:[#allocation5 + $0x140] sm:$0xff]   ;;  %v3290_v63 = vadd.f32 %v12425_v62, %v12419_v7  ;;  %v12426_v9 = vld [vmem:[#allocation148_spill] sm:$0xff]  ;;  %5451 = vmatprep.mubr.bf16.mxu1 %v4621_v43  ;;  %7611 = vmatpush3.bf16.msra.mxu1 %v8059_v5  ;;  %12429 = vst [vmem:[#allocation42_spill] sm:$0xff] %v11038_v57 }
 0x4f4   : > { %12418 = vst [vmem:[#allocation41_spill] sm:$0xff] %v11014_v34  ;;  %v8061_v28 = vld [vmem:[#allocation5 + $0x1c0] sm:$0xff]   ;;  %v3306_v40 = vadd.f32 %v12426_v9, %v12394_v27  ;;  %7500 = vmatprep.subr.bf16.mxu0 %v8060_v14  ;;  %v3300_v5 = vadd.f32 %v12435_v51, %v12419_v7  ;;  %v3863_v21 = vpack.c.bf16 %v3529_v24, %v3525_v16  ;;  %v12437_v14 = vld [vmem:[#allocation147_spill] sm:$0xff]  ;;  %v11064_v24 = vpop.f32.mrf.mxu0  ;;  %v12453_v34 = vmov 0.0  }
 0x4f5   : > { %v4619_v42 = vmul.bf16 %v10935_v33, %v12423_v58  ;;  %v8062_v45 = vld [vmem:[#allocation5 + $0x100] sm:$0xff]   ;;  %v3828_v4 = vpack.c.bf16 %v3294_v1, %v3290_v63  ;;  %7612 = vmatprep.subr.bf16.mxu1 %v8061_v28  ;;  %v3539_v57 = vadd.f32 %v12436_v32, %v10805_v15  ;;  %v11054_v1 = vsel %vm4537_vm12, %v10710_v35, %v4522_v48  ;;  %v12444_v48 = vld [vmem:[#allocation111_spill] sm:$0xff] }
 0x4f6   : > { %v8063_v47 = vld [vmem:[#allocation5 + $0x180] sm:$0xff]   ;;  %v3304_v28 = vadd.f32 %v12437_v14, %v12419_v7  ;;  %12442 = vst [vmem:[#allocation104_spill] sm:$0xff] %v11064_v24  ;;  %7501 = vmatpush3.bf16.msra.mxu0 %v8062_v45  ;;  %v11068_v35 = vmul.bf16 %v11054_v1, %v3863_v21  ;;  %v12448_v14 = vld [vmem:[#allocation151_spill] sm:$0xff] }
 0x4f7   : > { %5290 = vmatprep.mubr.bf16.mxu0 %v4619_v42  ;;  %v12430_v17 = vld [vmem:[#allocation146_spill] sm:$0xff]  ;;  %v12431_v42 = vld [vmem:[#allocation107_spill] sm:$0xff]  ;;  %v4620_v16 = vmul.bf16 %v10935_v33, %v3828_v4  ;;  %7613 = vmatpush3.bf16.msra.mxu1 %v8063_v47  ;;  %v12451_v45 = vld [vmem:[#allocation49_spill] sm:$0xff] }
 0x4f8   : > { %v3302_v58 = vadd.f32 %v12430_v17, %v12394_v27  ;;  %v12432_v43 = vld [vmem:[#allocation106_spill] sm:$0xff]  ;;  %v12438_v17 = vld [vmem:[#allocation113_spill] sm:$0xff]  ;;  %12443 = vst [vmem:[#allocation28_spill] sm:$0xff] %v11068_v35  ;;  %7835 = vmatprep.subr.bf16.mxu1 %v12453_v34 }
 0x4f9   : > { %v12433_v62 = vpack.c.bf16 %v12431_v42, %v12432_v43  ;;  %v3535_v42 = vadd.f32 %v12438_v17, %v10805_v15  ;;  %v12439_v43 = vld [vmem:[#allocation44_spill] sm:$0xff]  ;;  %v12445_v32 = vld [vmem:[#allocation110_spill] sm:$0xff]  ;;  %v11078_v17 = vadd.f32 %v12448_v14, %v12419_v7 }
 0x4fa   : > { %v3837_v63 = vpack.c.bf16 %v3306_v40, %v3302_v58  ;;  %v12446_v40 = vpack.c.bf16 %v12444_v48, %v12445_v32  ;;  %v12450_v4 = vld [vmem:[#allocation50_spill] sm:$0xff]  ;;  %v12454_v32 = vld [vmem:[#allocation120_spill] sm:$0xff]  ;;  %5452 = vmatmul.mubr.bf16.gmra.mxu1 %v4620_v16  ;;  %v11110_v16 = vpop.f32.mrf.mxu0 }
 0x4fb   : > { %v11046_v9 = vmul.bf16 %v11027_v26, %v12433_v62  ;;  %v12440_v62 = vld [vmem:[#allocation43_spill] sm:$0xff]  ;;  %v12452_v47 = vpack.c.bf16 %v12450_v4, %v12451_v45  ;;  %v3871_v48 = vpack.c.bf16 %v3539_v57, %v3535_v42  ;;  %v12456_v4 = vld [vmem:[#allocation66_spill] sm:$0xff]  ;;  %v12457_v45 = vld [vmem:[#allocation65_spill] sm:$0xff]  ;;  %12463 = vst [vmem:[#allocation101_spill] sm:$0xff] %v11110_v16 }
 0x4fc   : > { %v11074_v58 = vmul.bf16 %v11054_v1, %v12446_v40  ;;  %v4629_v35 = vmul.bf16 %v10970_v54, %v3837_v63  ;;  %v3549_v40 = vadd.f32 %v12454_v32, %v10805_v15  ;;  %v12458_v63 = vpack.c.bf16 %v12456_v4, %v12457_v45  ;;  %v12459_v57 = vld [vmem:[#allocation64_spill] sm:$0xff]  ;;  %v12460_v42 = vld [vmem:[#allocation63_spill] sm:$0xff]  ;;  %v12467_v4 = vld [vmem:[#allocation114_spill] sm:$0xff] }
 0x4fd   : > { %12434 = vst [vmem:[#allocation40_spill] sm:$0xff] %v11046_v9  ;;  %v12441_v9 = vpack.c.bf16 %v12439_v43, %v12440_v62  ;;  %v4524_v62 = vpop.permute.xlu0 %4523  ;;  %v4627_v21 = vmul.bf16 %v10970_v54, %v12452_v47  ;;  %v12461_v32 = vpack.c.bf16 %v12459_v57, %v12460_v42  ;;  %v3836_v57 = vpack.c.bf16 %v3304_v28, %v3300_v5  ;;  %v12470_v16 = vld [vmem:[#allocation124_spill] sm:$0xff]  ;;  %v12474_v5 = vld [vmem:[#allocation69_spill] sm:$0xff]  ;;  %v12490_v24 = vld [vmem:[#allocation78_spill] sm:$0xff] }
 0x4fe   : > { %12447 = vst [vmem:[#allocation144_spill] sm:$0xff] %v11074_v58  ;;  %v11092_v14 = vsel %vm4537_vm12, %v10718_v38, %v4524_v62  ;;  %5459 = vmatprep.mubr.bf16.mxu1 %v4629_v35  ;;  %v12462_v38 = vld [vmem:[#allocation150_spill] sm:$0xff]  ;;  %v12464_v62 = vld [vmem:[#allocation117_spill] sm:$0xff]  ;;  %v3559_v44 = vadd.f32 %v12470_v16, %v10805_v15  ;;  %v12480_v16 = vld [vmem:[#allocation48_spill] sm:$0xff] }
 0x4ff   : > { %v4618_v51 = vmul.bf16 %v10935_v33, %v12441_v9  ;;  %v12449_v9 = vld [vmem:[#allocation152_spill] sm:$0xff]  ;;  %v11100_v47 = vmul.bf16 %v11092_v14, %v12458_v63  ;;  %v11106_v36 = vmul.bf16 %v11092_v14, %v12461_v32  ;;  %v3545_v35 = vadd.f32 %v12464_v62, %v10805_v15  ;;  %v4526_v32 = vpop.permute.xlu1 %4525 }
 0x500   : > { %v3316_v43 = vadd.f32 %v12449_v9, %v12394_v27  ;;  %v12455_v9 = vld [vmem:[#allocation149_spill] sm:$0xff]  ;;  %v11128_v62 = vsel %vm4537_vm12, %v10726_v12, %v4526_v32  ;;  %v11146_v12 = vpop.f32.mrf.mxu0 }
 0x501   : > { %5291 = vmatmul.mubr.bf16.gmra.mxu0 %v4618_v51  ;;  %v3310_v58 = vadd.f32 %v12455_v9, %v12419_v7  ;;  %v3312_v51 = vadd.f32 %v12462_v38, %v12394_v27  ;;  %v12466_v9 = vld [vmem:[#allocation115_spill] sm:$0xff]  ;;  %v3879_v38 = vpack.c.bf16 %v3549_v40, %v3545_v35  ;;  %12479 = vst [vmem:[#allocation98_spill] sm:$0xff] %v11146_v12 }
 0x502   : > { %5298 = vmatprep.mubr.bf16.mxu0 %v4627_v21  ;;  %v11115_v21 = vmul.bf16 %v11092_v14, %v3871_v48  ;;  %v12468_v45 = vpack.c.bf16 %v12466_v9, %v12467_v4  ;;  %v12471_v48 = vld [vmem:[#allocation154_spill] sm:$0xff]  ;;  %v12472_v9 = vld [vmem:[#allocation121_spill] sm:$0xff]  ;;  %v12481_v35 = vld [vmem:[#allocation47_spill] sm:$0xff] }
 0x503   : > { %v3844_v42 = vpack.c.bf16 %v11078_v17, %v3310_v58  ;;  %v3845_v18 = vpack.c.bf16 %v3316_v43, %v3312_v51  ;;  %v3555_v4 = vadd.f32 %v12472_v9, %v10805_v15  ;;  %v12476_v17 = vld [vmem:[#allocation68_spill] sm:$0xff]  ;;  %v12477_v43 = vld [vmem:[#allocation67_spill] sm:$0xff]  ;;  %v12482_v32 = vpack.c.bf16 %v12480_v16, %v12481_v35  ;;  %v4528_v16 = vpop.permute.xlu0 %4527  ;;  %v12491_v35 = vld [vmem:[#allocation54_spill] sm:$0xff]  ;;  %v4530_v33 = vpop.permute.xlu1 %4529 }
 0x504   : > { %12465 = vst [vmem:[#allocation138_spill] sm:$0xff] %v11115_v21  ;;  %v11121_v63 = vmul.bf16 %v11092_v14, %v12468_v45  ;;  %v3322_v21 = vadd.f32 %v12471_v48, %v12394_v27  ;;  %v12473_v45 = vld [vmem:[#allocation70_spill] sm:$0xff]  ;;  %v12478_v40 = vpack.c.bf16 %v12476_v17, %v12477_v43  ;;  %v4628_v9 = vmul.bf16 %v10970_v54, %v3836_v57  ;;  %v12488_v43 = vld [vmem:[#allocation156_spill] sm:$0xff]  ;;  %v12489_v12 = vld [vmem:[#allocation27_spill] sm:$0xff] }
 0x505   : > { %v12475_v28 = vpack.c.bf16 %v12473_v45, %v12474_v5  ;;  %v4626_v48 = vmul.bf16 %v10970_v54, %v12482_v32  ;;  %v11154_v45 = vmul.bf16 %v11128_v62, %v3879_v38  ;;  %v12484_v5 = vld [vmem:[#allocation119_spill] sm:$0xff]  ;;  %v3183_v53 = vadd.f32 %v12490_v24, %v12489_v12  ;;  %v12492_v32 = vld [vmem:[#allocation53_spill] sm:$0xff] }
 0x506   : > { %12469 = vst [vmem:[#allocation99_spill] sm:$0xff] %v11121_v63  ;;  %v11144_v51 = vmul.bf16 %v11128_v62, %v12478_v40  ;;  %v3326_v40 = vadd.f32 %v12488_v43, %v12394_v27  ;;  %v12493_v11 = vpack.c.bf16 %v12491_v35, %v12492_v32  ;;  %v4637_v38 = vmul.bf16 %v10993_v37, %v3845_v18  ;;  %v12495_v24 = vld [vmem:[#allocation75_spill] sm:$0xff]  ;;  %v12496_v35 = vld [vmem:[#allocation74_spill] sm:$0xff]  ;;  %v12497_v32 = vld [vmem:[#allocation73_spill] sm:$0xff] }
 0x507   : > { %v11138_v58 = vmul.bf16 %v11128_v62, %v12475_v28  ;;  %12483 = vst [vmem:[#allocation108_spill] sm:$0xff] %v11154_v45  ;;  %v12485_v28 = vld [vmem:[#allocation118_spill] sm:$0xff]  ;;  %v3887_v45 = vpack.c.bf16 %v3559_v44, %v3555_v4  ;;  %5460 = vmatmul.mubr.bf16.gmra.mxu1 %v4628_v9  ;;  %v3179_v43 = vadd.f32 %v12495_v24, %v12489_v12  ;;  %v12499_v44 = vld [vmem:[#allocation72_spill] sm:$0xff]  ;;  %v12500_v4 = vld [vmem:[#allocation71_spill] sm:$0xff]  ;;  %v11193_v9 = vpop.f32.mrf.mxu0  ;;  %v4532_v46 = vpop.permute.xlu0 %4531 }
 0x508   : > { %v12486_v63 = vpack.c.bf16 %v12484_v5, %v12485_v28  ;;  %v4635_v57 = vmul.bf16 %v10993_v37, %v12493_v11  ;;  %v12494_v5 = vld [vmem:[#allocation128_spill] sm:$0xff]  ;;  %5467 = vmatprep.mubr.bf16.mxu1 %v4637_v38  ;;  %v12498_v11 = vpack.c.bf16 %v12496_v35, %v12497_v32  ;;  %12503 = vst [vmem:[#allocation37_spill] sm:$0xff] %v11193_v9  ;;  %v12506_v24 = vld [vmem:[#allocation123_spill] sm:$0xff]  ;;  %v12507_v35 = vld [vmem:[#allocation122_spill] sm:$0xff] }
 0x509   : > { %v3569_v28 = vadd.f32 %v12494_v5, %v10805_v15  ;;  %5299 = vmatmul.mubr.bf16.gmra.mxu0 %v4626_v48  ;;  %v12501_v5 = vpack.c.bf16 %v12499_v44, %v12500_v4  ;;  %v12508_v32 = vpack.c.bf16 %v12506_v24, %v12507_v35  ;;  %v12510_v44 = vld [vmem:[#allocation155_spill] sm:$0xff]  ;;  %v3891_v54 = vpack.c.bf16 %v3183_v53, %v3179_v43  ;;  %v12515_v53 = vld [vmem:[#allocation129_spill] sm:$0xff] }
 0x50a   : > { %v11160_v17 = vmul.bf16 %v11128_v62, %v12486_v63  ;;  %v11175_v63 = vsel %vm4537_vm12, %v10734_v10, %v4528_v16  ;;  %5306 = vmatprep.mubr.bf16.mxu0 %v4635_v57  ;;  %v12502_v10 = vld [vmem:[#allocation153_spill] sm:$0xff]  ;;  %v3324_v4 = vadd.f32 %v12510_v44, %v12419_v7  ;;  %v11216_v24 = vsel %vm4537_vm12, %v10742_v3, %v4530_v33  ;;  %v12514_v35 = vld [vmem:[#allocation79_spill] sm:$0xff]  ;;  %v12517_v44 = vld [vmem:[#allocation76_spill] sm:$0xff] }
 0x50b   : > { %v11183_v18 = vmul.bf16 %v11175_v63, %v12498_v11  ;;  %v3320_v48 = vadd.f32 %v12502_v10, %v12419_v7  ;;  %v12504_v16 = vld [vmem:[#allocation125_spill] sm:$0xff]  ;;  %v11198_v38 = vmul.bf16 %v11175_v63, %v3887_v45  ;;  %v11204_v11 = vmul.bf16 %v11175_v63, %v12508_v32  ;;  %v12511_v10 = vld [vmem:[#allocation82_spill] sm:$0xff]  ;;  %v12521_v3 = vld [vmem:[#allocation51_spill] sm:$0xff] }
 0x50c   : > { %12487 = vst [vmem:[#allocation105_spill] sm:$0xff] %v11160_v17  ;;  %v11189_v17 = vmul.bf16 %v11175_v63, %v12501_v5  ;;  %v3565_v57 = vadd.f32 %v12504_v16, %v10805_v15  ;;  %v3853_v5 = vpack.c.bf16 %v3326_v40, %v3322_v21  ;;  %v3193_v9 = vadd.f32 %v12511_v10, %v12489_v12  ;;  %v12512_v16 = vld [vmem:[#allocation160_spill] sm:$0xff]  ;;  %v12516_v43 = vld [vmem:[#allocation77_spill] sm:$0xff] }
 0x50d   : > { %12505 = vst [vmem:[#allocation35_spill] sm:$0xff] %v11198_v38  ;;  %12509 = vst [vmem:[#allocation38_spill] sm:$0xff] %v11204_v11  ;;  %v3336_v20 = vadd.f32 %v12512_v16, %v12394_v27  ;;  %v12513_v38 = vld [vmem:[#allocation132_spill] sm:$0xff]  ;;  %v3189_v32 = vadd.f32 %v12514_v35, %v12489_v12  ;;  %v3575_v21 = vadd.f32 %v12515_v53, %v10805_v15  ;;  %v12525_v11 = vld [vmem:[#allocation126_spill] sm:$0xff] }
 0x50e   : > { %v3895_v45 = vpack.c.bf16 %v3569_v28, %v3565_v57  ;;  %v3579_v56 = vadd.f32 %v12513_v38, %v10805_v15  ;;  %v11223_v40 = vmul.bf16 %v11216_v24, %v3891_v54  ;;  %v12518_v10 = vpack.c.bf16 %v12516_v43, %v12517_v44  ;;  %v11231_v57 = vpop.f32.mrf.mxu0  ;;  %v12520_v38 = vld [vmem:[#allocation52_spill] sm:$0xff]  ;;  %v12524_v54 = vld [vmem:[#allocation127_spill] sm:$0xff] }
 0x50f   : > { %12519 = vst [vmem:[#allocation36_spill] sm:$0xff] %v11231_v57  ;;  %v12522_v33 = vpack.c.bf16 %v12520_v38, %v12521_v3  ;;  %v4636_v35 = vmul.bf16 %v10993_v37, %v3844_v42  ;;  %v12526_v39 = vpack.c.bf16 %v12524_v54, %v12525_v11  ;;  %v3899_v44 = vpack.c.bf16 %v3193_v9, %v3189_v32  ;;  %v12530_v38 = vld [vmem:[#allocation57_spill] sm:$0xff]  ;;  %v12533_v9 = vld [vmem:[#allocation83_spill] sm:$0xff] }
 0x510   : > { %v11229_v28 = vmul.bf16 %v11216_v24, %v12518_v10  ;;  %v11239_v53 = vmul.bf16 %v11216_v24, %v3895_v45  ;;  %v12528_v10 = vld [vmem:[#allocation86_spill] sm:$0xff]  ;;  %v12531_v3 = vpack.c.bf16 %v12529_v6, %v12530_v38  ;;  %v4645_v42 = vmul.bf16 %v11027_v26, %v3853_v5  ;;  %v12534_v32 = vld [vmem:[#allocation81_spill] sm:$0xff]  ;;  %v12535_v5 = vld [vmem:[#allocation80_spill] sm:$0xff] }
 0x511   : > { %v4634_v16 = vmul.bf16 %v10993_v37, %v12522_v33  ;;  %v11245_v43 = vmul.bf16 %v11216_v24, %v12526_v39  ;;  %v3203_v57 = vadd.f32 %v12528_v10, %v12489_v12  ;;  %v3903_v45 = vpack.c.bf16 %v3579_v56, %v3575_v21  ;;  %5468 = vmatmul.mubr.bf16.gmra.mxu1 %v4636_v35  ;;  %v12540_v10 = vld [vmem:[#allocation131_spill] sm:$0xff] }
 0x512   : > { %12523 = vst [vmem:[#allocation103_spill] sm:$0xff] %v11239_v53  ;;  %v4643_v33 = vmul.bf16 %v11027_v26, %v12531_v3  ;;  %v12532_v53 = vld [vmem:[#allocation137_spill] sm:$0xff]  ;;  %v11258_v39 = vsel %vm4537_vm12, %v10750_v13, %v4532_v46  ;;  %v3199_v11 = vadd.f32 %v12533_v9, %v12489_v12  ;;  %5475 = vmatprep.mubr.bf16.mxu1 %v4645_v42  ;;  %v11273_v46 = vpop.f32.mrf.mxu0  ;;  %v12544_v9 = vld [vmem:[#allocation90_spill] sm:$0xff] }
 0x513   : > { %12527 = vst [vmem:[#allocation102_spill] sm:$0xff] %v11245_v43  ;;  %v3589_v37 = vadd.f32 %v12532_v53, %v10805_v15  ;;  %5307 = vmatmul.mubr.bf16.gmra.mxu0 %v4634_v16  ;;  %v11263_v6 = vmul.bf16 %v11258_v39, %v3899_v44  ;;  %v12536_v56 = vpack.c.bf16 %v12534_v32, %v12535_v5  ;;  %v12537_v53 = vld [vmem:[#allocation158_spill] sm:$0xff]  ;;  %v12538_v16 = vld [vmem:[#allocation133_spill] sm:$0xff]  ;;  %v4534_v5 = vpop.permute.xlu1 %4533  ;;  %v12545_v43 = vld [vmem:[#allocation143_spill] sm:$0xff] }
 0x514   : > { %5314 = vmatprep.mubr.bf16.mxu0 %v4643_v33  ;;  %v3332_v13 = vadd.f32 %v12537_v53, %v12394_v27  ;;  %v3585_v35 = vadd.f32 %v12538_v16, %v10805_v15  ;;  %v11278_v54 = vmul.bf16 %v11258_v39, %v3903_v45  ;;  %v12541_v44 = vld [vmem:[#allocation130_spill] sm:$0xff]  ;;  %v3852_v33 = vpack.c.bf16 %v3324_v4, %v3320_v48 }
 0x515   : > { %v11269_v21 = vmul.bf16 %v11258_v39, %v12536_v56  ;;  %v12542_v38 = vpack.c.bf16 %v12540_v10, %v12541_v44  ;;  %v3907_v42 = vpack.c.bf16 %v3203_v57, %v3199_v11  ;;  %v3213_v32 = vadd.f32 %v12544_v9, %v12489_v12  ;;  %v12546_v10 = vld [vmem:[#allocation87_spill] sm:$0xff]  ;;  %v12548_v57 = vld [vmem:[#allocation85_spill] sm:$0xff]  ;;  %v12549_v11 = vld [vmem:[#allocation84_spill] sm:$0xff] }
 0x516   : > { %12539 = vst [vmem:[#allocation26_spill] sm:$0xff] %v11278_v54  ;;  %v3861_v56 = vpack.c.bf16 %v3336_v20, %v3332_v13  ;;  %v3911_v53 = vpack.c.bf16 %v3589_v37, %v3585_v35  ;;  %v3599_v16 = vadd.f32 %v12545_v43, %v10805_v15  ;;  %v11292_v45 = vsel %vm4537_vm12, %v10758_v2, %v4534_v5  ;;  %v11307_v43 = vpop.f32.mrf.mxu0  ;;  %v12551_v13 = vld [vmem:[#allocation56_spill] sm:$0xff]  ;;  %v12552_v2 = vld [vmem:[#allocation55_spill] sm:$0xff]  ;;  %v12556_v5 = vld [vmem:[#allocation134_spill] sm:$0xff] }
 0x517   : > { %v11284_v3 = vmul.bf16 %v11258_v39, %v12542_v38  ;;  %v3209_v44 = vadd.f32 %v12546_v10, %v12489_v12  ;;  %v12547_v38 = vld [vmem:[#allocation139_spill] sm:$0xff]  ;;  %v11299_v4 = vmul.bf16 %v11292_v45, %v3907_v42  ;;  %v12550_v20 = vpack.c.bf16 %v12548_v57, %v12549_v11  ;;  %v4536_v11 = vpop.permute.xlu0 %4535 }
 0x518   : > { %v3595_v48 = vadd.f32 %v12547_v38, %v10805_v15  ;;  %v12553_v35 = vpack.c.bf16 %v12551_v13, %v12552_v2  ;;  %v4644_v12 = vmul.bf16 %v11027_v26, %v3852_v33  ;;  %v11315_v15 = vmul.bf16 %v11292_v45, %v3911_v53  ;;  %v12555_v42 = vld [vmem:[#allocation135_spill] sm:$0xff] }
 0x519   : > { %12543 = vst [vmem:[#allocation142_spill] sm:$0xff] %v11284_v3  ;;  %v11305_v37 = vmul.bf16 %v11292_v45, %v12550_v20  ;;  %v12557_v10 = vpack.c.bf16 %v12555_v42, %v12556_v5  ;;  %v3915_v57 = vpack.c.bf16 %v3213_v32, %v3209_v44  ;;  %v12558_v20 = vld [vmem:[#allocation62_spill] sm:$0xff]  ;;  %v12559_v3 = vld [vmem:[#allocation61_spill] sm:$0xff]  ;;  %v4653_v2 = vmul.bf16 %v11054_v1, %v3861_v56  ;;  %v12561_v33 = vld [vmem:[#allocation159_spill] sm:$0xff] }
 0x51a   : > { %v4642_v9 = vmul.bf16 %v11027_v26, %v12553_v35  ;;  %12554 = vst [vmem:[#allocation46_spill] sm:$0xff] %v11315_v15  ;;  %v12560_v54 = vpack.c.bf16 %v12558_v20, %v12559_v3  ;;  %v3334_v35 = vadd.f32 %v12561_v33, %v12419_v7  ;;  %v3919_v53 = vpack.c.bf16 %v3599_v16, %v3595_v48  ;;  %v12563_v56 = vld [vmem:[#allocation88_spill] sm:$0xff]  ;;  %v12565_v16 = vld [vmem:[#allocation157_spill] sm:$0xff]  ;;  %v11347_v48 = vpop.f32.mrf.mxu0  ;;  %v12570_v33 = vld [vmem:[#allocation59_spill] sm:$0xff] }
 0x51b   : > { %v11321_v38 = vmul.bf16 %v11292_v45, %v12557_v10  ;;  %v11332_v15 = vsel %vm4537_vm12, %v10769_v61, %v4536_v11  ;;  %5476 = vmatmul.mubr.bf16.gmra.mxu1 %v4644_v12  ;;  %v3346_v32 = vadd.f32 %v10622_v52, %v12394_v27  ;;  %v3330_v61 = vadd.f32 %v12565_v16, %v12419_v7  ;;  %v12566_v52 = vld [vmem:[#allocation141_spill] sm:$0xff]  ;;  %v12567_v12 = vld [vmem:[#allocation140_spill] sm:$0xff]  ;;  %v12572_v16 = vld [vmem:[#allocation162_spill] sm:$0xff] }
 0x51c   : > { %v4651_v13 = vmul.bf16 %v11054_v1, %v12560_v54  ;;  %5315 = vmatmul.mubr.bf16.gmra.mxu0 %v4642_v9  ;;  %5483 = vmatprep.mubr.bf16.mxu1 %v4653_v2  ;;  %v11337_v3 = vmul.bf16 %v11332_v15, %v3915_v57  ;;  %v12562_v54 = vld [vmem:[#allocation89_spill] sm:$0xff]  ;;  %v11350_v9 = vmul.bf16 %v11332_v15, %v3919_v53  ;;  %v12569_v2 = vld [vmem:[#allocation60_spill] sm:$0xff] }
 0x51d   : > { %v12564_v44 = vpack.c.bf16 %v12562_v54, %v12563_v56  ;;  %v12568_v5 = vpack.c.bf16 %v12566_v52, %v12567_v12  ;;  %v3342_v57 = vadd.f32 %v10618_v19, %v12394_v27  ;;  %v3860_v11 = vpack.c.bf16 %v3334_v35, %v3330_v61  ;;  %v12573_v35 = vld [vmem:[#allocation161_spill] sm:$0xff] }
 0x51e   : > { %5322 = vmatprep.mubr.bf16.mxu0 %v4651_v13  ;;  %v11360_v13 = vpop.f32.mrf.mxu0  ;;  %v12571_v54 = vpack.c.bf16 %v12569_v2, %v12570_v33  ;;  %v3344_v52 = vadd.f32 %v12572_v16, %v12419_v7  ;;  %v3356_v19 = vadd.f32 %v10630_v60, %v12394_v27  ;;  %v3352_v12 = vadd.f32 %v10626_v59, %v12394_v27  ;;  %v12574_v60 = vld [vmem:[#allocation164_spill] sm:$0xff]  ;;  %v12576_v59 = vld [vmem:[#allocation163_spill] sm:$0xff] }
 0x51f   : > { %v11343_v42 = vmul.bf16 %v11332_v15, %v12564_v44  ;;  %v11356_v10 = vmul.bf16 %v11332_v15, %v12568_v5  ;;  %v3869_v20 = vpack.c.bf16 %v3346_v32, %v3342_v57  ;;  %v4652_v53 = vmul.bf16 %v11054_v1, %v3860_v11  ;;  %v12575_v33 = vld [vmem:[#allocation168_spill] sm:$0xff] }
 0x520   : > { %v4650_v56 = vmul.bf16 %v11054_v1, %v12571_v54  ;;  %v3340_v32 = vadd.f32 %v12573_v35, %v12419_v7  ;;  %v11375_v61 = vpop.f32.mrf.mxu0  ;;  %v3877_v57 = vpack.c.bf16 %v3356_v19, %v3352_v12  ;;  %v3366_v54 = vadd.f32 %v12575_v33, %v12394_v27  ;;  %v12578_v12 = vld [vmem:[#allocation167_spill] sm:$0xff] }
 0x521   : > { %v4661_v44 = vmul.bf16 %v11092_v14, %v3869_v20 }
 0x522   : > { %v3868_v5 = vpack.c.bf16 %v3344_v52, %v3340_v32  ;;  %v11379_v11 = vpop.f32.mrf.mxu0  ;;  %v4669_v2 = vmul.bf16 %v11128_v62, %v3877_v57 }
 0x523   : > { %5484 = vmatmul.mubr.bf16.gmra.mxu1 %v4652_v53 }
 0x524   : > { %5323 = vmatmul.mubr.bf16.gmra.mxu0 %v4650_v56  ;;  %5491 = vmatprep.mubr.bf16.mxu1 %v4661_v44  ;;  %v4660_v20 = vmul.bf16 %v11092_v14, %v3868_v5  ;;  %v3350_v56 = vadd.f32 %v12576_v59, %v12419_v7  ;;  %v11391_v53 = vpop.f32.mrf.mxu0  ;;  %v12577_v44 = vld [vmem:[#allocation166_spill] sm:$0xff]  ;;  %v12579_v5 = vld [vmem:[#allocation172_spill] sm:$0xff] }
 0x525   : > { %5330 = vmatprep.mubr.bf16.mxu0 %v11100_v47  ;;  %v3354_v47 = vadd.f32 %v12574_v60, %v12419_v7  ;;  %v3362_v16 = vadd.f32 %v12577_v44, %v12394_v27  ;;  %v3376_v57 = vadd.f32 %v12579_v5, %v12394_v27 }
 0x526   : > { %v11395_v35 = vpop.f32.mrf.mxu0 }
 0x527   : > { %v3876_v52 = vpack.c.bf16 %v3354_v47, %v3350_v56  ;;  %v3885_v19 = vpack.c.bf16 %v3366_v54, %v3362_v16  ;;  %v12581_v47 = vld [vmem:[#allocation170_spill] sm:$0xff]  ;;  %v12582_v16 = vld [vmem:[#allocation171_spill] sm:$0xff] }
 0x528   : > { %v11407_v60 = vpop.f32.mrf.mxu0  ;;  %v3372_v33 = vadd.f32 %v12581_v47, %v12394_v27 }
 0x529   : > { %v4677_v32 = vmul.bf16 %v11175_v63, %v3885_v19 }
 0x52a   : > { %v3893_v59 = vpack.c.bf16 %v3376_v57, %v3372_v33  ;;  %v11411_v56 = vpop.f32.mrf.mxu0  ;;  %v12586_v33 = vld [vmem:[#allocation175_spill] sm:$0xff] }
 0x52b   : > { %5492 = vmatmul.mubr.bf16.gmra.mxu1 %v4660_v20  ;;  %v12580_v20 = vld [vmem:[#allocation165_spill] sm:$0xff] }
 0x52c   : > { %5331 = vmatmul.mubr.bf16.gmra.mxu0 %v11106_v36  ;;  %5499 = vmatprep.mubr.bf16.mxu1 %v4669_v2  ;;  %v4668_v36 = vmul.bf16 %v11128_v62, %v3876_v52  ;;  %v3360_v2 = vadd.f32 %v12580_v20, %v12419_v7  ;;  %v4685_v44 = vmul.bf16 %v11216_v24, %v3893_v59  ;;  %v12583_v52 = vld [vmem:[#allocation176_spill] sm:$0xff] }
 0x52d   : > { %5338 = vmatprep.mubr.bf16.mxu0 %v11138_v58  ;;  %v3364_v58 = vadd.f32 %v12578_v12, %v12419_v7  ;;  %v3386_v19 = vadd.f32 %v12583_v52, %v12394_v27  ;;  %v11423_v12 = vpop.f32.mrf.mxu0 }
 0x52f   : > { %v3884_v54 = vpack.c.bf16 %v3364_v58, %v3360_v2  ;;  %v12585_v58 = vld [vmem:[#allocation174_spill] sm:$0xff]  ;;  %v11427_v2 = vpop.f32.mrf.mxu0 }
 0x530   : > { %v3382_v5 = vadd.f32 %v12585_v58, %v12394_v27 }
 0x532   : > { %v3901_v20 = vpack.c.bf16 %v3386_v19, %v3382_v5  ;;  %v12590_v5 = vld [vmem:[#allocation179_spill] sm:$0xff] }
 0x533   : > { %5500 = vmatmul.mubr.bf16.gmra.mxu1 %v4668_v36  ;;  %v12584_v36 = vld [vmem:[#allocation169_spill] sm:$0xff] }
 0x534   : > { %5339 = vmatmul.mubr.bf16.gmra.mxu0 %v11144_v51  ;;  %5507 = vmatprep.mubr.bf16.mxu1 %v4677_v32  ;;  %v4676_v51 = vmul.bf16 %v11175_v63, %v3884_v54  ;;  %v3370_v32 = vadd.f32 %v12584_v36, %v12419_v7  ;;  %v4693_v47 = vmul.bf16 %v11258_v39, %v3901_v20  ;;  %v12587_v54 = vld [vmem:[#allocation180_spill] sm:$0xff] }
 0x535   : > { %5346 = vmatprep.mubr.bf16.mxu0 %v11183_v18  ;;  %v3374_v18 = vadd.f32 %v12582_v16, %v12419_v7  ;;  %v3396_v59 = vadd.f32 %v12587_v54, %v12394_v27  ;;  %v11439_v16 = vpop.f32.mrf.mxu0 }
 0x537   : > { %v3892_v57 = vpack.c.bf16 %v3374_v18, %v3370_v32  ;;  %v12589_v18 = vld [vmem:[#allocation178_spill] sm:$0xff]  ;;  %v11443_v32 = vpop.f32.mrf.mxu0 }
 0x538   : > { %v3392_v52 = vadd.f32 %v12589_v18, %v12394_v27 }
 0x53a   : > { %v3909_v36 = vpack.c.bf16 %v3396_v59, %v3392_v52  ;;  %v2884_v59 = vsub.s32 7, %v9813_v25 }
 0x53b   : > { %5508 = vmatmul.mubr.bf16.gmra.mxu1 %v4676_v51  ;;  %v12588_v51 = vld [vmem:[#allocation173_spill] sm:$0xff] }
 0x53c   : > { %5347 = vmatmul.mubr.bf16.gmra.mxu0 %v11189_v17  ;;  %5515 = vmatprep.mubr.bf16.mxu1 %v4685_v44  ;;  %v4684_v17 = vmul.bf16 %v11216_v24, %v3892_v57  ;;  %v3380_v44 = vadd.f32 %v12588_v51, %v12419_v7  ;;  %v4701_v58 = vmul.bf16 %v11292_v45, %v3909_v36  ;;  %v12591_v57 = vld [vmem:[#allocation184_spill] sm:$0xff] }
 0x53d   : > { %5354 = vmatprep.mubr.bf16.mxu0 %v11223_v40  ;;  %v3384_v40 = vadd.f32 %v12586_v33, %v12419_v7  ;;  %v3406_v20 = vadd.f32 %v12591_v57, %v12394_v27  ;;  %v11455_v33 = vpop.f32.mrf.mxu0  ;;  %v11464_v52 = vrot.slane %v10802_v41, %v2884_v59 }
 0x53f   : > { %v3900_v19 = vpack.c.bf16 %v3384_v40, %v3380_v44  ;;  %v12593_v40 = vld [vmem:[#allocation182_spill] sm:$0xff] }
 0x540   : > { %v3402_v54 = vadd.f32 %v12593_v40, %v12394_v27  ;;  %v12595_v27 = vld [vmem:[#allocation188_spill] sm:$0xff] }
 0x542   : > { %v3917_v44 = vpack.c.bf16 %v3406_v20, %v3402_v54  ;;  %v12597_v20 = vld [vmem:[#allocation186_spill] sm:$0xff] }
 0x543   : > { %5516 = vmatmul.mubr.bf16.gmra.mxu1 %v4684_v17  ;;  %v12592_v17 = vld [vmem:[#allocation177_spill] sm:$0xff] }
 0x544   : > { %5355 = vmatmul.mubr.bf16.gmra.mxu0 %v11229_v28  ;;  %5523 = vmatprep.mubr.bf16.mxu1 %v4693_v47  ;;  %v4692_v28 = vmul.bf16 %v11258_v39, %v3900_v19  ;;  %v3390_v47 = vadd.f32 %v12592_v17, %v12419_v7  ;;  %v12594_v19 = vld [vmem:[#allocation183_spill] sm:$0xff]  ;;  %v3638_v17 = vadd.f32 %v12597_v20, %v11464_v52 }
 0x545   : > { %5362 = vmatprep.mubr.bf16.mxu0 %v11263_v6  ;;  %v3394_v6 = vadd.f32 %v12590_v5, %v12419_v7  ;;  %v3404_v36 = vadd.f32 %v12594_v19, %v12419_v7 }
 0x547   : > { %v3908_v51 = vpack.c.bf16 %v3394_v6, %v3390_v47  ;;  %v2880_v6 = vsub.s32 6, %v9813_v25 }
 0x549   : > { %v4700_v18 = vmul.bf16 %v11292_v45, %v3908_v51 }
 0x54b   : > { %5524 = vmatmul.mubr.bf16.gmra.mxu1 %v4692_v28  ;;  %v3642_v28 = vadd.f32 %v12595_v27, %v11464_v52 }
 0x54c   : > { %5363 = vmatmul.mubr.bf16.gmra.mxu0 %v11269_v21  ;;  %5531 = vmatprep.mubr.bf16.mxu1 %v4701_v58  ;;  %v11460_v21 = vpop.f32.mrf.mxu0  ;;  %v12596_v58 = vld [vmem:[#allocation181_spill] sm:$0xff] }
 0x54d   : > { %5370 = vmatprep.mubr.bf16.mxu0 %v11299_v4  ;;  %v4709_v4 = vmul.bf16 %v11332_v15, %v3917_v44  ;;  %v3400_v5 = vadd.f32 %v12596_v58, %v12419_v7  ;;  %v3801_v40 = vpack.c.bf16 %v3642_v28, %v3638_v17  ;;  %v12598_v7 = vld [vmem:[#allocation187_spill] sm:$0xff]  ;;  %v12599_v44 = vld [vmem:[#allocation192_spill] sm:$0xff] }
 0x54e   : > { %v11476_v57 = vpop.f32.mrf.mxu0 }
 0x54f   : > { %v3916_v47 = vpack.c.bf16 %v3404_v36, %v3400_v5  ;;  %v4593_v59 = vmul.bf16 %v10819_v31, %v3801_v40  ;;  %v12601_v36 = vld [vmem:[#allocation190_spill] sm:$0xff] }
 0x550   : > { %v11483_v54 = vpop.f32.mrf.mxu0  ;;  %v3648_v27 = vadd.f32 %v12601_v36, %v11464_v52  ;;  %v12606_v36 = vld [vmem:[#allocation195_spill] sm:$0xff] }
 0x552   : > { %v11495_v19 = vpop.f32.mrf.mxu0 }
 0x553   : > { %5532 = vmatmul.mubr.bf16.gmra.mxu1 %v4700_v18  ;;  %v3652_v18 = vadd.f32 %v12599_v44, %v11464_v52 }
 0x554   : > { %5371 = vmatmul.mubr.bf16.gmra.mxu0 %v11305_v37  ;;  %5539 = vmatprep.mubr.bf16.mxu1 %v4709_v4  ;;  %v11481_v37 = vrot.slane %v10802_v41, %v2880_v6  ;;  %v12600_v41 = vld [vmem:[#allocation185_spill] sm:$0xff]  ;;  %v11499_v5 = vpop.f32.mrf.mxu0 }
 0x555   : > { %5378 = vmatprep.mubr.bf16.mxu0 %v11337_v3  ;;  %v4708_v3 = vmul.bf16 %v11332_v15, %v3916_v47  ;;  %v3809_v58 = vpack.c.bf16 %v3652_v18, %v3648_v27  ;;  %v8064_v6 = vld [vmem:[%s8668_s2 + $0x8] sm:$0xff]  }
 0x556   : > { %v3640_v51 = vadd.f32 %v12598_v7, %v11481_v37  ;;  %v3636_v4 = vadd.f32 %v12600_v41, %v11481_v37  ;;  %v12603_v47 = vld [vmem:[#allocation196_spill] sm:$0xff]  ;;  %v11512_v7 = vpop.f32.mrf.mxu0  ;;  %v3660_v27 = vadd.f32 %v12606_v36, %v11481_v37 }
 0x557   : > { %v4601_v20 = vmul.bf16 %v10854_v55, %v3809_v58  ;;  %v3662_v40 = vadd.f32 %v12603_v47, %v11464_v52  ;;  %v12607_v58 = vld [vmem:[#allocation193_spill] sm:$0xff] }
 0x558   : > { %v3800_v28 = vpack.c.bf16 %v3640_v51, %v3636_v4  ;;  %v12605_v51 = vld [vmem:[#allocation194_spill] sm:$0xff]  ;;  %v11518_v41 = vpop.f32.mrf.mxu0 }
 0x559   : > { %v3658_v44 = vadd.f32 %v12605_v51, %v11464_v52  ;;  %v12612_v51 = vld [vmem:[#allocation33_spill] sm:$0xff] }
 0x55b   : > { %5540 = vmatmul.mubr.bf16.gmra.mxu1 %v4708_v3  ;;  %v12604_v3 = vld [vmem:[#allocation189_spill] sm:$0xff]  ;;  %v3817_v18 = vpack.c.bf16 %v3662_v40, %v3658_v44 }
 0x55c   : > { %5379 = vmatmul.mubr.bf16.gmra.mxu0 %v11343_v42  ;;  %5741 = vmatprep.mubr.bf16.mxu1 %v4593_v59  ;;  %v4592_v42 = vmul.bf16 %v10819_v31, %v3800_v28  ;;  %v3646_v59 = vadd.f32 %v12604_v3, %v11481_v37  ;;  %v8065_v31 = vld [vmem:[%s8668_s2] sm:$0xff]   ;;  %v3672_v28 = vadd.f32 %v10839_v29, %v11464_v52  ;;  %v12610_v3 = vld [vmem:[#allocation202_spill] sm:$0xff]  ;;  %v12613_v44 = vld [vmem:[#allocation197_spill] sm:$0xff]  ;;  %s12708_s2 = sld [smem:[#allocation217_spill]] (!%p7083_p4) }
 0x55d   : > { %5580 = vmatprep.mubr.bf16.mxu0 %v10842_v30  ;;  %v12602_v30 = vld [vmem:[#allocation191_spill] sm:$0xff] }
 0x55e   : > { %v3650_v17 = vadd.f32 %v12602_v30, %v11481_v37  ;;  %v12609_v29 = vld [vmem:[#allocation199_spill] sm:$0xff] }
 0x563   : > { %5742 = vmatmul.mubr.bf16.vlgmr.msra.gmra.mxu1 %v4592_v42  ;;  %v3656_v42 = vadd.f32 %v12607_v58, %v11481_v37  ;;  %v12615_v58 = vld [vmem:[#allocation93_spill] sm:$0xff] }
 0x564   : > { %5581 = vmatmul.mubr.bf16.vlgmr.msra.gmra.mxu0 %v10848_v23  ;;  %5749 = vmatprep.mubr.bf16.mxu1 %v4601_v20  ;;  %v3808_v23 = vpack.c.bf16 %v3650_v17, %v3646_v59  ;;  %v12611_v59 = vld [vmem:[#allocation92_spill] sm:$0xff] }
 0x565   : > { %5588 = vmatprep.mubr.bf16.mxu0 %v10869_v49  ;;  %7836 = vmatpush3.bf16.msra.mxu1 %v8064_v6  ;;  %v4609_v49 = vmul.bf16 %v10881_v0, %v3817_v18  ;;  %v11530_v6 = vpop.f32.mrf.mxu0  ;;  %v3816_v30 = vpack.c.bf16 %v3660_v27, %v3656_v42 }
 0x566   : > { %7837 = vmatprep.subr.bf16.mxu1 %v12453_v34  ;;  %v4600_v4 = vmul.bf16 %v10854_v55, %v3808_v23  ;;  %v12608_v55 = vld [vmem:[#allocation198_spill] sm:$0xff]  ;;  %v3666_v23 = vadd.f32 %v12613_v44, %v11481_v37 }
 0x567   : > { %v3668_v20 = vadd.f32 %v12608_v55, %v11464_v52  ;;  %v11534_v47 = vpop.f32.mrf.mxu0  ;;  %v12616_v55 = vld [vmem:[#allocation34_spill] sm:$0xff] }
 0x569   : > { %7838 = vmatpush3.bf16.msra.mxu1 %v8065_v31  ;;  %v3825_v17 = vpack.c.bf16 %v3672_v28, %v3668_v20  ;;  %v3682_v31 = vadd.f32 %v12611_v59, %v11464_v52  ;;  %v11546_v18 = vpop.f32.mrf.mxu0  ;;  %v3680_v20 = vadd.f32 %v12616_v55, %v11481_v37 }
 0x56b   : > { %5750 = vmatmul.mubr.bf16.gmra.mxu1 %v4600_v4  ;;  %v4617_v40 = vmul.bf16 %v10916_v8, %v3825_v17  ;;  %v11550_v27 = vpop.f32.mrf.mxu0  ;;  %v12618_v17 = vld [vmem:[#allocation104_spill] sm:$0xff] }
 0x56c   : > { %5589 = vmatmul.mubr.bf16.gmra.mxu0 %v10875_v50  ;;  %5757 = vmatprep.mubr.bf16.mxu1 %v4609_v49  ;;  %v4608_v50 = vmul.bf16 %v10881_v0, %v3816_v30  ;;  %v12614_v0 = vld [vmem:[#allocation201_spill] sm:$0xff]  ;;  %v12617_v30 = vld [vmem:[#allocation96_spill] sm:$0xff] }
 0x56d   : > { %5596 = vmatprep.mubr.bf16.mxu0 %v10896_v22  ;;  %v3670_v22 = vadd.f32 %v12609_v29, %v11481_v37  ;;  %v3678_v4 = vadd.f32 %v12614_v0, %v11464_v52  ;;  %v12620_v29 = vld [vmem:[#allocation200_spill] sm:$0xff]  ;;  %v12622_v0 = vld [vmem:[#allocation97_spill] sm:$0xff] }
 0x56f   : > { %v3824_v49 = vpack.c.bf16 %v3670_v22, %v3666_v23  ;;  %v3833_v36 = vpack.c.bf16 %v3682_v31, %v3678_v4  ;;  %v3676_v22 = vadd.f32 %v12620_v29, %v11481_v37 }
 0x571   : > { %v4616_v28 = vmul.bf16 %v10916_v8, %v3824_v49  ;;  %v4625_v42 = vmul.bf16 %v12615_v58, %v3833_v36  ;;  %v12621_v8 = vld [vmem:[#allocation95_spill] sm:$0xff]  ;;  %v3832_v31 = vpack.c.bf16 %v3680_v20, %v3676_v22 }
 0x572   : > { %v3688_v59 = vadd.f32 %v12621_v8, %v11464_v52  ;;  %v12623_v49 = vld [vmem:[#allocation39_spill] sm:$0xff] }
 0x573   : > { %5758 = vmatmul.mubr.bf16.gmra.mxu1 %v4608_v50  ;;  %v3692_v50 = vadd.f32 %v12618_v17, %v11464_v52  ;;  %v4624_v23 = vmul.bf16 %v12615_v58, %v3832_v31  ;;  %v3690_v36 = vadd.f32 %v12623_v49, %v11481_v37  ;;  %v12627_v20 = vld [vmem:[#allocation31_spill] sm:$0xff]  ;;  %v12628_v58 = vld [vmem:[#allocation98_spill] sm:$0xff] }
 0x574   : > { %5597 = vmatmul.mubr.bf16.gmra.mxu0 %v12610_v3  ;;  %5765 = vmatprep.mubr.bf16.mxu1 %v4617_v40  ;;  %v12619_v40 = vld [vmem:[#allocation91_spill] sm:$0xff]  ;;  %v11562_v3 = vpop.f32.mrf.mxu0  ;;  %v3686_v17 = vadd.f32 %v12627_v20, %v11481_v37  ;;  %v12629_v31 = vld [vmem:[#allocation30_spill] sm:$0xff] }
 0x575   : > { %5604 = vmatprep.mubr.bf16.mxu0 %v12612_v51  ;;  %v3841_v51 = vpack.c.bf16 %v3692_v50, %v3688_v59 }
 0x576   : > { %v11566_v44 = vpop.f32.mrf.mxu0  ;;  %v3840_v29 = vpack.c.bf16 %v3690_v36, %v3686_v17  ;;  %v12633_v36 = vld [vmem:[#allocation101_spill] sm:$0xff] }
 0x577   : > { %v4633_v4 = vmul.bf16 %v12622_v0, %v3841_v51 }
 0x578   : > { %v11578_v50 = vpop.f32.mrf.mxu0  ;;  %v4632_v59 = vmul.bf16 %v12622_v0, %v3840_v29  ;;  %v3708_v0 = vadd.f32 %v11307_v43, %v11464_v52  ;;  %v3706_v43 = vadd.f32 %v11273_v46, %v11481_v37  ;;  %v3732_v46 = vadd.f32 %v11427_v2, %v11464_v52 }
 0x579   : > { %v3730_v2 = vadd.f32 %v11423_v12, %v11481_v37 }
 0x57a   : > { %v11582_v8 = vpop.f32.mrf.mxu0 }
 0x57b   : > { %5766 = vmatmul.mubr.bf16.gmra.mxu1 %v4616_v28  ;;  %v12624_v28 = vld [vmem:[#allocation100_spill] sm:$0xff] }
 0x57c   : > { %5605 = vmatmul.mubr.bf16.gmra.mxu0 %v12617_v30  ;;  %5773 = vmatprep.mubr.bf16.mxu1 %v4625_v42  ;;  %v12625_v42 = vld [vmem:[#allocation36_spill] sm:$0xff]  ;;  %v12626_v30 = vld [vmem:[#allocation29_spill] sm:$0xff] }
 0x57d   : > { %5612 = vmatprep.mubr.bf16.mxu0 %v12619_v40  ;;  %v3702_v55 = vadd.f32 %v12625_v42, %v11464_v52  ;;  %v3698_v40 = vadd.f32 %v12628_v58, %v11464_v52  ;;  %v12632_v42 = vld [vmem:[#allocation94_spill] sm:$0xff] }
 0x57f   : > { %v3849_v22 = vpack.c.bf16 %v3702_v55, %v3698_v40  ;;  %v3696_v55 = vadd.f32 %v12633_v36, %v11481_v37  ;;  %v12636_v36 = vld [vmem:[#allocation40_spill] sm:$0xff] }
 0x581   : > { %v4641_v51 = vmul.bf16 %v12629_v31, %v3849_v22  ;;  %v12634_v22 = vld [vmem:[#allocation41_spill] sm:$0xff] }
 0x583   : > { %5774 = vmatmul.mubr.bf16.gmra.mxu1 %v4624_v23  ;;  %v12630_v23 = vld [vmem:[#allocation37_spill] sm:$0xff] }
 0x584   : > { %5613 = vmatmul.mubr.bf16.gmra.mxu0 %v12624_v28  ;;  %5781 = vmatprep.mubr.bf16.mxu1 %v4633_v4  ;;  %v3700_v49 = vadd.f32 %v12630_v23, %v11481_v37  ;;  %v12631_v4 = vld [vmem:[#allocation32_spill] sm:$0xff]  ;;  %v3712_v28 = vadd.f32 %v11360_v13, %v11464_v52  ;;  %v3710_v13 = vadd.f32 %v11347_v48, %v11481_v37 }
 0x585   : > { %5620 = vmatprep.mubr.bf16.mxu0 %v12626_v30  ;;  %v11594_v30 = vpop.f32.mrf.mxu0 }
 0x586   : > { %v3848_v20 = vpack.c.bf16 %v3700_v49, %v3696_v55  ;;  %v3857_v17 = vpack.c.bf16 %v3712_v28, %v3708_v0  ;;  %v3856_v49 = vpack.c.bf16 %v3710_v13, %v3706_v43  ;;  %v12637_v55 = vld [vmem:[#allocation28_spill] sm:$0xff] }
 0x587   : > { %v11598_v58 = vpop.f32.mrf.mxu0 }
 0x588   : > { %v4640_v40 = vmul.bf16 %v12629_v31, %v3848_v20  ;;  %v4649_v29 = vmul.bf16 %v11027_v26, %v3857_v17  ;;  %v3718_v31 = vadd.f32 %v11379_v11, %v11464_v52  ;;  %v4648_v28 = vmul.bf16 %v11027_v26, %v3856_v49 }
 0x589   : > { %v11610_v23 = vpop.f32.mrf.mxu0  ;;  %v3716_v11 = vadd.f32 %v11375_v61, %v11481_v37  ;;  %v3728_v26 = vadd.f32 %v11411_v56, %v11464_v52  ;;  %v3742_v61 = vadd.f32 %v11460_v21, %v11464_v52  ;;  %v12639_v56 = vld [vmem:[#allocation138_spill] sm:$0xff] }
 0x58b   : > { %5782 = vmatmul.mubr.bf16.gmra.mxu1 %v4632_v59  ;;  %v3722_v59 = vadd.f32 %v11395_v35, %v11464_v52  ;;  %v11614_v48 = vpop.f32.mrf.mxu0  ;;  %v3720_v35 = vadd.f32 %v11391_v53, %v11481_v37  ;;  %v3873_v17 = vpack.c.bf16 %v3732_v46, %v3728_v26 }
 0x58c   : > { %5621 = vmatmul.mubr.bf16.gmra.mxu0 %v12631_v4  ;;  %5789 = vmatprep.mubr.bf16.mxu1 %v4641_v51  ;;  %v12635_v51 = vld [vmem:[#allocation42_spill] sm:$0xff] }
 0x58d   : > { %5628 = vmatprep.mubr.bf16.mxu0 %v12632_v42  ;;  %v3865_v4 = vpack.c.bf16 %v3722_v59, %v3718_v31  ;;  %v11626_v0 = vpop.f32.mrf.mxu0  ;;  %v3864_v20 = vpack.c.bf16 %v3720_v35, %v3716_v11  ;;  %v12638_v59 = vld [vmem:[#allocation144_spill] sm:$0xff]  ;;  %v3738_v31 = vadd.f32 %v11443_v32, %v11464_v52 }
 0x58f   : > { %v4657_v42 = vmul.bf16 %v11054_v1, %v3865_v4  ;;  %v11630_v53 = vpop.f32.mrf.mxu0  ;;  %v3881_v35 = vpack.c.bf16 %v3742_v61, %v3738_v31 }
 0x593   : > { %5790 = vmatmul.mubr.bf16.gmra.mxu1 %v4640_v40  ;;  %v4656_v40 = vmul.bf16 %v11054_v1, %v3864_v20  ;;  %v3740_v20 = vadd.f32 %v11455_v33, %v11481_v37  ;;  %v3748_v33 = vadd.f32 %v11483_v54, %v11464_v52 }
 0x594   : > { %5629 = vmatmul.mubr.bf16.gmra.mxu0 %v12634_v22  ;;  %5797 = vmatprep.mubr.bf16.mxu1 %v4649_v29  ;;  %v4665_v29 = vmul.bf16 %v11092_v14, %v3873_v17 }
 0x595   : > { %5636 = vmatprep.mubr.bf16.mxu0 %v12635_v51  ;;  %v3726_v51 = vadd.f32 %v11407_v60, %v11481_v37  ;;  %v4673_v60 = vmul.bf16 %v11128_v62, %v3881_v35  ;;  %v3750_v35 = vadd.f32 %v11495_v19, %v11481_v37  ;;  %v3758_v19 = vadd.f32 %v11518_v41, %v11464_v52 }
 0x597   : > { %v7278_v13 = vpop.f32.mrf.mxu0  ;;  %v7390_v22 = vpop.f32.mrf.mxu1  ;;  %v3872_v4 = vpack.c.bf16 %v3730_v2, %v3726_v51 }
 0x599   : > { %v7279_v1 = vpop.f32.mrf.mxu0  ;;  %v7391_v43 = vpop.f32.mrf.mxu1 }
 0x59a   : > { %v7280_v12 = vadd.f32 %v7279_v1, %v7278_v13  ;;  %v7392_v49 = vadd.f32 %v7391_v43, %v7390_v22  ;;  %v12641_v13 = vld [vmem:[#allocation108_spill] sm:$0xff] }
 0x59b   : > { %5798 = vmatmul.mubr.bf16.gmra.mxu1 %v4648_v28  ;;  %v7281_v28 = vpop.f32.mrf.mxu0 }
 0x59c   : > { %5637 = vmatmul.mubr.bf16.gmra.mxu0 %v12636_v36  ;;  %5805 = vmatprep.mubr.bf16.mxu1 %v4657_v42  ;;  %v7393_v42 = vpop.f32.mrf.mxu1  ;;  %v11644_v36 = vadd.f32 %v7392_v49, %v7280_v12 }
 0x59d   : > { %5644 = vmatprep.mubr.bf16.mxu0 %v12637_v55  ;;  %v7282_v21 = vpop.f32.mrf.mxu0  ;;  %v4664_v55 = vmul.bf16 %v11092_v14, %v3872_v4  ;;  %v3736_v14 = vadd.f32 %v11439_v16, %v11481_v37 }
 0x59e   : > { %v7394_v46 = vpop.f32.mrf.mxu1  ;;  %v7283_v11 = vadd.f32 %v7282_v21, %v7281_v28 }
 0x59f   : > { %v7395_v26 = vadd.f32 %v7394_v46, %v7393_v42  ;;  %v7284_v32 = vpop.f32.mrf.mxu0  ;;  %v3880_v51 = vpack.c.bf16 %v3740_v20, %v3736_v14  ;;  %v12642_v46 = vld [vmem:[#allocation105_spill] sm:$0xff] }
 0x5a0   : > { %v7396_v17 = vpop.f32.mrf.mxu1 }
 0x5a1   : > { %v11653_v2 = vadd.f32 %v7395_v26, %v7283_v11  ;;  %v7285_v22 = vpop.f32.mrf.mxu0  ;;  %v4672_v4 = vmul.bf16 %v11128_v62, %v3880_v51  ;;  %v12643_v26 = vld [vmem:[#allocation35_spill] sm:$0xff]  ;;  %v3746_v62 = vadd.f32 %v11476_v57, %v11481_v37  ;;  %v3760_v51 = vadd.f32 %v11530_v6, %v11481_v37 }
 0x5a2   : > { %v7286_v61 = vadd.f32 %v7285_v22, %v7284_v32  ;;  %v3768_v6 = vadd.f32 %v11550_v27, %v11464_v52 }
 0x5a3   : > { %5806 = vmatmul.mubr.bf16.gmra.mxu1 %v4656_v40  ;;  %v12640_v40 = vld [vmem:[#allocation99_spill] sm:$0xff]  ;;  %v7287_v1 = vpop.f32.mrf.mxu0 }
 0x5a4   : > { %5645 = vmatmul.mubr.bf16.gmra.mxu0 %v12638_v59  ;;  %5813 = vmatprep.mubr.bf16.mxu1 %v4665_v29  ;;  %v3752_v29 = vadd.f32 %v11499_v5, %v11464_v52  ;;  %v7397_v59 = vpop.f32.mrf.mxu1 }
 0x5a5   : > { %5652 = vmatprep.mubr.bf16.mxu0 %v12639_v56  ;;  %v7398_v56 = vadd.f32 %v7397_v59, %v7396_v17  ;;  %v7288_v12 = vpop.f32.mrf.mxu0 }
 0x5a6   : > { %v7399_v43 = vpop.f32.mrf.mxu1  ;;  %v3889_v31 = vpack.c.bf16 %v3752_v29, %v3748_v33  ;;  %v7289_v28 = vadd.f32 %v7288_v12, %v7287_v1 }
 0x5a7   : > { %v11660_v5 = vadd.f32 %v7398_v56, %v7286_v61  ;;  %v7290_v54 = vpop.f32.mrf.mxu0 }
 0x5a8   : > { %v7400_v49 = vpop.f32.mrf.mxu1  ;;  %v4681_v16 = vmul.bf16 %v11175_v63, %v3889_v31  ;;  %v3772_v31 = vadd.f32 %v11566_v44, %v11464_v52 }
 0x5a9   : > { %v7401_v42 = vadd.f32 %v7400_v49, %v7399_v43  ;;  %v12644_v43 = vld [vmem:[#allocation38_spill] sm:$0xff]  ;;  %v12645_v49 = vld [vmem:[#allocation103_spill] sm:$0xff] }
 0x5aa   : > { %v7402_v21 = vpop.f32.mrf.mxu1 }
 0x5ab   : > { %5814 = vmatmul.mubr.bf16.gmra.mxu1 %v4664_v55  ;;  %v3762_v55 = vadd.f32 %v11534_v47, %v11464_v52  ;;  %v11669_v11 = vadd.f32 %v7401_v42, %v7289_v28 }
 0x5ac   : > { %5653 = vmatmul.mubr.bf16.gmra.mxu0 %v12640_v40  ;;  %5821 = vmatprep.mubr.bf16.mxu1 %v4673_v60  ;;  %v7291_v60 = vpop.f32.mrf.mxu0  ;;  %v7403_v20 = vpop.f32.mrf.mxu1  ;;  %v3888_v40 = vpack.c.bf16 %v3750_v35, %v3746_v62 }
 0x5ad   : > { %5660 = vmatprep.mubr.bf16.mxu0 %v12641_v13  ;;  %v7292_v32 = vadd.f32 %v7291_v60, %v7290_v54  ;;  %v7404_v17 = vadd.f32 %v7403_v20, %v7402_v21  ;;  %v3897_v14 = vpack.c.bf16 %v3762_v55, %v3758_v19  ;;  %v3770_v19 = vadd.f32 %v11562_v3, %v11481_v37 }
 0x5ae   : > { %v7293_v29 = vpop.f32.mrf.mxu0  ;;  %v7405_v13 = vpop.f32.mrf.mxu1  ;;  %v4680_v33 = vmul.bf16 %v11175_v63, %v3888_v40  ;;  %v3756_v63 = vadd.f32 %v11512_v7, %v11481_v37  ;;  %v3782_v40 = vadd.f32 %v11598_v58, %v11464_v52  ;;  %v3778_v3 = vadd.f32 %v11582_v8, %v11464_v52 }
 0x5af   : > { %v11676_v47 = vadd.f32 %v7404_v17, %v7292_v32  ;;  %v4689_v57 = vmul.bf16 %v11216_v24, %v3897_v14  ;;  %v12646_v17 = vld [vmem:[#allocation102_spill] sm:$0xff] }
 0x5b0   : > { %v7294_v22 = vpop.f32.mrf.mxu0  ;;  %v7406_v59 = vpop.f32.mrf.mxu1  ;;  %v3896_v35 = vpack.c.bf16 %v3760_v51, %v3756_v63  ;;  %v3913_v51 = vpack.c.bf16 %v3782_v40, %v3778_v3  ;;  %v3780_v63 = vadd.f32 %v11594_v30, %v11481_v37  ;;  %v3788_v30 = vadd.f32 %v11614_v48, %v11464_v52 }
 0x5b1   : > { %v7295_v61 = vadd.f32 %v7294_v22, %v7293_v29  ;;  %v7407_v56 = vadd.f32 %v7406_v59, %v7405_v13  ;;  %v12647_v13 = vld [vmem:[#allocation26_spill] sm:$0xff] }
 0x5b2   : > { %v7296_v41 = vpop.f32.mrf.mxu0  ;;  %v7408_v1 = vpop.f32.mrf.mxu1  ;;  %v4688_v62 = vmul.bf16 %v11216_v24, %v3896_v35  ;;  %v3766_v24 = vadd.f32 %v11546_v18, %v11481_v37  ;;  %v4705_v18 = vmul.bf16 %v11292_v45, %v3913_v51 }
 0x5b3   : > { %5822 = vmatmul.mubr.bf16.gmra.mxu1 %v4672_v4  ;;  %v11685_v12 = vadd.f32 %v7407_v56, %v7295_v61 }
 0x5b4   : > { %5661 = vmatmul.mubr.bf16.gmra.mxu0 %v12642_v46  ;;  %5829 = vmatprep.mubr.bf16.mxu1 %v4681_v16  ;;  %v7297_v4 = vpop.f32.mrf.mxu0  ;;  %v7409_v28 = vpop.f32.mrf.mxu1  ;;  %v3905_v46 = vpack.c.bf16 %v3772_v31, %v3768_v6  ;;  %v3904_v61 = vpack.c.bf16 %v3770_v19, %v3766_v24  ;;  %v3792_v6 = vadd.f32 %v11630_v53, %v11464_v52 }
 0x5b5   : > { %5668 = vmatprep.mubr.bf16.mxu0 %v12643_v26  ;;  %v7298_v42 = vadd.f32 %v7297_v4, %v7296_v41  ;;  %v7410_v16 = vadd.f32 %v7409_v28, %v7408_v1  ;;  %v12648_v28 = vld [vmem:[#allocation142_spill] sm:$0xff] }
 0x5b6   : > { %v7299_v54 = vpop.f32.mrf.mxu0  ;;  %v7411_v21 = vpop.f32.mrf.mxu1  ;;  %v4697_v7 = vmul.bf16 %v11258_v39, %v3905_v46 }
 0x5b7   : > { %v11692_v44 = vadd.f32 %v7410_v16, %v7298_v42  ;;  %v12649_v16 = vld [vmem:[#allocation46_spill] sm:$0xff] }
 0x5b8   : > { %v7300_v55 = vpop.f32.mrf.mxu0  ;;  %v7412_v26 = vpop.f32.mrf.mxu1 }
 0x5b9   : > { %v7301_v60 = vadd.f32 %v7300_v55, %v7299_v54  ;;  %v7413_v20 = vadd.f32 %v7412_v26, %v7411_v21 }
 0x5ba   : > { %v7414_v32 = vpop.f32.mrf.mxu1 }
 0x5bb   : > { %5830 = vmatmul.mubr.bf16.gmra.mxu1 %v4680_v33  ;;  %v11701_v29 = vadd.f32 %v7413_v20, %v7301_v60  ;;  %v3921_v60 = vpack.c.bf16 %v3792_v6, %v3788_v30 }
 0x5bc   : > { %5669 = vmatmul.mubr.bf16.gmra.mxu0 %v12644_v43  ;;  %5837 = vmatprep.mubr.bf16.mxu1 %v4689_v57  ;;  %v7415_v22 = vpop.f32.mrf.mxu1  ;;  %v4696_v43 = vmul.bf16 %v11258_v39, %v3904_v61  ;;  %v3776_v39 = vadd.f32 %v11578_v50, %v11481_v37 }
 0x5bd   : > { %5676 = vmatprep.mubr.bf16.mxu0 %v12645_v49  ;;  %v7416_v33 = vadd.f32 %v7415_v22, %v7414_v32  ;;  %v4713_v50 = vmul.bf16 %v11332_v15, %v3921_v60 }
 0x5be   : > { %v7417_v57 = vpop.f32.mrf.mxu1  ;;  %v3912_v55 = vpack.c.bf16 %v3780_v63, %v3776_v39 }
 0x5c0   : > { %v7418_v1 = vpop.f32.mrf.mxu1  ;;  %v4704_v19 = vmul.bf16 %v11292_v45, %v3912_v55  ;;  %v3786_v45 = vadd.f32 %v11610_v23, %v11481_v37 }
 0x5c1   : > { %v7302_v27 = vpop.f32.mrf.mxu0  ;;  %v7419_v49 = vadd.f32 %v7418_v1, %v7417_v57 }
 0x5c3   : > { %5838 = vmatmul.mubr.bf16.gmra.mxu1 %v4688_v62  ;;  %v7303_v14 = vpop.f32.mrf.mxu0 }
 0x5c4   : > { %5677 = vmatmul.mubr.bf16.gmra.mxu0 %v12646_v17  ;;  %5845 = vmatprep.mubr.bf16.mxu1 %v4697_v7  ;;  %v7304_v59 = vadd.f32 %v7303_v14, %v7302_v27  ;;  %v3790_v17 = vadd.f32 %v11626_v0, %v11481_v37 }
 0x5c5   : > { %5684 = vmatprep.mubr.bf16.mxu0 %v12647_v13  ;;  %v7305_v56 = vpop.f32.mrf.mxu0 }
 0x5c6   : > { %v11708_v58 = vadd.f32 %v7416_v33, %v7304_v59  ;;  %v3920_v3 = vpack.c.bf16 %v3790_v17, %v3786_v45 }
 0x5c7   : > { %v7306_v41 = vpop.f32.mrf.mxu0  ;;  %v7420_v4 = vpop.f32.mrf.mxu1 }
 0x5c8   : > { %v7307_v31 = vadd.f32 %v7306_v41, %v7305_v56  ;;  %v4712_v56 = vmul.bf16 %v11332_v15, %v3920_v3 }
 0x5c9   : > { %v7308_v8 = vpop.f32.mrf.mxu0  ;;  %v7421_v54 = vpop.f32.mrf.mxu1 }
 0x5ca   : > { %v11717_v42 = vadd.f32 %v7419_v49, %v7307_v31  ;;  %v7422_v46 = vadd.f32 %v7421_v54, %v7420_v4  ;;  %v5979_v49 = vld [vmem:[#allocation3 + $0x8] sm:$0xff] }
 0x5cb   : > { %5846 = vmatmul.mubr.bf16.gmra.mxu1 %v4696_v43  ;;  %v7309_v35 = vpop.f32.mrf.mxu0  ;;  %v7423_v62 = vpop.f32.mrf.mxu1 }
 0x5cc   : > { %5685 = vmatmul.mubr.bf16.gmra.mxu0 %v12648_v28  ;;  %5853 = vmatprep.mubr.bf16.mxu1 %v4705_v18  ;;  %v7310_v21 = vadd.f32 %v7309_v35, %v7308_v8  ;;  %v5978_v8 = vld [vmem:[#allocation3] sm:$0xff] }
 0x5cd   : > { %5692 = vmatprep.mubr.bf16.mxu0 %v12649_v16  ;;  %v7311_v26 = vpop.f32.mrf.mxu0  ;;  %v7424_v7 = vpop.f32.mrf.mxu1  ;;  %v5980_v6 = vpack.c.bf16 %v5979_v49, %v5978_v8 }
 0x5ce   : > { %v11724_v53 = vadd.f32 %v7422_v46, %v7310_v21  ;;  %v7425_v32 = vadd.f32 %v7424_v7, %v7423_v62 }
 0x5cf   : > { %v7312_v20 = vpop.f32.mrf.mxu0 }
 0x5d0   : > { %v7313_v27 = vadd.f32 %v7312_v20, %v7311_v26 }
 0x5d1   : > { %v7426_v48 = vpop.f32.mrf.mxu1 }
 0x5d2   : > { %v11731_v40 = vadd.f32 %v7425_v32, %v7313_v27 }
 0x5d3   : > { %v7314_v52 = vpop.f32.mrf.mxu0  ;;  %5854 = vmatmul.mubr.bf16.gmra.mxu1 %v4704_v19  ;;  %v7427_v24 = vpop.f32.mrf.mxu1 }
 0x5d4   : > { %5693 = vmatmul.mubr.bf16.gmra.mxu0 %v11321_v38  ;;  %5861 = vmatprep.mubr.bf16.mxu1 %v4713_v50  ;;  %v7428_v22 = vadd.f32 %v7427_v24, %v7426_v48 }
 0x5d5   : > { %5700 = vmatprep.mubr.bf16.mxu0 %v11350_v9  ;;  %v7315_v13 = vpop.f32.mrf.mxu0  ;;  %v7429_v0 = vpop.f32.mrf.mxu1 }
 0x5d6   : > { %v7316_v14 = vadd.f32 %v7315_v13, %v7314_v52 }
 0x5d7   : > { %v7317_v59 = vpop.f32.mrf.mxu0  ;;  %v7430_v38 = vpop.f32.mrf.mxu1 }
 0x5d8   : > { %v11736_v33 = vadd.f32 %v7428_v22, %v7316_v14  ;;  %v7431_v51 = vadd.f32 %v7430_v38, %v7429_v0 }
 0x5d9   : > { %v7318_v61 = vpop.f32.mrf.mxu0 }
 0x5da   : > { %v7319_v57 = vadd.f32 %v7318_v61, %v7317_v59 }
 0x5db   : > { %v7432_v41 = vpop.f32.mrf.mxu1  ;;  %5862 = vmatmul.mubr.bf16.gmra.mxu1 %v4712_v56 }
 0x5dc   : > { %v7320_v9 = vpop.f32.mrf.mxu0  ;;  %5701 = vmatmul.mubr.bf16.gmra.mxu0 %v11356_v10  ;;  %v11740_v37 = vadd.f32 %v7431_v51, %v7319_v57  ;;  %7839 = vmatprep.mubr.msk.bf16.mxu1 %vm8346_vm4, %v12453_v34 }
 0x5dd   : > { %v7433_v1 = vpop.f32.mrf.mxu1 }
 0x5de   : > { %v7321_v23 = vpop.f32.mrf.mxu0  ;;  %v7434_v31 = vadd.f32 %v7433_v1, %v7432_v41 }
 0x5df   : > { %v7322_v43 = vadd.f32 %v7321_v23, %v7320_v9  ;;  %v7435_v63 = vpop.f32.mrf.mxu1 }
 0x5e0   : > { %v7323_v18 = vpop.f32.mrf.mxu0 }
 0x5e1   : > { %v11743_v15 = vadd.f32 %v7434_v31, %v7322_v43  ;;  %v7436_v28 = vpop.f32.mrf.mxu1 }
 0x5e2   : > { %v7324_v4 = vpop.f32.mrf.mxu0  ;;  %v7437_v16 = vadd.f32 %v7436_v28, %v7435_v63 }
 0x5e3   : > { %v7325_v10 = vadd.f32 %v7324_v4, %v7323_v18  ;;  %v7438_v35 = vpop.f32.mrf.mxu1  ;;  %7840 = vmatmul.mubr.msk.bf16.vlgmr.msra.gmra.mxu1 %vm2323_vm0, %v5980_v6 }
 0x5e4   : > { %v7326_v39 = vpop.f32.mrf.mxu0 }
 0x5e5   : > { %v11746_v34 = vadd.f32 %v7437_v16, %v7325_v10  ;;  %v7439_v30 = vpop.f32.mrf.mxu1 }
 0x5e6   : > { %v7327_v54 = vpop.f32.mrf.mxu0  ;;  %v7440_v46 = vadd.f32 %v7439_v30, %v7438_v35 }
 0x5e7   : > { %v7328_v21 = vadd.f32 %v7327_v54, %v7326_v39  ;;  %v7441_v26 = vpop.f32.mrf.mxu1 }
 0x5e8   : > { %v7329_v55 = vpop.f32.mrf.mxu0 }
 0x5e9   : > { %v11748_v62 = vadd.f32 %v7440_v46, %v7328_v21  ;;  %v7442_v20 = vpop.f32.mrf.mxu1 }
 0x5ea   : > { %v7330_v60 = vpop.f32.mrf.mxu0  ;;  %v7443_v19 = vadd.f32 %v7442_v20, %v7441_v26 }
 0x5eb   : > { %v7331_v7 = vadd.f32 %v7330_v60, %v7329_v55  ;;  %v7444_v32 = vpop.f32.mrf.mxu1 }
 0x5ec   : > { %v7332_v27 = vpop.f32.mrf.mxu0 }
 0x5ed   : > { %v11750_v50 = vadd.f32 %v7443_v19, %v7331_v7  ;;  %v7445_v52 = vpop.f32.mrf.mxu1 }
 0x5ee   : > { %v7333_v17 = vpop.f32.mrf.mxu0  ;;  %v7446_v45 = vadd.f32 %v7445_v52, %v7444_v32 }
 0x5ef   : > { %v7334_v48 = vadd.f32 %v7333_v17, %v7332_v27  ;;  %v7447_v24 = vpop.f32.mrf.mxu1 }
 0x5f0   : > { %v7335_v13 = vpop.f32.mrf.mxu0 }
 0x5f1   : > { %v11752_v14 = vadd.f32 %v7446_v45, %v7334_v48  ;;  %v7448_v3 = vpop.f32.mrf.mxu1 }
 0x5f2   : > { %v7336_v22 = vpop.f32.mrf.mxu0  ;;  %v7449_v0 = vadd.f32 %v7448_v3, %v7447_v24 }
 0x5f3   : > { %v7337_v59 = vadd.f32 %v7336_v22, %v7335_v13  ;;  %v7450_v38 = vpop.f32.mrf.mxu1 }
 0x5f4   : > { %v7338_v61 = vpop.f32.mrf.mxu0 }
 0x5f5   : > { %v11754_v56 = vadd.f32 %v7449_v0, %v7337_v59  ;;  %v7451_v51 = vpop.f32.mrf.mxu1 }
 0x5f6   : > { %v7339_v57 = vpop.f32.mrf.mxu0  ;;  %v7452_v41 = vadd.f32 %v7451_v51, %v7450_v38 }
 0x5f7   : > { %v7340_v9 = vadd.f32 %v7339_v57, %v7338_v61  ;;  %v7453_v1 = vpop.f32.mrf.mxu1 }
 0x5f8   : > { %v7341_v23 = vpop.f32.mrf.mxu0 }
 0x5f9   : > { %v11756_v43 = vadd.f32 %v7452_v41, %v7340_v9  ;;  %v7454_v49 = vpop.f32.mrf.mxu1 }
 0x5fa   : > { %v7342_v31 = vpop.f32.mrf.mxu0  ;;  %v7455_v63 = vadd.f32 %v7454_v49, %v7453_v1 }
 0x5fb   : > { %v7343_v18 = vadd.f32 %v7342_v31, %v7341_v23  ;;  %v7456_v4 = vpop.f32.mrf.mxu1 }
 0x5fc   : > { %v7344_v8 = vpop.f32.mrf.mxu0 }
 0x5fd   : > { %v11758_v28 = vadd.f32 %v7455_v63, %v7343_v18  ;;  %v7457_v10 = vpop.f32.mrf.mxu1 }
 0x5fe   : > { %v7345_v6 = vpop.f32.mrf.mxu0  ;;  %v7458_v39 = vadd.f32 %v7457_v10, %v7456_v4 }
 0x5ff   : > { %v7346_v16 = vadd.f32 %v7345_v6, %v7344_v8  ;;  %v7459_v54 = vpop.f32.mrf.mxu1 }
 0x600   : > { %v7347_v35 = vpop.f32.mrf.mxu0 }
 0x601   : > { %v11760_v30 = vadd.f32 %v7458_v39, %v7346_v16  ;;  %v7460_v46 = vpop.f32.mrf.mxu1 }
 0x602   : > { %v7348_v21 = vpop.f32.mrf.mxu0  ;;  %v7461_v26 = vadd.f32 %v7460_v46, %v7459_v54 }
 0x603   : > { %12650 = vst [vmem:[#allocation45_spill] sm:$0xff] %v11760_v30  ;;  %v7349_v55 = vadd.f32 %v7348_v21, %v7347_v35  ;;  %v7462_v20 = vpop.f32.mrf.mxu1 }
 0x604   : > { %v7350_v60 = vpop.f32.mrf.mxu0 }
 0x605   : > { %v11762_v7 = vadd.f32 %v7461_v26, %v7349_v55  ;;  %v7463_v27 = vpop.f32.mrf.mxu1 }
 0x606   : > { %v7351_v19 = vpop.f32.mrf.mxu0  ;;  %v7464_v17 = vadd.f32 %v7463_v27, %v7462_v20 }
 0x607   : > { %v7352_v32 = vadd.f32 %v7351_v19, %v7350_v60  ;;  %v7465_v48 = vpop.f32.mrf.mxu1 }
 0x608   : > { %v7353_v52 = vpop.f32.mrf.mxu0 }
 0x609   : > { %v11764_v45 = vadd.f32 %v7464_v17, %v7352_v32  ;;  %v7466_v24 = vpop.f32.mrf.mxu1 }
 0x60a   : > { %v7354_v13 = vpop.f32.mrf.mxu0  ;;  %v7467_v3 = vadd.f32 %v7466_v24, %v7465_v48 }
 0x60b   : > { %v7355_v22 = vadd.f32 %v7354_v13, %v7353_v52  ;;  %v7468_v0 = vpop.f32.mrf.mxu1 }
 0x60c   : > { %v7356_v59 = vpop.f32.mrf.mxu0 }
 0x60d   : > { %v11766_v61 = vadd.f32 %v7467_v3, %v7355_v22  ;;  %v7469_v57 = vpop.f32.mrf.mxu1 }
 0x60e   : > { %v7357_v38 = vpop.f32.mrf.mxu0  ;;  %v7470_v9 = vadd.f32 %v7469_v57, %v7468_v0 }
 0x60f   : > { %v7358_v51 = vadd.f32 %v7357_v38, %v7356_v59  ;;  %v7471_v23 = vpop.f32.mrf.mxu1 }
 0x610   : > { %v7359_v41 = vpop.f32.mrf.mxu0 }
 0x611   : > { %v11768_v1 = vadd.f32 %v7470_v9, %v7358_v51  ;;  %v7472_v49 = vpop.f32.mrf.mxu1 }
 0x612   : > { %v7360_v31 = vpop.f32.mrf.mxu0  ;;  %v7473_v63 = vadd.f32 %v7472_v49, %v7471_v23 }
 0x613   : > { %v7361_v18 = vadd.f32 %v7360_v31, %v7359_v41  ;;  %v7474_v4 = vpop.f32.mrf.mxu1 }
 0x614   : > { %v7362_v8 = vpop.f32.mrf.mxu0 }
 0x615   : > { %v11770_v6 = vadd.f32 %v7473_v63, %v7361_v18  ;;  %v7475_v16 = vpop.f32.mrf.mxu1 }
 0x616   : > { %v7363_v10 = vpop.f32.mrf.mxu0  ;;  %v7476_v35 = vadd.f32 %v7475_v16, %v7474_v4 }
 0x617   : > { %v7364_v39 = vadd.f32 %v7363_v10, %v7362_v8  ;;  %v7477_v21 = vpop.f32.mrf.mxu1 }
 0x618   : > { %v7365_v54 = vpop.f32.mrf.mxu0 }
 0x619   : > { %v11772_v46 = vadd.f32 %v7476_v35, %v7364_v39  ;;  %v7478_v26 = vpop.f32.mrf.mxu1 }
 0x61a   : > { %v7366_v55 = vpop.f32.mrf.mxu0  ;;  %v7479_v20 = vadd.f32 %v7478_v26, %v7477_v21 }
 0x61b   : > { %v7367_v60 = vadd.f32 %v7366_v55, %v7365_v54  ;;  %v7480_v27 = vpop.f32.mrf.mxu1 }
 0x61c   : > { %v7368_v19 = vpop.f32.mrf.mxu0 }
 0x61d   : > { %v11774_v32 = vadd.f32 %v7479_v20, %v7367_v60  ;;  %v7481_v52 = vpop.f32.mrf.mxu1 }
 0x61e   : > { %v7369_v17 = vpop.f32.mrf.mxu0  ;;  %v7482_v13 = vadd.f32 %v7481_v52, %v7480_v27 }
 0x61f   : > { %v7370_v48 = vadd.f32 %v7369_v17, %v7368_v19  ;;  %v7483_v22 = vpop.f32.mrf.mxu1 }
 0x620   : > { %v7371_v24 = vpop.f32.mrf.mxu0 }
 0x621   : > { %v11776_v3 = vadd.f32 %v7482_v13, %v7370_v48  ;;  %v7484_v0 = vpop.f32.mrf.mxu1 }
 0x622   : > { %v7372_v59 = vpop.f32.mrf.mxu0  ;;  %v7485_v57 = vadd.f32 %v7484_v0, %v7483_v22 }
 0x623   : > { %v7373_v38 = vadd.f32 %v7372_v59, %v7371_v24  ;;  %v7614_v9 = vpop.f32.mrf.mxu1 }
 0x624   : > { %v7502_v51 = vpop.f32.mrf.mxu0 }
 0x625   : > { %v11778_v41 = vadd.f32 %v7485_v57, %v7373_v38  ;;  %v7615_v31 = vpop.f32.mrf.mxu1 }
 0x626   : > { %v7503_v23 = vpop.f32.mrf.mxu0  ;;  %v7616_v18 = vadd.f32 %v7615_v31, %v7614_v9 }
 0x627   : > { %v7504_v49 = vadd.f32 %v7503_v23, %v7502_v51  ;;  %v7617_v8 = vpop.f32.mrf.mxu1 }
 0x628   : > { %v7505_v63 = vpop.f32.mrf.mxu0 }
 0x629   : > { %v5583_v4 = vadd.f32 %v7504_v49, %v11644_v36  ;;  %v7618_v16 = vpop.f32.mrf.mxu1 }
 0x62a   : > { %v7506_v10 = vpop.f32.mrf.mxu0  ;;  %v7619_v54 = vadd.f32 %v7618_v16, %v7617_v8 }
 0x62b   : > { %v11781_v39 = vadd.f32 %v7616_v18, %v5583_v4  ;;  %v7507_v35 = vadd.f32 %v7506_v10, %v7505_v63  ;;  %v7620_v55 = vpop.f32.mrf.mxu1 }
 0x62c   : > { %v7508_v21 = vpop.f32.mrf.mxu0 }
 0x62d   : > { %12651 = vst [vmem:[#allocation112_spill] sm:$0xff] %v11781_v39  ;;  %v5586_v26 = vadd.f32 %v7507_v35, %v11653_v2  ;;  %v7621_v20 = vpop.f32.mrf.mxu1 }
 0x62e   : > { %v7509_v60 = vpop.f32.mrf.mxu0  ;;  %v7622_v17 = vadd.f32 %v7621_v20, %v7620_v55 }
 0x62f   : > { %v11784_v19 = vadd.f32 %v7619_v54, %v5586_v26  ;;  %v7510_v27 = vadd.f32 %v7509_v60, %v7508_v21  ;;  %v7623_v48 = vpop.f32.mrf.mxu1 }
 0x630   : > { %v7511_v52 = vpop.f32.mrf.mxu0 }
 0x631   : > { %12652 = vst [vmem:[#allocation136_spill] sm:$0xff] %v11784_v19  ;;  %v5591_v36 = vadd.f32 %v7510_v27, %v11660_v5  ;;  %v7624_v24 = vpop.f32.mrf.mxu1 }
 0x632   : > { %v7512_v13 = vpop.f32.mrf.mxu0  ;;  %v7625_v0 = vadd.f32 %v7624_v24, %v7623_v48 }
 0x633   : > { %v11787_v22 = vadd.f32 %v7622_v17, %v5591_v36  ;;  %v7513_v59 = vadd.f32 %v7512_v13, %v7511_v52  ;;  %v7626_v57 = vpop.f32.mrf.mxu1 }
 0x634   : > { %v7514_v38 = vpop.f32.mrf.mxu0 }
 0x635   : > { %12653 = vst [vmem:[#allocation148_spill] sm:$0xff] %v11787_v22  ;;  %v5594_v2 = vadd.f32 %v7513_v59, %v11669_v11  ;;  %v7627_v9 = vpop.f32.mrf.mxu1 }
 0x636   : > { %v7515_v51 = vpop.f32.mrf.mxu0  ;;  %v7628_v49 = vadd.f32 %v7627_v9, %v7626_v57 }
 0x637   : > { %v11790_v23 = vadd.f32 %v7625_v0, %v5594_v2  ;;  %v7516_v31 = vadd.f32 %v7515_v51, %v7514_v38  ;;  %v7629_v63 = vpop.f32.mrf.mxu1  ;;  %v11802_v51 = vld [vmem:[#allocation6] sm:$0x3] }
 0x638   : > { %v7517_v18 = vpop.f32.mrf.mxu0  ;;  %12658 = vst [vmem:[#allocation145_spill] sm:$0xff] %v11802_v51 }
 0x639   : > { %12654 = vst [vmem:[#allocation109_spill] sm:$0xff] %v11790_v23  ;;  %v5599_v5 = vadd.f32 %v7516_v31, %v11676_v47  ;;  %v7630_v4 = vpop.f32.mrf.mxu1 }
 0x63a   : > { %v7518_v8 = vpop.f32.mrf.mxu0  ;;  %v7631_v35 = vadd.f32 %v7630_v4, %v7629_v63 }
 0x63b   : > { %v11793_v10 = vadd.f32 %v7628_v49, %v5599_v5  ;;  %v7519_v16 = vadd.f32 %v7518_v8, %v7517_v18  ;;  %v7632_v21 = vpop.f32.mrf.mxu1 }
 0x63c   : > { %v7520_v54 = vpop.f32.mrf.mxu0 }
 0x63d   : > { %12655 = vst [vmem:[#allocation146_spill] sm:$0xff] %v11793_v10  ;;  %v5602_v11 = vadd.f32 %v7519_v16, %v11685_v12  ;;  %v7633_v26 = vpop.f32.mrf.mxu1  ;;  %v12126_v16 = vmov 1.0  }
 0x63e   : > { %v7521_v55 = vpop.f32.mrf.mxu0  ;;  %v7634_v27 = vadd.f32 %v7633_v26, %v7632_v21 }
 0x63f   : > { %v11796_v60 = vadd.f32 %v7631_v35, %v5602_v11  ;;  %v7522_v20 = vadd.f32 %v7521_v55, %v7520_v54  ;;  %v7635_v52 = vpop.f32.mrf.mxu1 }
 0x640   : > { %v7523_v17 = vpop.f32.mrf.mxu0 }
 0x641   : > { %12656 = vst [vmem:[#allocation107_spill] sm:$0xff] %v11796_v60  ;;  %v5607_v47 = vadd.f32 %v7522_v20, %v11692_v44  ;;  %v7636_v36 = vpop.f32.mrf.mxu1  ;;  %v12660_v44 = vsub.s32 1, %v9813_v25 }
 0x642   : > { %v7524_v48 = vpop.f32.mrf.mxu0  ;;  %v7637_v59 = vadd.f32 %v7636_v36, %v7635_v52 }
 0x643   : > { %v11799_v13 = vadd.f32 %v7634_v27, %v5607_v47  ;;  %v7525_v24 = vadd.f32 %v7524_v48, %v7523_v17  ;;  %v7638_v38 = vpop.f32.mrf.mxu1  ;;  %v11809_v18 = vrot.slane %v11802_v51, %v12660_v44 }
 0x644   : > { %v7526_v0 = vpop.f32.mrf.mxu0 }
 0x645   : > { %12657 = vst [vmem:[#allocation106_spill] sm:$0xff] %v11799_v13  ;;  %v5610_v12 = vadd.f32 %v7525_v24, %v11701_v29  ;;  %v7639_v2 = vpop.f32.mrf.mxu1  ;;  %12661 = vst [vmem:[#allocation147_spill] sm:$0xff] %v11809_v18  ;;  %vm5883_vm9 = vcmp.eq.s32.totalorder %v9813_v25, %v11809_v18 }
 0x646   : > { %v7527_v57 = vpop.f32.mrf.mxu0  ;;  %v7640_v49 = vadd.f32 %v7639_v2, %v7638_v38  ;;  %7075 = vmatprep.mubr.msk.f32.mxu0 %vm5883_vm9, %v12126_v16 }
 0x647   : > { %v11804_v9 = vadd.f32 %v7637_v59, %v5610_v12  ;;  %v7528_v31 = vadd.f32 %v7527_v57, %v7526_v0  ;;  %v7641_v5 = vpop.f32.mrf.mxu1 }
 0x648   : > { %v7529_v63 = vpop.f32.mrf.mxu0 }
 0x649   : > { %12659 = vst [vmem:[#allocation116_spill] sm:$0xff] %v11804_v9  ;;  %v5615_v8 = vadd.f32 %v7528_v31, %v11708_v58  ;;  %v7642_v4 = vpop.f32.mrf.mxu1 }
 0x64a   : > { %v7530_v29 = vpop.f32.mrf.mxu0  ;;  %v7643_v21 = vadd.f32 %v7642_v4, %v7641_v5 }
 0x64b   : > { %v11815_v35 = vadd.f32 %v7640_v49, %v5615_v8  ;;  %v7531_v54 = vadd.f32 %v7530_v29, %v7529_v63  ;;  %v7644_v55 = vpop.f32.mrf.mxu1 }
 0x64c   : > { %v7532_v11 = vpop.f32.mrf.mxu0 }
 0x64d   : > { %12662 = vst [vmem:[#allocation113_spill] sm:$0xff] %v11815_v35  ;;  %v5618_v26 = vadd.f32 %v7531_v54, %v11717_v42  ;;  %v7645_v27 = vpop.f32.mrf.mxu1 }
 0x64e   : > { %v7533_v20 = vpop.f32.mrf.mxu0  ;;  %v7646_v52 = vadd.f32 %v7645_v27, %v7644_v55 }
 0x64f   : > { %v11818_v17 = vadd.f32 %v7643_v21, %v5618_v26  ;;  %v7534_v58 = vadd.f32 %v7533_v20, %v7532_v11  ;;  %v7647_v48 = vpop.f32.mrf.mxu1 }
 0x650   : > { %v7535_v47 = vpop.f32.mrf.mxu0 }
 0x651   : > { %12663 = vst [vmem:[#allocation44_spill] sm:$0xff] %v11818_v17  ;;  %v5623_v36 = vadd.f32 %v7534_v58, %v11724_v53  ;;  %v7648_v59 = vpop.f32.mrf.mxu1 }
 0x652   : > { %v7536_v24 = vpop.f32.mrf.mxu0  ;;  %v7649_v12 = vadd.f32 %v7648_v59, %v7647_v48 }
 0x653   : > { %v11821_v0 = vadd.f32 %v7646_v52, %v5623_v36  ;;  %v7537_v38 = vadd.f32 %v7536_v24, %v7535_v47  ;;  %v7650_v2 = vpop.f32.mrf.mxu1 }
 0x654   : > { %v7538_v57 = vpop.f32.mrf.mxu0 }
 0x655   : > { %12664 = vst [vmem:[#allocation43_spill] sm:$0xff] %v11821_v0  ;;  %v5626_v42 = vadd.f32 %v7537_v38, %v11731_v40  ;;  %v7651_v49 = vpop.f32.mrf.mxu1 }
 0x656   : > { %v7539_v31 = vpop.f32.mrf.mxu0  ;;  %v7652_v5 = vadd.f32 %v7651_v49, %v7650_v2 }
 0x657   : > { %v11824_v44 = vadd.f32 %v7649_v12, %v5626_v42  ;;  %v7540_v63 = vadd.f32 %v7539_v31, %v7538_v57  ;;  %v7653_v29 = vpop.f32.mrf.mxu1 }
 0x658   : > { %v7541_v8 = vpop.f32.mrf.mxu0 }
 0x659   : > { %v5631_v53 = vadd.f32 %v7540_v63, %v11736_v33  ;;  %v7654_v54 = vpop.f32.mrf.mxu1 }
 0x65a   : > { %v7542_v4 = vpop.f32.mrf.mxu0  ;;  %v7655_v55 = vadd.f32 %v7654_v54, %v7653_v29 }
 0x65b   : > { %v11827_v21 = vadd.f32 %v7652_v5, %v5631_v53  ;;  %v7543_v11 = vadd.f32 %v7542_v4, %v7541_v8  ;;  %v7656_v20 = vpop.f32.mrf.mxu1 }
 0x65c   : > { %v7544_v26 = vpop.f32.mrf.mxu0 }
 0x65d   : > { %v5634_v40 = vadd.f32 %v7543_v11, %v11740_v37  ;;  %v7657_v58 = vpop.f32.mrf.mxu1 }
 0x65e   : > { %v7545_v27 = vpop.f32.mrf.mxu0  ;;  %v7658_v48 = vadd.f32 %v7657_v58, %v7656_v20 }
 0x65f   : > { %v11830_v52 = vadd.f32 %v7655_v55, %v5634_v40  ;;  %v7546_v47 = vadd.f32 %v7545_v27, %v7544_v26  ;;  %v7659_v24 = vpop.f32.mrf.mxu1 }
 0x660   : > { %v7547_v36 = vpop.f32.mrf.mxu0 }
 0x661   : > { %v5639_v33 = vadd.f32 %v7546_v47, %v11743_v15  ;;  %v7660_v38 = vpop.f32.mrf.mxu1 }
 0x662   : > { %v7548_v59 = vpop.f32.mrf.mxu0  ;;  %v7661_v2 = vadd.f32 %v7660_v38, %v7659_v24 }
 0x663   : > { %v11833_v12 = vadd.f32 %v7658_v48, %v5639_v33  ;;  %v7549_v57 = vadd.f32 %v7548_v59, %v7547_v36  ;;  %v7662_v31 = vpop.f32.mrf.mxu1 }
 0x664   : > { %v7550_v42 = vpop.f32.mrf.mxu0 }
 0x665   : > { %v5642_v37 = vadd.f32 %v7549_v57, %v11746_v34  ;;  %v7663_v63 = vpop.f32.mrf.mxu1 }
 0x666   : > { %v7551_v49 = vpop.f32.mrf.mxu0  ;;  %v7664_v29 = vadd.f32 %v7663_v63, %v7662_v31 }
 0x667   : > { %v11836_v5 = vadd.f32 %v7661_v2, %v5642_v37  ;;  %v7552_v8 = vadd.f32 %v7551_v49, %v7550_v42  ;;  %v7665_v4 = vpop.f32.mrf.mxu1 }
 0x668   : > { %v7553_v53 = vpop.f32.mrf.mxu0 }
 0x669   : > { %v5647_v15 = vadd.f32 %v7552_v8, %v11748_v62  ;;  %v7666_v11 = vpop.f32.mrf.mxu1 }
 0x66a   : > { %v7554_v54 = vpop.f32.mrf.mxu0  ;;  %v7667_v20 = vadd.f32 %v7666_v11, %v7665_v4 }
 0x66b   : > { %v11839_v55 = vadd.f32 %v7664_v29, %v5647_v15  ;;  %v7555_v26 = vadd.f32 %v7554_v54, %v7553_v53  ;;  %v7668_v27 = vpop.f32.mrf.mxu1 }
 0x66c   : > { %v7556_v40 = vpop.f32.mrf.mxu0 }
 0x66d   : > { %12665 = vst [vmem:[#allocation111_spill] sm:$0xff] %v11839_v55  ;;  %v5650_v34 = vadd.f32 %v7555_v26, %v11750_v50  ;;  %v7669_v47 = vpop.f32.mrf.mxu1 }
 0x66e   : > { %v7557_v58 = vpop.f32.mrf.mxu0  ;;  %v7670_v24 = vadd.f32 %v7669_v47, %v7668_v27 }
 0x66f   : > { %v11842_v48 = vadd.f32 %v7667_v20, %v5650_v34  ;;  %v7558_v36 = vadd.f32 %v7557_v58, %v7556_v40  ;;  %v7671_v59 = vpop.f32.mrf.mxu1 }
 0x670   : > { %v7559_v33 = vpop.f32.mrf.mxu0 }
 0x671   : > { %12666 = vst [vmem:[#allocation110_spill] sm:$0xff] %v11842_v48  ;;  %v5655_v62 = vadd.f32 %v7558_v36, %v11752_v14  ;;  %v7672_v57 = vpop.f32.mrf.mxu1 }
 0x672   : > { %v7560_v38 = vpop.f32.mrf.mxu0  ;;  %v7673_v31 = vadd.f32 %v7672_v57, %v7671_v59 }
 0x673   : > { %v11845_v2 = vadd.f32 %v7670_v24, %v5655_v62  ;;  %v7561_v42 = vadd.f32 %v7560_v38, %v7559_v33  ;;  %v7674_v49 = vpop.f32.mrf.mxu1 }
 0x674   : > { %v7562_v37 = vpop.f32.mrf.mxu0 }
 0x675   : > { %12667 = vst [vmem:[#allocation151_spill] sm:$0xff] %v11845_v2  ;;  %v5658_v50 = vadd.f32 %v7561_v42, %v11754_v56  ;;  %v7675_v8 = vpop.f32.mrf.mxu1 }
 0x676   : > { %v7563_v63 = vpop.f32.mrf.mxu0  ;;  %v7676_v4 = vadd.f32 %v7675_v8, %v7674_v49 }
 0x677   : > { %v11848_v29 = vadd.f32 %v7673_v31, %v5658_v50  ;;  %v7564_v53 = vadd.f32 %v7563_v63, %v7562_v37  ;;  %v7677_v54 = vpop.f32.mrf.mxu1 }
 0x678   : > { %v7565_v15 = vpop.f32.mrf.mxu0 }
 0x679   : > { %12668 = vst [vmem:[#allocation152_spill] sm:$0xff] %v11848_v29  ;;  %v5663_v14 = vadd.f32 %v7564_v53, %v11756_v43  ;;  %v7678_v26 = vpop.f32.mrf.mxu1 }
 0x67a   : > { %v7566_v11 = vpop.f32.mrf.mxu0  ;;  %v7679_v58 = vadd.f32 %v7678_v26, %v7677_v54 }
 0x67b   : > { %v11851_v20 = vadd.f32 %v7676_v4, %v5663_v14  ;;  %v7567_v40 = vadd.f32 %v7566_v11, %v7565_v15  ;;  %v11855_v34 = vpop.f32.mrf.mxu1 }
 0x67c   : > { %v11853_v27 = vpop.f32.mrf.mxu0  ;;  %12670 = vst [vmem:[#allocation49_spill] sm:$0xff] %v11855_v34 }
 0x67d   : > { %12669 = vst [vmem:[#allocation50_spill] sm:$0xff] %v11851_v20  ;;  %v5666_v56 = vadd.f32 %v7567_v40, %v11758_v28  ;;  %v11860_v36 = vpop.f32.mrf.mxu1 }
 0x67e   : > { %v11858_v47 = vpop.f32.mrf.mxu0  ;;  %12671 = vst [vmem:[#allocation120_spill] sm:$0xff] %v11860_v36 }
 0x67f   : > { %v11862_v24 = vadd.f32 %v7679_v58, %v5666_v56  ;;  %v11866_v43 = vpop.f32.mrf.mxu1 }
 0x680   : > { %v11864_v33 = vpop.f32.mrf.mxu0  ;;  %12673 = vst [vmem:[#allocation66_spill] sm:$0xff] %v11866_v43 }
 0x681   : > { %12672 = vst [vmem:[#allocation149_spill] sm:$0xff] %v11862_v24  ;;  %v11870_v62 = vpop.f32.mrf.mxu1 }
 0x682   : > { %v11868_v59 = vpop.f32.mrf.mxu0  ;;  %12674 = vst [vmem:[#allocation65_spill] sm:$0xff] %v11870_v62 }
 0x683   : > { %v11872_v57 = vpop.f32.mrf.mxu1 }
 0x684   : > { %v7574_v38 = vpop.f32.mrf.mxu0 }
 0x685   : > { %v11874_v28 = vpop.f32.mrf.mxu1 }
 0x686   : > { %v7575_v42 = vpop.f32.mrf.mxu0 }
 0x687   : > { %v11876_v37 = vpop.f32.mrf.mxu1 }
 0x688   : > { %v7577_v31 = vpop.f32.mrf.mxu0 }
 0x689   : > { %v11878_v50 = vpop.f32.mrf.mxu1 }
 0x68a   : > { %v7578_v49 = vpop.f32.mrf.mxu0 }
 0x68b   : > { %v7692_v8 = vpop.f32.mrf.mxu1 }
 0x68c   : > { %v7580_v63 = vpop.f32.mrf.mxu0 }
 0x68d   : > { %v7693_v4 = vpop.f32.mrf.mxu1 }
 0x68e   : > { %v7581_v53 = vpop.f32.mrf.mxu0 }
 0x68f   : > { %v7695_v54 = vpop.f32.mrf.mxu1 }
 0x690   : > { %v7583_v15 = vpop.f32.mrf.mxu0 }
 0x691   : > { %v7696_v11 = vpop.f32.mrf.mxu1 }
 0x692   : > { %v7584_v14 = vpop.f32.mrf.mxu0 }
 0x693   : > { %v7698_v40 = vpop.f32.mrf.mxu1  ;;  %v7585_v17 = vadd.f32 %v7584_v14, %v7583_v15  ;;  %v12697_v15 = vld [vmem:[#allocation136_spill] sm:$0xff]  ;;  %v12699_v14 = vld [vmem:[#allocation147_spill] sm:$0xff] }
 0x694   : > { %v7586_v26 = vpop.f32.mrf.mxu0 }
 0x695   : > { %v7699_v58 = vpop.f32.mrf.mxu1 }
 0x696   : > { %v7587_v56 = vpop.f32.mrf.mxu0 }
 0x697   : > { %v7701_v39 = vpop.f32.mrf.mxu1  ;;  %v7588_v13 = vadd.f32 %v7587_v56, %v7586_v26  ;;  %v12701_v26 = vmov 1.0   ;;  %v5894_v56 = vld [vmem:[#allocation4] sm:$0xff] }
 0x698   : > { %v7589_v16 = vpop.f32.mrf.mxu0 }
 0x699   : > { %v7702_v55 = vpop.f32.mrf.mxu1 }
 0x69a   : > { %v7590_v18 = vpop.f32.mrf.mxu0 }
 0x69b   : > { %v7704_v48 = vpop.f32.mrf.mxu1  ;;  %v7591_v20 = vadd.f32 %v7590_v18, %v7589_v16  ;;  %v7697_v16 = vadd.f32 %v7696_v11, %v7695_v54  ;;  %v12698_v54 = vld [vmem:[#allocation111_spill] sm:$0xff]  ;;  %v12700_v11 = vld [vmem:[#allocation112_spill] sm:$0xff] }
 0x69c   : > { %v7592_v19 = vpop.f32.mrf.mxu0 }
 0x69d   : > { %v7705_v2 = vpop.f32.mrf.mxu1  ;;  %v5698_v62 = vadd.f32 %v7591_v20, %v11774_v32  ;;  %v7576_v32 = vadd.f32 %v7575_v42, %v7574_v38  ;;  %v12679_v20 = vld [vmem:[#allocation44_spill] sm:$0xff]  ;;  %v12687_v38 = vld [vmem:[#allocation50_spill] sm:$0xff] }
 0x69e   : > { %v7593_v22 = vpop.f32.mrf.mxu0  ;;  %v7706_v43 = vadd.f32 %v7705_v2, %v7704_v48  ;;  %v12677_v48 = vld [vmem:[#allocation66_spill] sm:$0xff]  ;;  %v12689_v42 = vld [vmem:[#allocation152_spill] sm:$0xff] }
 0x69f   : > { %v7707_v25 = vpop.f32.mrf.mxu1  ;;  %v7594_v23 = vadd.f32 %v7593_v22, %v7592_v19  ;;  %v7582_v19 = vadd.f32 %v7581_v53, %v7580_v63  ;;  %v5695_v22 = vadd.f32 %v7588_v13, %v11772_v46  ;;  %v7570_v13 = vadd.f32 %v11858_v47, %v11853_v27  ;;  %v12680_v27 = vld [vmem:[#allocation49_spill] sm:$0xff]  ;;  %v12694_v63 = vld [vmem:[#allocation151_spill] sm:$0xff]  ;;  %v12695_v53 = vld [vmem:[#allocation148_spill] sm:$0xff] }
 0x6a0   : > { %v7595_v51 = vpop.f32.mrf.mxu0  ;;  %v12682_v47 = vld [vmem:[#allocation113_spill] sm:$0xff] }
 0x6a1   : > { %v7708_v10 = vpop.f32.mrf.mxu1  ;;  %v5703_v9 = vadd.f32 %v7594_v23, %v11776_v3  ;;  %v7579_v23 = vadd.f32 %v7578_v49, %v7577_v31  ;;  %v12691_v31 = vld [vmem:[#allocation25_spill] sm:$0xff] }
 0x6a2   : > { %v7596_v29 = vpop.f32.mrf.mxu0  ;;  %v7709_v36 = vadd.f32 %v7708_v10, %v7707_v25  ;;  %v5690_v25 = vadd.f32 %v7585_v17, %v11770_v6  ;;  %v12693_v49 = vld [vmem:[#allocation145_spill] sm:$0xff] }
 0x6a3   : > { %v7597_v60 = vadd.f32 %v7596_v29, %v7595_v51  ;;  %v11880_v24 = vpop.f32.mrf.mxu1  ;;  %v7703_v51 = vadd.f32 %v7702_v55, %v7701_v39  ;;  %v5864_v18 = vadd.f32 %v7706_v43, %v5703_v9  ;;  %v5682_v46 = vadd.f32 %v7579_v23, %v11766_v61  ;;  %v12684_v43 = vld [vmem:[#allocation106_spill] sm:$0xff] }
 0x6a4   : > { %v7694_v39 = vadd.f32 %v7693_v4, %v7692_v8  ;;  %v5851_v6 = vadd.f32 %v7697_v16, %v5690_v25  ;;  %v7691_v9 = vadd.f32 %v11878_v50, %v11876_v37  ;;  %v7688_v61 = vadd.f32 %v11874_v28, %v11872_v57  ;;  %v12688_v57 = vld [vmem:[#allocation146_spill] sm:$0xff]  ;;  %v12690_v28 = vld [vmem:[#allocation109_spill] sm:$0xff] }
 0x6a5   : > { %v5706_v35 = vadd.f32 %v7597_v60, %v11778_v41  ;;  %v7841_v34 = vpop.f32.mrf.mxu1  ;;  %v7700_v41 = vadd.f32 %v7699_v58, %v7698_v40  ;;  %v5859_v10 = vadd.f32 %v7703_v51, %v5698_v62  ;;  %v5687_v60 = vadd.f32 %v7582_v19, %v11768_v1  ;;  %v12686_v62 = vld [vmem:[#allocation107_spill] sm:$0xff]  ;;  %v12696_v4 = vld [vmem:[#allocation110_spill] sm:$0xff] }
 0x6a6   : > { %v5679_v1 = vadd.f32 %v7576_v32, %v11764_v45  ;;  %v12678_v45 = vld [vmem:[#allocation65_spill] sm:$0xff]  ;;  %v12692_v37 = vsub.s32 0, %v12691_v31  ;;  %v5873_v8 = vadd.s32 8, %v12691_v31 }
 0x6a7   : > { %v5867_v30 = vadd.f32 %v7709_v36, %v5706_v35  ;;  %v11885_v0 = vpop.f32.mrf.mxu1  ;;  %v5856_v35 = vadd.f32 %v7700_v41, %v5695_v22  ;;  %v5848_v17 = vadd.f32 %v7694_v39, %v5687_v60  ;;  %v7685_v2 = vadd.f32 %v12678_v45, %v12677_v48  ;;  %v5988_v41 = vpop.permute.xlu1 %5987  ;;  %v7082_v60 = vld [vmem:[%s765_s26] ss:$0 sm:$0xff] }
 0x6a8   : > { %v5840_v29 = vadd.f32 %v7688_v61, %v5679_v1  ;;  %v5877_v50 = vrot.slane %v12693_v49, %v12692_v37  ;;  %vm5885_vm5 = vcmp.eq.s32.totalorder %v5873_v8, %v12699_v14 }
 0x6a9   : > { %7710 = vmatprep.subr.mxu0 %v5867_v30  ;;  %v7842_v3 = vpop.f32.mrf.mxu1  ;;  %v7573_v30 = vadd.f32 %v11868_v59, %v11864_v33  ;;  %v12683_v33 = vld [vmem:[#allocation116_spill] sm:$0xff]  ;;  %v12685_v59 = vld [vmem:[#allocation149_spill] sm:$0xff] }
 0x6aa   : > { %7711 = vmatpush3.msra.mxu0 %v11836_v5  ;;  %v12676_v5 = vld [vmem:[#allocation45_spill] sm:$0xff]  ;;  %vm5882_vm7 = vcmp.eq.s32.totalorder %v12691_v31, %v5877_v50  ;;  %vm5884_vm10 = vcmp.eq.s32.totalorder %v5873_v8, %v5877_v50 }
 0x6ab   : > { %7712 = vmatprep.subr.mxu0 %v5864_v18  ;;  %v5671_v55 = vadd.f32 %v7570_v13, %v12676_v5  ;;  %v5895_v18 = vld [vmem:[#allocation4 + $0x8] sm:$0xff] }
 0x6ac   : > { %7713 = vmatpush3.msra.mxu0 %v11833_v12  ;;  %v5843_v12 = vadd.f32 %v7691_v9, %v5682_v46  ;;  %v6069_v9 = vld [vmem:[#allocation2 + $0x8] sm:$0xff] }
 0x6ad   : > { %7714 = vmatprep.subr.mxu0 %v5859_v10 }
 0x6ae   : > { %7715 = vmatpush3.msra.mxu0 %v11830_v52  ;;  %v5674_v52 = vadd.f32 %v7573_v30, %v11762_v7  ;;  %v6068_v30 = vld [vmem:[#allocation2] sm:$0xff] }
 0x6af   : > { %7716 = vmatprep.subr.mxu0 %v5856_v35  ;;  %v5993_v35 = vpop.permute.xlu0 %5992 }
 0x6b0   : > { %7717 = vmatpush3.msra.mxu0 %v11827_v21  ;;  %v12675_v21 = vld [vmem:[#allocation43_spill] sm:$0xff]  ;;  %v5835_v7 = vadd.f32 %v7685_v2, %v5674_v52 }
 0x6b1   : > { %7718 = vmatprep.subr.mxu0 %v5851_v6 }
 0x6b2   : > { %7719 = vmatpush3.msra.mxu0 %v11824_v44  ;;  %v12681_v44 = vld [vmem:[#allocation120_spill] sm:$0xff] }
 0x6b3   : > { %7720 = vmatprep.subr.mxu0 %v5848_v17  ;;  %v7682_v34 = vadd.f32 %v12681_v44, %v12680_v27 }
 0x6b4   : > { %7721 = vmatpush3.msra.mxu0 %v12675_v21 }
 0x6b5   : > { %7722 = vmatprep.subr.mxu0 %v5843_v12  ;;  %v5832_v36 = vadd.f32 %v7682_v34, %v5671_v55 }
 0x6b6   : > { %7723 = vmatpush3.msra.mxu0 %v12679_v20 }
 0x6b7   : > { %7724 = vmatprep.subr.mxu0 %v5840_v29 }
 0x6b8   : > { %7725 = vmatpush3.msra.mxu0 %v12682_v47 }
 0x6b9   : > { %7726 = vmatprep.subr.mxu0 %v5835_v7 }
 0x6ba   : > { %7727 = vmatpush3.msra.mxu0 %v12683_v33 }
 0x6bb   : > { %7728 = vmatprep.subr.mxu0 %v5832_v36 }
 0x6bc   : > { %7729 = vmatpush3.msra.mxu0 %v12684_v43 }
 0x6bd   : > { %7730 = vmatprep.subr.mxu0 %v12685_v59 }
 0x6be   : > { %7731 = vmatpush3.msra.mxu0 %v12686_v62 }
 0x6bf   : > { %7732 = vmatprep.subr.mxu0 %v12687_v38 }
 0x6c0   : > { %7733 = vmatpush3.msra.mxu0 %v12688_v57 }
 0x6c1   : > { %7734 = vmatprep.subr.mxu0 %v12689_v42 }
 0x6c2   : > { %7735 = vmatpush3.msra.mxu0 %v12690_v28 }
 0x6c3   : > { %7736 = vmatprep.subr.mxu0 %v12694_v63 }
 0x6c4   : > { %7737 = vmatpush3.msra.mxu0 %v12695_v53 }
 0x6c5   : > { %7738 = vmatprep.subr.mxu0 %v12696_v4 }
 0x6c6   : > { %7739 = vmatpush3.msra.mxu0 %v12697_v15 }
 0x6c7   : > { %7740 = vmatprep.subr.mxu0 %v12698_v54 }
 0x6c8   : > { %7741 = vmatpush3.msra.mxu0 %v12700_v11 }
 0x6c9   : > { %7076 = vmatmul.mubr.msk.f32.vlgmr.msra.gmra.mxu0 %vm5882_vm7, %v12701_v26 }
 0x6ca   : > { %7077 = vmatprep.mubr.msk.f32.mxu0 %vm5885_vm5, %v12701_v26 }
 0x6cd   : > { %7078 = vmatmul.mubr.msk.f32.gmra.mxu0 %vm5884_vm10, %v12701_v26 }
 0x789   : > { %v7742_v40 = vpop.f32.mrf.mxu0 }
 0x78b   : > { %v7743_v58 = vpop.f32.mrf.mxu0 }
 0x78c   : > { %v7744_v19 = vadd.f32 %v7743_v58, %v7742_v40 }
 0x78d   : > { %v7745_v22 = vpop.f32.mrf.mxu0 }
 0x78e   : > { %v5971_v51 = vadd.f32 %v7744_v19, %v5894_v56 }
 0x78f   : > { %v7746_v3 = vpop.f32.mrf.mxu0 }
 0x790   : > { %5973 = vst.msk [vmem:[#allocation4] sm:$0xff] %vm2323_vm0, %v5971_v51  ;;  %v7747_v23 = vadd.f32 %v7746_v3, %v7745_v22 }
 0x792   : > { %v5972_v25 = vadd.f32 %v7747_v23, %v5895_v18 }
 0x794   : > { %5974 = vst.msk [vmem:[#allocation4 + $0x8] sm:$0xff] %vm2323_vm0, %v5972_v25 }
 0x797   : > { %v5981_v10 = vld [vmem:[#allocation4] sm:$0xff] }
 0x798   : > { %v5995_v32 = vmul.f32 %v5988_v41, %v5981_v10 }
 0x79a   : > { %v6057_v16 = vadd.f32 %v11880_v24, %v5995_v32 }
 0x79b   : > { %v5982_v46 = vld [vmem:[#allocation4 + $0x8] sm:$0xff] }
 0x79c   : > { %v6066_v39 = vadd.f32 %v7082_v60, %v6057_v16  ;;  %v5996_v6 = vmul.f32 %v5993_v35, %v5982_v46 }
 0x79e   : > { %v6070_v13 = vadd.f32 %v6068_v30, %v6066_v39  ;;  %v6058_v1 = vadd.f32 %v11885_v0, %v5996_v6 }
 0x7a0   : > { %6072 = vst.msk [vmem:[#allocation2] sm:$0xff] %vm2323_vm0, %v6070_v13  ;;  %v6067_v17 = vadd.f32 %v7082_v60, %v6058_v1  ;;  %6077 = sbr.rel (%p7083_p4) target bundleno = 2558 (0x9fe), region = 144 }
 0x7a2   : > { %v6071_v52 = vadd.f32 %v6069_v9, %v6067_v17 }
 0x7a4   : > { %6073 = vst.msk [vmem:[#allocation2 + $0x8] sm:$0xff] %vm2323_vm0, %v6071_v52 }
 0x7a5   : > { %v6083_v61 = vld [vmem:[#allocation16 + $0x18] sm:$0xff]  ;;  %v6082_v24 = vld [vmem:[#allocation16 + $0x10] sm:$0xff]  ;;  %v6081_v21 = vld [vmem:[#allocation16 + $0x8] sm:$0xff]  ;;  %v8348_v55 = vmov 0.0   ;;  %vm8349_vm1 = vmmov 0   ;;  %v8350_v45 = vmov 0  }
 0x7a6   : > { %7843 = vmatprep.subr.mxu0 %v6083_v61  ;;  %v6080_v0 = vld [vmem:[#allocation16] sm:$0xff]  ;;  %7854 = vmatprep.subr.mxu1 %v8348_v55  ;;  %v6253_v48 = vld [vmem:[%s12702_s18] sm:$0xff]  ;;  %v6266_v36 = vld [vmem:[%s12706_s19 + $0x18] sm:$0xff]  ;;  %vm6347_vm11 = vcmask 31744  }
 0x7a7   : > { %v6078_v12 = vld [vmem:[#allocation2] sm:$0xff]  ;;  %7844 = vmatpush3.msra.mxu0 %v6083_v61  ;;  %7858 = vmatprep.mubr.msk.f32.mxu1 %vm8349_vm1, %v8348_v55  ;;  %v12705_v27 = vld [vmem:[#allocation25_spill] sm:$0xff] }
 0x7a8   : > { %7851 = vmatprep.mubr.msk.f32.mxu0 %vm2323_vm0, %v6078_v12  ;;  %7845 = vmatprep.subr.mxu0 %v6082_v24  ;;  %v7087_v2 = vld [vmem:[%s12703_s17] ss:$0 sm:$0xff]  ;;  %v6265_v33 = vld [vmem:[%s12706_s19 + $0x10] sm:$0xff]  ;;  %v6264_v43 = vld [vmem:[%s12706_s19 + $0x8] sm:$0xff] }
 0x7a9   : > { %7846 = vmatpush3.msra.mxu0 %v6082_v24  ;;  %8071 = vset.pattern.permute.xlu0 %v8350_v45  ;;  %v7084_v29 = vld [vmem:[%s12704_s11] ss:$0 sm:$0xff]  ;;  %vm6177_vm13 = vcmp.eq.s32.totalorder %v12705_v27, %v7087_v2 }
 0x7aa   : > { %7847 = vmatprep.subr.mxu0 %v6081_v21  ;;  %6256 = vperm.xlu0 %8071, %v6253_v48   ;;  %v7088_v47 = vsel %vm6177_vm13, 1.0, %v8348_v55  ;;  %v6263_v59 = vld [vmem:[%s12706_s19] sm:$0xff] }
 0x7ab   : > { %7848 = vmatpush3.msra.mxu0 %v6081_v21  ;;  %v6079_v5 = vld [vmem:[#allocation2 + $0x8] sm:$0xff]  ;;  %v7090_v37 = vld [vmem:[%s12707_s16] ss:$0 sm:$0xff] }
 0x7ac   : > { %7849 = vmatprep.subr.mxu0 %v6080_v0 }
 0x7ad   : > { %7850 = vmatpush3.msra.mxu0 %v6080_v0 }
 0x7ae   : > { %7852 = vmatmul.mubr.msk.f32.vlgmr.msra.gmra.mxu0 %vm2323_vm0, %v6079_v5 }
 0x825   : > { %v6257_v62 = vpop.permute.xlu0 %6256 }
 0x86e   : > { %v7853_v20 = vpop.f32.mrf.mxu0 }
 0x86f   : > { %v6169_v44 = vadd.f32 %v7853_v20, %v7084_v29 }
 0x870   : > { %v6163_v34 = vpop.f32.mrf.mxu0 }
 0x871   : > { %v6164_v7 = vadd.f32 %v7084_v29, %v6163_v34  ;;  %7855 = vmatpush3.msra.mxu1 %v6169_v44 }
 0x872   : > { %7856 = vmatprep.subr.mxu1 %v8348_v55 }
 0x873   : > { %7857 = vmatpush3.msra.mxu1 %v6164_v7 }
 0x874   : > { %7859 = vmatmul.mubr.msk.f32.vlgmr.msra.gmra.mxu1 %vm4167_vm15, %v7088_v47  ;;  %7861 = vmatprep.subr.mxu1 %v8348_v55 }
 0x875   : > { %7862 = vmatpush3.msra.mxu1 %v6266_v36  ;;  %7869 = vmatprep.mubr.msk.f32.mxu1 %vm8349_vm1, %v8348_v55 }
 0x876   : > { %7863 = vmatprep.subr.mxu1 %v8348_v55 }
 0x877   : > { %7864 = vmatpush3.msra.mxu1 %v6265_v33 }
 0x878   : > { %7865 = vmatprep.subr.mxu1 %v8348_v55 }
 0x879   : > { %7866 = vmatpush3.msra.mxu1 %v6264_v43 }
 0x87a   : > { %7867 = vmatprep.subr.mxu1 %v8348_v55 }
 0x87b   : > { %7868 = vmatpush3.msra.mxu1 %v6263_v59 }
 0x934   : > { %v6249_v38 = vpop.f32.mrf.mxu1 }
 0x935   : > { %v6259_v57 = vmul.f32 %v6257_v62, %v6249_v38 }
 0x936   : > { %v7860_v42 = vpop.f32.mrf.mxu1 }
 0x937   : > { %vm6260_vm15 = vcmp.ge.f32.partialorder %v6259_v57, 0.0  ;;  %v6261_v28 = vmul.f32 0.01, %v6259_v57 }
 0x939   : > { %v6262_v31 = vsel %vm6260_vm15, %v6259_v57, %v6261_v28 }
 0x93a   : > { %7870 = vmatmul.mubr.msk.f32.vlgmr.msra.gmra.mxu1 %vm2323_vm0, %v6262_v31 }
 0x9fa   : > { %v6343_v49 = vpop.f32.mrf.mxu1 }
 0x9fb   : > { %v6344_v50 = vadd.f32 %v7090_v37, %v6343_v49 }
 0x9fc   : > { %v7871_v63 = vpop.f32.mrf.mxu1 }
 0x9fd   : > { %6348 = vst.msk [vmem:[%s12708_s2] sm:$0xff] %vm6347_vm11, %v6344_v50 }
 0x9fe PF: > { %s39_s22 = sadd.s32 1, %s8330_s22   ;;  %s12709_s17 = sld [smem:[#allocation22_spill]] }
 0x9ff   : > { %p36_p0 = scmp.ge.s32.totalorder %s39_s22, 5   ;;  %s12710_s20 = sld [smem:[#allocation24_spill]] }
 0xa00   : > { %s12711_s4 = sld [smem:[#allocation23_spill]]  ;;  %s12712_s0 = smov %s8314_s30 }
 0xa01   : > { %s12714_s21 = smov %s8326_s1 }
 0xa02   :  { %38 = sbr.rel (!%p36_p0) target bundleno = 25 (0x19), region = 225 }
 0xa04   : > { %s12713_s30 = smov %s12709_s17 }
 0xa06   : > { %s12715_s1 = smov %s12711_s4 }
 0xa07   :  { %6360 = vsyncpa [#allocation7], 1 }
 0xa08   :  { %6362 = vsyncpa [#allocation7 + $0x1], 1 }
 0xa09   :  { %6363 = vsyncpa [#allocation9], 1 }
 0xa0a   :  { %6365 = vsyncpa [#allocation9 + $0x1], 1 }
 0xa0b   :  { %6366 = vsyncpa [#allocation12], 1 }
 0xa0c   :  { %6368 = vsyncpa [#allocation12 + $0x1], 1 }
 0xa0d   :  { %6369 = vsyncpa [#allocation15], 1 }
 0xa0e   :  { %6371 = vsyncpa [#allocation15 + $0x1], 1 }

</bundles_post_ra>
